<compile_context>
chip_gen: v5e
topology: v5e:2x2
jax: 0.10.0
libtpu: 0.0.40
codegen_flags: <defaults>
</compile_context>

<pallas_src>
import functools

import jax
import jax.numpy as jnp
from jax.experimental import pallas as pl
from jax.experimental.pallas import tpu as pltpu


# ----------------------------------------------------------------------------
# Pallas kernel: fused matmul + bias + (optional) ReLU, whole arrays in VMEM
# ----------------------------------------------------------------------------
def _matmul_bias_act_kernel(x_ref, w_ref, b_ref, o_ref, *, apply_relu):
    acc = jnp.dot(x_ref[...], w_ref[...], preferred_element_type=jnp.float32)
    acc = acc + b_ref[...]                      # [1, N] broadcast over M
    if apply_relu:
        acc = jnp.maximum(acc, 0.0)
    o_ref[...] = acc.astype(o_ref.dtype)


def pallas_matmul_bias(x, w, b, apply_relu):
    """out = relu?(x @ w + b); x:[M,K] w:[K,N] b:[N] -> [M,N] (f32).

    Single kernel invocation per layer: no grid, operands resident whole in
    VMEM (Mosaic pads layout internally), no HBM zero-padding or output slice.
    """
    M, K = x.shape
    _, N = w.shape
    vmem = pl.BlockSpec(memory_space=pltpu.MemorySpace.VMEM)
    return pl.pallas_call(
        functools.partial(_matmul_bias_act_kernel, apply_relu=apply_relu),
        out_shape=jax.ShapeDtypeStruct((M, N), jnp.float32),
        in_specs=[vmem, vmem, vmem],
        out_specs=vmem,
    )(x.astype(jnp.float32), w.astype(jnp.float32),
      b.reshape(1, N).astype(jnp.float32))


# ----------------------------------------------------------------------------
# NHWC im2col + conv / conv-transpose wrappers (pure layout glue)
# ----------------------------------------------------------------------------
def _im2col_nhwc(x, k, stride):
    """x: [B, H, W, C] (already padded). Returns ([B*Ho*Wo, k*k*C], Ho, Wo)."""
    B, H, W, C = x.shape
    if H == k and W == k:
        # Window covers the whole input (e3): cols is just a reshape.
        return x.reshape(B, k * k * C), 1, 1
    Ho = (H - k) // stride + 1
    Wo = (W - k) // stride + 1
    patches = []
    for i in range(k):
        for j in range(k):
            patches.append(
                x[:, i:i + stride * (Ho - 1) + 1:stride,
                     j:j + stride * (Wo - 1) + 1:stride, :])
    cols = jnp.stack(patches, axis=3)           # [B, Ho, Wo, k*k, C]
    return cols.reshape(B * Ho * Wo, k * k * C), Ho, Wo


def conv2d_nhwc(x, w, b, stride, pad, relu):
    """PyTorch nn.Conv2d semantics; x:[B,H,W,Cin] NHWC, w:[Cout,Cin,k,k]."""
    Cout, Cin, k, _ = w.shape
    B = x.shape[0]
    xp = jnp.pad(x, ((0, 0), (pad, pad), (pad, pad), (0, 0)))
    cols, Ho, Wo = _im2col_nhwc(xp, k, stride)
    # K ordering = (i*k + j)*Cin + cin  <-> w transposed to [k, k, Cin, Cout]
    wm = jnp.transpose(w, (2, 3, 1, 0)).reshape(k * k * Cin, Cout)
    out = pallas_matmul_bias(cols, wm, b, relu)
    return out.reshape(B, Ho, Wo, Cout)


def conv_transpose2d_nhwc(x, w, b, stride, pad, out_pad, relu):
    """PyTorch nn.ConvTranspose2d semantics; x:[B,H,W,Cin] NHWC, w:[Cin,Cout,k,k]."""
    Cin, Cout, k, _ = w.shape
    B, H, W, _ = x.shape
    if H == 1 and W == 1 and stride == 1 and pad == 0 and out_pad == 0:
        # 1x1 spatial input (d1): transposed conv == outer product GEMM.
        # out[b, i, j, cout] = sum_cin x[b, cin] * w[cin, cout, i, j] + b[cout]
        xm = x.reshape(B, Cin)
        wm = jnp.transpose(w, (0, 2, 3, 1)).reshape(Cin, k * k * Cout)
        bt = jnp.tile(b, k * k)                 # column n -> b[n % Cout]
        out = pallas_matmul_bias(xm, wm, bt, relu)
        return out.reshape(B, k, k, Cout)
    # General path: zero-dilate by `stride`, pad, flipped-kernel forward conv.
    Hd = (H - 1) * stride + 1
    Wd = (W - 1) * stride + 1
    xd = jnp.zeros((B, Hd, Wd, Cin), x.dtype).at[:, ::stride, ::stride, :].set(x)
    p_lo = k - 1 - pad
    p_hi = k - 1 - pad + out_pad
    xp = jnp.pad(xd, ((0, 0), (p_lo, p_hi), (p_lo, p_hi), (0, 0)))
    wf = jnp.flip(w, axis=(2, 3)).transpose(1, 0, 2, 3)   # [Cout, Cin, k, k]
    cols, Ho, Wo = _im2col_nhwc(xp, k, 1)
    wm = jnp.transpose(wf, (2, 3, 1, 0)).reshape(k * k * Cin, Cout)
    out = pallas_matmul_bias(cols, wm, b, relu)
    return out.reshape(B, Ho, Wo, Cout)


# ----------------------------------------------------------------------------
# Parameters (deterministic, PyTorch-default-style uniform init)
# ----------------------------------------------------------------------------
def init_params(key):
    def conv_p(key, cout, cin, k):
        kw, kb = jax.random.split(key)
        bound = 1.0 / jnp.sqrt(cin * k * k)
        w = jax.random.uniform(kw, (cout, cin, k, k), jnp.float32, -bound, bound)
        b = jax.random.uniform(kb, (cout,), jnp.float32, -bound, bound)
        return w, b

    def convt_p(key, cin, cout, k):
        kw, kb = jax.random.split(key)
        bound = 1.0 / jnp.sqrt(cout * k * k)
        w = jax.random.uniform(kw, (cin, cout, k, k), jnp.float32, -bound, bound)
        b = jax.random.uniform(kb, (cout,), jnp.float32, -bound, bound)
        return w, b

    ks = jax.random.split(key, 6)
    p = {}
    p['e1_w'], p['e1_b'] = conv_p(ks[0], 16, 1, 3)
    p['e2_w'], p['e2_b'] = conv_p(ks[1], 32, 16, 3)
    p['e3_w'], p['e3_b'] = conv_p(ks[2], 64, 32, 7)
    p['d1_w'], p['d1_b'] = convt_p(ks[3], 64, 32, 7)
    p['d2_w'], p['d2_b'] = convt_p(ks[4], 32, 16, 3)
    p['d3_w'], p['d3_b'] = convt_p(ks[5], 16, 1, 3)
    return p


def autoencoder_forward(x, p):
    """x: NCHW [B, 1, 28, 28] -> NCHW [B, 1, 28, 28] (PyTorch module boundary)."""
    h = jnp.transpose(x, (0, 2, 3, 1))                                    # -> NHWC
    # encoder
    h = conv2d_nhwc(h, p['e1_w'], p['e1_b'], stride=2, pad=1, relu=True)  # 28 -> 14
    h = conv2d_nhwc(h, p['e2_w'], p['e2_b'], stride=2, pad=1, relu=True)  # 14 -> 7
    h = conv2d_nhwc(h, p['e3_w'], p['e3_b'], stride=1, pad=0, relu=False) # 7  -> 1
    # decoder
    h = conv_transpose2d_nhwc(h, p['d1_w'], p['d1_b'], 1, 0, 0, relu=True)   # 1  -> 7
    h = conv_transpose2d_nhwc(h, p['d2_w'], p['d2_b'], 2, 1, 1, relu=True)   # 7  -> 14
    h = conv_transpose2d_nhwc(h, p['d3_w'], p['d3_b'], 2, 1, 1, relu=False)  # 14 -> 28
    return jnp.transpose(h, (0, 3, 1, 2))                                 # -> NCHW


# ----------------------------------------------------------------------------
# Reference (lax conv, NCHW) for correctness sanity check
# ----------------------------------------------------------------------------
def _ref_forward(x, p):
    dn = ('NCHW', 'OIHW', 'NCHW')

    def conv(x, w, b, stride, pad, relu):
        y = jax.lax.conv_general_dilated(
            x, w, (stride, stride), [(pad, pad), (pad, pad)],
            dimension_numbers=dn)
        y = y + b[None, :, None, None]
        return jnp.maximum(y, 0.0) if relu else y

    def convt(x, w, b, stride, pad, out_pad, relu):
        k = w.shape[2]
        wf = jnp.flip(w, axis=(2, 3)).transpose(1, 0, 2, 3)
        p_lo = k - 1 - pad
        p_hi = k - 1 - pad + out_pad
        y = jax.lax.conv_general_dilated(
            x, wf, (1, 1), [(p_lo, p_hi), (p_lo, p_hi)],
            lhs_dilation=(stride, stride), dimension_numbers=dn)
        y = y + b[None, :, None, None]
        return jnp.maximum(y, 0.0) if relu else y

    h = conv(x, p['e1_w'], p['e1_b'], 2, 1, True)
    h = conv(h, p['e2_w'], p['e2_b'], 2, 1, True)
    h = conv(h, p['e3_w'], p['e3_b'], 1, 0, False)
    h = convt(h, p['d1_w'], p['d1_b'], 1, 0, 0, True)
    h = convt(h, p['d2_w'], p['d2_b'], 2, 1, 1, True)
    h = convt(h, p['d3_w'], p['d3_b'], 2, 1, 1, False)
    return h


if __name__ == "__main__":
    key = jax.random.PRNGKey(0)
    kp, kx = jax.random.split(key)
    params = init_params(kp)
    # MNIST-like input implied by the 7x7 bottleneck conv: [B, 1, 28, 28]
    x = jax.random.normal(kx, (2, 1, 28, 28), jnp.float32)

    fwd = jax.jit(autoencoder_forward)
    out = jax.block_until_ready(fwd(x, params))
    assert out.shape == (2, 1, 28, 28), out.shape

    ref = jax.block_until_ready(_ref_forward(x, params))
    assert jnp.allclose(out, ref, atol=1e-4, rtol=1e-4), float(
        jnp.max(jnp.abs(out - ref)))

    print("KERNEL_OK")
</pallas_src>

<mosaic_0001>
module attributes {stable_mosaic.version = 11 : i64} {
  func.func @_matmul_bias_act_kernel(%arg0: memref<392x9xf32, #tpu.memory_space<vmem>>, %arg1: memref<9x16xf32, #tpu.memory_space<vmem>>, %arg2: memref<1x16xf32, #tpu.memory_space<vmem>>, %arg3: memref<392x16xf32, #tpu.memory_space<vmem>>) attributes {dimension_semantics = [], scalar_prefetch = 0 : i64, scratch_operands = 0 : i64, tpu.core_type = #tpu.core_type<tc>} {
    %c0 = arith.constant 0 : index
    %c0_0 = arith.constant 0 : index
    %0 = vector.load %arg0[%c0, %c0_0] : memref<392x9xf32, #tpu.memory_space<vmem>>, vector<392x9xf32>
    %c0_1 = arith.constant 0 : index
    %c0_2 = arith.constant 0 : index
    %1 = vector.load %arg1[%c0_1, %c0_2] : memref<9x16xf32, #tpu.memory_space<vmem>>, vector<9x16xf32>
    %cst = arith.constant dense<0.000000e+00> : vector<392x16xf32>
    %2 = tpu.matmul %0, %1, %cst {dimension_numbers = #tpu.dot_dimension_numbers<[1], [0], [0], [1], [0, 0, 1, 1], [], []>} : vector<392x9xf32>, vector<9x16xf32>, vector<392x16xf32> -> vector<392x16xf32>
    %c0_3 = arith.constant 0 : index
    %c0_4 = arith.constant 0 : index
    %3 = vector.load %arg2[%c0_3, %c0_4] : memref<1x16xf32, #tpu.memory_space<vmem>>, vector<1x16xf32>
    %4 = vector.broadcast %3 : vector<1x16xf32> to vector<392x16xf32>
    %5 = arith.addf %2, %4 : vector<392x16xf32>
    %cst_5 = arith.constant 0.000000e+00 : f32
    %6 = vector.broadcast %cst_5 : f32 to vector<392x16xf32>
    %7 = arith.maximumf %5, %6 : vector<392x16xf32>
    %c0_6 = arith.constant 0 : index
    %c0_7 = arith.constant 0 : index
    %8 = vector.load %arg3[%c0_6, %c0_7] : memref<392x16xf32, #tpu.memory_space<vmem>>, vector<392x16xf32>
    tpu.vector_store %arg3[%c0_6, %c0_7], %7 {strides = array<i32>} : memref<392x16xf32, #tpu.memory_space<vmem>>, vector<392x16xf32>,
    return
  }
}

module attributes {stable_mosaic.version = 11 : i64} {
  func.func @_matmul_bias_act_kernel(%arg0: memref<98x144xf32, #tpu.memory_space<vmem>>, %arg1: memref<144x32xf32, #tpu.memory_space<vmem>>, %arg2: memref<1x32xf32, #tpu.memory_space<vmem>>, %arg3: memref<98x32xf32, #tpu.memory_space<vmem>>) attributes {dimension_semantics = [], scalar_prefetch = 0 : i64, scratch_operands = 0 : i64, tpu.core_type = #tpu.core_type<tc>} {
    %c0 = arith.constant 0 : index
    %c0_0 = arith.constant 0 : index
    %0 = vector.load %arg0[%c0, %c0_0] : memref<98x144xf32, #tpu.memory_space<vmem>>, vector<98x144xf32>
    %c0_1 = arith.constant 0 : index
    %c0_2 = arith.constant 0 : index
    %1 = vector.load %arg1[%c0_1, %c0_2] : memref<144x32xf32, #tpu.memory_space<vmem>>, vector<144x32xf32>
    %cst = arith.constant dense<0.000000e+00> : vector<98x32xf32>
    %2 = tpu.matmul %0, %1, %cst {dimension_numbers = #tpu.dot_dimension_numbers<[1], [0], [0], [1], [0, 0, 1, 1], [], []>} : vector<98x144xf32>, vector<144x32xf32>, vector<98x32xf32> -> vector<98x32xf32>
    %c0_3 = arith.constant 0 : index
    %c0_4 = arith.constant 0 : index
    %3 = vector.load %arg2[%c0_3, %c0_4] : memref<1x32xf32, #tpu.memory_space<vmem>>, vector<1x32xf32>
    %4 = vector.broadcast %3 : vector<1x32xf32> to vector<98x32xf32>
    %5 = arith.addf %2, %4 : vector<98x32xf32>
    %cst_5 = arith.constant 0.000000e+00 : f32
    %6 = vector.broadcast %cst_5 : f32 to vector<98x32xf32>
    %7 = arith.maximumf %5, %6 : vector<98x32xf32>
    %c0_6 = arith.constant 0 : index
    %c0_7 = arith.constant 0 : index
    %8 = vector.load %arg3[%c0_6, %c0_7] : memref<98x32xf32, #tpu.memory_space<vmem>>, vector<98x32xf32>
    tpu.vector_store %arg3[%c0_6, %c0_7], %7 {strides = array<i32>} : memref<98x32xf32, #tpu.memory_space<vmem>>, vector<98x32xf32>,
    return
  }
}

module attributes {stable_mosaic.version = 11 : i64} {
  func.func @_matmul_bias_act_kernel(%arg0: memref<2x1568xf32, #tpu.memory_space<vmem>>, %arg1: memref<1568x64xf32, #tpu.memory_space<vmem>>, %arg2: memref<1x64xf32, #tpu.memory_space<vmem>>, %arg3: memref<2x64xf32, #tpu.memory_space<vmem>>) attributes {dimension_semantics = [], scalar_prefetch = 0 : i64, scratch_operands = 0 : i64, tpu.core_type = #tpu.core_type<tc>} {
    %c0 = arith.constant 0 : index
    %c0_0 = arith.constant 0 : index
    %0 = vector.load %arg0[%c0, %c0_0] : memref<2x1568xf32, #tpu.memory_space<vmem>>, vector<2x1568xf32>
    %c0_1 = arith.constant 0 : index
    %c0_2 = arith.constant 0 : index
    %1 = vector.load %arg1[%c0_1, %c0_2] : memref<1568x64xf32, #tpu.memory_space<vmem>>, vector<1568x64xf32>
    %cst = arith.constant dense<0.000000e+00> : vector<2x64xf32>
    %2 = tpu.matmul %0, %1, %cst {dimension_numbers = #tpu.dot_dimension_numbers<[1], [0], [0], [1], [0, 0, 1, 1], [], []>} : vector<2x1568xf32>, vector<1568x64xf32>, vector<2x64xf32> -> vector<2x64xf32>
    %c0_3 = arith.constant 0 : index
    %c0_4 = arith.constant 0 : index
    %3 = vector.load %arg2[%c0_3, %c0_4] : memref<1x64xf32, #tpu.memory_space<vmem>>, vector<1x64xf32>
    %4 = vector.broadcast %3 : vector<1x64xf32> to vector<2x64xf32>
    %5 = arith.addf %2, %4 : vector<2x64xf32>
    %c0_5 = arith.constant 0 : index
    %c0_6 = arith.constant 0 : index
    %6 = vector.load %arg3[%c0_5, %c0_6] : memref<2x64xf32, #tpu.memory_space<vmem>>, vector<2x64xf32>
    tpu.vector_store %arg3[%c0_5, %c0_6], %5 {strides = array<i32>} : memref<2x64xf32, #tpu.memory_space<vmem>>, vector<2x64xf32>,
    return
  }
}

module attributes {stable_mosaic.version = 11 : i64} {
  func.func @_matmul_bias_act_kernel(%arg0: memref<2x64xf32, #tpu.memory_space<vmem>>, %arg1: memref<64x1568xf32, #tpu.memory_space<vmem>>, %arg2: memref<1x1568xf32, #tpu.memory_space<vmem>>, %arg3: memref<2x1568xf32, #tpu.memory_space<vmem>>) attributes {dimension_semantics = [], scalar_prefetch = 0 : i64, scratch_operands = 0 : i64, tpu.core_type = #tpu.core_type<tc>} {
    %c0 = arith.constant 0 : index
    %c0_0 = arith.constant 0 : index
    %0 = vector.load %arg0[%c0, %c0_0] : memref<2x64xf32, #tpu.memory_space<vmem>>, vector<2x64xf32>
    %c0_1 = arith.constant 0 : index
    %c0_2 = arith.constant 0 : index
    %1 = vector.load %arg1[%c0_1, %c0_2] : memref<64x1568xf32, #tpu.memory_space<vmem>>, vector<64x1568xf32>
    %cst = arith.constant dense<0.000000e+00> : vector<2x1568xf32>
    %2 = tpu.matmul %0, %1, %cst {dimension_numbers = #tpu.dot_dimension_numbers<[1], [0], [0], [1], [0, 0, 1, 1], [], []>} : vector<2x64xf32>, vector<64x1568xf32>, vector<2x1568xf32> -> vector<2x1568xf32>
    %c0_3 = arith.constant 0 : index
    %c0_4 = arith.constant 0 : index
    %3 = vector.load %arg2[%c0_3, %c0_4] : memref<1x1568xf32, #tpu.memory_space<vmem>>, vector<1x1568xf32>
    %4 = vector.broadcast %3 : vector<1x1568xf32> to vector<2x1568xf32>
    %5 = arith.addf %2, %4 : vector<2x1568xf32>
    %cst_5 = arith.constant 0.000000e+00 : f32
    %6 = vector.broadcast %cst_5 : f32 to vector<2x1568xf32>
    %7 = arith.maximumf %5, %6 : vector<2x1568xf32>
    %c0_6 = arith.constant 0 : index
    %c0_7 = arith.constant 0 : index
    %8 = vector.load %arg3[%c0_6, %c0_7] : memref<2x1568xf32, #tpu.memory_space<vmem>>, vector<2x1568xf32>
    tpu.vector_store %arg3[%c0_6, %c0_7], %7 {strides = array<i32>} : memref<2x1568xf32, #tpu.memory_space<vmem>>, vector<2x1568xf32>,
    return
  }
}

module attributes {stable_mosaic.version = 11 : i64} {
  func.func @_matmul_bias_act_kernel(%arg0: memref<392x288xf32, #tpu.memory_space<vmem>>, %arg1: memref<288x16xf32, #tpu.memory_space<vmem>>, %arg2: memref<1x16xf32, #tpu.memory_space<vmem>>, %arg3: memref<392x16xf32, #tpu.memory_space<vmem>>) attributes {dimension_semantics = [], scalar_prefetch = 0 : i64, scratch_operands = 0 : i64, tpu.core_type = #tpu.core_type<tc>} {
    %c0 = arith.constant 0 : index
    %c0_0 = arith.constant 0 : index
    %0 = vector.load %arg0[%c0, %c0_0] : memref<392x288xf32, #tpu.memory_space<vmem>>, vector<392x288xf32>
    %c0_1 = arith.constant 0 : index
    %c0_2 = arith.constant 0 : index
    %1 = vector.load %arg1[%c0_1, %c0_2] : memref<288x16xf32, #tpu.memory_space<vmem>>, vector<288x16xf32>
    %cst = arith.constant dense<0.000000e+00> : vector<392x16xf32>
    %2 = tpu.matmul %0, %1, %cst {dimension_numbers = #tpu.dot_dimension_numbers<[1], [0], [0], [1], [0, 0, 1, 1], [], []>} : vector<392x288xf32>, vector<288x16xf32>, vector<392x16xf32> -> vector<392x16xf32>
    %c0_3 = arith.constant 0 : index
    %c0_4 = arith.constant 0 : index
    %3 = vector.load %arg2[%c0_3, %c0_4] : memref<1x16xf32, #tpu.memory_space<vmem>>, vector<1x16xf32>
    %4 = vector.broadcast %3 : vector<1x16xf32> to vector<392x16xf32>
    %5 = arith.addf %2, %4 : vector<392x16xf32>
    %cst_5 = arith.constant 0.000000e+00 : f32
    %6 = vector.broadcast %cst_5 : f32 to vector<392x16xf32>
    %7 = arith.maximumf %5, %6 : vector<392x16xf32>
    %c0_6 = arith.constant 0 : index
    %c0_7 = arith.constant 0 : index
    %8 = vector.load %arg3[%c0_6, %c0_7] : memref<392x16xf32, #tpu.memory_space<vmem>>, vector<392x16xf32>
    tpu.vector_store %arg3[%c0_6, %c0_7], %7 {strides = array<i32>} : memref<392x16xf32, #tpu.memory_space<vmem>>, vector<392x16xf32>,
    return
  }
}

module attributes {stable_mosaic.version = 11 : i64} {
  func.func @_matmul_bias_act_kernel(%arg0: memref<1568x144xf32, #tpu.memory_space<vmem>>, %arg1: memref<144x1xf32, #tpu.memory_space<vmem>>, %arg2: memref<1x1xf32, #tpu.memory_space<vmem>>, %arg3: memref<1568x1xf32, #tpu.memory_space<vmem>>) attributes {dimension_semantics = [], scalar_prefetch = 0 : i64, scratch_operands = 0 : i64, tpu.core_type = #tpu.core_type<tc>} {
    %c0 = arith.constant 0 : index
    %c0_0 = arith.constant 0 : index
    %0 = vector.load %arg0[%c0, %c0_0] : memref<1568x144xf32, #tpu.memory_space<vmem>>, vector<1568x144xf32>
    %c0_1 = arith.constant 0 : index
    %c0_2 = arith.constant 0 : index
    %1 = vector.load %arg1[%c0_1, %c0_2] : memref<144x1xf32, #tpu.memory_space<vmem>>, vector<144x1xf32>
    %cst = arith.constant dense<0.000000e+00> : vector<1568x1xf32>
    %2 = tpu.matmul %0, %1, %cst {dimension_numbers = #tpu.dot_dimension_numbers<[1], [0], [0], [1], [0, 0, 1, 1], [], []>} : vector<1568x144xf32>, vector<144x1xf32>, vector<1568x1xf32> -> vector<1568x1xf32>
    %c0_3 = arith.constant 0 : index
    %c0_4 = arith.constant 0 : index
    %3 = vector.load %arg2[%c0_3, %c0_4] : memref<1x1xf32, #tpu.memory_space<vmem>>, vector<1x1xf32>
    %4 = vector.broadcast %3 : vector<1x1xf32> to vector<1568x1xf32>
    %5 = arith.addf %2, %4 : vector<1568x1xf32>
    %c0_5 = arith.constant 0 : index
    %c0_6 = arith.constant 0 : index
    %6 = vector.load %arg3[%c0_5, %c0_6] : memref<1568x1xf32, #tpu.memory_space<vmem>>, vector<1568x1xf32>
    tpu.vector_store %arg3[%c0_5, %c0_6], %5 {strides = array<i32>} : memref<1568x1xf32, #tpu.memory_space<vmem>>, vector<1568x1xf32>,
    return
  }
}

</mosaic_0001>

<bundles_post_ra>
// kernel: autoencoder_forward.6
= control target key start
LH: loop header
LB: loop body
LE: loop exit
PB: predicated region body
PF: predicated region fallthrough
CT: control target
= control target key end

     0   :  { %8 = vsyncpa [#allocation3], 0  ;;  %s587_s15 = smov [#allocation2]   ;;  %s1060_s0 = inlined_call_operand.vmem [shape: f32[392,9], index: 0, kind: input, shape index: {}]   ;;  %s1061_s1 = inlined_call_operand.vmem [shape: f32[9,16], index: 1, kind: input, shape index: {}]   ;;  %s1062_s2 = inlined_call_operand.hbm [shape: f32[1,16], index: 2, kind: input, shape index: {}]   ;;  %s1063_s3 = inlined_call_operand.vmem [shape: f32[392,16], index: 3, kind: output, shape index: {}]  }
   0x1   :  { %s18_s14 = sshll.u32 %s1062_s2, 4  ;;  %s20_s16 = sshll.u32 %s587_s15, 4  ;;  %s19_s14 = int_to_ptr.hbm [resolvable:$true] %s18_s14  ;;  %s21_s16 = int_to_ptr.vmem [resolvable:$true] %s20_s16 }
   0x2   :  { %23 = dma.hbm_to_vmem [thread:$0]  %s19_s14, 16, %s21_s16, [#allocation3]  }
   0x3   :  { %585 = dma.done.wait [#allocation3], 16  }
   0x4   :  { %586 = vsyncadd [#allocation3], 4294967280  ;;  %vm231_vm0 = vcmask 1040384   ;;  %v78_v0 = vld [vmem:[%s1061_s1 + $0x8] sm:$0x1]  ;;  %v77_v1 = vld [vmem:[%s1061_s1] sm:$0xff] }
   0x5   :  { %554 = vmatpush.msk.msra.mxu2 %vm231_vm0, %v78_v0  ;;  %v53_v2 = vld [vmem:[%s1060_s0 + $0xc8] sm:$0xff]  ;;  %vm83_vm1 = vcmask 72704   ;;  %553 = vmatpush.msk.msra.mxu1 %vm231_vm0, %v78_v0  ;;  %v40_v3 = vld [vmem:[%s1060_s0 + $0x60] sm:$0xff]  ;;  %v66_v5 = vld [vmem:[%s1060_s0 + $0x130] sm:$0xff]  ;;  %vm448_vm2 = vcmask 130048  }
   0x6   :  { %503 = vmatpush.msk.msra.mxu0 %vm231_vm0, %v78_v0  ;;  %555 = vmatpush.msk.msra.mxu3 %vm231_vm0, %v78_v0  ;;  %v28_v4 = vld [vmem:[%s1060_s0] sm:$0xff]  ;;  %v54_v6 = vld [vmem:[%s1060_s0 + $0xd0] sm:$0xff]  ;;  %v41_v7 = vld [vmem:[%s1060_s0 + $0x68] sm:$0xff] }
   0x7   :  { %557 = vmatpush.msra.mxu2 %v77_v1  ;;  %556 = vmatpush.msra.mxu1 %v77_v1  ;;  %v29_v8 = vld [vmem:[%s1060_s0 + $0x8] sm:$0xff]  ;;  %v67_v9 = vld [vmem:[%s1060_s0 + $0x138] sm:$0xff]  ;;  %v42_v11 = vld [vmem:[%s1060_s0 + $0x70] sm:$0xff] }
   0x8   :  { %529 = vmatmul.msk.f32.vlgmr.msra.gmra.mxu2 %vm83_vm1, %v53_v2  ;;  %516 = vmatmul.msk.f32.vlgmr.msra.gmra.mxu1 %vm83_vm1, %v40_v3  ;;  %v55_v10 = vld [vmem:[%s1060_s0 + $0xd8] sm:$0xff]  ;;  %v30_v12 = vld [vmem:[%s1060_s0 + $0x10] sm:$0xff]  ;;  %v68_v13 = vld [vmem:[%s1060_s0 + $0x140] sm:$0xff] }
   0x9   :  { %250 = vmatpush.msra.mxu0 %v77_v1  ;;  %558 = vmatpush.msra.mxu3 %v77_v1  ;;  %v56_v14 = vld [vmem:[%s1060_s0 + $0xe0] sm:$0xff]  ;;  %v43_v15 = vld [vmem:[%s1060_s0 + $0x78] sm:$0xff]  ;;  %v69_v17 = vld [vmem:[%s1060_s0 + $0x148] sm:$0xff] }
   0xa   :  { %504 = vmatmul.msk.f32.vlgmr.msra.gmra.mxu0 %vm83_vm1, %v28_v4  ;;  %542 = vmatmul.msk.f32.vlgmr.msra.gmra.mxu3 %vm83_vm1, %v66_v5  ;;  %v31_v16 = vld [vmem:[%s1060_s0 + $0x18] sm:$0xff]  ;;  %v57_v18 = vld [vmem:[%s1060_s0 + $0xe8] sm:$0xff]  ;;  %v44_v19 = vld [vmem:[%s1060_s0 + $0x80] sm:$0xff] }
   0xb   :  { %v32_v20 = vld [vmem:[%s1060_s0 + $0x20] sm:$0xff]  ;;  %v70_v21 = vld [vmem:[%s1060_s0 + $0x150] sm:$0xff]  ;;  %v45_v23 = vld [vmem:[%s1060_s0 + $0x88] sm:$0xff] }
   0xc   :  { %v58_v22 = vld [vmem:[%s1060_s0 + $0xf0] sm:$0xff]  ;;  %v33_v24 = vld [vmem:[%s1060_s0 + $0x28] sm:$0xff]  ;;  %v71_v25 = vld [vmem:[%s1060_s0 + $0x158] sm:$0xff] }
   0xd   :  { %v59_v26 = vld [vmem:[%s1060_s0 + $0xf8] sm:$0xff]  ;;  %v46_v27 = vld [vmem:[%s1060_s0 + $0x90] sm:$0xff]  ;;  %v72_v29 = vld [vmem:[%s1060_s0 + $0x160] sm:$0xff] }
   0xe   :  { %v34_v28 = vld [vmem:[%s1060_s0 + $0x30] sm:$0xff]  ;;  %v60_v30 = vld [vmem:[%s1060_s0 + $0x100] sm:$0xff]  ;;  %v47_v31 = vld [vmem:[%s1060_s0 + $0x98] sm:$0xff] }
   0xf   :  { %v35_v32 = vld [vmem:[%s1060_s0 + $0x38] sm:$0xff]  ;;  %v73_v33 = vld [vmem:[%s1060_s0 + $0x168] sm:$0xff]  ;;  %v48_v35 = vld [vmem:[%s1060_s0 + $0xa0] sm:$0xff] }
  0x10   :  { %530 = vmatmul.msk.f32.gmra.mxu2 %vm83_vm1, %v54_v6  ;;  %517 = vmatmul.msk.f32.gmra.mxu1 %vm83_vm1, %v41_v7  ;;  %v61_v34 = vld [vmem:[%s1060_s0 + $0x108] sm:$0xff]  ;;  %v36_v36 = vld [vmem:[%s1060_s0 + $0x40] sm:$0xff]  ;;  %v74_v37 = vld [vmem:[%s1060_s0 + $0x170] sm:$0xff] }
  0x11   :  { %v62_v38 = vld [vmem:[%s1060_s0 + $0x110] sm:$0xff]  ;;  %v49_v39 = vld [vmem:[%s1060_s0 + $0xa8] sm:$0xff]  ;;  %v75_v41 = vld [vmem:[%s1060_s0 + $0x178] sm:$0xff] }
  0x12   :  { %505 = vmatmul.msk.f32.gmra.mxu0 %vm83_vm1, %v29_v8  ;;  %543 = vmatmul.msk.f32.gmra.mxu3 %vm83_vm1, %v67_v9  ;;  %v37_v40 = vld [vmem:[%s1060_s0 + $0x48] sm:$0xff]  ;;  %v63_v42 = vld [vmem:[%s1060_s0 + $0x118] sm:$0xff]  ;;  %v50_v43 = vld [vmem:[%s1060_s0 + $0xb0] sm:$0xff] }
  0x13   :  { %v38_v44 = vld [vmem:[%s1060_s0 + $0x50] sm:$0xff]  ;;  %v76_v45 = vld [vmem:[%s1060_s0 + $0x180] sm:$0xff]  ;;  %v51_v47 = vld [vmem:[%s1060_s0 + $0xb8] sm:$0xff] }
  0x14   :  { %v64_v46 = vld [vmem:[%s1060_s0 + $0x120] sm:$0xff]  ;;  %v39_v48 = vld [vmem:[%s1060_s0 + $0x58] sm:$0xff]  ;;  %v65_v49 = vld [vmem:[%s1060_s0 + $0x128] sm:$0xff] }
  0x15   :  { %v52_v50 = vld [vmem:[%s1060_s0 + $0xc0] sm:$0xff] }
  0x16   :  { %v813_v51 = vld [vmem:[#allocation2] ss:$0 sm:$0xff] }
  0x18   :  { %531 = vmatmul.msk.f32.gmra.mxu2 %vm83_vm1, %v55_v10  ;;  %518 = vmatmul.msk.f32.gmra.mxu1 %vm83_vm1, %v42_v11 }
  0x1a   :  { %506 = vmatmul.msk.f32.gmra.mxu0 %vm83_vm1, %v30_v12  ;;  %544 = vmatmul.msk.f32.gmra.mxu3 %vm83_vm1, %v68_v13 }
  0x20   :  { %532 = vmatmul.msk.f32.gmra.mxu2 %vm83_vm1, %v56_v14  ;;  %519 = vmatmul.msk.f32.gmra.mxu1 %vm83_vm1, %v43_v15 }
  0x22   :  { %507 = vmatmul.msk.f32.gmra.mxu0 %vm83_vm1, %v31_v16  ;;  %545 = vmatmul.msk.f32.gmra.mxu3 %vm83_vm1, %v69_v17 }
  0x28   :  { %533 = vmatmul.msk.f32.gmra.mxu2 %vm83_vm1, %v57_v18  ;;  %520 = vmatmul.msk.f32.gmra.mxu1 %vm83_vm1, %v44_v19 }
  0x2a   :  { %508 = vmatmul.msk.f32.gmra.mxu0 %vm83_vm1, %v32_v20  ;;  %546 = vmatmul.msk.f32.gmra.mxu3 %vm83_vm1, %v70_v21 }
  0x30   :  { %534 = vmatmul.msk.f32.gmra.mxu2 %vm83_vm1, %v58_v22  ;;  %521 = vmatmul.msk.f32.gmra.mxu1 %vm83_vm1, %v45_v23 }
  0x32   :  { %509 = vmatmul.msk.f32.gmra.mxu0 %vm83_vm1, %v33_v24  ;;  %547 = vmatmul.msk.f32.gmra.mxu3 %vm83_vm1, %v71_v25 }
  0x38   :  { %535 = vmatmul.msk.f32.gmra.mxu2 %vm83_vm1, %v59_v26  ;;  %522 = vmatmul.msk.f32.gmra.mxu1 %vm83_vm1, %v46_v27 }
  0x3a   :  { %510 = vmatmul.msk.f32.gmra.mxu0 %vm83_vm1, %v34_v28  ;;  %548 = vmatmul.msk.f32.gmra.mxu3 %vm83_vm1, %v72_v29 }
  0x40   :  { %536 = vmatmul.msk.f32.gmra.mxu2 %vm83_vm1, %v60_v30  ;;  %523 = vmatmul.msk.f32.gmra.mxu1 %vm83_vm1, %v47_v31 }
  0x42   :  { %511 = vmatmul.msk.f32.gmra.mxu0 %vm83_vm1, %v35_v32  ;;  %549 = vmatmul.msk.f32.gmra.mxu3 %vm83_vm1, %v73_v33 }
  0x48   :  { %537 = vmatmul.msk.f32.gmra.mxu2 %vm83_vm1, %v61_v34  ;;  %524 = vmatmul.msk.f32.gmra.mxu1 %vm83_vm1, %v48_v35 }
  0x4a   :  { %512 = vmatmul.msk.f32.gmra.mxu0 %vm83_vm1, %v36_v36  ;;  %550 = vmatmul.msk.f32.gmra.mxu3 %vm83_vm1, %v74_v37 }
  0x50   :  { %538 = vmatmul.msk.f32.gmra.mxu2 %vm83_vm1, %v62_v38  ;;  %525 = vmatmul.msk.f32.gmra.mxu1 %vm83_vm1, %v49_v39 }
  0x52   :  { %513 = vmatmul.msk.f32.gmra.mxu0 %vm83_vm1, %v37_v40  ;;  %551 = vmatmul.msk.f32.gmra.mxu3 %vm83_vm1, %v75_v41 }
  0x58   :  { %539 = vmatmul.msk.f32.gmra.mxu2 %vm83_vm1, %v63_v42  ;;  %526 = vmatmul.msk.f32.gmra.mxu1 %vm83_vm1, %v50_v43 }
  0x5a   :  { %514 = vmatmul.msk.f32.gmra.mxu0 %vm83_vm1, %v38_v44  ;;  %552 = vmatmul.msk.f32.gmra.mxu3 %vm83_vm1, %v76_v45 }
  0x60   :  { %540 = vmatmul.msk.f32.gmra.mxu2 %vm83_vm1, %v64_v46  ;;  %527 = vmatmul.msk.f32.gmra.mxu1 %vm83_vm1, %v51_v47 }
  0x62   :  { %515 = vmatmul.msk.f32.gmra.mxu0 %vm83_vm1, %v39_v48 }
  0x68   :  { %541 = vmatmul.msk.f32.gmra.mxu2 %vm83_vm1, %v65_v49  ;;  %528 = vmatmul.msk.f32.gmra.mxu1 %vm83_vm1, %v52_v50 }
  0x85   :  { %v288_v52 = vpop.f32.mrf.mxu1 }
  0x86   :  { %v289_v53 = vadd.f32 %v813_v51, %v288_v52 }
  0x87   :  { %v252_v54 = vpop.f32.mrf.mxu0 }
  0x88   :  { %v411_v55 = vmax.f32 %v289_v53, 0.0  ;;  %v253_v56 = vadd.f32 %v813_v51, %v252_v54 }
  0x8a   :  { %461 = vst.msk [vmem:[%s1063_s3 + $0x60] sm:$0xff] %vm448_vm2, %v411_v55  ;;  %v399_v57 = vmax.f32 %v253_v56, 0.0 }
  0x8b   :  { %v327_v58 = vpop.f32.mrf.mxu2 }
  0x8c   :  { %v328_v59 = vadd.f32 %v813_v51, %v327_v58  ;;  %449 = vst.msk [vmem:[%s1063_s3] sm:$0xff] %vm448_vm2, %v399_v57 }
  0x8d   :  { %v291_v60 = vpop.f32.mrf.mxu1  ;;  %v366_v61 = vpop.f32.mrf.mxu3 }
  0x8e   :  { %v424_v62 = vmax.f32 %v328_v59, 0.0  ;;  %v292_v63 = vadd.f32 %v813_v51, %v291_v60  ;;  %v367_v0 = vadd.f32 %v813_v51, %v366_v61 }
  0x8f   :  { %v255_v1 = vpop.f32.mrf.mxu0 }
  0x90   :  { %474 = vst.msk [vmem:[%s1063_s3 + $0xc8] sm:$0xff] %vm448_vm2, %v424_v62  ;;  %v412_v2 = vmax.f32 %v292_v63, 0.0  ;;  %v256_v3 = vadd.f32 %v813_v51, %v255_v1  ;;  %v437_v4 = vmax.f32 %v367_v0, 0.0 }
  0x92   :  { %462 = vst.msk [vmem:[%s1063_s3 + $0x68] sm:$0xff] %vm448_vm2, %v412_v2  ;;  %v400_v5 = vmax.f32 %v256_v3, 0.0 }
  0x93   :  { %v330_v6 = vpop.f32.mrf.mxu2  ;;  %487 = vst.msk [vmem:[%s1063_s3 + $0x130] sm:$0xff] %vm448_vm2, %v437_v4 }
  0x94   :  { %v331_v7 = vadd.f32 %v813_v51, %v330_v6  ;;  %450 = vst.msk [vmem:[%s1063_s3 + $0x8] sm:$0xff] %vm448_vm2, %v400_v5 }
  0x95   :  { %v294_v8 = vpop.f32.mrf.mxu1  ;;  %v369_v9 = vpop.f32.mrf.mxu3 }
  0x96   :  { %v425_v10 = vmax.f32 %v331_v7, 0.0  ;;  %v295_v11 = vadd.f32 %v813_v51, %v294_v8  ;;  %v370_v12 = vadd.f32 %v813_v51, %v369_v9 }
  0x97   :  { %v258_v13 = vpop.f32.mrf.mxu0 }
  0x98   :  { %475 = vst.msk [vmem:[%s1063_s3 + $0xd0] sm:$0xff] %vm448_vm2, %v425_v10  ;;  %v413_v14 = vmax.f32 %v295_v11, 0.0  ;;  %v259_v15 = vadd.f32 %v813_v51, %v258_v13  ;;  %v438_v16 = vmax.f32 %v370_v12, 0.0 }
  0x9a   :  { %463 = vst.msk [vmem:[%s1063_s3 + $0x70] sm:$0xff] %vm448_vm2, %v413_v14  ;;  %v401_v17 = vmax.f32 %v259_v15, 0.0 }
  0x9b   :  { %v333_v18 = vpop.f32.mrf.mxu2  ;;  %488 = vst.msk [vmem:[%s1063_s3 + $0x138] sm:$0xff] %vm448_vm2, %v438_v16 }
  0x9c   :  { %v334_v19 = vadd.f32 %v813_v51, %v333_v18  ;;  %451 = vst.msk [vmem:[%s1063_s3 + $0x10] sm:$0xff] %vm448_vm2, %v401_v17 }
  0x9d   :  { %v297_v20 = vpop.f32.mrf.mxu1  ;;  %v372_v21 = vpop.f32.mrf.mxu3 }
  0x9e   :  { %v426_v22 = vmax.f32 %v334_v19, 0.0  ;;  %v298_v23 = vadd.f32 %v813_v51, %v297_v20  ;;  %v373_v24 = vadd.f32 %v813_v51, %v372_v21 }
  0x9f   :  { %v261_v25 = vpop.f32.mrf.mxu0 }
  0xa0   :  { %476 = vst.msk [vmem:[%s1063_s3 + $0xd8] sm:$0xff] %vm448_vm2, %v426_v22  ;;  %v414_v26 = vmax.f32 %v298_v23, 0.0  ;;  %v262_v27 = vadd.f32 %v813_v51, %v261_v25  ;;  %v439_v28 = vmax.f32 %v373_v24, 0.0 }
  0xa2   :  { %464 = vst.msk [vmem:[%s1063_s3 + $0x78] sm:$0xff] %vm448_vm2, %v414_v26  ;;  %v402_v29 = vmax.f32 %v262_v27, 0.0 }
  0xa3   :  { %v336_v30 = vpop.f32.mrf.mxu2  ;;  %489 = vst.msk [vmem:[%s1063_s3 + $0x140] sm:$0xff] %vm448_vm2, %v439_v28 }
  0xa4   :  { %v337_v31 = vadd.f32 %v813_v51, %v336_v30  ;;  %452 = vst.msk [vmem:[%s1063_s3 + $0x18] sm:$0xff] %vm448_vm2, %v402_v29 }
  0xa5   :  { %v300_v32 = vpop.f32.mrf.mxu1  ;;  %v375_v33 = vpop.f32.mrf.mxu3 }
  0xa6   :  { %v427_v34 = vmax.f32 %v337_v31, 0.0  ;;  %v301_v35 = vadd.f32 %v813_v51, %v300_v32  ;;  %v376_v36 = vadd.f32 %v813_v51, %v375_v33 }
  0xa7   :  { %v264_v37 = vpop.f32.mrf.mxu0 }
  0xa8   :  { %477 = vst.msk [vmem:[%s1063_s3 + $0xe0] sm:$0xff] %vm448_vm2, %v427_v34  ;;  %v415_v38 = vmax.f32 %v301_v35, 0.0  ;;  %v265_v39 = vadd.f32 %v813_v51, %v264_v37  ;;  %v440_v40 = vmax.f32 %v376_v36, 0.0 }
  0xaa   :  { %465 = vst.msk [vmem:[%s1063_s3 + $0x80] sm:$0xff] %vm448_vm2, %v415_v38  ;;  %v403_v41 = vmax.f32 %v265_v39, 0.0 }
  0xab   :  { %v339_v42 = vpop.f32.mrf.mxu2  ;;  %490 = vst.msk [vmem:[%s1063_s3 + $0x148] sm:$0xff] %vm448_vm2, %v440_v40 }
  0xac   :  { %v340_v43 = vadd.f32 %v813_v51, %v339_v42  ;;  %453 = vst.msk [vmem:[%s1063_s3 + $0x20] sm:$0xff] %vm448_vm2, %v403_v41 }
  0xad   :  { %v303_v44 = vpop.f32.mrf.mxu1  ;;  %v378_v45 = vpop.f32.mrf.mxu3 }
  0xae   :  { %v428_v46 = vmax.f32 %v340_v43, 0.0  ;;  %v304_v47 = vadd.f32 %v813_v51, %v303_v44  ;;  %v379_v48 = vadd.f32 %v813_v51, %v378_v45 }
  0xaf   :  { %v267_v49 = vpop.f32.mrf.mxu0 }
  0xb0   :  { %478 = vst.msk [vmem:[%s1063_s3 + $0xe8] sm:$0xff] %vm448_vm2, %v428_v46  ;;  %v416_v50 = vmax.f32 %v304_v47, 0.0  ;;  %v268_v52 = vadd.f32 %v813_v51, %v267_v49  ;;  %v441_v53 = vmax.f32 %v379_v48, 0.0 }
  0xb2   :  { %466 = vst.msk [vmem:[%s1063_s3 + $0x88] sm:$0xff] %vm448_vm2, %v416_v50  ;;  %v404_v54 = vmax.f32 %v268_v52, 0.0 }
  0xb3   :  { %v342_v55 = vpop.f32.mrf.mxu2  ;;  %491 = vst.msk [vmem:[%s1063_s3 + $0x150] sm:$0xff] %vm448_vm2, %v441_v53 }
  0xb4   :  { %v343_v56 = vadd.f32 %v813_v51, %v342_v55  ;;  %454 = vst.msk [vmem:[%s1063_s3 + $0x28] sm:$0xff] %vm448_vm2, %v404_v54 }
  0xb5   :  { %v306_v57 = vpop.f32.mrf.mxu1  ;;  %v381_v58 = vpop.f32.mrf.mxu3 }
  0xb6   :  { %v429_v59 = vmax.f32 %v343_v56, 0.0  ;;  %v307_v60 = vadd.f32 %v813_v51, %v306_v57  ;;  %v382_v61 = vadd.f32 %v813_v51, %v381_v58 }
  0xb7   :  { %v270_v62 = vpop.f32.mrf.mxu0 }
  0xb8   :  { %479 = vst.msk [vmem:[%s1063_s3 + $0xf0] sm:$0xff] %vm448_vm2, %v429_v59  ;;  %v417_v63 = vmax.f32 %v307_v60, 0.0  ;;  %v271_v0 = vadd.f32 %v813_v51, %v270_v62  ;;  %v442_v1 = vmax.f32 %v382_v61, 0.0 }
  0xba   :  { %467 = vst.msk [vmem:[%s1063_s3 + $0x90] sm:$0xff] %vm448_vm2, %v417_v63  ;;  %v405_v2 = vmax.f32 %v271_v0, 0.0 }
  0xbb   :  { %v345_v3 = vpop.f32.mrf.mxu2  ;;  %492 = vst.msk [vmem:[%s1063_s3 + $0x158] sm:$0xff] %vm448_vm2, %v442_v1 }
  0xbc   :  { %v346_v4 = vadd.f32 %v813_v51, %v345_v3  ;;  %455 = vst.msk [vmem:[%s1063_s3 + $0x30] sm:$0xff] %vm448_vm2, %v405_v2 }
  0xbd   :  { %v309_v5 = vpop.f32.mrf.mxu1  ;;  %v384_v6 = vpop.f32.mrf.mxu3 }
  0xbe   :  { %v430_v7 = vmax.f32 %v346_v4, 0.0  ;;  %v310_v8 = vadd.f32 %v813_v51, %v309_v5  ;;  %v385_v9 = vadd.f32 %v813_v51, %v384_v6 }
  0xbf   :  { %v273_v10 = vpop.f32.mrf.mxu0 }
  0xc0   :  { %480 = vst.msk [vmem:[%s1063_s3 + $0xf8] sm:$0xff] %vm448_vm2, %v430_v7  ;;  %v418_v11 = vmax.f32 %v310_v8, 0.0  ;;  %v274_v12 = vadd.f32 %v813_v51, %v273_v10  ;;  %v443_v13 = vmax.f32 %v385_v9, 0.0 }
  0xc2   :  { %468 = vst.msk [vmem:[%s1063_s3 + $0x98] sm:$0xff] %vm448_vm2, %v418_v11  ;;  %v406_v14 = vmax.f32 %v274_v12, 0.0 }
  0xc3   :  { %v348_v15 = vpop.f32.mrf.mxu2  ;;  %493 = vst.msk [vmem:[%s1063_s3 + $0x160] sm:$0xff] %vm448_vm2, %v443_v13 }
  0xc4   :  { %v349_v16 = vadd.f32 %v813_v51, %v348_v15  ;;  %456 = vst.msk [vmem:[%s1063_s3 + $0x38] sm:$0xff] %vm448_vm2, %v406_v14 }
  0xc5   :  { %v312_v17 = vpop.f32.mrf.mxu1  ;;  %v387_v18 = vpop.f32.mrf.mxu3 }
  0xc6   :  { %v431_v19 = vmax.f32 %v349_v16, 0.0  ;;  %v313_v20 = vadd.f32 %v813_v51, %v312_v17  ;;  %v388_v21 = vadd.f32 %v813_v51, %v387_v18 }
  0xc7   :  { %v276_v22 = vpop.f32.mrf.mxu0 }
  0xc8   :  { %481 = vst.msk [vmem:[%s1063_s3 + $0x100] sm:$0xff] %vm448_vm2, %v431_v19  ;;  %v419_v23 = vmax.f32 %v313_v20, 0.0  ;;  %v277_v24 = vadd.f32 %v813_v51, %v276_v22  ;;  %v444_v25 = vmax.f32 %v388_v21, 0.0 }
  0xca   :  { %469 = vst.msk [vmem:[%s1063_s3 + $0xa0] sm:$0xff] %vm448_vm2, %v419_v23  ;;  %v407_v26 = vmax.f32 %v277_v24, 0.0 }
  0xcb   :  { %v351_v27 = vpop.f32.mrf.mxu2  ;;  %494 = vst.msk [vmem:[%s1063_s3 + $0x168] sm:$0xff] %vm448_vm2, %v444_v25 }
  0xcc   :  { %v352_v28 = vadd.f32 %v813_v51, %v351_v27  ;;  %457 = vst.msk [vmem:[%s1063_s3 + $0x40] sm:$0xff] %vm448_vm2, %v407_v26 }
  0xcd   :  { %v315_v29 = vpop.f32.mrf.mxu1  ;;  %v390_v30 = vpop.f32.mrf.mxu3 }
  0xce   :  { %v432_v31 = vmax.f32 %v352_v28, 0.0  ;;  %v316_v32 = vadd.f32 %v813_v51, %v315_v29  ;;  %v391_v33 = vadd.f32 %v813_v51, %v390_v30 }
  0xcf   :  { %v279_v34 = vpop.f32.mrf.mxu0 }
  0xd0   :  { %482 = vst.msk [vmem:[%s1063_s3 + $0x108] sm:$0xff] %vm448_vm2, %v432_v31  ;;  %v420_v35 = vmax.f32 %v316_v32, 0.0  ;;  %v280_v36 = vadd.f32 %v813_v51, %v279_v34  ;;  %v445_v37 = vmax.f32 %v391_v33, 0.0 }
  0xd2   :  { %470 = vst.msk [vmem:[%s1063_s3 + $0xa8] sm:$0xff] %vm448_vm2, %v420_v35  ;;  %v408_v38 = vmax.f32 %v280_v36, 0.0 }
  0xd3   :  { %v354_v39 = vpop.f32.mrf.mxu2  ;;  %495 = vst.msk [vmem:[%s1063_s3 + $0x170] sm:$0xff] %vm448_vm2, %v445_v37 }
  0xd4   :  { %v355_v40 = vadd.f32 %v813_v51, %v354_v39  ;;  %458 = vst.msk [vmem:[%s1063_s3 + $0x48] sm:$0xff] %vm448_vm2, %v408_v38 }
  0xd5   :  { %v318_v41 = vpop.f32.mrf.mxu1  ;;  %v393_v42 = vpop.f32.mrf.mxu3 }
  0xd6   :  { %v433_v43 = vmax.f32 %v355_v40, 0.0  ;;  %v319_v44 = vadd.f32 %v813_v51, %v318_v41  ;;  %v394_v45 = vadd.f32 %v813_v51, %v393_v42 }
  0xd7   :  { %v282_v46 = vpop.f32.mrf.mxu0 }
  0xd8   :  { %483 = vst.msk [vmem:[%s1063_s3 + $0x110] sm:$0xff] %vm448_vm2, %v433_v43  ;;  %v421_v47 = vmax.f32 %v319_v44, 0.0  ;;  %v283_v48 = vadd.f32 %v813_v51, %v282_v46  ;;  %v446_v49 = vmax.f32 %v394_v45, 0.0 }
  0xda   :  { %471 = vst.msk [vmem:[%s1063_s3 + $0xb0] sm:$0xff] %vm448_vm2, %v421_v47  ;;  %v409_v50 = vmax.f32 %v283_v48, 0.0 }
  0xdb   :  { %v357_v52 = vpop.f32.mrf.mxu2  ;;  %496 = vst.msk [vmem:[%s1063_s3 + $0x178] sm:$0xff] %vm448_vm2, %v446_v49 }
  0xdc   :  { %v358_v53 = vadd.f32 %v813_v51, %v357_v52  ;;  %459 = vst.msk [vmem:[%s1063_s3 + $0x50] sm:$0xff] %vm448_vm2, %v409_v50 }
  0xdd   :  { %v321_v54 = vpop.f32.mrf.mxu1  ;;  %v396_v55 = vpop.f32.mrf.mxu3 }
  0xde   :  { %v434_v56 = vmax.f32 %v358_v53, 0.0  ;;  %v322_v57 = vadd.f32 %v813_v51, %v321_v54  ;;  %v397_v58 = vadd.f32 %v813_v51, %v396_v55 }
  0xdf   :  { %v285_v59 = vpop.f32.mrf.mxu0 }
  0xe0   :  { %484 = vst.msk [vmem:[%s1063_s3 + $0x118] sm:$0xff] %vm448_vm2, %v434_v56  ;;  %v422_v60 = vmax.f32 %v322_v57, 0.0  ;;  %v286_v61 = vadd.f32 %v813_v51, %v285_v59  ;;  %v447_v62 = vmax.f32 %v397_v58, 0.0 }
  0xe2   :  { %472 = vst.msk [vmem:[%s1063_s3 + $0xb8] sm:$0xff] %vm448_vm2, %v422_v60  ;;  %v410_v63 = vmax.f32 %v286_v61, 0.0 }
  0xe3   :  { %v360_v0 = vpop.f32.mrf.mxu2  ;;  %497 = vst.msk [vmem:[%s1063_s3 + $0x180] sm:$0xff] %vm448_vm2, %v447_v62 }
  0xe4   :  { %v361_v1 = vadd.f32 %v813_v51, %v360_v0  ;;  %460 = vst.msk [vmem:[%s1063_s3 + $0x58] sm:$0xff] %vm448_vm2, %v410_v63 }
  0xe5   :  { %v324_v2 = vpop.f32.mrf.mxu1 }
  0xe6   :  { %v435_v3 = vmax.f32 %v361_v1, 0.0  ;;  %v325_v4 = vadd.f32 %v813_v51, %v324_v2 }
  0xe8   :  { %485 = vst.msk [vmem:[%s1063_s3 + $0x120] sm:$0xff] %vm448_vm2, %v435_v3  ;;  %v423_v5 = vmax.f32 %v325_v4, 0.0 }
  0xea   :  { %473 = vst.msk [vmem:[%s1063_s3 + $0xc0] sm:$0xff] %vm448_vm2, %v423_v5 }
  0xeb   :  { %v363_v6 = vpop.f32.mrf.mxu2 }
  0xec   :  { %v364_v7 = vadd.f32 %v813_v51, %v363_v6 }
  0xee   :  { %v436_v8 = vmax.f32 %v364_v7, 0.0 }
  0xf0   :  { %486 = vst.msk [vmem:[%s1063_s3 + $0x128] sm:$0xff] %vm448_vm2, %v436_v8 }
  0xf1   :  { %502 = vsyncpa [#allocation3], 1 }

// kernel: autoencoder_forward.7
= control target key start
LH: loop header
LB: loop body
LE: loop exit
PB: predicated region body
PF: predicated region fallthrough
CT: control target
= control target key end

     0   :  { %vm62_vm0 = vcmask 130048   ;;  %vm227_vm1 = vcmask 261120   ;;  %vm240_vm2 = vcmask 254976   ;;  %s536_s1 = inlined_call_operand.vmem [shape: f32[144,32], index: 1, kind: input, shape index: {}]   ;;  %s537_s0 = inlined_call_operand.vmem [shape: f32[98,144], index: 0, kind: input, shape index: {}]   ;;  %s538_s2 = inlined_call_operand.vmem [shape: f32[1,32], index: 2, kind: input, shape index: {}]   ;;  %s539_s3 = inlined_call_operand.vmem [shape: f32[98,32], index: 3, kind: output, shape index: {}]  }
   0x1   :  { %v55_v0 = vld [vmem:[%s536_s1 + $0x78] sm:$0xff]  ;;  %v320_v1 = vld [vmem:[%s536_s1 + $0x88] sm:$0xff]  ;;  %v54_v2 = vld [vmem:[%s536_s1 + $0x70] sm:$0xff] }
   0x2   :  { %102 = vmatpush.msra.mxu0 %v55_v0  ;;  %259 = vmatpush.msra.mxu2 %v55_v0  ;;  %v328_v3 = vld [vmem:[%s536_s1 + $0x80] sm:$0xff]  ;;  %v15_v4 = vld [vmem:[%s537_s0 + $0x8] sm:$0xff]  ;;  %v51_v7 = vld [vmem:[%s536_s1 + $0x58] sm:$0xff] }
   0x3   :  { %260 = vmatpush.msra.mxu3 %v55_v0  ;;  %172 = vmatpush.msra.mxu1 %v320_v1  ;;  %v53_v5 = vld [vmem:[%s536_s1 + $0x68] sm:$0xff]  ;;  %v52_v6 = vld [vmem:[%s536_s1 + $0x60] sm:$0xff]  ;;  %v50_v8 = vld [vmem:[%s536_s1 + $0x50] sm:$0xff] }
   0x4   :  { %103 = vmatpush.msra.mxu0 %v54_v2  ;;  %261 = vmatpush.msra.mxu2 %v54_v2  ;;  %v17_v9 = vld [vmem:[%s537_s0 + $0x18] sm:$0xff]  ;;  %v49_v10 = vld [vmem:[%s536_s1 + $0x48] sm:$0xff]  ;;  %v48_v11 = vld [vmem:[%s536_s1 + $0x40] sm:$0xff] }
   0x5   :  { %262 = vmatpush.msra.mxu3 %v54_v2  ;;  %173 = vmatpush.msra.mxu1 %v328_v3  ;;  %v47_v12 = vld [vmem:[%s536_s1 + $0x38] sm:$0xff]  ;;  %v46_v13 = vld [vmem:[%s536_s1 + $0x30] sm:$0xff]  ;;  %v19_v14 = vld [vmem:[%s537_s0 + $0x28] sm:$0xff] }
   0x6   :  { %246 = vmatmul.msk.f32.vlgmr.msra.gmra.mxu1 %vm62_vm0, %v15_v4  ;;  %104 = vmatpush.msra.mxu0 %v53_v5  ;;  %v45_v15 = vld [vmem:[%s536_s1 + $0x28] sm:$0xff]  ;;  %v44_v16 = vld [vmem:[%s536_s1 + $0x20] sm:$0xff]  ;;  %v43_v17 = vld [vmem:[%s536_s1 + $0x18] sm:$0xff] }
   0x7   :  { %263 = vmatpush.msra.mxu2 %v53_v5  ;;  %264 = vmatpush.msra.mxu3 %v53_v5  ;;  %v42_v18 = vld [vmem:[%s536_s1 + $0x10] sm:$0xff]  ;;  %v21_v19 = vld [vmem:[%s537_s0 + $0x38] sm:$0xff]  ;;  %v41_v20 = vld [vmem:[%s536_s1 + $0x8] sm:$0xff] }
   0x8   :  { %105 = vmatpush.msra.mxu0 %v52_v6  ;;  %v40_v21 = vld [vmem:[%s536_s1] sm:$0xff]  ;;  %v24_v23 = vld [vmem:[%s537_s0 + $0x50] sm:$0xff]  ;;  %v23_v25 = vld [vmem:[%s537_s0 + $0x48] sm:$0xff] }
   0x9   :  { %265 = vmatpush.msra.mxu2 %v52_v6  ;;  %266 = vmatpush.msra.mxu3 %v52_v6  ;;  %v14_v22 = vld [vmem:[%s537_s0] sm:$0xff]  ;;  %v36_v24 = vld [vmem:[%s537_s0 + $0xb0] sm:$0xff]  ;;  %v25_v29 = vld [vmem:[%s537_s0 + $0x58] sm:$0xff] }
   0xa   :  { %106 = vmatpush.msra.mxu0 %v51_v7  ;;  %v16_v26 = vld [vmem:[%s537_s0 + $0x10] sm:$0xff]  ;;  %v26_v27 = vld [vmem:[%s537_s0 + $0x60] sm:$0xff]  ;;  %v33_v32 = vld [vmem:[%s537_s0 + $0x98] sm:$0xff] }
   0xb   :  { %267 = vmatpush.msra.mxu2 %v51_v7  ;;  %268 = vmatpush.msra.mxu3 %v51_v7  ;;  %v38_v28 = vld [vmem:[%s537_s0 + $0xc0] sm:$0x3]  ;;  %v28_v31 = vld [vmem:[%s537_s0 + $0x70] sm:$0xff]  ;;  %v27_v33 = vld [vmem:[%s537_s0 + $0x68] sm:$0xff] }
   0xc   :  { %107 = vmatpush.msra.mxu0 %v50_v8  ;;  %v18_v30 = vld [vmem:[%s537_s0 + $0x20] sm:$0xff]  ;;  %v20_v34 = vld [vmem:[%s537_s0 + $0x30] sm:$0xff]  ;;  %v35_v36 = vld [vmem:[%s537_s0 + $0xa8] sm:$0xff] }
   0xd   :  { %269 = vmatpush.msra.mxu2 %v50_v8  ;;  %270 = vmatpush.msra.mxu3 %v50_v8  ;;  %v30_v35 = vld [vmem:[%s537_s0 + $0x80] sm:$0xff]  ;;  %v29_v37 = vld [vmem:[%s537_s0 + $0x78] sm:$0xff]  ;;  %v32_v39 = vld [vmem:[%s537_s0 + $0x90] sm:$0xff] }
   0xe   :  { %247 = vmatmul.msk.f32.gmra.mxu1 %vm62_vm0, %v17_v9  ;;  %108 = vmatpush.msra.mxu0 %v49_v10  ;;  %v22_v38 = vld [vmem:[%s537_s0 + $0x40] sm:$0xff]  ;;  %v37_v40 = vld [vmem:[%s537_s0 + $0xb8] sm:$0xff]  ;;  %v31_v41 = vld [vmem:[%s537_s0 + $0x88] sm:$0xff] }
   0xf   :  { %271 = vmatpush.msra.mxu2 %v49_v10  ;;  %272 = vmatpush.msra.mxu3 %v49_v10  ;;  %v34_v42 = vld [vmem:[%s537_s0 + $0xa0] sm:$0xff]  ;;  %v39_v43 = vld [vmem:[%s537_s0 + $0xc8] sm:$0x3] }
  0x10   :  { %109 = vmatpush.msra.mxu0 %v48_v11  ;;  %v470_v48 = vld [vmem:[%s538_s2] ss:$0 sm:$0xff] }
  0x11   :  { %273 = vmatpush.msra.mxu2 %v48_v11  ;;  %274 = vmatpush.msra.mxu3 %v48_v11 }
  0x12   :  { %110 = vmatpush.msra.mxu0 %v47_v12 }
  0x13   :  { %275 = vmatpush.msra.mxu2 %v47_v12  ;;  %276 = vmatpush.msra.mxu3 %v47_v12 }
  0x14   :  { %111 = vmatpush.msra.mxu0 %v46_v13 }
  0x15   :  { %277 = vmatpush.msra.mxu2 %v46_v13  ;;  %278 = vmatpush.msra.mxu3 %v46_v13 }
  0x16   :  { %248 = vmatmul.msk.f32.gmra.mxu1 %vm62_vm0, %v19_v14  ;;  %112 = vmatpush.msra.mxu0 %v45_v15 }
  0x17   :  { %279 = vmatpush.msra.mxu2 %v45_v15  ;;  %280 = vmatpush.msra.mxu3 %v45_v15 }
  0x18   :  { %113 = vmatpush.msra.mxu0 %v44_v16 }
  0x19   :  { %281 = vmatpush.msra.mxu2 %v44_v16  ;;  %282 = vmatpush.msra.mxu3 %v44_v16 }
  0x1a   :  { %114 = vmatpush.msra.mxu0 %v43_v17 }
  0x1b   :  { %283 = vmatpush.msra.mxu2 %v43_v17  ;;  %284 = vmatpush.msra.mxu3 %v43_v17 }
  0x1c   :  { %115 = vmatpush.msra.mxu0 %v42_v18 }
  0x1d   :  { %285 = vmatpush.msra.mxu2 %v42_v18  ;;  %286 = vmatpush.msra.mxu3 %v42_v18 }
  0x1e   :  { %249 = vmatmul.msk.f32.gmra.mxu1 %vm62_vm0, %v21_v19  ;;  %116 = vmatpush.msra.mxu0 %v41_v20 }
  0x1f   :  { %287 = vmatpush.msra.mxu2 %v41_v20  ;;  %288 = vmatpush.msra.mxu3 %v41_v20 }
  0x20   :  { %117 = vmatpush.msra.mxu0 %v40_v21 }
  0x21   :  { %289 = vmatpush.msra.mxu2 %v40_v21  ;;  %290 = vmatpush.msra.mxu3 %v40_v21 }
  0x22   :  { %118 = vmatmul.f32.vlgmr.msra.gmra.mxu0 %v14_v22  ;;  %133 = vmatmul.f32.vlgmr.msra.gmra.mxu2 %v24_v23 }
  0x23   :  { %151 = vmatmul.f32.vlgmr.msra.gmra.mxu3 %v36_v24 }
  0x24   :  { %291 = vmatpush.msrb.mxu3 %v320_v1 }
  0x26   :  { %250 = vmatmul.msk.f32.gmra.mxu1 %vm62_vm0, %v23_v25  ;;  %292 = vmatpush.msrb.mxu3 %v328_v3 }
  0x2a   :  { %121 = vmatmul.f32.gmra.mxu0 %v16_v26  ;;  %136 = vmatmul.f32.gmra.mxu2 %v26_v27 }
  0x2b   :  { %154 = vmatmul.f32.gmra.mxu3 %v38_v28 }
  0x2e   :  { %251 = vmatmul.msk.f32.gmra.mxu1 %vm62_vm0, %v25_v29 }
  0x32   :  { %124 = vmatmul.f32.gmra.mxu0 %v18_v30  ;;  %139 = vmatmul.f32.gmra.mxu2 %v28_v31 }
  0x33   :  { %255 = vmatmul.msk.f32.vlgmr.msrb.gmra.mxu3 %vm62_vm0, %v33_v32 }
  0x36   :  { %252 = vmatmul.msk.f32.gmra.mxu1 %vm62_vm0, %v27_v33 }
  0x3a   :  { %127 = vmatmul.f32.gmra.mxu0 %v20_v34  ;;  %142 = vmatmul.f32.gmra.mxu2 %v30_v35 }
  0x3b   :  { %256 = vmatmul.msk.f32.gmra.mxu3 %vm62_vm0, %v35_v36 }
  0x3e   :  { %253 = vmatmul.msk.f32.gmra.mxu1 %vm62_vm0, %v29_v37 }
  0x42   :  { %130 = vmatmul.f32.gmra.mxu0 %v22_v38  ;;  %145 = vmatmul.f32.gmra.mxu2 %v32_v39 }
  0x43   :  { %257 = vmatmul.msk.f32.gmra.mxu3 %vm62_vm0, %v37_v40 }
  0x46   :  { %254 = vmatmul.msk.f32.gmra.mxu1 %vm62_vm0, %v31_v41 }
  0x4a   :  { %148 = vmatmul.f32.gmra.mxu2 %v34_v42 }
  0x4b   :  { %258 = vmatmul.msk.f32.gmra.mxu3 %vm62_vm0, %v39_v43 }
  0x83   :  { %v175_v44 = vpop.f32.mrf.mxu1 }
  0x8b   :  { %v178_v45 = vpop.f32.mrf.mxu1 }
  0x93   :  { %v181_v46 = vpop.f32.mrf.mxu1 }
  0x9b   :  { %v184_v47 = vpop.f32.mrf.mxu1 }
  0x9f   :  { %v119_v49 = vpop.f32.mrf.mxu0 }
  0xa0   :  { %v120_v50 = vadd.f32 %v470_v48, %v119_v49 }
  0xa2   :  { %v176_v51 = vadd.f32 %v175_v44, %v120_v50 }
  0xa3   :  { %v187_v52 = vpop.f32.mrf.mxu1 }
  0xa4   :  { %v214_v53 = vmax.f32 %v176_v51, 0.0 }
  0xa5   :  { %v134_v54 = vpop.f32.mrf.mxu2 }
  0xa6   :  { %228 = vst.msk [vmem:[%s539_s3] sm:$0xff] %vm227_vm1, %v214_v53  ;;  %v152_v55 = vpop.f32.mrf.mxu3  ;;  %v135_v58 = vadd.f32 %v470_v48, %v134_v54 }
  0xa7   :  { %v122_v56 = vpop.f32.mrf.mxu0  ;;  %v153_v29 = vadd.f32 %v470_v48, %v152_v55 }
  0xa8   :  { %v123_v57 = vadd.f32 %v470_v48, %v122_v56 }
  0xaa   :  { %v179_v59 = vadd.f32 %v178_v45, %v123_v57 }
  0xab   :  { %v190_v60 = vpop.f32.mrf.mxu1 }
  0xac   :  { %v215_v61 = vmax.f32 %v179_v59, 0.0  ;;  %v191_v62 = vadd.f32 %v190_v60, %v135_v58 }
  0xad   :  { %v137_v63 = vpop.f32.mrf.mxu2 }
  0xae   :  { %229 = vst.msk [vmem:[%s539_s3 + $0x8] sm:$0xff] %vm227_vm1, %v215_v61  ;;  %v219_v0 = vmax.f32 %v191_v62, 0.0  ;;  %v155_v1 = vpop.f32.mrf.mxu3  ;;  %v138_v4 = vadd.f32 %v470_v48, %v137_v63 }
  0xaf   :  { %v125_v2 = vpop.f32.mrf.mxu0  ;;  %v156_v38 = vadd.f32 %v470_v48, %v155_v1 }
  0xb0   :  { %233 = vst.msk [vmem:[%s539_s3 + $0x28] sm:$0xff] %vm227_vm1, %v219_v0  ;;  %v126_v3 = vadd.f32 %v470_v48, %v125_v2 }
  0xb2   :  { %v182_v5 = vadd.f32 %v181_v46, %v126_v3 }
  0xb3   :  { %v193_v6 = vpop.f32.mrf.mxu1 }
  0xb4   :  { %v216_v7 = vmax.f32 %v182_v5, 0.0  ;;  %v194_v8 = vadd.f32 %v193_v6, %v138_v4 }
  0xb5   :  { %v140_v9 = vpop.f32.mrf.mxu2 }
  0xb6   :  { %230 = vst.msk [vmem:[%s539_s3 + $0x10] sm:$0xff] %vm227_vm1, %v216_v7  ;;  %v220_v10 = vmax.f32 %v194_v8, 0.0  ;;  %v202_v11 = vpop.f32.mrf.mxu3  ;;  %v141_v14 = vadd.f32 %v470_v48, %v140_v9 }
  0xb7   :  { %v128_v12 = vpop.f32.mrf.mxu0 }
  0xb8   :  { %234 = vst.msk [vmem:[%s539_s3 + $0x30] sm:$0xff] %vm227_vm1, %v220_v10  ;;  %v129_v13 = vadd.f32 %v470_v48, %v128_v12 }
  0xba   :  { %v185_v15 = vadd.f32 %v184_v47, %v129_v13 }
  0xbb   :  { %v196_v16 = vpop.f32.mrf.mxu1 }
  0xbc   :  { %v217_v17 = vmax.f32 %v185_v15, 0.0  ;;  %v197_v18 = vadd.f32 %v196_v16, %v141_v14 }
  0xbd   :  { %v143_v19 = vpop.f32.mrf.mxu2 }
  0xbe   :  { %231 = vst.msk [vmem:[%s539_s3 + $0x18] sm:$0xff] %vm227_vm1, %v217_v17  ;;  %v221_v20 = vmax.f32 %v197_v18, 0.0  ;;  %v205_v21 = vpop.f32.mrf.mxu3  ;;  %v144_v24 = vadd.f32 %v470_v48, %v143_v19 }
  0xbf   :  { %v131_v22 = vpop.f32.mrf.mxu0 }
  0xc0   :  { %235 = vst.msk [vmem:[%s539_s3 + $0x38] sm:$0xff] %vm227_vm1, %v221_v20  ;;  %v132_v23 = vadd.f32 %v470_v48, %v131_v22 }
  0xc2   :  { %v188_v25 = vadd.f32 %v187_v52, %v132_v23 }
  0xc3   :  { %v199_v26 = vpop.f32.mrf.mxu1 }
  0xc4   :  { %v218_v27 = vmax.f32 %v188_v25, 0.0  ;;  %v200_v28 = vadd.f32 %v199_v26, %v144_v24 }
  0xc5   :  { %v146_v30 = vpop.f32.mrf.mxu2 }
  0xc6   :  { %232 = vst.msk [vmem:[%s539_s3 + $0x20] sm:$0xff] %vm227_vm1, %v218_v27  ;;  %v222_v31 = vmax.f32 %v200_v28, 0.0  ;;  %v147_v32 = vadd.f32 %v470_v48, %v146_v30  ;;  %v208_v33 = vpop.f32.mrf.mxu3 }
  0xc7   :  { %v209_v34 = vadd.f32 %v208_v33, %v153_v29 }
  0xc8   :  { %236 = vst.msk [vmem:[%s539_s3 + $0x40] sm:$0xff] %vm227_vm1, %v222_v31  ;;  %v203_v35 = vadd.f32 %v202_v11, %v147_v32 }
  0xc9   :  { %v225_v36 = vmax.f32 %v209_v34, 0.0 }
  0xca   :  { %v223_v37 = vmax.f32 %v203_v35, 0.0 }
  0xcb   :  { %239 = vst.msk [vmem:[%s539_s3 + $0x58] sm:$0xff] %vm227_vm1, %v225_v36 }
  0xcc   :  { %237 = vst.msk [vmem:[%s539_s3 + $0x48] sm:$0xff] %vm227_vm1, %v223_v37 }
  0xcd   :  { %v149_v39 = vpop.f32.mrf.mxu2 }
  0xce   :  { %v150_v40 = vadd.f32 %v470_v48, %v149_v39  ;;  %v211_v41 = vpop.f32.mrf.mxu3 }
  0xcf   :  { %v212_v42 = vadd.f32 %v211_v41, %v156_v38 }
  0xd0   :  { %v206_v43 = vadd.f32 %v205_v21, %v150_v40 }
  0xd1   :  { %v226_v44 = vmax.f32 %v212_v42, 0.0 }
  0xd2   :  { %v224_v45 = vmax.f32 %v206_v43, 0.0 }
  0xd3   :  { %241 = vst.msk [vmem:[%s539_s3 + $0x60] sm:$0x3] %vm240_vm2, %v226_v44 }
  0xd4   :  { %238 = vst.msk [vmem:[%s539_s3 + $0x50] sm:$0xff] %vm227_vm1, %v224_v45 }

// kernel: tile.8
= control target key start
LH: loop header
LB: loop body
LE: loop exit
PB: predicated region body
PF: predicated region fallthrough
CT: control target
= control target key end

     0   :  { %s58_s0 = inlined_call_operand.vmem [shape: f32[32], index: 0, kind: input, shape index: {}]   ;;  %s59_s1 = inlined_call_operand.vmem [shape: f32[49,32], index: 1, kind: output, shape index: {}]  }
   0x1   :  { %v4_v0 = vld [vmem:[%s58_s0] ss:$0 sm:$0xff] }
   0x2   :  { %5 = vst [vmem:[%s59_s1] sm:$0xff] %v4_v0 }
   0x3   :  { %18 = vst [vmem:[%s59_s1 + $0x8] sm:$0xff] %v4_v0 }
   0x4   :  { %19 = vst [vmem:[%s59_s1 + $0x10] sm:$0xff] %v4_v0 }
   0x5   :  { %20 = vst [vmem:[%s59_s1 + $0x18] sm:$0xff] %v4_v0 }
   0x6   :  { %21 = vst [vmem:[%s59_s1 + $0x20] sm:$0xff] %v4_v0 }
   0x7   :  { %22 = vst [vmem:[%s59_s1 + $0x28] sm:$0xff] %v4_v0 }
   0x8   :  { %23 = vst [vmem:[%s59_s1 + $0x30] sm:$0xff] %v4_v0 }

// kernel: tile.9
= control target key start
LH: loop header
LB: loop body
LE: loop exit
PB: predicated region body
PF: predicated region fallthrough
CT: control target
= control target key end

     0   :  { %s155_s10 = smov 96   ;;  %s156_s11 = smov 64   ;;  %vm3_vm0 = vcmask 261120   ;;  %vm17_vm1 = vcmask 1048320   ;;  %vm31_vm2 = vcmask 785920   ;;  %vm45_vm3 = vcmask 523520   ;;  %s231_s0 = inlined_call_operand.vmem [shape: f32[49,32], index: 0, kind: input, shape index: {}]   ;;  %s232_s1 = inlined_call_operand.vmem [shape: f32[1,1568], index: 1, kind: output, shape index: {}]  }
   0x1   :  { %v134_v0 = vld [vmem:[%s231_s0 + $0x3] ss:$4 sm:$0xff]   ;;  %v136_v1 = vld [vmem:[%s231_s0 + $0x2] ss:$4 sm:$0xff]   ;;  %v138_v2 = vld [vmem:[%s231_s0 + $0x1] ss:$4 sm:$0xff]  }
   0x2   :  { %15 = vrot.lane.b32.xlu0 %v134_v0, %s155_s10  ;;  %29 = vrot.lane.b32.xlu1 %v136_v1, %s156_s11  ;;  %s157_s14 = smov 32   ;;  %v135_v3 = vld [vmem:[%s231_s0 + $0x23] ss:$4 sm:$0xf]   ;;  %v2_v6 = vld [vmem:[%s231_s0] ss:$4 sm:$0xff]  }
   0x3   :  { %43 = vrot.lane.b32.xlu2 %v138_v2, %s157_s14  ;;  %v137_v4 = vld [vmem:[%s231_s0 + $0x22] ss:$4 sm:$0xf]   ;;  %v139_v5 = vld [vmem:[%s231_s0 + $0x21] ss:$4 sm:$0xf]  }
   0x4   :  { %4 = vst.msk [vmem:[#allocation0] ss:$8 sm:$0xf] %vm3_vm0, %v2_v6   ;;  %v133_v8 = vld [vmem:[%s231_s0 + $0x20] ss:$4 sm:$0x1f]  }
   0x5   :  { %5 = vst.msk [vmem:[#allocation0] ss:$8 sm:$0xf0] %vm3_vm0, %v2_v6  }
   0x6   :  { %10 = vst.msk [vmem:[#allocation0 + $0x40] ss:$8 sm:$0xf] %vm3_vm0, %v133_v8  }
   0x7   :  { %12 = vst.msk [vmem:[#allocation0 + $0x5c] sm:$0x10] %vm3_vm0, %v133_v8  }
   0xa   :  { %22 = vrot.lane.b32.xlu0 %v135_v3, %s155_s10  ;;  %36 = vrot.lane.b32.xlu1 %v137_v4, %s156_s11 }
   0xb   :  { %50 = vrot.lane.b32.xlu2 %v139_v5, %s157_s14 }
   0xe   :  { %v128_v10 = vld [vmem:[#allocation0 + $0x60] sm:$0x1] }
   0xf   :  { %151 = vst [vmem:[%s232_s1 + $0xc] sm:$0x1] %v128_v10 }
  0x5d   :  { %v44_v7 = vpop.permute.xlu2 %43  }
  0x65   :  { %v51_v9 = vpop.permute.xlu2 %50  }
  0x74   :  { %v16_v11 = vpop.permute.xlu0 %15   ;;  %v30_v12 = vpop.permute.xlu1 %29  }
  0x75   :  { %18 = vst.msk [vmem:[#allocation0] ss:$8 sm:$0xf] %vm17_vm1, %v16_v11  }
  0x76   :  { %19 = vst.msk [vmem:[#allocation0] ss:$8 sm:$0xf0] %vm17_vm1, %v16_v11  }
  0x77   :  { %32 = vst.msk [vmem:[#allocation0] ss:$8 sm:$0xf] %vm31_vm2, %v30_v12  }
  0x78   :  { %33 = vst.msk [vmem:[#allocation0] ss:$8 sm:$0xf0] %vm31_vm2, %v30_v12  }
  0x79   :  { %46 = vst.msk [vmem:[#allocation0] ss:$8 sm:$0xf] %vm45_vm3, %v44_v7  }
  0x7a   :  { %47 = vst.msk [vmem:[#allocation0] ss:$8 sm:$0xf0] %vm45_vm3, %v44_v7  }
  0x7c   :  { %v23_v13 = vpop.permute.xlu0 %22   ;;  %v37_v14 = vpop.permute.xlu1 %36  }
  0x7d   :  { %26 = vst.msk [vmem:[#allocation0 + $0x40] ss:$8 sm:$0xf] %vm17_vm1, %v23_v13  }
  0x7e   :  { %40 = vst.msk [vmem:[#allocation0 + $0x40] ss:$8 sm:$0xf] %vm31_vm2, %v37_v14  }
  0x7f   :  { %54 = vst.msk [vmem:[#allocation0 + $0x40] ss:$8 sm:$0xf] %vm45_vm3, %v51_v9  }
  0x80   :  { %v57_v15 = vld [vmem:[#allocation0] sm:$0x1]  ;;  %v62_v16 = vld [vmem:[#allocation0 + $0x8] sm:$0x1]  ;;  %v68_v17 = vld [vmem:[#allocation0 + $0x10] sm:$0x1] }
  0x81   :  { %60 = vst [vmem:[%s232_s1] sm:$0x1] %v57_v15  ;;  %v74_v18 = vld [vmem:[#allocation0 + $0x18] sm:$0x1]  ;;  %v80_v19 = vld [vmem:[#allocation0 + $0x20] sm:$0x1] }
  0x82   :  { %140 = vst [vmem:[%s232_s1 + $0x1] sm:$0x1] %v62_v16  ;;  %v86_v20 = vld [vmem:[#allocation0 + $0x28] sm:$0x1]  ;;  %v92_v21 = vld [vmem:[#allocation0 + $0x30] sm:$0x1] }
  0x83   :  { %141 = vst [vmem:[%s232_s1 + $0x2] sm:$0x1] %v68_v17  ;;  %v98_v22 = vld [vmem:[#allocation0 + $0x38] sm:$0x1] }
  0x84   :  { %142 = vst [vmem:[%s232_s1 + $0x3] sm:$0x1] %v74_v18 }
  0x85   :  { %143 = vst [vmem:[%s232_s1 + $0x4] sm:$0x1] %v80_v19 }
  0x86   :  { %144 = vst [vmem:[%s232_s1 + $0x5] sm:$0x1] %v86_v20  ;;  %v104_v23 = vld [vmem:[#allocation0 + $0x40] sm:$0x1]  ;;  %v110_v24 = vld [vmem:[#allocation0 + $0x48] sm:$0x1] }
  0x87   :  { %145 = vst [vmem:[%s232_s1 + $0x6] sm:$0x1] %v92_v21  ;;  %v116_v25 = vld [vmem:[#allocation0 + $0x50] sm:$0x1]  ;;  %v122_v26 = vld [vmem:[#allocation0 + $0x58] sm:$0x1] }
  0x88   :  { %146 = vst [vmem:[%s232_s1 + $0x7] sm:$0x1] %v98_v22 }
  0x89   :  { %147 = vst [vmem:[%s232_s1 + $0x8] sm:$0x1] %v104_v23 }
  0x8a   :  { %148 = vst [vmem:[%s232_s1 + $0x9] sm:$0x1] %v110_v24 }
  0x8b   :  { %149 = vst [vmem:[%s232_s1 + $0xa] sm:$0x1] %v116_v25 }
  0x8c   :  { %150 = vst [vmem:[%s232_s1 + $0xb] sm:$0x1] %v122_v26 }

// kernel: autoencoder_forward.8
= control target key start
LH: loop header
LB: loop body
LE: loop exit
PB: predicated region body
PF: predicated region fallthrough
CT: control target
= control target key end

     0   :  { %vm252_vm0 = vcmask 261120   ;;  %vm515_vm1 = vcmask 517120   ;;  %s1167_s1 = inlined_call_operand.vmem [shape: f32[1568,64], index: 1, kind: input, shape index: {}]   ;;  %s1168_s0 = inlined_call_operand.vmem [shape: f32[2,1568], index: 0, kind: input, shape index: {}]   ;;  %s1169_s2 = inlined_call_operand.vmem [shape: f32[1,64], index: 2, kind: input, shape index: {}]   ;;  %s1170_s3 = inlined_call_operand.vmem [shape: f32[2,64], index: 3, kind: output, shape index: {}]  }
   0x1   :  { %v33_v0 = vld [vmem:[%s1167_s1 + $0x78] sm:$0xff]  ;;  %v32_v2 = vld [vmem:[%s1167_s1 + $0x70] sm:$0xff]  ;;  %v31_v6 = vld [vmem:[%s1167_s1 + $0x68] sm:$0xff] }
   0x2   :  { %v65_v1 = vld [vmem:[%s1167_s1 + $0x178] sm:$0xff]  ;;  %255 = vmatpush.msra.mxu0 %v33_v0  ;;  %v64_v4 = vld [vmem:[%s1167_s1 + $0x170] sm:$0xff]  ;;  %v63_v8 = vld [vmem:[%s1167_s1 + $0x168] sm:$0xff] }
   0x3   :  { %295 = vmatpush.msra.mxu2 %v65_v1  ;;  %v49_v3 = vld [vmem:[%s1167_s1 + $0xf8] sm:$0xff]  ;;  %v48_v7 = vld [vmem:[%s1167_s1 + $0xf0] sm:$0xff]  ;;  %v47_v10 = vld [vmem:[%s1167_s1 + $0xe8] sm:$0xff] }
   0x4   :  { %v81_v5 = vld [vmem:[%s1167_s1 + $0x1f8] sm:$0xff]  ;;  %275 = vmatpush.msra.mxu1 %v49_v3  ;;  %256 = vmatpush.msra.mxu0 %v32_v2  ;;  %v80_v9 = vld [vmem:[%s1167_s1 + $0x1f0] sm:$0xff]  ;;  %v30_v11 = vld [vmem:[%s1167_s1 + $0x60] sm:$0xff] }
   0x5   :  { %315 = vmatpush.msra.mxu3 %v81_v5  ;;  %296 = vmatpush.msra.mxu2 %v64_v4  ;;  %v62_v12 = vld [vmem:[%s1167_s1 + $0x160] sm:$0xff]  ;;  %v79_v13 = vld [vmem:[%s1167_s1 + $0x1e8] sm:$0xff]  ;;  %v29_v16 = vld [vmem:[%s1167_s1 + $0x58] sm:$0xff] }
   0x6   :  { %276 = vmatpush.msra.mxu1 %v48_v7  ;;  %257 = vmatpush.msra.mxu0 %v31_v6  ;;  %v46_v14 = vld [vmem:[%s1167_s1 + $0xe0] sm:$0xff]  ;;  %v61_v17 = vld [vmem:[%s1167_s1 + $0x158] sm:$0xff]  ;;  %v28_v20 = vld [vmem:[%s1167_s1 + $0x50] sm:$0xff] }
   0x7   :  { %316 = vmatpush.msra.mxu3 %v80_v9  ;;  %297 = vmatpush.msra.mxu2 %v63_v8  ;;  %v78_v15 = vld [vmem:[%s1167_s1 + $0x1e0] sm:$0xff]  ;;  %v45_v18 = vld [vmem:[%s1167_s1 + $0xd8] sm:$0xff]  ;;  %v60_v21 = vld [vmem:[%s1167_s1 + $0x150] sm:$0xff] }
   0x8   :  { %277 = vmatpush.msra.mxu1 %v47_v10  ;;  %258 = vmatpush.msra.mxu0 %v30_v11  ;;  %v77_v19 = vld [vmem:[%s1167_s1 + $0x1d8] sm:$0xff]  ;;  %v44_v22 = vld [vmem:[%s1167_s1 + $0xd0] sm:$0xff]  ;;  %v27_v24 = vld [vmem:[%s1167_s1 + $0x48] sm:$0xff] }
   0x9   :  { %317 = vmatpush.msra.mxu3 %v79_v13  ;;  %298 = vmatpush.msra.mxu2 %v62_v12  ;;  %v76_v23 = vld [vmem:[%s1167_s1 + $0x1d0] sm:$0xff]  ;;  %v59_v25 = vld [vmem:[%s1167_s1 + $0x148] sm:$0xff]  ;;  %v26_v28 = vld [vmem:[%s1167_s1 + $0x40] sm:$0xff] }
   0xa   :  { %278 = vmatpush.msra.mxu1 %v46_v14  ;;  %259 = vmatpush.msra.mxu0 %v29_v16  ;;  %v43_v26 = vld [vmem:[%s1167_s1 + $0xc8] sm:$0xff]  ;;  %v58_v29 = vld [vmem:[%s1167_s1 + $0x140] sm:$0xff]  ;;  %v25_v32 = vld [vmem:[%s1167_s1 + $0x38] sm:$0xff] }
   0xb   :  { %318 = vmatpush.msra.mxu3 %v78_v15  ;;  %299 = vmatpush.msra.mxu2 %v61_v17  ;;  %v75_v27 = vld [vmem:[%s1167_s1 + $0x1c8] sm:$0xff]  ;;  %v42_v30 = vld [vmem:[%s1167_s1 + $0xc0] sm:$0xff]  ;;  %v57_v33 = vld [vmem:[%s1167_s1 + $0x138] sm:$0xff] }
   0xc   :  { %279 = vmatpush.msra.mxu1 %v45_v18  ;;  %260 = vmatpush.msra.mxu0 %v28_v20  ;;  %v74_v31 = vld [vmem:[%s1167_s1 + $0x1c0] sm:$0xff]  ;;  %v41_v34 = vld [vmem:[%s1167_s1 + $0xb8] sm:$0xff]  ;;  %v24_v36 = vld [vmem:[%s1167_s1 + $0x30] sm:$0xff] }
   0xd   :  { %319 = vmatpush.msra.mxu3 %v77_v19  ;;  %300 = vmatpush.msra.mxu2 %v60_v21  ;;  %v73_v35 = vld [vmem:[%s1167_s1 + $0x1b8] sm:$0xff]  ;;  %v56_v37 = vld [vmem:[%s1167_s1 + $0x130] sm:$0xff]  ;;  %v23_v40 = vld [vmem:[%s1167_s1 + $0x28] sm:$0xff] }
   0xe   :  { %280 = vmatpush.msra.mxu1 %v44_v22  ;;  %261 = vmatpush.msra.mxu0 %v27_v24  ;;  %v40_v38 = vld [vmem:[%s1167_s1 + $0xb0] sm:$0xff]  ;;  %v55_v41 = vld [vmem:[%s1167_s1 + $0x128] sm:$0xff]  ;;  %v22_v44 = vld [vmem:[%s1167_s1 + $0x20] sm:$0xff] }
   0xf   :  { %320 = vmatpush.msra.mxu3 %v76_v23  ;;  %301 = vmatpush.msra.mxu2 %v59_v25  ;;  %v72_v39 = vld [vmem:[%s1167_s1 + $0x1b0] sm:$0xff]  ;;  %v39_v42 = vld [vmem:[%s1167_s1 + $0xa8] sm:$0xff]  ;;  %v54_v45 = vld [vmem:[%s1167_s1 + $0x120] sm:$0xff] }
  0x10   :  { %281 = vmatpush.msra.mxu1 %v43_v26  ;;  %262 = vmatpush.msra.mxu0 %v26_v28  ;;  %v71_v43 = vld [vmem:[%s1167_s1 + $0x1a8] sm:$0xff]  ;;  %v38_v46 = vld [vmem:[%s1167_s1 + $0xa0] sm:$0xff]  ;;  %v21_v48 = vld [vmem:[%s1167_s1 + $0x18] sm:$0xff] }
  0x11   :  { %321 = vmatpush.msra.mxu3 %v75_v27  ;;  %302 = vmatpush.msra.mxu2 %v58_v29  ;;  %v70_v47 = vld [vmem:[%s1167_s1 + $0x1a0] sm:$0xff]  ;;  %v53_v49 = vld [vmem:[%s1167_s1 + $0x118] sm:$0xff]  ;;  %v20_v52 = vld [vmem:[%s1167_s1 + $0x10] sm:$0xff] }
  0x12   :  { %282 = vmatpush.msra.mxu1 %v42_v30  ;;  %263 = vmatpush.msra.mxu0 %v25_v32  ;;  %v37_v50 = vld [vmem:[%s1167_s1 + $0x98] sm:$0xff]  ;;  %v52_v53 = vld [vmem:[%s1167_s1 + $0x110] sm:$0xff]  ;;  %v19_v56 = vld [vmem:[%s1167_s1 + $0x8] sm:$0xff] }
  0x13   :  { %322 = vmatpush.msra.mxu3 %v74_v31  ;;  %303 = vmatpush.msra.mxu2 %v57_v33  ;;  %v69_v51 = vld [vmem:[%s1167_s1 + $0x198] sm:$0xff]  ;;  %v36_v54 = vld [vmem:[%s1167_s1 + $0x90] sm:$0xff]  ;;  %v51_v57 = vld [vmem:[%s1167_s1 + $0x108] sm:$0xff] }
  0x14   :  { %283 = vmatpush.msra.mxu1 %v41_v34  ;;  %264 = vmatpush.msra.mxu0 %v24_v36  ;;  %v68_v55 = vld [vmem:[%s1167_s1 + $0x190] sm:$0xff]  ;;  %v35_v58 = vld [vmem:[%s1167_s1 + $0x88] sm:$0xff]  ;;  %v18_v60 = vld [vmem:[%s1167_s1] sm:$0xff] }
  0x15   :  { %323 = vmatpush.msra.mxu3 %v73_v35  ;;  %304 = vmatpush.msra.mxu2 %v56_v37  ;;  %v67_v59 = vld [vmem:[%s1167_s1 + $0x188] sm:$0xff]  ;;  %v50_v61 = vld [vmem:[%s1167_s1 + $0x100] sm:$0xff]  ;;  %v97_v62 = vld [vmem:[%s1167_s1 + $0x278] sm:$0xff] }
  0x16   :  { %284 = vmatpush.msra.mxu1 %v40_v38  ;;  %265 = vmatpush.msra.mxu0 %v23_v40  ;;  %v129_v63 = vld [vmem:[%s1167_s1 + $0x378] sm:$0xff]  ;;  %v34_v0 = vld [vmem:[%s1167_s1 + $0x80] sm:$0xff]  ;;  %v96_v2 = vld [vmem:[%s1167_s1 + $0x270] sm:$0xff] }
  0x17   :  { %324 = vmatpush.msra.mxu3 %v72_v39  ;;  %305 = vmatpush.msra.mxu2 %v55_v41  ;;  %v66_v1 = vld [vmem:[%s1167_s1 + $0x180] sm:$0xff]  ;;  %v113_v3 = vld [vmem:[%s1167_s1 + $0x2f8] sm:$0xff]  ;;  %v128_v4 = vld [vmem:[%s1167_s1 + $0x370] sm:$0xff] }
  0x18   :  { %285 = vmatpush.msra.mxu1 %v39_v42  ;;  %266 = vmatpush.msra.mxu0 %v22_v44  ;;  %v145_v5 = vld [vmem:[%s1167_s1 + $0x3f8] sm:$0xff]  ;;  %v95_v6 = vld [vmem:[%s1167_s1 + $0x268] sm:$0xff]  ;;  %v112_v7 = vld [vmem:[%s1167_s1 + $0x2f0] sm:$0xff] }
  0x19   :  { %325 = vmatpush.msra.mxu3 %v71_v43  ;;  %306 = vmatpush.msra.mxu2 %v54_v45  ;;  %v127_v8 = vld [vmem:[%s1167_s1 + $0x368] sm:$0xff]  ;;  %v144_v9 = vld [vmem:[%s1167_s1 + $0x3f0] sm:$0xff]  ;;  %v94_v10 = vld [vmem:[%s1167_s1 + $0x260] sm:$0xff] }
  0x1a   :  { %286 = vmatpush.msra.mxu1 %v38_v46  ;;  %267 = vmatpush.msra.mxu0 %v21_v48  ;;  %v111_v11 = vld [vmem:[%s1167_s1 + $0x2e8] sm:$0xff]  ;;  %v126_v12 = vld [vmem:[%s1167_s1 + $0x360] sm:$0xff]  ;;  %v93_v14 = vld [vmem:[%s1167_s1 + $0x258] sm:$0xff] }
  0x1b   :  { %326 = vmatpush.msra.mxu3 %v70_v47  ;;  %307 = vmatpush.msra.mxu2 %v53_v49  ;;  %v143_v13 = vld [vmem:[%s1167_s1 + $0x3e8] sm:$0xff]  ;;  %v110_v15 = vld [vmem:[%s1167_s1 + $0x2e0] sm:$0xff]  ;;  %v125_v16 = vld [vmem:[%s1167_s1 + $0x358] sm:$0xff] }
  0x1c   :  { %287 = vmatpush.msra.mxu1 %v37_v50  ;;  %268 = vmatpush.msra.mxu0 %v20_v52  ;;  %v142_v17 = vld [vmem:[%s1167_s1 + $0x3e0] sm:$0xff]  ;;  %v92_v18 = vld [vmem:[%s1167_s1 + $0x250] sm:$0xff]  ;;  %v109_v19 = vld [vmem:[%s1167_s1 + $0x2d8] sm:$0xff] }
  0x1d   :  { %327 = vmatpush.msra.mxu3 %v69_v51  ;;  %308 = vmatpush.msra.mxu2 %v52_v53  ;;  %v124_v20 = vld [vmem:[%s1167_s1 + $0x350] sm:$0xff]  ;;  %v141_v21 = vld [vmem:[%s1167_s1 + $0x3d8] sm:$0xff]  ;;  %v91_v22 = vld [vmem:[%s1167_s1 + $0x248] sm:$0xff] }
  0x1e   :  { %288 = vmatpush.msra.mxu1 %v36_v54  ;;  %269 = vmatpush.msra.mxu0 %v19_v56  ;;  %v108_v23 = vld [vmem:[%s1167_s1 + $0x2d0] sm:$0xff]  ;;  %v123_v24 = vld [vmem:[%s1167_s1 + $0x348] sm:$0xff]  ;;  %v14_v26 = vld [vmem:[%s1168_s0] sm:$0xff] }
  0x1f   :  { %328 = vmatpush.msra.mxu3 %v68_v55  ;;  %309 = vmatpush.msra.mxu2 %v51_v57  ;;  %v140_v25 = vld [vmem:[%s1167_s1 + $0x3d0] sm:$0xff]  ;;  %v90_v27 = vld [vmem:[%s1167_s1 + $0x240] sm:$0xff]  ;;  %v107_v28 = vld [vmem:[%s1167_s1 + $0x2c8] sm:$0xff]  ;;  %222 = vst [vmem:[#allocation1] ss:$4 sm:$0xff] %v14_v26 }
  0x20   :  { %289 = vmatpush.msra.mxu1 %v35_v58  ;;  %270 = vmatpush.msra.mxu0 %v18_v60  ;;  %v122_v29 = vld [vmem:[%s1167_s1 + $0x340] sm:$0xff]  ;;  %v139_v30 = vld [vmem:[%s1167_s1 + $0x3c8] sm:$0xff]  ;;  %v89_v31 = vld [vmem:[%s1167_s1 + $0x238] sm:$0xff] }
  0x21   :  { %329 = vmatpush.msra.mxu3 %v67_v59  ;;  %310 = vmatpush.msra.mxu2 %v50_v61  ;;  %v106_v32 = vld [vmem:[%s1167_s1 + $0x2c0] sm:$0xff]  ;;  %v121_v33 = vld [vmem:[%s1167_s1 + $0x338] sm:$0xff]  ;;  %v88_v35 = vld [vmem:[%s1167_s1 + $0x230] sm:$0xff] }
  0x22   :  { %335 = vmatpush.msrb.mxu0 %v97_v62  ;;  %290 = vmatpush.msra.mxu1 %v34_v0  ;;  %v138_v34 = vld [vmem:[%s1167_s1 + $0x3c0] sm:$0xff]  ;;  %v105_v36 = vld [vmem:[%s1167_s1 + $0x2b8] sm:$0xff]  ;;  %v120_v37 = vld [vmem:[%s1167_s1 + $0x330] sm:$0xff] }
  0x23   :  { %375 = vmatpush.msrb.mxu2 %v129_v63  ;;  %330 = vmatpush.msra.mxu3 %v66_v1  ;;  %v137_v38 = vld [vmem:[%s1167_s1 + $0x3b8] sm:$0xff]  ;;  %v87_v39 = vld [vmem:[%s1167_s1 + $0x228] sm:$0xff]  ;;  %v104_v40 = vld [vmem:[%s1167_s1 + $0x2b0] sm:$0xff] }
  0x24   :  { %336 = vmatpush.msrb.mxu0 %v96_v2  ;;  %355 = vmatpush.msrb.mxu1 %v113_v3  ;;  %v119_v41 = vld [vmem:[%s1167_s1 + $0x328] sm:$0xff]  ;;  %v136_v42 = vld [vmem:[%s1167_s1 + $0x3b0] sm:$0xff]  ;;  %v86_v44 = vld [vmem:[%s1167_s1 + $0x220] sm:$0xff] }
  0x25   :  { %376 = vmatpush.msrb.mxu2 %v128_v4  ;;  %395 = vmatpush.msrb.mxu3 %v145_v5  ;;  %v15_v43 = vld [vmem:[%s1168_s0 + $0x8] sm:$0xff]  ;;  %v16_v46 = vld [vmem:[%s1168_s0 + $0x10] sm:$0xff]  ;;  %v118_v47 = vld [vmem:[%s1167_s1 + $0x320] sm:$0xff] }
  0x26   :  { %337 = vmatpush.msrb.mxu0 %v95_v6  ;;  %356 = vmatpush.msrb.mxu1 %v112_v7  ;;  %v103_v45 = vld [vmem:[%s1167_s1 + $0x2a8] sm:$0xff]  ;;  %224 = vst [vmem:[#allocation1 + $0x20] ss:$4 sm:$0xff] %v15_v43  ;;  %v225_v48 = vld.sshfl [vmem:[#allocation1] sm:$0xff pattern:$0x73625140] }
  0x27   :  { %377 = vmatpush.msrb.mxu2 %v127_v8  ;;  %396 = vmatpush.msrb.mxu3 %v144_v9  ;;  %v227_v49 = vld.sshfl [vmem:[#allocation1 + $0x10] sm:$0xff pattern:$0x73625140]  ;;  %v879_v50 = vld.sshfl [vmem:[#allocation1 + $0x8] sm:$0xff pattern:$0x73625140] }
  0x28   :  { %338 = vmatpush.msrb.mxu0 %v94_v10  ;;  %357 = vmatpush.msrb.mxu1 %v111_v11  ;;  %v881_v51 = vld.sshfl [vmem:[#allocation1 + $0x18] sm:$0xff pattern:$0x73625140]  ;;  %v135_v52 = vld [vmem:[%s1167_s1 + $0x3a8] sm:$0xff]  ;;  %v102_v54 = vld [vmem:[%s1167_s1 + $0x2a0] sm:$0xff] }
  0x29   :  { %378 = vmatpush.msrb.mxu2 %v126_v12  ;;  %397 = vmatpush.msrb.mxu3 %v143_v13  ;;  %v85_v53 = vld [vmem:[%s1167_s1 + $0x218] sm:$0xff]  ;;  %233 = vst [vmem:[#allocation1] ss:$4 sm:$0xff] %v16_v46  ;;  %v134_v56 = vld [vmem:[%s1167_s1 + $0x3a0] sm:$0xff]  ;;  %v84_v57 = vld [vmem:[%s1167_s1 + $0x210] sm:$0xff] }
  0x2a   :  { %339 = vmatpush.msrb.mxu0 %v93_v14  ;;  %358 = vmatpush.msrb.mxu1 %v110_v15  ;;  %v117_v55 = vld [vmem:[%s1167_s1 + $0x318] sm:$0xff]  ;;  %v116_v59 = vld [vmem:[%s1167_s1 + $0x310] sm:$0xff]  ;;  %v83_v61 = vld [vmem:[%s1167_s1 + $0x208] sm:$0xff] }
  0x2b   :  { %379 = vmatpush.msrb.mxu2 %v125_v16  ;;  %398 = vmatpush.msrb.mxu3 %v142_v17  ;;  %v101_v58 = vld [vmem:[%s1167_s1 + $0x298] sm:$0xff]  ;;  %v100_v62 = vld [vmem:[%s1167_s1 + $0x290] sm:$0xff]  ;;  %v115_v4 = vld [vmem:[%s1167_s1 + $0x308] sm:$0xff] }
  0x2c   :  { %340 = vmatpush.msrb.mxu0 %v92_v18  ;;  %359 = vmatpush.msrb.mxu1 %v109_v19  ;;  %v133_v60 = vld [vmem:[%s1167_s1 + $0x398] sm:$0xff]  ;;  %v132_v5 = vld [vmem:[%s1167_s1 + $0x390] sm:$0xff]  ;;  %v82_v6 = vld [vmem:[%s1167_s1 + $0x200] sm:$0xff] }
  0x2d   :  { %380 = vmatpush.msrb.mxu2 %v124_v20  ;;  %399 = vmatpush.msrb.mxu3 %v141_v21  ;;  %v17_v63 = vld [vmem:[%s1168_s0 + $0x18] sm:$0x3]  ;;  %v919_v0 = vld.sshfl [vmem:[#allocation1 + $0x30] sm:$0xff pattern:$0x73625140]  ;;  %v99_v7 = vld [vmem:[%s1167_s1 + $0x288] sm:$0xff] }
  0x2e   :  { %341 = vmatpush.msrb.mxu0 %v91_v22  ;;  %360 = vmatpush.msrb.mxu1 %v108_v23  ;;  %v921_v1 = vld.sshfl [vmem:[#allocation1 + $0x20] sm:$0xff pattern:$0x73625140]  ;;  %v923_v2 = vld.sshfl [vmem:[#allocation1 + $0x38] sm:$0xff pattern:$0x73625140] }
  0x2f   :  { %381 = vmatpush.msrb.mxu2 %v123_v24  ;;  %400 = vmatpush.msrb.mxu3 %v140_v25  ;;  %v925_v3 = vld.sshfl [vmem:[#allocation1 + $0x28] sm:$0xff pattern:$0x73625140]  ;;  %v114_v8 = vld [vmem:[%s1167_s1 + $0x300] sm:$0xff]  ;;  %v161_v10 = vld [vmem:[%s1167_s1 + $0x478] sm:$0xff] }
  0x30   :  { %342 = vmatpush.msrb.mxu0 %v90_v27  ;;  %361 = vmatpush.msrb.mxu1 %v107_v28  ;;  %234 = vst [vmem:[#allocation1 + $0x20] ss:$4 sm:$0xff] %v17_v63  ;;  %v131_v9 = vld [vmem:[%s1167_s1 + $0x388] sm:$0xff]  ;;  %v193_v11 = vld [vmem:[%s1167_s1 + $0x578] sm:$0xff]  ;;  %v98_v12 = vld [vmem:[%s1167_s1 + $0x280] sm:$0xff] }
  0x31   :  { %382 = vmatpush.msrb.mxu2 %v122_v29  ;;  %401 = vmatpush.msrb.mxu3 %v139_v30  ;;  %v130_v13 = vld [vmem:[%s1167_s1 + $0x380] sm:$0xff]  ;;  %v160_v14 = vld [vmem:[%s1167_s1 + $0x470] sm:$0xff]  ;;  %v177_v15 = vld [vmem:[%s1167_s1 + $0x4f8] sm:$0xff] }
  0x32   :  { %343 = vmatpush.msrb.mxu0 %v89_v31  ;;  %362 = vmatpush.msrb.mxu1 %v106_v32  ;;  %v192_v16 = vld [vmem:[%s1167_s1 + $0x570] sm:$0xff]  ;;  %v209_v17 = vld [vmem:[%s1167_s1 + $0x5f8] sm:$0xff]  ;;  %v159_v18 = vld [vmem:[%s1167_s1 + $0x468] sm:$0xff] }
  0x33   :  { %383 = vmatpush.msrb.mxu2 %v121_v33  ;;  %402 = vmatpush.msrb.mxu3 %v138_v34  ;;  %v176_v19 = vld [vmem:[%s1167_s1 + $0x4f0] sm:$0xff]  ;;  %v191_v20 = vld [vmem:[%s1167_s1 + $0x568] sm:$0xff]  ;;  %v158_v22 = vld [vmem:[%s1167_s1 + $0x460] sm:$0xff] }
  0x34   :  { %344 = vmatpush.msrb.mxu0 %v88_v35  ;;  %363 = vmatpush.msrb.mxu1 %v105_v36  ;;  %v208_v21 = vld [vmem:[%s1167_s1 + $0x5f0] sm:$0xff]  ;;  %v175_v23 = vld [vmem:[%s1167_s1 + $0x4e8] sm:$0xff]  ;;  %v190_v24 = vld [vmem:[%s1167_s1 + $0x560] sm:$0xff] }
  0x35   :  { %384 = vmatpush.msrb.mxu2 %v120_v37  ;;  %403 = vmatpush.msrb.mxu3 %v137_v38  ;;  %v207_v25 = vld [vmem:[%s1167_s1 + $0x5e8] sm:$0xff]  ;;  %v157_v26 = vld [vmem:[%s1167_s1 + $0x458] sm:$0xff]  ;;  %v174_v27 = vld [vmem:[%s1167_s1 + $0x4e0] sm:$0xff] }
  0x36   :  { %345 = vmatpush.msrb.mxu0 %v87_v39  ;;  %364 = vmatpush.msrb.mxu1 %v104_v40  ;;  %v189_v28 = vld [vmem:[%s1167_s1 + $0x558] sm:$0xff]  ;;  %v206_v29 = vld [vmem:[%s1167_s1 + $0x5e0] sm:$0xff]  ;;  %v156_v30 = vld [vmem:[%s1167_s1 + $0x450] sm:$0xff] }
  0x37   :  { %385 = vmatpush.msrb.mxu2 %v119_v41  ;;  %404 = vmatpush.msrb.mxu3 %v136_v42  ;;  %v173_v31 = vld [vmem:[%s1167_s1 + $0x4d8] sm:$0xff]  ;;  %v188_v32 = vld [vmem:[%s1167_s1 + $0x550] sm:$0xff]  ;;  %v155_v34 = vld [vmem:[%s1167_s1 + $0x448] sm:$0xff] }
  0x38   :  { %346 = vmatpush.msrb.mxu0 %v86_v44  ;;  %365 = vmatpush.msrb.mxu1 %v103_v45  ;;  %v205_v33 = vld [vmem:[%s1167_s1 + $0x5d8] sm:$0xff]  ;;  %v172_v35 = vld [vmem:[%s1167_s1 + $0x4d0] sm:$0xff]  ;;  %v187_v36 = vld [vmem:[%s1167_s1 + $0x548] sm:$0xff] }
  0x39   :  { %386 = vmatpush.msrb.mxu2 %v118_v47  ;;  %405 = vmatpush.msrb.mxu3 %v135_v52  ;;  %v204_v37 = vld [vmem:[%s1167_s1 + $0x5d0] sm:$0xff]  ;;  %v154_v38 = vld [vmem:[%s1167_s1 + $0x440] sm:$0xff]  ;;  %v171_v39 = vld [vmem:[%s1167_s1 + $0x4c8] sm:$0xff] }
  0x3a   :  { %347 = vmatpush.msrb.mxu0 %v85_v53  ;;  %366 = vmatpush.msrb.mxu1 %v102_v54  ;;  %v186_v40 = vld [vmem:[%s1167_s1 + $0x540] sm:$0xff]  ;;  %v203_v41 = vld [vmem:[%s1167_s1 + $0x5c8] sm:$0xff]  ;;  %v153_v42 = vld [vmem:[%s1167_s1 + $0x438] sm:$0xff] }
  0x3b   :  { %387 = vmatpush.msrb.mxu2 %v117_v55  ;;  %406 = vmatpush.msrb.mxu3 %v134_v56  ;;  %v170_v43 = vld [vmem:[%s1167_s1 + $0x4c0] sm:$0xff]  ;;  %v185_v44 = vld [vmem:[%s1167_s1 + $0x538] sm:$0xff]  ;;  %v152_v46 = vld [vmem:[%s1167_s1 + $0x430] sm:$0xff] }
  0x3c   :  { %348 = vmatpush.msrb.mxu0 %v84_v57  ;;  %367 = vmatpush.msrb.mxu1 %v101_v58  ;;  %v202_v45 = vld [vmem:[%s1167_s1 + $0x5c0] sm:$0xff]  ;;  %v169_v47 = vld [vmem:[%s1167_s1 + $0x4b8] sm:$0xff]  ;;  %v183_v52 = vld [vmem:[%s1167_s1 + $0x528] sm:$0xff] }
  0x3d   :  { %388 = vmatpush.msrb.mxu2 %v116_v59  ;;  %407 = vmatpush.msrb.mxu3 %v133_v60  ;;  %v200_v53 = vld [vmem:[%s1167_s1 + $0x5b0] sm:$0xff]  ;;  %v150_v54 = vld [vmem:[%s1167_s1 + $0x420] sm:$0xff]  ;;  %v167_v55 = vld [vmem:[%s1167_s1 + $0x4a8] sm:$0xff] }
  0x3e   :  { %349 = vmatpush.msrb.mxu0 %v83_v61  ;;  %368 = vmatpush.msrb.mxu1 %v100_v62  ;;  %v182_v56 = vld [vmem:[%s1167_s1 + $0x520] sm:$0xff]  ;;  %v199_v57 = vld [vmem:[%s1167_s1 + $0x5a8] sm:$0xff]  ;;  %v149_v58 = vld [vmem:[%s1167_s1 + $0x418] sm:$0xff] }
  0x3f   :  { %389 = vmatpush.msrb.mxu2 %v115_v4  ;;  %408 = vmatpush.msrb.mxu3 %v132_v5  ;;  %v166_v59 = vld [vmem:[%s1167_s1 + $0x4a0] sm:$0xff]  ;;  %v181_v60 = vld [vmem:[%s1167_s1 + $0x518] sm:$0xff]  ;;  %v148_v62 = vld [vmem:[%s1167_s1 + $0x410] sm:$0xff] }
  0x40   :  { %350 = vmatpush.msrb.mxu0 %v82_v6  ;;  %369 = vmatpush.msrb.mxu1 %v99_v7  ;;  %v198_v61 = vld [vmem:[%s1167_s1 + $0x5a0] sm:$0xff]  ;;  %v165_v63 = vld [vmem:[%s1167_s1 + $0x498] sm:$0xff]  ;;  %v179_v4 = vld [vmem:[%s1167_s1 + $0x508] sm:$0xff] }
  0x41   :  { %390 = vmatpush.msrb.mxu2 %v114_v8  ;;  %409 = vmatpush.msrb.mxu3 %v131_v9  ;;  %v196_v5 = vld [vmem:[%s1167_s1 + $0x590] sm:$0xff]  ;;  %v146_v6 = vld [vmem:[%s1167_s1 + $0x400] sm:$0xff]  ;;  %v163_v7 = vld [vmem:[%s1167_s1 + $0x488] sm:$0xff] }
  0x42   :  { %271 = vmatmul.f32.vlgmr.msra.gmra.mxu0 %v225_v48  ;;  %311 = vmatmul.f32.vlgmr.msra.gmra.mxu2 %v227_v49  ;;  %v184_v48 = vld [vmem:[%s1167_s1 + $0x530] sm:$0xff]  ;;  %v201_v49 = vld [vmem:[%s1167_s1 + $0x5b8] sm:$0xff]  ;;  %v178_v8 = vld [vmem:[%s1167_s1 + $0x500] sm:$0xff] }
  0x43   :  { %415 = vmatpush.msra.mxu0 %v161_v10  ;;  %455 = vmatpush.msra.mxu2 %v193_v11  ;;  %v195_v9 = vld [vmem:[%s1167_s1 + $0x588] sm:$0xff]  ;;  %v235_v10 = vld.sshfl [vmem:[#allocation1] sm:$0xff pattern:$0x73625140] }
  0x44   :  { %370 = vmatpush.msrb.mxu1 %v98_v12  ;;  %410 = vmatpush.msrb.mxu3 %v130_v13  ;;  %v237_v11 = vld.sshfl [vmem:[#allocation1 + $0x10] sm:$0xff pattern:$0x73625140]  ;;  %v162_v12 = vld [vmem:[%s1167_s1 + $0x480] sm:$0xff] }
  0x45   :  { %291 = vmatmul.f32.vlgmr.msra.gmra.mxu1 %v879_v50  ;;  %331 = vmatmul.f32.vlgmr.msra.gmra.mxu3 %v881_v51  ;;  %v151_v50 = vld [vmem:[%s1167_s1 + $0x428] sm:$0xff]  ;;  %v168_v51 = vld [vmem:[%s1167_s1 + $0x4b0] sm:$0xff]  ;;  %v194_v13 = vld [vmem:[%s1167_s1 + $0x580] sm:$0xff] }
  0x46   :  { %416 = vmatpush.msra.mxu0 %v160_v14  ;;  %435 = vmatpush.msra.mxu1 %v177_v15  ;;  %v236_v14 = vld.sshfl [vmem:[#allocation1 + $0x8] sm:$0xff pattern:$0x73625140]  ;;  %v238_v15 = vld.sshfl [vmem:[#allocation1 + $0x18] sm:$0xff pattern:$0x73625140] }
  0x47   :  { %456 = vmatpush.msra.mxu2 %v192_v16  ;;  %475 = vmatpush.msra.mxu3 %v209_v17  ;;  %v213_v16 = vld [vmem:[%s1167_s1 + $0x618] sm:$0xff]  ;;  %v212_v17 = vld [vmem:[%s1167_s1 + $0x610] sm:$0xff] }
  0x48   :  { %417 = vmatpush.msra.mxu0 %v159_v18  ;;  %436 = vmatpush.msra.mxu1 %v176_v19  ;;  %v211_v18 = vld [vmem:[%s1167_s1 + $0x608] sm:$0xff]  ;;  %v210_v19 = vld [vmem:[%s1167_s1 + $0x600] sm:$0xff] }
  0x49   :  { %457 = vmatpush.msra.mxu2 %v191_v20  ;;  %476 = vmatpush.msra.mxu3 %v208_v21  ;;  %v239_v20 = vld.sshfl [vmem:[#allocation1 + $0x20] sm:$0xff pattern:$0x73625140] }
  0x4a   :  { %418 = vmatpush.msra.mxu0 %v158_v22  ;;  %437 = vmatpush.msra.mxu1 %v175_v23  ;;  %v522_v21 = vld [vmem:[%s1169_s2] ss:$0 sm:$0xff] }
  0x4b   :  { %458 = vmatpush.msra.mxu2 %v190_v24  ;;  %477 = vmatpush.msra.mxu3 %v207_v25 }
  0x4c   :  { %391 = vmatmul.f32.vlgmr.msrb.gmra.mxu2 %v919_v0  ;;  %419 = vmatpush.msra.mxu0 %v157_v26  ;;  %v180_v0 = vld [vmem:[%s1167_s1 + $0x510] sm:$0xff] }
  0x4d   :  { %438 = vmatpush.msra.mxu1 %v174_v27  ;;  %459 = vmatpush.msra.mxu2 %v189_v28 }
  0x4e   :  { %478 = vmatpush.msra.mxu3 %v206_v29  ;;  %351 = vmatmul.f32.vlgmr.msrb.gmra.mxu0 %v921_v1  ;;  %v197_v1 = vld [vmem:[%s1167_s1 + $0x598] sm:$0xff] }
  0x4f   :  { %411 = vmatmul.f32.vlgmr.msrb.gmra.mxu3 %v923_v2  ;;  %420 = vmatpush.msra.mxu0 %v156_v30  ;;  %v147_v2 = vld [vmem:[%s1167_s1 + $0x408] sm:$0xff] }
  0x50   :  { %439 = vmatpush.msra.mxu1 %v173_v31  ;;  %460 = vmatpush.msra.mxu2 %v188_v32 }
  0x51   :  { %479 = vmatpush.msra.mxu3 %v205_v33  ;;  %371 = vmatmul.f32.vlgmr.msrb.gmra.mxu1 %v925_v3  ;;  %v164_v3 = vld [vmem:[%s1167_s1 + $0x490] sm:$0xff] }
  0x52   :  { %421 = vmatpush.msra.mxu0 %v155_v34  ;;  %440 = vmatpush.msra.mxu1 %v172_v35 }
  0x53   :  { %461 = vmatpush.msra.mxu2 %v187_v36  ;;  %480 = vmatpush.msra.mxu3 %v204_v37 }
  0x54   :  { %422 = vmatpush.msra.mxu0 %v154_v38  ;;  %441 = vmatpush.msra.mxu1 %v171_v39 }
  0x55   :  { %462 = vmatpush.msra.mxu2 %v186_v40  ;;  %481 = vmatpush.msra.mxu3 %v203_v41 }
  0x56   :  { %423 = vmatpush.msra.mxu0 %v153_v42  ;;  %442 = vmatpush.msra.mxu1 %v170_v43 }
  0x57   :  { %463 = vmatpush.msra.mxu2 %v185_v44  ;;  %482 = vmatpush.msra.mxu3 %v202_v45 }
  0x58   :  { %424 = vmatpush.msra.mxu0 %v152_v46  ;;  %443 = vmatpush.msra.mxu1 %v169_v47 }
  0x59   :  { %464 = vmatpush.msra.mxu2 %v184_v48  ;;  %483 = vmatpush.msra.mxu3 %v201_v49 }
  0x5a   :  { %425 = vmatpush.msra.mxu0 %v151_v50  ;;  %444 = vmatpush.msra.mxu1 %v168_v51 }
  0x5b   :  { %465 = vmatpush.msra.mxu2 %v183_v52  ;;  %484 = vmatpush.msra.mxu3 %v200_v53 }
  0x5c   :  { %426 = vmatpush.msra.mxu0 %v150_v54  ;;  %445 = vmatpush.msra.mxu1 %v167_v55 }
  0x5d   :  { %466 = vmatpush.msra.mxu2 %v182_v56  ;;  %485 = vmatpush.msra.mxu3 %v199_v57 }
  0x5e   :  { %427 = vmatpush.msra.mxu0 %v149_v58  ;;  %446 = vmatpush.msra.mxu1 %v166_v59 }
  0x5f   :  { %467 = vmatpush.msra.mxu2 %v181_v60  ;;  %486 = vmatpush.msra.mxu3 %v198_v61 }
  0x60   :  { %428 = vmatpush.msra.mxu0 %v148_v62  ;;  %447 = vmatpush.msra.mxu1 %v165_v63 }
  0x61   :  { %468 = vmatpush.msra.mxu2 %v180_v0  ;;  %487 = vmatpush.msra.mxu3 %v197_v1 }
  0x62   :  { %429 = vmatpush.msra.mxu0 %v147_v2  ;;  %448 = vmatpush.msra.mxu1 %v164_v3 }
  0x63   :  { %469 = vmatpush.msra.mxu2 %v179_v4  ;;  %488 = vmatpush.msra.mxu3 %v196_v5 }
  0x64   :  { %430 = vmatpush.msra.mxu0 %v146_v6  ;;  %449 = vmatpush.msra.mxu1 %v163_v7 }
  0x65   :  { %470 = vmatpush.msra.mxu2 %v178_v8  ;;  %489 = vmatpush.msra.mxu3 %v195_v9 }
  0x66   :  { %431 = vmatmul.f32.vlgmr.msra.gmra.mxu0 %v235_v10  ;;  %471 = vmatmul.f32.vlgmr.msra.gmra.mxu2 %v237_v11 }
  0x67   :  { %450 = vmatpush.msra.mxu1 %v162_v12  ;;  %490 = vmatpush.msra.mxu3 %v194_v13 }
  0x68   :  { %451 = vmatmul.f32.vlgmr.msra.gmra.mxu1 %v236_v14  ;;  %491 = vmatmul.f32.vlgmr.msra.gmra.mxu3 %v238_v15 }
  0x69   :  { %507 = vmatpush.msrb.mxu0 %v213_v16 }
  0x6b   :  { %508 = vmatpush.msrb.mxu0 %v212_v17 }
  0x6d   :  { %509 = vmatpush.msrb.mxu0 %v211_v18 }
  0x6f   :  { %510 = vmatpush.msrb.mxu0 %v210_v19 }
  0x70   :  { %521 = vmatmul.msk.f32.vlgmr.msrb.gmra.mxu0 %vm252_vm0, %v239_v20 }
  0xbf   :  { %v272_v22 = vpop.f32.mrf.mxu0 }
  0xc0   :  { %v273_v23 = vadd.f32 %v522_v21, %v272_v22 }
  0xc2   :  { %v292_v24 = vpop.f32.mrf.mxu1 }
  0xc3   :  { %v293_v25 = vadd.f32 %v292_v24, %v273_v23 }
  0xc5   :  { %v312_v26 = vpop.f32.mrf.mxu2 }
  0xc6   :  { %v313_v27 = vadd.f32 %v312_v26, %v293_v25 }
  0xc8   :  { %v332_v28 = vpop.f32.mrf.mxu3 }
  0xc9   :  { %v333_v29 = vadd.f32 %v332_v28, %v313_v27 }
  0xcb   :  { %v352_v30 = vpop.f32.mrf.mxu0 }
  0xcc   :  { %v353_v31 = vadd.f32 %v352_v30, %v333_v29 }
  0xce   :  { %v372_v32 = vpop.f32.mrf.mxu1 }
  0xcf   :  { %v373_v33 = vadd.f32 %v372_v32, %v353_v31  ;;  %v392_v34 = vpop.f32.mrf.mxu2 }
  0xd1   :  { %v393_v35 = vadd.f32 %v392_v34, %v373_v33 }
  0xd2   :  { %v412_v36 = vpop.f32.mrf.mxu3 }
  0xd3   :  { %v413_v37 = vadd.f32 %v412_v36, %v393_v35 }
  0xe3   :  { %v432_v38 = vpop.f32.mrf.mxu0 }
  0xe4   :  { %v433_v39 = vadd.f32 %v432_v38, %v413_v37 }
  0xe5   :  { %v452_v40 = vpop.f32.mrf.mxu1 }
  0xe6   :  { %v453_v41 = vadd.f32 %v452_v40, %v433_v39 }
  0xe9   :  { %v472_v42 = vpop.f32.mrf.mxu2 }
  0xea   :  { %v473_v43 = vadd.f32 %v472_v42, %v453_v41 }
  0xeb   :  { %v492_v44 = vpop.f32.mrf.mxu3 }
  0xec   :  { %v493_v45 = vadd.f32 %v492_v44, %v473_v43 }
  0xed   :  { %v512_v46 = vpop.f32.mrf.mxu0 }
  0xee   :  { %v513_v47 = vadd.f32 %v512_v46, %v493_v45 }
  0xf0   :  { %516 = vst.msk [vmem:[%s1170_s3] sm:$0x3] %vm515_vm1, %v513_v47 }

// kernel: autoencoder_forward.9
= control target key start
LH: loop header
LB: loop body
LE: loop exit
PB: predicated region body
PF: predicated region fallthrough
CT: control target
= control target key end

     0   :  { %vm149_vm0 = vcmask 523264   ;;  %vm449_vm1 = vcmask 1045508   ;;  %vm447_vm2 = vcmask 1041408   ;;  %vm451_vm3 = vcmask 1043456   ;;  %s874_s1 = inlined_call_operand.vmem [shape: f32[64,1568], index: 1, kind: input, shape index: {}]   ;;  %s875_s0 = inlined_call_operand.vmem [shape: f32[2,64], index: 0, kind: input, shape index: {}]   ;;  %s876_s2 = inlined_call_operand.vmem [shape: f32[1,1568], index: 2, kind: input, shape index: {}]   ;;  %s877_s3 = inlined_call_operand.vmem [shape: f32[2,1568], index: 3, kind: output, shape index: {}]  }
   0x1   :  { %v106_v0 = vld [vmem:[%s874_s1 + $0x2d8] sm:$0xff]  ;;  %v108_v1 = vld [vmem:[%s874_s1 + $0x2e8] sm:$0xff]  ;;  %v109_v2 = vld [vmem:[%s874_s1 + $0x2f0] sm:$0xff]  ;;  %vm465_vm4 = vcmask 254976  }
   0x2   :  { %161 = vmatpush.msra.mxu0 %v106_v0  ;;  %201 = vmatpush.msra.mxu2 %v108_v1  ;;  %v93_v3 = vld [vmem:[%s874_s1 + $0x270] sm:$0xff]  ;;  %v95_v4 = vld [vmem:[%s874_s1 + $0x280] sm:$0xff]  ;;  %v96_v5 = vld [vmem:[%s874_s1 + $0x288] sm:$0xff] }
   0x3   :  { %221 = vmatpush.msra.mxu3 %v109_v2  ;;  %v80_v6 = vld [vmem:[%s874_s1 + $0x208] sm:$0xff]  ;;  %v82_v7 = vld [vmem:[%s874_s1 + $0x218] sm:$0xff]  ;;  %v83_v8 = vld [vmem:[%s874_s1 + $0x220] sm:$0xff] }
   0x4   :  { %162 = vmatpush.msra.mxu0 %v93_v3  ;;  %202 = vmatpush.msra.mxu2 %v95_v4  ;;  %v107_v9 = vld [vmem:[%s874_s1 + $0x2e0] sm:$0xff]  ;;  %v69_v11 = vld [vmem:[%s874_s1 + $0x1b0] sm:$0xff]  ;;  %v94_v12 = vld [vmem:[%s874_s1 + $0x278] sm:$0xff] }
   0x5   :  { %222 = vmatpush.msra.mxu3 %v96_v5  ;;  %181 = vmatpush.msra.mxu1 %v107_v9  ;;  %v67_v10 = vld [vmem:[%s874_s1 + $0x1a0] sm:$0xff]  ;;  %v70_v13 = vld [vmem:[%s874_s1 + $0x1b8] sm:$0xff]  ;;  %v81_v14 = vld [vmem:[%s874_s1 + $0x210] sm:$0xff] }
   0x6   :  { %163 = vmatpush.msra.mxu0 %v80_v6  ;;  %203 = vmatpush.msra.mxu2 %v82_v7  ;;  %v54_v15 = vld [vmem:[%s874_s1 + $0x138] sm:$0xff]  ;;  %v56_v16 = vld [vmem:[%s874_s1 + $0x148] sm:$0xff]  ;;  %v57_v17 = vld [vmem:[%s874_s1 + $0x150] sm:$0xff] }
   0x7   :  { %223 = vmatpush.msra.mxu3 %v83_v8  ;;  %182 = vmatpush.msra.mxu1 %v94_v12  ;;  %v68_v18 = vld [vmem:[%s874_s1 + $0x1a8] sm:$0xff]  ;;  %v41_v19 = vld [vmem:[%s874_s1 + $0xd0] sm:$0xff]  ;;  %v43_v20 = vld [vmem:[%s874_s1 + $0xe0] sm:$0xff] }
   0x8   :  { %164 = vmatpush.msra.mxu0 %v67_v10  ;;  %204 = vmatpush.msra.mxu2 %v69_v11  ;;  %v44_v21 = vld [vmem:[%s874_s1 + $0xe8] sm:$0xff]  ;;  %v55_v22 = vld [vmem:[%s874_s1 + $0x140] sm:$0xff]  ;;  %v30_v24 = vld [vmem:[%s874_s1 + $0x78] sm:$0xff] }
   0x9   :  { %224 = vmatpush.msra.mxu3 %v70_v13  ;;  %183 = vmatpush.msra.mxu1 %v81_v14  ;;  %v28_v23 = vld [vmem:[%s874_s1 + $0x68] sm:$0xff]  ;;  %v31_v25 = vld [vmem:[%s874_s1 + $0x80] sm:$0xff]  ;;  %v42_v26 = vld [vmem:[%s874_s1 + $0xd8] sm:$0xff] }
   0xa   :  { %165 = vmatpush.msra.mxu0 %v54_v15  ;;  %205 = vmatpush.msra.mxu2 %v56_v16  ;;  %v15_v27 = vld [vmem:[%s874_s1] sm:$0xff]  ;;  %v17_v28 = vld [vmem:[%s874_s1 + $0x10] sm:$0xff]  ;;  %v18_v29 = vld [vmem:[%s874_s1 + $0x18] sm:$0xff] }
   0xb   :  { %225 = vmatpush.msra.mxu3 %v57_v17  ;;  %184 = vmatpush.msra.mxu1 %v68_v18  ;;  %v110_v30 = vld [vmem:[%s874_s1 + $0x2f8] sm:$0xff]  ;;  %v112_v31 = vld [vmem:[%s874_s1 + $0x308] sm:$0xff]  ;;  %v113_v32 = vld [vmem:[%s874_s1 + $0x310] sm:$0xff] }
   0xc   :  { %166 = vmatpush.msra.mxu0 %v41_v19  ;;  %206 = vmatpush.msra.mxu2 %v43_v20  ;;  %v29_v33 = vld [vmem:[%s874_s1 + $0x70] sm:$0xff]  ;;  %v99_v35 = vld [vmem:[%s874_s1 + $0x2a0] sm:$0xff]  ;;  %v100_v36 = vld [vmem:[%s874_s1 + $0x2a8] sm:$0xff] }
   0xd   :  { %226 = vmatpush.msra.mxu3 %v44_v21  ;;  %185 = vmatpush.msra.mxu1 %v55_v22  ;;  %v97_v34 = vld [vmem:[%s874_s1 + $0x290] sm:$0xff]  ;;  %v16_v37 = vld [vmem:[%s874_s1 + $0x8] sm:$0xff]  ;;  %v86_v39 = vld [vmem:[%s874_s1 + $0x238] sm:$0xff] }
   0xe   :  { %167 = vmatpush.msra.mxu0 %v28_v23  ;;  %207 = vmatpush.msra.mxu2 %v30_v24  ;;  %v84_v38 = vld [vmem:[%s874_s1 + $0x228] sm:$0xff]  ;;  %v87_v40 = vld [vmem:[%s874_s1 + $0x240] sm:$0xff]  ;;  %v73_v43 = vld [vmem:[%s874_s1 + $0x1d0] sm:$0xff] }
   0xf   :  { %227 = vmatpush.msra.mxu3 %v31_v25  ;;  %186 = vmatpush.msra.mxu1 %v42_v26  ;;  %v111_v41 = vld [vmem:[%s874_s1 + $0x300] sm:$0xff]  ;;  %v74_v44 = vld [vmem:[%s874_s1 + $0x1d8] sm:$0xff]  ;;  %v60_v48 = vld [vmem:[%s874_s1 + $0x168] sm:$0xff] }
  0x10   :  { %168 = vmatpush.msra.mxu0 %v15_v27  ;;  %208 = vmatpush.msra.mxu2 %v17_v28  ;;  %v71_v42 = vld [vmem:[%s874_s1 + $0x1c0] sm:$0xff]  ;;  %v98_v46 = vld [vmem:[%s874_s1 + $0x298] sm:$0xff]  ;;  %v61_v49 = vld [vmem:[%s874_s1 + $0x170] sm:$0xff] }
  0x11   :  { %228 = vmatpush.msra.mxu3 %v18_v29  ;;  %187 = vmatpush.msra.mxu1 %v29_v33  ;;  %v642_v45 = vld [vmem:[%s875_s0] sm:$0x3]  ;;  %v58_v47 = vld [vmem:[%s874_s1 + $0x158] sm:$0xff]  ;;  %v85_v50 = vld [vmem:[%s874_s1 + $0x230] sm:$0xff] }
  0x12   :  { %241 = vmatpush.msrb.mxu0 %v110_v30  ;;  %281 = vmatpush.msrb.mxu2 %v112_v31  ;;  %v45_v51 = vld [vmem:[%s874_s1 + $0xf0] sm:$0xff]  ;;  %v47_v52 = vld [vmem:[%s874_s1 + $0x100] sm:$0xff]  ;;  %v48_v53 = vld [vmem:[%s874_s1 + $0x108] sm:$0xff] }
  0x13   :  { %301 = vmatpush.msrb.mxu3 %v113_v32  ;;  %188 = vmatpush.msra.mxu1 %v16_v37  ;;  %v72_v54 = vld [vmem:[%s874_s1 + $0x1c8] sm:$0xff]  ;;  %v34_v56 = vld [vmem:[%s874_s1 + $0x98] sm:$0xff]  ;;  %v35_v57 = vld [vmem:[%s874_s1 + $0xa0] sm:$0xff] }
  0x14   :  { %242 = vmatpush.msrb.mxu0 %v97_v34  ;;  %282 = vmatpush.msrb.mxu2 %v99_v35  ;;  %v32_v55 = vld [vmem:[%s874_s1 + $0x88] sm:$0xff]  ;;  %v19_v58 = vld [vmem:[%s874_s1 + $0x20] sm:$0xff]  ;;  %v21_v60 = vld [vmem:[%s874_s1 + $0x30] sm:$0xff] }
  0x15   :  { %302 = vmatpush.msrb.mxu3 %v100_v36  ;;  %261 = vmatpush.msrb.mxu1 %v111_v41  ;;  %v59_v59 = vld [vmem:[%s874_s1 + $0x160] sm:$0xff]  ;;  %v22_v61 = vld [vmem:[%s874_s1 + $0x38] sm:$0xff]  ;;  %v116_v0 = vld [vmem:[%s874_s1 + $0x328] sm:$0xff] }
  0x16   :  { %243 = vmatpush.msrb.mxu0 %v84_v38  ;;  %283 = vmatpush.msrb.mxu2 %v86_v39  ;;  %v46_v62 = vld [vmem:[%s874_s1 + $0xf8] sm:$0xff]  ;;  %v117_v1 = vld [vmem:[%s874_s1 + $0x330] sm:$0xff]  ;;  %v103_v4 = vld [vmem:[%s874_s1 + $0x2c0] sm:$0xff] }
  0x17   :  { %303 = vmatpush.msrb.mxu3 %v87_v40  ;;  %473 = vmatmul.msk.f32.vlgmr.msra.gmra.mxu2 %vm149_vm0, %v642_v45  ;;  %v114_v63 = vld [vmem:[%s874_s1 + $0x318] sm:$0xff]  ;;  %v33_v2 = vld [vmem:[%s874_s1 + $0x90] sm:$0xff]  ;;  %v104_v5 = vld [vmem:[%s874_s1 + $0x2c8] sm:$0xff] }
  0x18   :  { %244 = vmatpush.msrb.mxu0 %v71_v42  ;;  %284 = vmatpush.msrb.mxu2 %v73_v43  ;;  %v101_v3 = vld [vmem:[%s874_s1 + $0x2b0] sm:$0xff]  ;;  %v20_v6 = vld [vmem:[%s874_s1 + $0x28] sm:$0xff]  ;;  %v90_v8 = vld [vmem:[%s874_s1 + $0x258] sm:$0xff] }
  0x19   :  { %304 = vmatpush.msrb.mxu3 %v74_v44  ;;  %262 = vmatpush.msrb.mxu1 %v98_v46  ;;  %v88_v7 = vld [vmem:[%s874_s1 + $0x248] sm:$0xff]  ;;  %v91_v9 = vld [vmem:[%s874_s1 + $0x260] sm:$0xff]  ;;  %v77_v12 = vld [vmem:[%s874_s1 + $0x1f0] sm:$0xff] }
  0x1a   :  { %474 = vmatmul.msk.f32.vlgmr.msra.gmra.mxu3 %vm149_vm0, %v642_v45  ;;  %245 = vmatpush.msrb.mxu0 %v58_v47  ;;  %v115_v10 = vld [vmem:[%s874_s1 + $0x320] sm:$0xff]  ;;  %v78_v13 = vld [vmem:[%s874_s1 + $0x1f8] sm:$0xff]  ;;  %v64_v16 = vld [vmem:[%s874_s1 + $0x188] sm:$0xff] }
  0x1b   :  { %285 = vmatpush.msrb.mxu2 %v60_v48  ;;  %305 = vmatpush.msrb.mxu3 %v61_v49  ;;  %v75_v11 = vld [vmem:[%s874_s1 + $0x1e0] sm:$0xff]  ;;  %v102_v14 = vld [vmem:[%s874_s1 + $0x2b8] sm:$0xff]  ;;  %v65_v17 = vld [vmem:[%s874_s1 + $0x190] sm:$0xff] }
  0x1c   :  { %263 = vmatpush.msrb.mxu1 %v85_v50  ;;  %246 = vmatpush.msrb.mxu0 %v45_v51  ;;  %v62_v15 = vld [vmem:[%s874_s1 + $0x178] sm:$0xff]  ;;  %v89_v18 = vld [vmem:[%s874_s1 + $0x250] sm:$0xff]  ;;  %v51_v20 = vld [vmem:[%s874_s1 + $0x120] sm:$0xff] }
  0x1d   :  { %286 = vmatpush.msrb.mxu2 %v47_v52  ;;  %306 = vmatpush.msrb.mxu3 %v48_v53  ;;  %v49_v19 = vld [vmem:[%s874_s1 + $0x110] sm:$0xff]  ;;  %v52_v21 = vld [vmem:[%s874_s1 + $0x128] sm:$0xff]  ;;  %v38_v24 = vld [vmem:[%s874_s1 + $0xb8] sm:$0xff] }
  0x1e   :  { %264 = vmatpush.msrb.mxu1 %v72_v54  ;;  %247 = vmatpush.msrb.mxu0 %v32_v55  ;;  %v76_v22 = vld [vmem:[%s874_s1 + $0x1e8] sm:$0xff]  ;;  %v39_v25 = vld [vmem:[%s874_s1 + $0xc0] sm:$0xff]  ;;  %v25_v27 = vld [vmem:[%s874_s1 + $0x50] sm:$0xff] }
  0x1f   :  { %287 = vmatpush.msrb.mxu2 %v34_v56  ;;  %307 = vmatpush.msrb.mxu3 %v35_v57  ;;  %v36_v23 = vld [vmem:[%s874_s1 + $0xa8] sm:$0xff]  ;;  %v63_v26 = vld [vmem:[%s874_s1 + $0x180] sm:$0xff]  ;;  %v26_v29 = vld [vmem:[%s874_s1 + $0x58] sm:$0xff] }
  0x20   :  { %472 = vmatmul.msk.f32.vlgmr.msra.gmra.mxu1 %vm149_vm0, %v642_v45  ;;  %248 = vmatpush.msrb.mxu0 %v19_v58  ;;  %v23_v28 = vld [vmem:[%s874_s1 + $0x40] sm:$0xff]  ;;  %v50_v30 = vld [vmem:[%s874_s1 + $0x118] sm:$0xff]  ;;  %v37_v32 = vld [vmem:[%s874_s1 + $0xb0] sm:$0xff] }
  0x21   :  { %265 = vmatpush.msrb.mxu1 %v59_v59  ;;  %288 = vmatpush.msrb.mxu2 %v21_v60  ;;  %v118_v31 = vld [vmem:[%s874_s1 + $0x338] sm:$0xff]  ;;  %v105_v33 = vld [vmem:[%s874_s1 + $0x2d0] sm:$0xff]  ;;  %v24_v34 = vld [vmem:[%s874_s1 + $0x48] sm:$0xff] }
  0x22   :  { %308 = vmatpush.msrb.mxu3 %v22_v61  ;;  %471 = vmatmul.msk.f32.vlgmr.msra.gmra.mxu0 %vm149_vm0, %v642_v45  ;;  %v92_v35 = vld [vmem:[%s874_s1 + $0x268] sm:$0xff]  ;;  %v79_v36 = vld [vmem:[%s874_s1 + $0x200] sm:$0xff]  ;;  %v66_v37 = vld [vmem:[%s874_s1 + $0x198] sm:$0xff] }
  0x23   :  { %266 = vmatpush.msrb.mxu1 %v46_v62  ;;  %321 = vmatpush.msra.mxu0 %v114_v63  ;;  %v53_v38 = vld [vmem:[%s874_s1 + $0x130] sm:$0xff]  ;;  %v40_v39 = vld [vmem:[%s874_s1 + $0xc8] sm:$0xff]  ;;  %v27_v40 = vld [vmem:[%s874_s1 + $0x60] sm:$0xff] }
  0x24   :  { %361 = vmatpush.msra.mxu2 %v116_v0  ;;  %381 = vmatpush.msra.mxu3 %v117_v1  ;;  %v119_v41 = vld [vmem:[%s876_s2] sm:$0xff] }
  0x25   :  { %267 = vmatpush.msrb.mxu1 %v33_v2  ;;  %322 = vmatpush.msra.mxu0 %v101_v3  ;;  %v125_v42 = vperm.slane %v119_v41, 2  ;;  %v126_v43 = vperm.slane %v119_v41, 3  ;;  %v124_v44 = vperm.slane %v119_v41, 1  ;;  %v123_v48 = vperm.slane %v119_v41, 0 }
  0x26   :  { %362 = vmatpush.msra.mxu2 %v103_v4  ;;  %382 = vmatpush.msra.mxu3 %v104_v5  ;;  %v129_v0 = vperm.slane %v119_v41, 6  ;;  %v130_v1 = vperm.slane %v119_v41, 7  ;;  %v128_v2 = vperm.slane %v119_v41, 5 }
  0x27   :  { %268 = vmatpush.msrb.mxu1 %v20_v6  ;;  %323 = vmatpush.msra.mxu0 %v88_v7  ;;  %v127_v6 = vperm.slane %v119_v41, 4 }
  0x28   :  { %363 = vmatpush.msra.mxu2 %v90_v8  ;;  %383 = vmatpush.msra.mxu3 %v91_v9 }
  0x29   :  { %341 = vmatpush.msra.mxu1 %v115_v10  ;;  %477 = vmatmul.msk.f32.vlgmr.msrb.gmra.mxu2 %vm149_vm0, %v642_v45 }
  0x2a   :  { %478 = vmatmul.msk.f32.vlgmr.msrb.gmra.mxu3 %vm149_vm0, %v642_v45  ;;  %324 = vmatpush.msra.mxu0 %v75_v11 }
  0x2b   :  { %364 = vmatpush.msra.mxu2 %v77_v12  ;;  %384 = vmatpush.msra.mxu3 %v78_v13 }
  0x2c   :  { %342 = vmatpush.msra.mxu1 %v102_v14  ;;  %325 = vmatpush.msra.mxu0 %v62_v15 }
  0x2d   :  { %365 = vmatpush.msra.mxu2 %v64_v16  ;;  %385 = vmatpush.msra.mxu3 %v65_v17  ;;  %v120_v16 = vld [vmem:[%s876_s2 + $0x8] sm:$0x1f] }
  0x2e   :  { %343 = vmatpush.msra.mxu1 %v89_v18  ;;  %326 = vmatpush.msra.mxu0 %v49_v19 }
  0x2f   :  { %366 = vmatpush.msra.mxu2 %v51_v20  ;;  %386 = vmatpush.msra.mxu3 %v52_v21  ;;  %v132_v21 = vperm.slane %v120_v16, 1 }
  0x30   :  { %344 = vmatpush.msra.mxu1 %v76_v22  ;;  %327 = vmatpush.msra.mxu0 %v36_v23  ;;  %v133_v23 = vperm.slane %v120_v16, 2 }
  0x31   :  { %476 = vmatmul.msk.f32.vlgmr.msrb.gmra.mxu1 %vm149_vm0, %v642_v45  ;;  %367 = vmatpush.msra.mxu2 %v38_v24  ;;  %v131_v24 = vperm.slane %v120_v16, 0 }
  0x32   :  { %387 = vmatpush.msra.mxu3 %v39_v25  ;;  %345 = vmatpush.msra.mxu1 %v63_v26  ;;  %v134_v26 = vperm.slane %v120_v16, 3 }
  0x33   :  { %475 = vmatmul.msk.f32.vlgmr.msrb.gmra.mxu0 %vm149_vm0, %v642_v45  ;;  %368 = vmatpush.msra.mxu2 %v25_v27 }
  0x34   :  { %328 = vmatpush.msra.mxu0 %v23_v28  ;;  %388 = vmatpush.msra.mxu3 %v26_v29 }
  0x35   :  { %346 = vmatpush.msra.mxu1 %v50_v30  ;;  %481 = vmatmul.msk.f32.vlgmr.msra.gmra.mxu2 %vm149_vm0, %v642_v45 }
  0x36   :  { %482 = vmatmul.msk.f32.vlgmr.msra.gmra.mxu3 %vm149_vm0, %v642_v45  ;;  %401 = vmatpush.msrb.mxu0 %v118_v31 }
  0x37   :  { %347 = vmatpush.msra.mxu1 %v37_v32 }
  0x38   :  { %402 = vmatpush.msrb.mxu0 %v105_v33 }
  0x39   :  { %348 = vmatpush.msra.mxu1 %v24_v34 }
  0x3a   :  { %403 = vmatpush.msrb.mxu0 %v92_v35  ;;  %480 = vmatmul.msk.f32.vlgmr.msra.gmra.mxu1 %vm149_vm0, %v642_v45 }
  0x3b   :  { %479 = vmatmul.msk.f32.vlgmr.msra.gmra.mxu0 %vm149_vm0, %v642_v45 }
  0x3c   :  { %404 = vmatpush.msrb.mxu0 %v79_v36 }
  0x3e   :  { %405 = vmatpush.msrb.mxu0 %v66_v37 }
  0x40   :  { %406 = vmatpush.msrb.mxu0 %v53_v38 }
  0x42   :  { %407 = vmatpush.msrb.mxu0 %v40_v39 }
  0x44   :  { %408 = vmatpush.msrb.mxu0 %v27_v40 }
  0x45   :  { %483 = vmatmul.msk.f32.vlgmr.msrb.gmra.mxu0 %vm149_vm0, %v642_v45 }
  0x9a   :  { %v210_v46 = vpop.f32.mrf.mxu2 }
  0x9b   :  { %v211_v50 = vadd.f32 %v210_v46, %v125_v42 }
  0x9d   :  { %v230_v47 = vpop.f32.mrf.mxu3  ;;  %v190_v49 = vpop.f32.mrf.mxu1  ;;  %v415_v53 = vmax.f32 %v211_v50, 0.0 }
  0x9e   :  { %v231_v51 = vadd.f32 %v230_v47, %v126_v43  ;;  %v191_v52 = vadd.f32 %v190_v49, %v124_v44  ;;  %v135_v43 = vperm.slane %v120_v16, 4 }
  0x9f   :  { %v170_v55 = vpop.f32.mrf.mxu0  ;;  %v439_v57 = vrot.slane %v415_v53, 4 }
  0xa0   :  { %v416_v54 = vmax.f32 %v231_v51, 0.0  ;;  %v414_v56 = vmax.f32 %v191_v52, 0.0  ;;  %v171_v45 = vadd.f32 %v170_v55, %v123_v48 }
  0xa2   :  { %v440_v58 = vrot.slane %v416_v54, 2  ;;  %v438_v59 = vrot.slane %v414_v56, 6  ;;  %v413_v60 = vmax.f32 %v171_v45, 0.0 }
  0xa4   :  { %v450_v61 = vsel %vm449_vm1, %v439_v57, %v440_v58  ;;  %v448_v62 = vsel %vm447_vm2, %v413_v60, %v438_v59 }
  0xa5   :  { %v452_v63 = vsel %vm451_vm3, %v448_v62, %v450_v61 }
  0xa6   :  { %462 = vst [vmem:[%s877_s3] sm:$0xff] %v452_v63 }
  0xac   :  { %v290_v3 = vpop.f32.mrf.mxu2 }
  0xad   :  { %v291_v4 = vadd.f32 %v290_v3, %v129_v0  ;;  %v310_v5 = vpop.f32.mrf.mxu3 }
  0xae   :  { %v270_v7 = vpop.f32.mrf.mxu1  ;;  %v311_v8 = vadd.f32 %v310_v5, %v130_v1 }
  0xaf   :  { %v271_v9 = vadd.f32 %v270_v7, %v128_v2  ;;  %v419_v10 = vmax.f32 %v291_v4, 0.0 }
  0xb0   :  { %v420_v11 = vmax.f32 %v311_v8, 0.0  ;;  %v250_v12 = vpop.f32.mrf.mxu0 }
  0xb1   :  { %v418_v13 = vmax.f32 %v271_v9, 0.0  ;;  %v442_v14 = vrot.slane %v419_v10, 4  ;;  %v251_v15 = vadd.f32 %v250_v12, %v127_v6 }
  0xb2   :  { %v443_v17 = vrot.slane %v420_v11, 2 }
  0xb3   :  { %v441_v18 = vrot.slane %v418_v13, 6  ;;  %v417_v19 = vmax.f32 %v251_v15, 0.0 }
  0xb4   :  { %v454_v20 = vsel %vm449_vm1, %v442_v14, %v443_v17 }
  0xb5   :  { %v453_v22 = vsel %vm447_vm2, %v417_v19, %v441_v18 }
  0xb6   :  { %v455_v25 = vsel %vm451_vm3, %v453_v22, %v454_v20 }
  0xb7   :  { %463 = vst [vmem:[%s877_s3 + $0x8] sm:$0xff] %v455_v25  ;;  %v350_v27 = vpop.f32.mrf.mxu1 }
  0xb8   :  { %v351_v28 = vadd.f32 %v350_v27, %v132_v21  ;;  %v370_v29 = vpop.f32.mrf.mxu2  ;;  %v330_v30 = vpop.f32.mrf.mxu0 }
  0xb9   :  { %v371_v31 = vadd.f32 %v370_v29, %v133_v23  ;;  %v390_v32 = vpop.f32.mrf.mxu3  ;;  %v331_v33 = vadd.f32 %v330_v30, %v131_v24 }
  0xba   :  { %v422_v34 = vmax.f32 %v351_v28, 0.0  ;;  %v391_v35 = vadd.f32 %v390_v32, %v134_v26 }
  0xbb   :  { %v423_v36 = vmax.f32 %v371_v31, 0.0  ;;  %v421_v37 = vmax.f32 %v331_v33, 0.0 }
  0xbc   :  { %v444_v38 = vrot.slane %v422_v34, 6  ;;  %v424_v39 = vmax.f32 %v391_v35, 0.0 }
  0xbd   :  { %v445_v40 = vrot.slane %v423_v36, 4 }
  0xbe   :  { %v446_v41 = vrot.slane %v424_v39, 2  ;;  %v456_v42 = vsel %vm447_vm2, %v421_v37, %v444_v38 }
  0xc0   :  { %v457_v44 = vsel %vm449_vm1, %v445_v40, %v446_v41 }
  0xc1   :  { %v458_v46 = vsel %vm451_vm3, %v456_v42, %v457_v44 }
  0xc2   :  { %464 = vst [vmem:[%s877_s3 + $0x10] sm:$0xff] %v458_v46  ;;  %v410_v47 = vpop.f32.mrf.mxu0 }
  0xc3   :  { %v411_v48 = vadd.f32 %v410_v47, %v135_v43 }
  0xc5   :  { %v425_v49 = vmax.f32 %v411_v48, 0.0 }
  0xc7   :  { %466 = vst.msk [vmem:[%s877_s3 + $0x18] sm:$0x3] %vm465_vm4, %v425_v49 }

// kernel: autoencoder_forward.10
= control target key start
LH: loop header
LB: loop body
LE: loop exit
PB: predicated region body
PF: predicated region fallthrough
CT: control target
= control target key end

     0   :  { %vm201_vm0 = vcmask 261120   ;;  %vm890_vm1 = vcmask 130048   ;;  %s2046_s1 = inlined_call_operand.vmem [shape: f32[288,16], index: 1, kind: input, shape index: {}]   ;;  %s2047_s0 = inlined_call_operand.vmem [shape: f32[392,288], index: 0, kind: input, shape index: {}]   ;;  %s2048_s2 = inlined_call_operand.vmem [shape: f32[1,16], index: 2, kind: input, shape index: {}]   ;;  %s2049_s3 = inlined_call_operand.vmem [shape: f32[392,16], index: 3, kind: output, shape index: {}]  }
   0x1   :  { %v176_v0 = vld [vmem:[%s2046_s1 + $0x78] sm:$0xff]  ;;  %v175_v2 = vld [vmem:[%s2046_s1 + $0x70] sm:$0xff]  ;;  %v174_v5 = vld [vmem:[%s2046_s1 + $0x68] sm:$0xff] }
   0x2   :  { %v1057_v1 = vld [vmem:[%s2046_s1 + $0x118] sm:$0xff]  ;;  %349 = vmatpush.msra.mxu0 %v176_v0  ;;  %993 = vmatpush.msra.mxu3 %v176_v0  ;;  %v1070_v4 = vld [vmem:[%s2046_s1 + $0x110] sm:$0xff]  ;;  %v1085_v7 = vld [vmem:[%s2046_s1 + $0x108] sm:$0xff] }
   0x3   :  { %v1065_v3 = vld [vmem:[%s2046_s1 + $0xf8] sm:$0xff]  ;;  %689 = vmatpush.msra.mxu2 %v1057_v1  ;;  %v1080_v6 = vld [vmem:[%s2046_s1 + $0xf0] sm:$0xff]  ;;  %v1090_v8 = vld [vmem:[%s2046_s1 + $0xe8] sm:$0xff] }
   0x4   :  { %513 = vmatpush.msra.mxu1 %v1065_v3  ;;  %350 = vmatpush.msra.mxu0 %v175_v2  ;;  %v173_v9 = vld [vmem:[%s2046_s1 + $0x60] sm:$0xff]  ;;  %v16_v12 = vld [vmem:[%s2047_s0 + $0x10] sm:$0xff]  ;;  %v172_v13 = vld [vmem:[%s2046_s1 + $0x58] sm:$0xff] }
   0x5   :  { %994 = vmatpush.msra.mxu3 %v175_v2  ;;  %690 = vmatpush.msra.mxu2 %v1070_v4  ;;  %v1100_v10 = vld [vmem:[%s2046_s1 + $0x100] sm:$0xff]  ;;  %v1118_v14 = vld [vmem:[%s2046_s1 + $0xd8] sm:$0xff]  ;;  %v171_v15 = vld [vmem:[%s2046_s1 + $0x50] sm:$0xff] }
   0x6   :  { %514 = vmatpush.msra.mxu1 %v1080_v6  ;;  %351 = vmatpush.msra.mxu0 %v174_v5  ;;  %v1105_v11 = vld [vmem:[%s2046_s1 + $0xe0] sm:$0xff]  ;;  %v1129_v16 = vld [vmem:[%s2046_s1 + $0xd0] sm:$0xff]  ;;  %v170_v17 = vld [vmem:[%s2046_s1 + $0x48] sm:$0xff] }
   0x7   :  { %995 = vmatpush.msra.mxu3 %v174_v5  ;;  %691 = vmatpush.msra.mxu2 %v1085_v7  ;;  %v1138_v18 = vld [vmem:[%s2046_s1 + $0xc8] sm:$0xff]  ;;  %v169_v19 = vld [vmem:[%s2046_s1 + $0x40] sm:$0xff]  ;;  %v168_v22 = vld [vmem:[%s2046_s1 + $0x38] sm:$0xff] }
   0x8   :  { %515 = vmatpush.msra.mxu1 %v1090_v8  ;;  %352 = vmatpush.msra.mxu0 %v173_v9  ;;  %v1147_v20 = vld [vmem:[%s2046_s1 + $0xc0] sm:$0xff]  ;;  %v19_v21 = vld [vmem:[%s2047_s0 + $0x28] sm:$0xff]  ;;  %v1159_v23 = vld [vmem:[%s2046_s1 + $0xb8] sm:$0xff] }
   0x9   :  { %996 = vmatpush.msra.mxu3 %v173_v9  ;;  %692 = vmatpush.msra.mxu2 %v1100_v10  ;;  %v167_v24 = vld [vmem:[%s2046_s1 + $0x30] sm:$0xff]  ;;  %v166_v26 = vld [vmem:[%s2046_s1 + $0x28] sm:$0xff]  ;;  %v165_v28 = vld [vmem:[%s2046_s1 + $0x20] sm:$0xff] }
   0xa   :  { %516 = vmatpush.msra.mxu1 %v1105_v11  ;;  %944 = vmatmul.msk.f32.vlgmr.msra.gmra.mxu2 %vm201_vm0, %v16_v12  ;;  %v1169_v25 = vld [vmem:[%s2046_s1 + $0xb0] sm:$0xff]  ;;  %v1178_v27 = vld [vmem:[%s2046_s1 + $0xa8] sm:$0xff]  ;;  %v1187_v29 = vld [vmem:[%s2046_s1 + $0xa0] sm:$0xff] }
   0xb   :  { %353 = vmatpush.msra.mxu0 %v172_v13  ;;  %997 = vmatpush.msra.mxu3 %v172_v13  ;;  %v22_v30 = vld [vmem:[%s2047_s0 + $0x40] sm:$0xff]  ;;  %v164_v31 = vld [vmem:[%s2046_s1 + $0x18] sm:$0xff]  ;;  %v163_v33 = vld [vmem:[%s2046_s1 + $0x10] sm:$0xff] }
   0xc   :  { %517 = vmatpush.msra.mxu1 %v1118_v14  ;;  %v1199_v32 = vld [vmem:[%s2046_s1 + $0x98] sm:$0xff]  ;;  %v179_v34 = vld [vmem:[%s2046_s1 + $0x90] sm:$0xff]  ;;  %v162_v35 = vld [vmem:[%s2046_s1 + $0x8] sm:$0xff] }
   0xd   :  { %354 = vmatpush.msra.mxu0 %v171_v15  ;;  %998 = vmatpush.msra.mxu3 %v171_v15  ;;  %v178_v36 = vld [vmem:[%s2046_s1 + $0x88] sm:$0xff]  ;;  %v161_v37 = vld [vmem:[%s2046_s1] sm:$0xff]  ;;  %v25_v40 = vld [vmem:[%s2047_s0 + $0x58] sm:$0xff] }
   0xe   :  { %518 = vmatpush.msra.mxu1 %v1129_v16  ;;  %v14_v38 = vld [vmem:[%s2047_s0] sm:$0xff]  ;;  %v15_v42 = vld [vmem:[%s2047_s0 + $0x8] sm:$0xff]  ;;  %v17_v43 = vld [vmem:[%s2047_s0 + $0x18] sm:$0xff] }
   0xf   :  { %355 = vmatpush.msra.mxu0 %v170_v17  ;;  %999 = vmatpush.msra.mxu3 %v170_v17  ;;  %v122_v39 = vld [vmem:[%s2047_s0 + $0x360] sm:$0xff]  ;;  %v125_v44 = vld [vmem:[%s2047_s0 + $0x378] sm:$0xff]  ;;  %v28_v45 = vld [vmem:[%s2047_s0 + $0x70] sm:$0xff] }
  0x10   :  { %519 = vmatpush.msra.mxu1 %v1138_v18  ;;  %v177_v41 = vld [vmem:[%s2046_s1 + $0x80] sm:$0xff]  ;;  %v20_v47 = vld [vmem:[%s2047_s0 + $0x30] sm:$0xff]  ;;  %v31_v49 = vld [vmem:[%s2047_s0 + $0x88] sm:$0xff] }
  0x11   :  { %356 = vmatpush.msra.mxu0 %v169_v19  ;;  %1000 = vmatpush.msra.mxu3 %v169_v19  ;;  %v18_v46 = vld [vmem:[%s2047_s0 + $0x20] sm:$0xff]  ;;  %v128_v48 = vld [vmem:[%s2047_s0 + $0x390] sm:$0xff]  ;;  %v21_v50 = vld [vmem:[%s2047_s0 + $0x38] sm:$0xff] }
  0x12   :  { %520 = vmatpush.msra.mxu1 %v1147_v20  ;;  %945 = vmatmul.msk.f32.gmra.mxu2 %vm201_vm0, %v19_v21  ;;  %v23_v51 = vld [vmem:[%s2047_s0 + $0x48] sm:$0xff]  ;;  %v34_v53 = vld [vmem:[%s2047_s0 + $0xa0] sm:$0xff]  ;;  %v24_v54 = vld [vmem:[%s2047_s0 + $0x50] sm:$0xff] }
  0x13   :  { %357 = vmatpush.msra.mxu0 %v168_v22  ;;  %1001 = vmatpush.msra.mxu3 %v168_v22  ;;  %v131_v52 = vld [vmem:[%s2047_s0 + $0x3a8] sm:$0xff]  ;;  %v26_v55 = vld [vmem:[%s2047_s0 + $0x60] sm:$0xff]  ;;  %v37_v57 = vld [vmem:[%s2047_s0 + $0xb8] sm:$0xff] }
  0x14   :  { %521 = vmatpush.msra.mxu1 %v1159_v23  ;;  %v134_v56 = vld [vmem:[%s2047_s0 + $0x3c0] sm:$0xff]  ;;  %v27_v58 = vld [vmem:[%s2047_s0 + $0x68] sm:$0xff]  ;;  %v29_v59 = vld [vmem:[%s2047_s0 + $0x78] sm:$0xff] }
  0x15   :  { %358 = vmatpush.msra.mxu0 %v167_v24  ;;  %1002 = vmatpush.msra.mxu3 %v167_v24  ;;  %v137_v60 = vld [vmem:[%s2047_s0 + $0x3d8] sm:$0xff]  ;;  %v40_v61 = vld [vmem:[%s2047_s0 + $0xd0] sm:$0xff]  ;;  %v30_v62 = vld [vmem:[%s2047_s0 + $0x80] sm:$0xff] }
  0x16   :  { %522 = vmatpush.msra.mxu1 %v1169_v25  ;;  %v32_v63 = vld [vmem:[%s2047_s0 + $0x90] sm:$0xff]  ;;  %v33_v2 = vld [vmem:[%s2047_s0 + $0x98] sm:$0xff]  ;;  %v46_v5 = vld [vmem:[%s2047_s0 + $0x100] sm:$0xff] }
  0x17   :  { %359 = vmatpush.msra.mxu0 %v166_v26  ;;  %1003 = vmatpush.msra.mxu3 %v166_v26  ;;  %v140_v0 = vld [vmem:[%s2047_s0 + $0x3f0] sm:$0xff]  ;;  %v49_v9 = vld [vmem:[%s2047_s0 + $0x118] sm:$0xff]  ;;  %v55_v17 = vld [vmem:[%s2047_s0 + $0x148] sm:$0xff] }
  0x18   :  { %523 = vmatpush.msra.mxu1 %v1178_v27  ;;  %v149_v12 = vld [vmem:[%s2047_s0 + $0x438] sm:$0xff]  ;;  %v52_v13 = vld [vmem:[%s2047_s0 + $0x130] sm:$0xff]  ;;  %v47_v19 = vld [vmem:[%s2047_s0 + $0x108] sm:$0xff] }
  0x19   :  { %360 = vmatpush.msra.mxu0 %v165_v28  ;;  %1004 = vmatpush.msra.mxu3 %v165_v28  ;;  %v44_v15 = vld [vmem:[%s2047_s0 + $0xf0] sm:$0xff]  ;;  %v58_v21 = vld [vmem:[%s2047_s0 + $0x160] sm:$0xff]  ;;  %v51_v26 = vld [vmem:[%s2047_s0 + $0x128] sm:$0xff] }
  0x1a   :  { %524 = vmatpush.msra.mxu1 %v1187_v29  ;;  %946 = vmatmul.msk.f32.gmra.mxu2 %vm201_vm0, %v22_v30  ;;  %v48_v22 = vld [vmem:[%s2047_s0 + $0x110] sm:$0xff]  ;;  %v158_v24 = vld [vmem:[%s2047_s0 + $0x480] sm:$0xff]  ;;  %v123_v28 = vld [vmem:[%s2047_s0 + $0x368] sm:$0xff] }
  0x1b   :  { %361 = vmatpush.msra.mxu0 %v164_v31  ;;  %1005 = vmatpush.msra.mxu3 %v164_v31  ;;  %v54_v30 = vld [vmem:[%s2047_s0 + $0x140] sm:$0xff] }
  0x1c   :  { %525 = vmatpush.msra.mxu1 %v1199_v32 }
  0x1d   :  { %362 = vmatpush.msra.mxu0 %v163_v33  ;;  %1006 = vmatpush.msra.mxu3 %v163_v33  ;;  %v126_v33 = vld [vmem:[%s2047_s0 + $0x380] sm:$0xff] }
  0x1e   :  { %526 = vmatpush.msra.mxu1 %v179_v34 }
  0x1f   :  { %363 = vmatpush.msra.mxu0 %v162_v35  ;;  %1007 = vmatpush.msra.mxu3 %v162_v35  ;;  %v57_v35 = vld [vmem:[%s2047_s0 + $0x158] sm:$0xff] }
  0x20   :  { %527 = vmatpush.msra.mxu1 %v178_v36 }
  0x21   :  { %364 = vmatpush.msra.mxu0 %v161_v37  ;;  %1008 = vmatpush.msra.mxu3 %v161_v37  ;;  %v59_v37 = vld [vmem:[%s2047_s0 + $0x168] sm:$0xff] }
  0x22   :  { %365 = vmatmul.f32.vlgmr.msra.gmra.mxu0 %v14_v38  ;;  %473 = vmatmul.f32.vlgmr.msra.gmra.mxu3 %v122_v39  ;;  %v129_v38 = vld [vmem:[%s2047_s0 + $0x398] sm:$0xff]  ;;  %v70_v39 = vld [vmem:[%s2047_s0 + $0x1c0] sm:$0xff] }
  0x23   :  { %947 = vmatmul.msk.f32.gmra.mxu2 %vm201_vm0, %v25_v40  ;;  %1009 = vmatpush.msrb.mxu3 %v1065_v3  ;;  %v35_v3 = vld [vmem:[%s2047_s0 + $0xa8] sm:$0xff]  ;;  %v60_v40 = vld [vmem:[%s2047_s0 + $0x170] sm:$0xff] }
  0x24   :  { %528 = vmatpush.msra.mxu1 %v177_v41 }
  0x25   :  { %529 = vmatmul.f32.vlgmr.msra.gmra.mxu1 %v15_v42  ;;  %1010 = vmatpush.msrb.mxu3 %v1080_v6  ;;  %v36_v6 = vld [vmem:[%s2047_s0 + $0xb0] sm:$0xff] }
  0x27   :  { %1011 = vmatpush.msrb.mxu3 %v1090_v8  ;;  %v146_v8 = vld [vmem:[%s2047_s0 + $0x420] sm:$0xff] }
  0x29   :  { %1012 = vmatpush.msrb.mxu3 %v1105_v11  ;;  %v41_v11 = vld [vmem:[%s2047_s0 + $0xd8] sm:$0xff] }
  0x2a   :  { %368 = vmatmul.f32.gmra.mxu0 %v17_v43  ;;  %476 = vmatmul.f32.gmra.mxu3 %v125_v44  ;;  %v62_v44 = vld [vmem:[%s2047_s0 + $0x180] sm:$0xff] }
  0x2b   :  { %948 = vmatmul.msk.f32.gmra.mxu2 %vm201_vm0, %v28_v45  ;;  %1013 = vmatpush.msrb.mxu3 %v1118_v14  ;;  %v42_v14 = vld [vmem:[%s2047_s0 + $0xe0] sm:$0xff] }
  0x2d   :  { %532 = vmatmul.f32.gmra.mxu1 %v18_v46  ;;  %1014 = vmatpush.msrb.mxu3 %v1129_v16  ;;  %v152_v16 = vld [vmem:[%s2047_s0 + $0x450] sm:$0xff] }
  0x2e   :  { %v132_v46 = vld [vmem:[%s2047_s0 + $0x3b0] sm:$0xff] }
  0x2f   :  { %1015 = vmatpush.msrb.mxu3 %v1138_v18  ;;  %v45_v18 = vld [vmem:[%s2047_s0 + $0xf8] sm:$0xff] }
  0x31   :  { %1016 = vmatpush.msrb.mxu3 %v1147_v20  ;;  %v155_v20 = vld [vmem:[%s2047_s0 + $0x468] sm:$0xff] }
  0x32   :  { %371 = vmatmul.f32.gmra.mxu0 %v20_v47  ;;  %479 = vmatmul.f32.gmra.mxu3 %v128_v48  ;;  %v73_v47 = vld [vmem:[%s2047_s0 + $0x1d8] sm:$0xff] }
  0x33   :  { %949 = vmatmul.msk.f32.gmra.mxu2 %vm201_vm0, %v31_v49  ;;  %1017 = vmatpush.msrb.mxu3 %v1159_v23  ;;  %v50_v23 = vld [vmem:[%s2047_s0 + $0x120] sm:$0xff]  ;;  %v63_v49 = vld [vmem:[%s2047_s0 + $0x188] sm:$0xff] }
  0x35   :  { %535 = vmatmul.f32.gmra.mxu1 %v21_v50  ;;  %1018 = vmatpush.msrb.mxu3 %v1169_v25  ;;  %v61_v25 = vld [vmem:[%s2047_s0 + $0x178] sm:$0xff] }
  0x37   :  { %1019 = vmatpush.msrb.mxu3 %v1178_v27  ;;  %v53_v27 = vld [vmem:[%s2047_s0 + $0x138] sm:$0xff] }
  0x39   :  { %1020 = vmatpush.msrb.mxu3 %v1187_v29  ;;  %v64_v29 = vld [vmem:[%s2047_s0 + $0x190] sm:$0xff] }
  0x3a   :  { %374 = vmatmul.f32.gmra.mxu0 %v23_v51  ;;  %482 = vmatmul.f32.gmra.mxu3 %v131_v52 }
  0x3b   :  { %950 = vmatmul.msk.f32.gmra.mxu2 %vm201_vm0, %v34_v53  ;;  %1021 = vmatpush.msrb.mxu3 %v1199_v32  ;;  %v56_v32 = vld [vmem:[%s2047_s0 + $0x150] sm:$0xff] }
  0x3d   :  { %538 = vmatmul.f32.gmra.mxu1 %v24_v54  ;;  %1022 = vmatpush.msrb.mxu3 %v179_v34  ;;  %v67_v34 = vld [vmem:[%s2047_s0 + $0x1a8] sm:$0xff] }
  0x3f   :  { %1023 = vmatpush.msrb.mxu3 %v178_v36 }
  0x41   :  { %1024 = vmatpush.msrb.mxu3 %v177_v41  ;;  %v1450_v41 = vld [vmem:[%s2048_s2] ss:$0 sm:$0xff] }
  0x42   :  { %377 = vmatmul.f32.gmra.mxu0 %v26_v55  ;;  %485 = vmatmul.f32.gmra.mxu3 %v134_v56  ;;  %v65_v56 = vld [vmem:[%s2047_s0 + $0x198] sm:$0xff] }
  0x43   :  { %951 = vmatmul.msk.f32.gmra.mxu2 %vm201_vm0, %v37_v57  ;;  %1025 = vmatpush.msra.mxu3 %v1057_v1  ;;  %v43_v1 = vld [vmem:[%s2047_s0 + $0xe8] sm:$0xff] }
  0x45   :  { %541 = vmatmul.f32.gmra.mxu1 %v27_v58  ;;  %1026 = vmatpush.msra.mxu3 %v1070_v4  ;;  %v143_v4 = vld [vmem:[%s2047_s0 + $0x408] sm:$0xff] }
  0x46   :  { %v135_v58 = vld [vmem:[%s2047_s0 + $0x3c8] sm:$0xff] }
  0x47   :  { %1027 = vmatpush.msra.mxu3 %v1085_v7  ;;  %v38_v7 = vld [vmem:[%s2047_s0 + $0xc0] sm:$0xff] }
  0x49   :  { %1028 = vmatpush.msra.mxu3 %v1100_v10  ;;  %v39_v10 = vld [vmem:[%s2047_s0 + $0xc8] sm:$0xff] }
  0x4a   :  { %380 = vmatmul.f32.gmra.mxu0 %v29_v59  ;;  %488 = vmatmul.f32.gmra.mxu3 %v137_v60  ;;  %v76_v59 = vld [vmem:[%s2047_s0 + $0x1f0] sm:$0xff] }
  0x4b   :  { %952 = vmatmul.msk.f32.gmra.mxu2 %vm201_vm0, %v40_v61  ;;  %v66_v61 = vld [vmem:[%s2047_s0 + $0x1a0] sm:$0xff] }
  0x4d   :  { %544 = vmatmul.f32.gmra.mxu1 %v30_v62 }
  0x52   :  { %383 = vmatmul.f32.gmra.mxu0 %v32_v63  ;;  %491 = vmatmul.f32.gmra.mxu3 %v140_v0 }
  0x53   :  { %953 = vmatmul.msk.f32.gmra.mxu2 %vm201_vm0, %v43_v1 }
  0x55   :  { %547 = vmatmul.f32.gmra.mxu1 %v33_v2 }
  0x5a   :  { %386 = vmatmul.f32.gmra.mxu0 %v35_v3  ;;  %494 = vmatmul.f32.gmra.mxu3 %v143_v4  ;;  %v68_v4 = vld [vmem:[%s2047_s0 + $0x1b0] sm:$0xff] }
  0x5b   :  { %954 = vmatmul.msk.f32.gmra.mxu2 %vm201_vm0, %v46_v5 }
  0x5d   :  { %550 = vmatmul.f32.gmra.mxu1 %v36_v6  ;;  %v138_v6 = vld [vmem:[%s2047_s0 + $0x3e0] sm:$0xff] }
  0x62   :  { %389 = vmatmul.f32.gmra.mxu0 %v38_v7  ;;  %497 = vmatmul.f32.gmra.mxu3 %v146_v8  ;;  %v79_v7 = vld [vmem:[%s2047_s0 + $0x208] sm:$0xff] }
  0x63   :  { %955 = vmatmul.msk.f32.gmra.mxu2 %vm201_vm0, %v49_v9  ;;  %v69_v9 = vld [vmem:[%s2047_s0 + $0x1b8] sm:$0xff] }
  0x65   :  { %553 = vmatmul.f32.gmra.mxu1 %v39_v10 }
  0x6a   :  { %392 = vmatmul.f32.gmra.mxu0 %v41_v11  ;;  %500 = vmatmul.f32.gmra.mxu3 %v149_v12 }
  0x6b   :  { %956 = vmatmul.msk.f32.gmra.mxu2 %vm201_vm0, %v52_v13 }
  0x6d   :  { %556 = vmatmul.f32.gmra.mxu1 %v42_v14 }
  0x72   :  { %395 = vmatmul.f32.gmra.mxu0 %v44_v15  ;;  %503 = vmatmul.f32.gmra.mxu3 %v152_v16  ;;  %v71_v16 = vld [vmem:[%s2047_s0 + $0x1c8] sm:$0xff] }
  0x73   :  { %957 = vmatmul.msk.f32.gmra.mxu2 %vm201_vm0, %v55_v17 }
  0x75   :  { %559 = vmatmul.f32.gmra.mxu1 %v45_v18  ;;  %v141_v18 = vld [vmem:[%s2047_s0 + $0x3f8] sm:$0xff] }
  0x7a   :  { %398 = vmatmul.f32.gmra.mxu0 %v47_v19  ;;  %506 = vmatmul.f32.gmra.mxu3 %v155_v20  ;;  %v82_v19 = vld [vmem:[%s2047_s0 + $0x220] sm:$0xff] }
  0x7b   :  { %958 = vmatmul.msk.f32.gmra.mxu2 %vm201_vm0, %v58_v21  ;;  %v72_v21 = vld [vmem:[%s2047_s0 + $0x1d0] sm:$0xff] }
  0x7d   :  { %562 = vmatmul.f32.gmra.mxu1 %v48_v22 }
  0x82   :  { %401 = vmatmul.f32.gmra.mxu0 %v50_v23  ;;  %509 = vmatmul.f32.gmra.mxu3 %v158_v24 }
  0x83   :  { %959 = vmatmul.msk.f32.gmra.mxu2 %vm201_vm0, %v61_v25 }
  0x85   :  { %565 = vmatmul.f32.gmra.mxu1 %v51_v26 }
  0x8a   :  { %404 = vmatmul.f32.gmra.mxu0 %v53_v27  ;;  %637 = vmatmul.f32.vlgmr.msrb.gmra.mxu3 %v123_v28  ;;  %v74_v28 = vld [vmem:[%s2047_s0 + $0x1e0] sm:$0xff] }
  0x8b   :  { %960 = vmatmul.msk.f32.gmra.mxu2 %vm201_vm0, %v64_v29 }
  0x8d   :  { %568 = vmatmul.f32.gmra.mxu1 %v54_v30  ;;  %v694_v31 = vpop.f32.mrf.mxu2  ;;  %v144_v30 = vld [vmem:[%s2047_s0 + $0x410] sm:$0xff] }
  0x92   :  { %407 = vmatmul.f32.gmra.mxu0 %v56_v32  ;;  %640 = vmatmul.f32.gmra.mxu3 %v126_v33  ;;  %v75_v33 = vld [vmem:[%s2047_s0 + $0x1e8] sm:$0xff] }
  0x93   :  { %961 = vmatmul.msk.f32.gmra.mxu2 %vm201_vm0, %v67_v34 }
  0x95   :  { %571 = vmatmul.f32.gmra.mxu1 %v57_v35  ;;  %v697_v36 = vpop.f32.mrf.mxu2 }
  0x9a   :  { %410 = vmatmul.f32.gmra.mxu0 %v59_v37  ;;  %643 = vmatmul.f32.gmra.mxu3 %v129_v38 }
  0x9b   :  { %962 = vmatmul.msk.f32.gmra.mxu2 %vm201_vm0, %v70_v39 }
  0x9d   :  { %574 = vmatmul.f32.gmra.mxu1 %v60_v40  ;;  %v700_v42 = vpop.f32.mrf.mxu2  ;;  %v77_v40 = vld [vmem:[%s2047_s0 + $0x1f8] sm:$0xff] }
  0x9f   :  { %v366_v43 = vpop.f32.mrf.mxu0 }
  0xa0   :  { %v367_v45 = vadd.f32 %v1450_v41, %v366_v43  ;;  %v147_v43 = vld [vmem:[%s2047_s0 + $0x428] sm:$0xff] }
  0xa2   :  { %v530_v48 = vpop.f32.mrf.mxu1  ;;  %413 = vmatmul.f32.gmra.mxu0 %v62_v44  ;;  %646 = vmatmul.f32.gmra.mxu3 %v132_v46  ;;  %v88_v44 = vld [vmem:[%s2047_s0 + $0x250] sm:$0xff]  ;;  %v78_v46 = vld [vmem:[%s2047_s0 + $0x200] sm:$0xff] }
  0xa3   :  { %v531_v50 = vadd.f32 %v530_v48, %v367_v45  ;;  %963 = vmatmul.msk.f32.gmra.mxu2 %vm201_vm0, %v73_v47 }
  0xa5   :  { %v695_v51 = vadd.f32 %v694_v31, %v531_v50  ;;  %577 = vmatmul.f32.gmra.mxu1 %v63_v49  ;;  %v1466_v52 = vpop.f32.mrf.mxu3  ;;  %v85_v31 = vld [vmem:[%s2047_s0 + $0x238] sm:$0xff] }
  0xa6   :  { %v703_v53 = vpop.f32.mrf.mxu2 }
  0xa7   :  { %v841_v54 = vmax.f32 %v695_v51, 0.0  ;;  %v369_v55 = vpop.f32.mrf.mxu0 }
  0xa8   :  { %v370_v57 = vadd.f32 %v1450_v41, %v369_v55 }
  0xa9   :  { %891 = vst.msk [vmem:[%s2049_s3] sm:$0xff] %vm890_vm1, %v841_v54  ;;  %v80_v54 = vld [vmem:[%s2047_s0 + $0x210] sm:$0xff] }
  0xaa   :  { %v533_v60 = vpop.f32.mrf.mxu1  ;;  %416 = vmatmul.f32.gmra.mxu0 %v65_v56  ;;  %649 = vmatmul.f32.gmra.mxu3 %v135_v58  ;;  %v150_v56 = vld [vmem:[%s2047_s0 + $0x440] sm:$0xff] }
  0xab   :  { %v534_v62 = vadd.f32 %v533_v60, %v370_v57  ;;  %964 = vmatmul.msk.f32.gmra.mxu2 %vm201_vm0, %v76_v59  ;;  %v91_v57 = vld [vmem:[%s2047_s0 + $0x268] sm:$0xff]  ;;  %v81_v59 = vld [vmem:[%s2047_s0 + $0x218] sm:$0xff] }
  0xad   :  { %v698_v63 = vadd.f32 %v697_v36, %v534_v62  ;;  %580 = vmatmul.f32.gmra.mxu1 %v66_v61  ;;  %v1486_v0 = vpop.f32.mrf.mxu3 }
  0xae   :  { %v706_v1 = vpop.f32.mrf.mxu2 }
  0xaf   :  { %v842_v2 = vmax.f32 %v698_v63, 0.0  ;;  %v372_v3 = vpop.f32.mrf.mxu0 }
  0xb0   :  { %v373_v5 = vadd.f32 %v1450_v41, %v372_v3  ;;  %v83_v3 = vld [vmem:[%s2047_s0 + $0x228] sm:$0xff] }
  0xb1   :  { %892 = vst.msk [vmem:[%s2049_s3 + $0x8] sm:$0xff] %vm890_vm1, %v842_v2 }
  0xb2   :  { %v536_v8 = vpop.f32.mrf.mxu1  ;;  %419 = vmatmul.f32.gmra.mxu0 %v68_v4  ;;  %652 = vmatmul.f32.gmra.mxu3 %v138_v6  ;;  %v94_v6 = vld [vmem:[%s2047_s0 + $0x280] sm:$0xff] }
  0xb3   :  { %v537_v10 = vadd.f32 %v536_v8, %v373_v5  ;;  %965 = vmatmul.msk.f32.gmra.mxu2 %vm201_vm0, %v79_v7  ;;  %v153_v5 = vld [vmem:[%s2047_s0 + $0x458] sm:$0xff]  ;;  %v84_v8 = vld [vmem:[%s2047_s0 + $0x230] sm:$0xff] }
  0xb5   :  { %v701_v11 = vadd.f32 %v700_v42, %v537_v10  ;;  %583 = vmatmul.f32.gmra.mxu1 %v69_v9  ;;  %v1506_v12 = vpop.f32.mrf.mxu3 }
  0xb6   :  { %v709_v13 = vpop.f32.mrf.mxu2 }
  0xb7   :  { %v843_v14 = vmax.f32 %v701_v11, 0.0  ;;  %v375_v15 = vpop.f32.mrf.mxu0 }
  0xb8   :  { %v376_v17 = vadd.f32 %v1450_v41, %v375_v15 }
  0xb9   :  { %893 = vst.msk [vmem:[%s2049_s3 + $0x10] sm:$0xff] %vm890_vm1, %v843_v14 }
  0xba   :  { %v539_v20 = vpop.f32.mrf.mxu1  ;;  %422 = vmatmul.f32.gmra.mxu0 %v71_v16  ;;  %655 = vmatmul.f32.gmra.mxu3 %v141_v18  ;;  %v86_v16 = vld [vmem:[%s2047_s0 + $0x240] sm:$0xff]  ;;  %v156_v18 = vld [vmem:[%s2047_s0 + $0x470] sm:$0xff] }
  0xbb   :  { %v540_v22 = vadd.f32 %v539_v20, %v376_v17  ;;  %966 = vmatmul.msk.f32.gmra.mxu2 %vm201_vm0, %v82_v19  ;;  %v97_v19 = vld [vmem:[%s2047_s0 + $0x298] sm:$0xff] }
  0xbd   :  { %v704_v23 = vadd.f32 %v703_v53, %v540_v22  ;;  %586 = vmatmul.f32.gmra.mxu1 %v72_v21  ;;  %v1526_v24 = vpop.f32.mrf.mxu3  ;;  %v87_v21 = vld [vmem:[%s2047_s0 + $0x248] sm:$0xff] }
  0xbe   :  { %v712_v25 = vpop.f32.mrf.mxu2 }
  0xbf   :  { %v844_v26 = vmax.f32 %v704_v23, 0.0  ;;  %v378_v27 = vpop.f32.mrf.mxu0 }
  0xc0   :  { %v379_v29 = vadd.f32 %v1450_v41, %v378_v27 }
  0xc1   :  { %894 = vst.msk [vmem:[%s2049_s3 + $0x18] sm:$0xff] %vm890_vm1, %v844_v26 }
  0xc2   :  { %v542_v32 = vpop.f32.mrf.mxu1  ;;  %425 = vmatmul.f32.gmra.mxu0 %v74_v28  ;;  %658 = vmatmul.f32.gmra.mxu3 %v144_v30 }
  0xc3   :  { %v543_v34 = vadd.f32 %v542_v32, %v379_v29  ;;  %967 = vmatmul.msk.f32.gmra.mxu2 %vm201_vm0, %v85_v31  ;;  %v89_v29 = vld [vmem:[%s2047_s0 + $0x258] sm:$0xff]  ;;  %v159_v31 = vld [vmem:[%s2047_s0 + $0x488] sm:$0xff]  ;;  %v100_v32 = vld [vmem:[%s2047_s0 + $0x2b0] sm:$0xff] }
  0xc5   :  { %v707_v35 = vadd.f32 %v706_v1, %v543_v34  ;;  %589 = vmatmul.f32.gmra.mxu1 %v75_v33  ;;  %v1546_v36 = vpop.f32.mrf.mxu3  ;;  %v90_v34 = vld [vmem:[%s2047_s0 + $0x260] sm:$0xff] }
  0xc6   :  { %v715_v37 = vpop.f32.mrf.mxu2 }
  0xc7   :  { %v845_v38 = vmax.f32 %v707_v35, 0.0  ;;  %v381_v39 = vpop.f32.mrf.mxu0 }
  0xc8   :  { %v382_v42 = vadd.f32 %v1450_v41, %v381_v39 }
  0xc9   :  { %895 = vst.msk [vmem:[%s2049_s3 + $0x20] sm:$0xff] %vm890_vm1, %v845_v38 }
  0xca   :  { %v545_v45 = vpop.f32.mrf.mxu1  ;;  %428 = vmatmul.f32.gmra.mxu0 %v77_v40  ;;  %661 = vmatmul.f32.gmra.mxu3 %v147_v43  ;;  %v92_v43 = vld [vmem:[%s2047_s0 + $0x270] sm:$0xff] }
  0xcb   :  { %v546_v47 = vadd.f32 %v545_v45, %v382_v42  ;;  %968 = vmatmul.msk.f32.gmra.mxu2 %vm201_vm0, %v88_v44  ;;  %v103_v45 = vld [vmem:[%s2047_s0 + $0x2c8] sm:$0xff] }
  0xcd   :  { %v710_v48 = vadd.f32 %v709_v13, %v546_v47  ;;  %592 = vmatmul.f32.gmra.mxu1 %v78_v46  ;;  %v1566_v49 = vpop.f32.mrf.mxu3  ;;  %v133_v46 = vld [vmem:[%s2047_s0 + $0x3b8] sm:$0xff] }
  0xce   :  { %v718_v50 = vpop.f32.mrf.mxu2 }
  0xcf   :  { %v846_v51 = vmax.f32 %v710_v48, 0.0  ;;  %v384_v53 = vpop.f32.mrf.mxu0  ;;  %v93_v48 = vld [vmem:[%s2047_s0 + $0x278] sm:$0xff] }
  0xd0   :  { %v385_v55 = vadd.f32 %v1450_v41, %v384_v53 }
  0xd1   :  { %896 = vst.msk [vmem:[%s2049_s3 + $0x28] sm:$0xff] %vm890_vm1, %v846_v51 }
  0xd2   :  { %v548_v58 = vpop.f32.mrf.mxu1  ;;  %431 = vmatmul.f32.gmra.mxu0 %v80_v54  ;;  %664 = vmatmul.f32.gmra.mxu3 %v150_v56 }
  0xd3   :  { %v549_v60 = vadd.f32 %v548_v58, %v385_v55  ;;  %969 = vmatmul.msk.f32.gmra.mxu2 %vm201_vm0, %v91_v57  ;;  %v95_v57 = vld [vmem:[%s2047_s0 + $0x288] sm:$0xff] }
  0xd5   :  { %v713_v61 = vadd.f32 %v712_v25, %v549_v60  ;;  %595 = vmatmul.f32.gmra.mxu1 %v81_v59  ;;  %v1586_v62 = vpop.f32.mrf.mxu3  ;;  %v106_v59 = vld [vmem:[%s2047_s0 + $0x2e0] sm:$0xff]  ;;  %v136_v60 = vld [vmem:[%s2047_s0 + $0x3d0] sm:$0xff] }
  0xd6   :  { %v721_v63 = vpop.f32.mrf.mxu2 }
  0xd7   :  { %v847_v1 = vmax.f32 %v713_v61, 0.0  ;;  %v387_v2 = vpop.f32.mrf.mxu0 }
  0xd8   :  { %v388_v4 = vadd.f32 %v1450_v41, %v387_v2 }
  0xd9   :  { %897 = vst.msk [vmem:[%s2049_s3 + $0x30] sm:$0xff] %vm890_vm1, %v847_v1 }
  0xda   :  { %v551_v7 = vpop.f32.mrf.mxu1  ;;  %434 = vmatmul.f32.gmra.mxu0 %v83_v3  ;;  %667 = vmatmul.f32.gmra.mxu3 %v153_v5 }
  0xdb   :  { %v552_v9 = vadd.f32 %v551_v7, %v388_v4  ;;  %970 = vmatmul.msk.f32.gmra.mxu2 %vm201_vm0, %v94_v6  ;;  %v98_v7 = vld [vmem:[%s2047_s0 + $0x2a0] sm:$0xff] }
  0xdd   :  { %v716_v10 = vadd.f32 %v715_v37, %v552_v9  ;;  %598 = vmatmul.f32.gmra.mxu1 %v84_v8  ;;  %v1606_v11 = vpop.f32.mrf.mxu3  ;;  %v109_v9 = vld [vmem:[%s2047_s0 + $0x2f8] sm:$0xff] }
  0xde   :  { %v724_v13 = vpop.f32.mrf.mxu2 }
  0xdf   :  { %v848_v14 = vmax.f32 %v716_v10, 0.0  ;;  %v390_v15 = vpop.f32.mrf.mxu0  ;;  %v139_v10 = vld [vmem:[%s2047_s0 + $0x3e8] sm:$0xff] }
  0xe0   :  { %v391_v17 = vadd.f32 %v1450_v41, %v390_v15 }
  0xe1   :  { %898 = vst.msk [vmem:[%s2049_s3 + $0x38] sm:$0xff] %vm890_vm1, %v848_v14  ;;  %v99_v14 = vld [vmem:[%s2047_s0 + $0x2a8] sm:$0xff] }
  0xe2   :  { %v554_v20 = vpop.f32.mrf.mxu1  ;;  %437 = vmatmul.f32.gmra.mxu0 %v86_v16  ;;  %670 = vmatmul.f32.gmra.mxu3 %v156_v18 }
  0xe3   :  { %v555_v22 = vadd.f32 %v554_v20, %v391_v17  ;;  %971 = vmatmul.msk.f32.gmra.mxu2 %vm201_vm0, %v97_v19 }
  0xe5   :  { %v719_v23 = vadd.f32 %v718_v50, %v555_v22  ;;  %601 = vmatmul.f32.gmra.mxu1 %v87_v21  ;;  %v1626_v25 = vpop.f32.mrf.mxu3  ;;  %v101_v21 = vld [vmem:[%s2047_s0 + $0x2b8] sm:$0xff] }
  0xe6   :  { %v727_v26 = vpop.f32.mrf.mxu2 }
  0xe7   :  { %v849_v27 = vmax.f32 %v719_v23, 0.0  ;;  %v393_v28 = vpop.f32.mrf.mxu0  ;;  %v112_v23 = vld [vmem:[%s2047_s0 + $0x310] sm:$0xff] }
  0xe8   :  { %v394_v30 = vadd.f32 %v1450_v41, %v393_v28  ;;  %v102_v28 = vld [vmem:[%s2047_s0 + $0x2c0] sm:$0xff] }
  0xe9   :  { %899 = vst.msk [vmem:[%s2049_s3 + $0x40] sm:$0xff] %vm890_vm1, %v849_v27 }
  0xea   :  { %v557_v33 = vpop.f32.mrf.mxu1  ;;  %440 = vmatmul.f32.gmra.mxu0 %v89_v29  ;;  %673 = vmatmul.f32.gmra.mxu3 %v159_v31 }
  0xeb   :  { %v558_v35 = vadd.f32 %v557_v33, %v394_v30  ;;  %972 = vmatmul.msk.f32.gmra.mxu2 %vm201_vm0, %v100_v32  ;;  %v475_v30 = vadd.f32 %v1450_v41, %v1466_v52  ;;  %v145_v52 = vld [vmem:[%s2047_s0 + $0x418] sm:$0xff] }
  0xed   :  { %v722_v37 = vadd.f32 %v721_v63, %v558_v35  ;;  %604 = vmatmul.f32.gmra.mxu1 %v90_v34  ;;  %v1646_v38 = vpop.f32.mrf.mxu3  ;;  %v96_v63 = vld [vmem:[%s2047_s0 + $0x290] sm:$0xff] }
  0xee   :  { %v730_v39 = vpop.f32.mrf.mxu2 }
  0xef   :  { %v850_v40 = vmax.f32 %v722_v37, 0.0  ;;  %v396_v42 = vpop.f32.mrf.mxu0 }
  0xf0   :  { %v397_v44 = vadd.f32 %v1450_v41, %v396_v42  ;;  %v115_v42 = vld [vmem:[%s2047_s0 + $0x328] sm:$0xff] }
  0xf1   :  { %900 = vst.msk [vmem:[%s2049_s3 + $0x48] sm:$0xff] %vm890_vm1, %v850_v40 }
  0xf2   :  { %v560_v47 = vpop.f32.mrf.mxu1  ;;  %443 = vmatmul.f32.gmra.mxu0 %v92_v43  ;;  %983 = vmatmul.msk.f32.vlgmr.msra.gmra.mxu3 %vm201_vm0, %v133_v46  ;;  %v478_v46 = vadd.f32 %v1450_v41, %v1486_v0  ;;  %v148_v0 = vld [vmem:[%s2047_s0 + $0x430] sm:$0xff] }
  0xf3   :  { %v561_v50 = vadd.f32 %v560_v47, %v397_v44  ;;  %973 = vmatmul.msk.f32.gmra.mxu2 %vm201_vm0, %v103_v45  ;;  %v105_v44 = vld [vmem:[%s2047_s0 + $0x2d8] sm:$0xff] }
  0xf5   :  { %v725_v51 = vadd.f32 %v724_v13, %v561_v50  ;;  %607 = vmatmul.f32.gmra.mxu1 %v93_v48  ;;  %v1667_v53 = vpop.f32.mrf.mxu3 }
  0xf6   :  { %v733_v54 = vpop.f32.mrf.mxu2 }
  0xf7   :  { %v851_v55 = vmax.f32 %v725_v51, 0.0  ;;  %v399_v56 = vpop.f32.mrf.mxu0 }
  0xf8   :  { %v400_v58 = vadd.f32 %v1450_v41, %v399_v56  ;;  %v107_v56 = vld [vmem:[%s2047_s0 + $0x2e8] sm:$0xff] }
  0xf9   :  { %901 = vst.msk [vmem:[%s2049_s3 + $0x50] sm:$0xff] %vm890_vm1, %v851_v55 }
  0xfa   :  { %v563_v61 = vpop.f32.mrf.mxu1  ;;  %446 = vmatmul.f32.gmra.mxu0 %v95_v57  ;;  %984 = vmatmul.msk.f32.gmra.mxu3 %vm201_vm0, %v136_v60  ;;  %v108_v60 = vld [vmem:[%s2047_s0 + $0x2f0] sm:$0xff] }
  0xfb   :  { %v564_v1 = vadd.f32 %v563_v61, %v400_v58  ;;  %974 = vmatmul.msk.f32.gmra.mxu2 %vm201_vm0, %v106_v59  ;;  %v118_v58 = vld [vmem:[%s2047_s0 + $0x340] sm:$0xff] }
  0xfd   :  { %v728_v2 = vadd.f32 %v727_v26, %v564_v1  ;;  %610 = vmatmul.f32.gmra.mxu1 %v96_v63  ;;  %v1688_v3 = vpop.f32.mrf.mxu3  ;;  %v142_v26 = vld [vmem:[%s2047_s0 + $0x400] sm:$0xff]  ;;  %v481_v63 = vadd.f32 %v1450_v41, %v1506_v12  ;;  %v151_v12 = vld [vmem:[%s2047_s0 + $0x448] sm:$0xff] }
  0xfe   :  { %v736_v4 = vpop.f32.mrf.mxu2 }
  0xff   :  { %v852_v5 = vmax.f32 %v728_v2, 0.0  ;;  %v402_v6 = vpop.f32.mrf.mxu0 }
 0x100   :  { %v403_v8 = vadd.f32 %v1450_v41, %v402_v6 }
 0x101   :  { %902 = vst.msk [vmem:[%s2049_s3 + $0x58] sm:$0xff] %vm890_vm1, %v852_v5 }
 0x102   :  { %v566_v13 = vpop.f32.mrf.mxu1  ;;  %449 = vmatmul.f32.gmra.mxu0 %v98_v7  ;;  %985 = vmatmul.msk.f32.gmra.mxu3 %vm201_vm0, %v139_v10  ;;  %v121_v10 = vld [vmem:[%s2047_s0 + $0x358] sm:$0xff] }
 0x103   :  { %v567_v15 = vadd.f32 %v566_v13, %v403_v8  ;;  %975 = vmatmul.msk.f32.gmra.mxu2 %vm201_vm0, %v109_v9  ;;  %v110_v8 = vld [vmem:[%s2047_s0 + $0x300] sm:$0xff] }
 0x105   :  { %v731_v16 = vadd.f32 %v730_v39, %v567_v15  ;;  %613 = vmatmul.f32.gmra.mxu1 %v99_v14  ;;  %v1709_v17 = vpop.f32.mrf.mxu3  ;;  %v104_v39 = vld [vmem:[%s2047_s0 + $0x2d0] sm:$0xff]  ;;  %v111_v14 = vld [vmem:[%s2047_s0 + $0x308] sm:$0xff] }
 0x106   :  { %v739_v18 = vpop.f32.mrf.mxu2 }
 0x107   :  { %v853_v19 = vmax.f32 %v731_v16, 0.0  ;;  %v405_v20 = vpop.f32.mrf.mxu0  ;;  %v484_v16 = vadd.f32 %v1450_v41, %v1526_v24  ;;  %v154_v24 = vld [vmem:[%s2047_s0 + $0x460] sm:$0xff] }
 0x108   :  { %v406_v22 = vadd.f32 %v1450_v41, %v405_v20 }
 0x109   :  { %903 = vst.msk [vmem:[%s2049_s3 + $0x60] sm:$0xff] %vm890_vm1, %v853_v19 }
 0x10a   :  { %v569_v27 = vpop.f32.mrf.mxu1  ;;  %452 = vmatmul.f32.gmra.mxu0 %v101_v21  ;;  %986 = vmatmul.msk.f32.gmra.mxu3 %vm201_vm0, %v142_v26  ;;  %v113_v26 = vld [vmem:[%s2047_s0 + $0x318] sm:$0xff] }
 0x10b   :  { %v570_v29 = vadd.f32 %v569_v27, %v406_v22  ;;  %976 = vmatmul.msk.f32.gmra.mxu2 %vm201_vm0, %v112_v23 }
 0x10d   :  { %v734_v31 = vadd.f32 %v733_v54, %v570_v29  ;;  %616 = vmatmul.f32.gmra.mxu1 %v102_v28  ;;  %v638_v32 = vpop.f32.mrf.mxu3  ;;  %v124_v28 = vld [vmem:[%s2047_s0 + $0x370] sm:$0xff] }
 0x10e   :  { %v742_v33 = vpop.f32.mrf.mxu2  ;;  %v1732_v35 = vadd.f32 %v638_v32, %v475_v30  ;;  %v114_v30 = vld [vmem:[%s2047_s0 + $0x320] sm:$0xff]  ;;  %v487_v32 = vadd.f32 %v1450_v41, %v1546_v36  ;;  %v157_v36 = vld [vmem:[%s2047_s0 + $0x478] sm:$0xff] }
 0x10f   :  { %v854_v34 = vmax.f32 %v734_v31, 0.0  ;;  %v408_v37 = vpop.f32.mrf.mxu0 }
 0x110   :  { %v409_v40 = vadd.f32 %v1450_v41, %v408_v37 }
 0x111   :  { %904 = vst.msk [vmem:[%s2049_s3 + $0x68] sm:$0xff] %vm890_vm1, %v854_v34 }
 0x112   :  { %v572_v43 = vpop.f32.mrf.mxu1  ;;  %455 = vmatmul.f32.gmra.mxu0 %v104_v39  ;;  %987 = vmatmul.msk.f32.gmra.mxu3 %vm201_vm0, %v145_v52  ;;  %v116_v52 = vld [vmem:[%s2047_s0 + $0x330] sm:$0xff] }
 0x113   :  { %v573_v45 = vadd.f32 %v572_v43, %v409_v40  ;;  %977 = vmatmul.msk.f32.gmra.mxu2 %vm201_vm0, %v115_v42 }
 0x115   :  { %v737_v47 = vadd.f32 %v736_v4, %v573_v45  ;;  %619 = vmatmul.f32.gmra.mxu1 %v105_v44  ;;  %v641_v48 = vpop.f32.mrf.mxu3  ;;  %v127_v44 = vld [vmem:[%s2047_s0 + $0x388] sm:$0xff] }
 0x116   :  { %v745_v50 = vpop.f32.mrf.mxu2  ;;  %v1755_v54 = vadd.f32 %v641_v48, %v478_v46  ;;  %v117_v46 = vld [vmem:[%s2047_s0 + $0x338] sm:$0xff]  ;;  %v490_v48 = vadd.f32 %v1450_v41, %v1566_v49  ;;  %v160_v49 = vld [vmem:[%s2047_s0 + $0x490] sm:$0xff] }
 0x117   :  { %v855_v51 = vmax.f32 %v737_v47, 0.0  ;;  %v411_v55 = vpop.f32.mrf.mxu0 }
 0x118   :  { %v412_v57 = vadd.f32 %v1450_v41, %v411_v55 }
 0x119   :  { %905 = vst.msk [vmem:[%s2049_s3 + $0x70] sm:$0xff] %vm890_vm1, %v855_v51 }
 0x11a   :  { %v575_v59 = vpop.f32.mrf.mxu1  ;;  %458 = vmatmul.f32.gmra.mxu0 %v107_v56  ;;  %988 = vmatmul.msk.f32.gmra.mxu3 %vm201_vm0, %v148_v0  ;;  %v119_v0 = vld [vmem:[%s2047_s0 + $0x348] sm:$0xff] }
 0x11b   :  { %v576_v61 = vadd.f32 %v575_v59, %v412_v57  ;;  %978 = vmatmul.msk.f32.gmra.mxu2 %vm201_vm0, %v118_v58 }
 0x11d   :  { %v740_v1 = vadd.f32 %v739_v18, %v576_v61  ;;  %622 = vmatmul.f32.gmra.mxu1 %v108_v60  ;;  %v644_v2 = vpop.f32.mrf.mxu3  ;;  %v130_v60 = vld [vmem:[%s2047_s0 + $0x3a0] sm:$0xff] }
 0x11e   :  { %v748_v4 = vpop.f32.mrf.mxu2  ;;  %v1778_v6 = vadd.f32 %v644_v2, %v481_v63  ;;  %v120_v63 = vld [vmem:[%s2047_s0 + $0x350] sm:$0xff]  ;;  %v493_v2 = vadd.f32 %v1450_v41, %v1586_v62  ;;  %v496_v62 = vadd.f32 %v1450_v41, %v1606_v11 }
 0x11f   :  { %v856_v5 = vmax.f32 %v740_v1, 0.0  ;;  %v414_v7 = vpop.f32.mrf.mxu0 }
 0x120   :  { %v415_v9 = vadd.f32 %v1450_v41, %v414_v7 }
 0x121   :  { %906 = vst.msk [vmem:[%s2049_s3 + $0x78] sm:$0xff] %vm890_vm1, %v856_v5 }
 0x122   :  { %v578_v13 = vpop.f32.mrf.mxu1  ;;  %461 = vmatmul.f32.gmra.mxu0 %v110_v8  ;;  %989 = vmatmul.msk.f32.gmra.mxu3 %vm201_vm0, %v151_v12 }
 0x123   :  { %v579_v15 = vadd.f32 %v578_v13, %v415_v9  ;;  %979 = vmatmul.msk.f32.gmra.mxu2 %vm201_vm0, %v121_v10 }
 0x125   :  { %v743_v18 = vadd.f32 %v742_v33, %v579_v15  ;;  %625 = vmatmul.f32.gmra.mxu1 %v111_v14  ;;  %v647_v19 = vpop.f32.mrf.mxu3 }
 0x126   :  { %v751_v20 = vpop.f32.mrf.mxu2  ;;  %v1801_v22 = vadd.f32 %v647_v19, %v484_v16 }
 0x127   :  { %v857_v21 = vmax.f32 %v743_v18, 0.0  ;;  %v417_v23 = vpop.f32.mrf.mxu0 }
 0x128   :  { %v418_v27 = vadd.f32 %v1450_v41, %v417_v23 }
 0x129   :  { %907 = vst.msk [vmem:[%s2049_s3 + $0x80] sm:$0xff] %vm890_vm1, %v857_v21 }
 0x12a   :  { %v581_v29 = vpop.f32.mrf.mxu1  ;;  %464 = vmatmul.f32.gmra.mxu0 %v113_v26  ;;  %990 = vmatmul.msk.f32.gmra.mxu3 %vm201_vm0, %v154_v24 }
 0x12b   :  { %v582_v31 = vadd.f32 %v581_v29, %v418_v27  ;;  %980 = vmatmul.msk.f32.gmra.mxu2 %vm201_vm0, %v124_v28  ;;  %v499_v28 = vadd.f32 %v1450_v41, %v1626_v25 }
 0x12d   :  { %v746_v33 = vadd.f32 %v745_v50, %v582_v31  ;;  %628 = vmatmul.f32.gmra.mxu1 %v114_v30  ;;  %v650_v34 = vpop.f32.mrf.mxu3 }
 0x12e   :  { %v754_v37 = vpop.f32.mrf.mxu2  ;;  %v1824_v40 = vadd.f32 %v650_v34, %v487_v32 }
 0x12f   :  { %v858_v39 = vmax.f32 %v746_v33, 0.0  ;;  %v420_v42 = vpop.f32.mrf.mxu0 }
 0x130   :  { %v421_v43 = vadd.f32 %v1450_v41, %v420_v42 }
 0x131   :  { %908 = vst.msk [vmem:[%s2049_s3 + $0x88] sm:$0xff] %vm890_vm1, %v858_v39  ;;  %v502_v39 = vadd.f32 %v1450_v41, %v1646_v38 }
 0x132   :  { %v584_v45 = vpop.f32.mrf.mxu1  ;;  %467 = vmatmul.f32.gmra.mxu0 %v116_v52  ;;  %991 = vmatmul.msk.f32.gmra.mxu3 %vm201_vm0, %v157_v36 }
 0x133   :  { %v585_v47 = vadd.f32 %v584_v45, %v421_v43  ;;  %981 = vmatmul.msk.f32.gmra.mxu2 %vm201_vm0, %v127_v44 }
 0x135   :  { %v749_v50 = vadd.f32 %v748_v4, %v585_v47  ;;  %631 = vmatmul.f32.gmra.mxu1 %v117_v46  ;;  %v653_v51 = vpop.f32.mrf.mxu3 }
 0x136   :  { %v757_v55 = vpop.f32.mrf.mxu2  ;;  %v1847_v57 = vadd.f32 %v653_v51, %v490_v48  ;;  %v505_v48 = vadd.f32 %v1450_v41, %v1667_v53 }
 0x137   :  { %v859_v56 = vmax.f32 %v749_v50, 0.0  ;;  %v423_v58 = vpop.f32.mrf.mxu0 }
 0x138   :  { %v424_v59 = vadd.f32 %v1450_v41, %v423_v58 }
 0x139   :  { %909 = vst.msk [vmem:[%s2049_s3 + $0x90] sm:$0xff] %vm890_vm1, %v859_v56 }
 0x13a   :  { %v587_v61 = vpop.f32.mrf.mxu1  ;;  %470 = vmatmul.f32.gmra.mxu0 %v119_v0  ;;  %992 = vmatmul.msk.f32.gmra.mxu3 %vm201_vm0, %v160_v49  ;;  %v508_v49 = vadd.f32 %v1450_v41, %v1688_v3 }
 0x13b   :  { %v588_v1 = vadd.f32 %v587_v61, %v424_v59  ;;  %982 = vmatmul.msk.f32.gmra.mxu2 %vm201_vm0, %v130_v60 }
 0x13d   :  { %v752_v4 = vadd.f32 %v751_v20, %v588_v1  ;;  %634 = vmatmul.f32.gmra.mxu1 %v120_v63  ;;  %v656_v5 = vpop.f32.mrf.mxu3 }
 0x13e   :  { %v760_v7 = vpop.f32.mrf.mxu2  ;;  %v1870_v9 = vadd.f32 %v656_v5, %v493_v2 }
 0x13f   :  { %v860_v8 = vmax.f32 %v752_v4, 0.0  ;;  %v426_v10 = vpop.f32.mrf.mxu0 }
 0x140   :  { %v427_v12 = vadd.f32 %v1450_v41, %v426_v10  ;;  %v511_v10 = vadd.f32 %v1450_v41, %v1709_v17 }
 0x141   :  { %910 = vst.msk [vmem:[%s2049_s3 + $0x98] sm:$0xff] %vm890_vm1, %v860_v8 }
 0x142   :  { %v590_v13 = vpop.f32.mrf.mxu1 }
 0x143   :  { %v591_v14 = vadd.f32 %v590_v13, %v427_v12 }
 0x145   :  { %v755_v15 = vadd.f32 %v754_v37, %v591_v14  ;;  %v659_v16 = vpop.f32.mrf.mxu3 }
 0x146   :  { %v763_v18 = vpop.f32.mrf.mxu2  ;;  %v1879_v20 = vadd.f32 %v659_v16, %v496_v62 }
 0x147   :  { %v861_v19 = vmax.f32 %v755_v15, 0.0  ;;  %v429_v21 = vpop.f32.mrf.mxu0 }
 0x148   :  { %v430_v23 = vadd.f32 %v1450_v41, %v429_v21 }
 0x149   :  { %911 = vst.msk [vmem:[%s2049_s3 + $0xa0] sm:$0xff] %vm890_vm1, %v861_v19 }
 0x14a   :  { %v593_v26 = vpop.f32.mrf.mxu1 }
 0x14b   :  { %v594_v27 = vadd.f32 %v593_v26, %v430_v23 }
 0x14d   :  { %v758_v11 = vadd.f32 %v757_v55, %v594_v27  ;;  %v662_v24 = vpop.f32.mrf.mxu3 }
 0x14e   :  { %v766_v29 = vpop.f32.mrf.mxu2  ;;  %v1888_v31 = vadd.f32 %v662_v24, %v499_v28 }
 0x14f   :  { %v862_v30 = vmax.f32 %v758_v11, 0.0  ;;  %v432_v32 = vpop.f32.mrf.mxu0 }
 0x150   :  { %v433_v33 = vadd.f32 %v1450_v41, %v432_v32 }
 0x151   :  { %912 = vst.msk [vmem:[%s2049_s3 + $0xa8] sm:$0xff] %vm890_vm1, %v862_v30 }
 0x152   :  { %v596_v34 = vpop.f32.mrf.mxu1 }
 0x153   :  { %v597_v37 = vadd.f32 %v596_v34, %v433_v33 }
 0x155   :  { %v761_v25 = vadd.f32 %v760_v7, %v597_v37  ;;  %v665_v42 = vpop.f32.mrf.mxu3 }
 0x156   :  { %v769_v52 = vpop.f32.mrf.mxu2  ;;  %v1897_v44 = vadd.f32 %v665_v42, %v502_v39 }
 0x157   :  { %v863_v43 = vmax.f32 %v761_v25, 0.0  ;;  %v435_v36 = vpop.f32.mrf.mxu0 }
 0x158   :  { %v436_v45 = vadd.f32 %v1450_v41, %v435_v36 }
 0x159   :  { %913 = vst.msk [vmem:[%s2049_s3 + $0xb0] sm:$0xff] %vm890_vm1, %v863_v43 }
 0x15a   :  { %v599_v46 = vpop.f32.mrf.mxu1 }
 0x15b   :  { %v600_v47 = vadd.f32 %v599_v46, %v436_v45 }
 0x15d   :  { %v764_v38 = vadd.f32 %v763_v18, %v600_v47  ;;  %v668_v50 = vpop.f32.mrf.mxu3 }
 0x15e   :  { %v772_v51 = vpop.f32.mrf.mxu2  ;;  %v1906_v56 = vadd.f32 %v668_v50, %v505_v48 }
 0x15f   :  { %v864_v55 = vmax.f32 %v764_v38, 0.0  ;;  %v438_v58 = vpop.f32.mrf.mxu0 }
 0x160   :  { %v439_v0 = vadd.f32 %v1450_v41, %v438_v58 }
 0x161   :  { %914 = vst.msk [vmem:[%s2049_s3 + $0xb8] sm:$0xff] %vm890_vm1, %v864_v55 }
 0x162   :  { %v602_v59 = vpop.f32.mrf.mxu1 }
 0x163   :  { %v603_v60 = vadd.f32 %v602_v59, %v439_v0 }
 0x165   :  { %v767_v53 = vadd.f32 %v766_v29, %v603_v60  ;;  %v671_v61 = vpop.f32.mrf.mxu3 }
 0x166   :  { %v775_v63 = vpop.f32.mrf.mxu2  ;;  %v1915_v2 = vadd.f32 %v671_v61, %v508_v49 }
 0x167   :  { %v865_v1 = vmax.f32 %v767_v53, 0.0  ;;  %v441_v4 = vpop.f32.mrf.mxu0 }
 0x168   :  { %v442_v5 = vadd.f32 %v1450_v41, %v441_v4 }
 0x169   :  { %915 = vst.msk [vmem:[%s2049_s3 + $0xc0] sm:$0xff] %vm890_vm1, %v865_v1 }
 0x16a   :  { %v605_v7 = vpop.f32.mrf.mxu1 }
 0x16b   :  { %v606_v8 = vadd.f32 %v605_v7, %v442_v5 }
 0x16d   :  { %v770_v3 = vadd.f32 %v769_v52, %v606_v8  ;;  %v674_v12 = vpop.f32.mrf.mxu3 }
 0x16e   :  { %v778_v13 = vpop.f32.mrf.mxu2  ;;  %v1924_v62 = vadd.f32 %v674_v12, %v511_v10 }
 0x16f   :  { %v866_v14 = vmax.f32 %v770_v3, 0.0  ;;  %v444_v15 = vpop.f32.mrf.mxu0 }
 0x170   :  { %v445_v16 = vadd.f32 %v1450_v41, %v444_v15 }
 0x171   :  { %916 = vst.msk [vmem:[%s2049_s3 + $0xc8] sm:$0xff] %vm890_vm1, %v866_v14 }
 0x172   :  { %v608_v18 = vpop.f32.mrf.mxu1 }
 0x173   :  { %v609_v19 = vadd.f32 %v608_v18, %v445_v16 }
 0x175   :  { %v773_v21 = vadd.f32 %v772_v51, %v609_v19  ;;  %v811_v26 = vpop.f32.mrf.mxu3 }
 0x176   :  { %v781_v23 = vpop.f32.mrf.mxu2  ;;  %v812_v27 = vadd.f32 %v811_v26, %v1801_v22 }
 0x177   :  { %v867_v17 = vmax.f32 %v773_v21, 0.0  ;;  %v447_v28 = vpop.f32.mrf.mxu0 }
 0x178   :  { %v448_v11 = vadd.f32 %v1450_v41, %v447_v28  ;;  %v880_v24 = vmax.f32 %v812_v27, 0.0 }
 0x179   :  { %917 = vst.msk [vmem:[%s2049_s3 + $0xd0] sm:$0xff] %vm890_vm1, %v867_v17 }
 0x17a   :  { %v611_v29 = vpop.f32.mrf.mxu1  ;;  %930 = vst.msk [vmem:[%s2049_s3 + $0x138] sm:$0xff] %vm890_vm1, %v880_v24 }
 0x17b   :  { %v612_v30 = vadd.f32 %v611_v29, %v448_v11 }
 0x17d   :  { %v776_v32 = vadd.f32 %v775_v63, %v612_v30  ;;  %v814_v34 = vpop.f32.mrf.mxu3 }
 0x17e   :  { %v784_v33 = vpop.f32.mrf.mxu2  ;;  %v815_v37 = vadd.f32 %v814_v34, %v1824_v40 }
 0x17f   :  { %v868_v22 = vmax.f32 %v776_v32, 0.0  ;;  %v450_v39 = vpop.f32.mrf.mxu0 }
 0x180   :  { %v451_v25 = vadd.f32 %v1450_v41, %v450_v39  ;;  %v881_v42 = vmax.f32 %v815_v37, 0.0 }
 0x181   :  { %918 = vst.msk [vmem:[%s2049_s3 + $0xd8] sm:$0xff] %vm890_vm1, %v868_v22 }
 0x182   :  { %v614_v52 = vpop.f32.mrf.mxu1  ;;  %931 = vst.msk [vmem:[%s2049_s3 + $0x140] sm:$0xff] %vm890_vm1, %v881_v42 }
 0x183   :  { %v615_v43 = vadd.f32 %v614_v52, %v451_v25 }
 0x185   :  { %v779_v36 = vadd.f32 %v778_v13, %v615_v43  ;;  %v817_v46 = vpop.f32.mrf.mxu3  ;;  %v1030_v43 = vld [vmem:[%s2048_s2] ss:$0 sm:$0xff] }
 0x186   :  { %v787_v45 = vpop.f32.mrf.mxu2  ;;  %v818_v47 = vadd.f32 %v817_v46, %v1847_v57 }
 0x187   :  { %v869_v40 = vmax.f32 %v779_v36, 0.0  ;;  %v453_v48 = vpop.f32.mrf.mxu0 }
 0x188   :  { %v454_v38 = vadd.f32 %v1450_v41, %v453_v48  ;;  %v882_v50 = vmax.f32 %v818_v47, 0.0 }
 0x189   :  { %919 = vst.msk [vmem:[%s2049_s3 + $0xe0] sm:$0xff] %vm890_vm1, %v869_v40 }
 0x18a   :  { %v617_v51 = vpop.f32.mrf.mxu1  ;;  %932 = vst.msk [vmem:[%s2049_s3 + $0x148] sm:$0xff] %vm890_vm1, %v882_v50 }
 0x18b   :  { %v618_v55 = vadd.f32 %v617_v51, %v454_v38 }
 0x18d   :  { %v782_v58 = vadd.f32 %v781_v23, %v618_v55  ;;  %v820_v59 = vpop.f32.mrf.mxu3 }
 0x18e   :  { %v790_v0 = vpop.f32.mrf.mxu2  ;;  %v821_v60 = vadd.f32 %v820_v59, %v1870_v9 }
 0x18f   :  { %v870_v57 = vmax.f32 %v782_v58, 0.0  ;;  %v456_v49 = vpop.f32.mrf.mxu0 }
 0x190   :  { %v457_v53 = vadd.f32 %v1450_v41, %v456_v49  ;;  %v883_v61 = vmax.f32 %v821_v60, 0.0 }
 0x191   :  { %920 = vst.msk [vmem:[%s2049_s3 + $0xe8] sm:$0xff] %vm890_vm1, %v870_v57 }
 0x192   :  { %v620_v63 = vpop.f32.mrf.mxu1  ;;  %933 = vst.msk [vmem:[%s2049_s3 + $0x150] sm:$0xff] %vm890_vm1, %v883_v61 }
 0x193   :  { %v621_v1 = vadd.f32 %v620_v63, %v457_v53 }
 0x195   :  { %v785_v4 = vadd.f32 %v784_v33, %v621_v1  ;;  %v823_v7 = vpop.f32.mrf.mxu3 }
 0x196   :  { %v793_v5 = vpop.f32.mrf.mxu2  ;;  %v824_v8 = vadd.f32 %v823_v7, %v1879_v20 }
 0x197   :  { %v871_v9 = vmax.f32 %v785_v4, 0.0  ;;  %v459_v10 = vpop.f32.mrf.mxu0 }
 0x198   :  { %v460_v3 = vadd.f32 %v1450_v41, %v459_v10  ;;  %v884_v12 = vmax.f32 %v824_v8, 0.0 }
 0x199   :  { %921 = vst.msk [vmem:[%s2049_s3 + $0xf0] sm:$0xff] %vm890_vm1, %v871_v9 }
 0x19a   :  { %v623_v13 = vpop.f32.mrf.mxu1  ;;  %934 = vst.msk [vmem:[%s2049_s3 + $0x158] sm:$0xff] %vm890_vm1, %v884_v12 }
 0x19b   :  { %v624_v14 = vadd.f32 %v623_v13, %v460_v3 }
 0x19d   :  { %v788_v15 = vadd.f32 %v787_v45, %v624_v14  ;;  %v826_v18 = vpop.f32.mrf.mxu3 }
 0x19e   :  { %v796_v16 = vpop.f32.mrf.mxu2  ;;  %v827_v19 = vadd.f32 %v826_v18, %v1888_v31 }
 0x19f   :  { %v872_v20 = vmax.f32 %v788_v15, 0.0  ;;  %v462_v21 = vpop.f32.mrf.mxu0 }
 0x1a0   :  { %v463_v23 = vadd.f32 %v1450_v41, %v462_v21  ;;  %v885_v26 = vmax.f32 %v827_v19, 0.0 }
 0x1a1   :  { %922 = vst.msk [vmem:[%s2049_s3 + $0xf8] sm:$0xff] %vm890_vm1, %v872_v20 }
 0x1a2   :  { %v626_v17 = vpop.f32.mrf.mxu1  ;;  %935 = vst.msk [vmem:[%s2049_s3 + $0x160] sm:$0xff] %vm890_vm1, %v885_v26 }
 0x1a3   :  { %v627_v27 = vadd.f32 %v626_v17, %v463_v23 }
 0x1a5   :  { %v791_v28 = vadd.f32 %v790_v0, %v627_v27  ;;  %v829_v24 = vpop.f32.mrf.mxu3 }
 0x1a6   :  { %v799_v11 = vpop.f32.mrf.mxu2  ;;  %v830_v29 = vadd.f32 %v829_v24, %v1897_v44 }
 0x1a7   :  { %v873_v31 = vmax.f32 %v791_v28, 0.0  ;;  %v465_v30 = vpop.f32.mrf.mxu0 }
 0x1a8   :  { %v466_v32 = vadd.f32 %v1450_v41, %v465_v30  ;;  %v886_v33 = vmax.f32 %v830_v29, 0.0 }
 0x1a9   :  { %923 = vst.msk [vmem:[%s2049_s3 + $0x100] sm:$0xff] %vm890_vm1, %v873_v31 }
 0x1aa   :  { %v629_v34 = vpop.f32.mrf.mxu1  ;;  %936 = vst.msk [vmem:[%s2049_s3 + $0x168] sm:$0xff] %vm890_vm1, %v886_v33 }
 0x1ab   :  { %v630_v22 = vadd.f32 %v629_v34, %v466_v32 }
 0x1ad   :  { %v794_v37 = vadd.f32 %v793_v5, %v630_v22  ;;  %v832_v25 = vpop.f32.mrf.mxu3 }
 0x1ae   :  { %v802_v39 = vpop.f32.mrf.mxu2  ;;  %v833_v41 = vadd.f32 %v832_v25, %v1906_v56 }
 0x1af   :  { %v874_v44 = vmax.f32 %v794_v37, 0.0  ;;  %v803_v42 = vadd.f32 %v802_v39, %v1732_v35  ;;  %v468_v52 = vpop.f32.mrf.mxu0 }
 0x1b0   :  { %v469_v36 = vadd.f32 %v1030_v43, %v468_v52  ;;  %v887_v46 = vmax.f32 %v833_v41, 0.0 }
 0x1b1   :  { %924 = vst.msk [vmem:[%s2049_s3 + $0x108] sm:$0xff] %vm890_vm1, %v874_v44  ;;  %v877_v45 = vmax.f32 %v803_v42, 0.0 }
 0x1b2   :  { %v632_v40 = vpop.f32.mrf.mxu1  ;;  %937 = vst.msk [vmem:[%s2049_s3 + $0x170] sm:$0xff] %vm890_vm1, %v887_v46 }
 0x1b3   :  { %927 = vst.msk [vmem:[%s2049_s3 + $0x120] sm:$0xff] %vm890_vm1, %v877_v45  ;;  %v633_v35 = vadd.f32 %v632_v40, %v469_v36 }
 0x1b5   :  { %v797_v56 = vadd.f32 %v796_v16, %v633_v35  ;;  %v835_v48 = vpop.f32.mrf.mxu3 }
 0x1b6   :  { %v805_v47 = vpop.f32.mrf.mxu2  ;;  %v836_v51 = vadd.f32 %v835_v48, %v1915_v2 }
 0x1b7   :  { %v875_v38 = vmax.f32 %v797_v56, 0.0  ;;  %v806_v50 = vadd.f32 %v805_v47, %v1755_v54  ;;  %v471_v55 = vpop.f32.mrf.mxu0 }
 0x1b8   :  { %v472_v58 = vadd.f32 %v1030_v43, %v471_v55  ;;  %v888_v59 = vmax.f32 %v836_v51, 0.0 }
 0x1b9   :  { %925 = vst.msk [vmem:[%s2049_s3 + $0x110] sm:$0xff] %vm890_vm1, %v875_v38  ;;  %v878_v0 = vmax.f32 %v806_v50, 0.0 }
 0x1ba   :  { %v635_v57 = vpop.f32.mrf.mxu1  ;;  %938 = vst.msk [vmem:[%s2049_s3 + $0x178] sm:$0xff] %vm890_vm1, %v888_v59 }
 0x1bb   :  { %928 = vst.msk [vmem:[%s2049_s3 + $0x128] sm:$0xff] %vm890_vm1, %v878_v0  ;;  %v636_v60 = vadd.f32 %v635_v57, %v472_v58 }
 0x1bd   :  { %v800_v54 = vadd.f32 %v799_v11, %v636_v60  ;;  %v838_v49 = vpop.f32.mrf.mxu3 }
 0x1be   :  { %v808_v2 = vpop.f32.mrf.mxu2  ;;  %v839_v63 = vadd.f32 %v838_v49, %v1924_v62 }
 0x1bf   :  { %v876_v53 = vmax.f32 %v800_v54, 0.0  ;;  %v809_v61 = vadd.f32 %v808_v2, %v1778_v6 }
 0x1c0   :  { %v889_v4 = vmax.f32 %v839_v63, 0.0 }
 0x1c1   :  { %926 = vst.msk [vmem:[%s2049_s3 + $0x118] sm:$0xff] %vm890_vm1, %v876_v53  ;;  %v879_v1 = vmax.f32 %v809_v61, 0.0 }
 0x1c2   :  { %939 = vst.msk [vmem:[%s2049_s3 + $0x180] sm:$0xff] %vm890_vm1, %v889_v4 }
 0x1c3   :  { %929 = vst.msk [vmem:[%s2049_s3 + $0x130] sm:$0xff] %vm890_vm1, %v879_v1 }

// kernel: autoencoder_forward.11
= control target key start
LH: loop header
LB: loop body
LE: loop exit
PB: predicated region body
PF: predicated region fallthrough
CT: control target
= control target key end

     0   :  { %vm430_vm0 = vcmask 130048   ;;  %vm2229_vm1 = vcmask 7168   ;;  %s5349_s1 = inlined_call_operand.vmem [shape: f32[144,1], index: 1, kind: input, shape index: {}]   ;;  %s5350_s0 = inlined_call_operand.vmem [shape: f32[1568,144], index: 0, kind: input, shape index: {}]   ;;  %s5351_s2 = inlined_call_operand.<no memory space> [shape: f32[1,1], index: 2, kind: input, shape index: {}]   ;;  %s5352_s3 = inlined_call_operand.vmem [shape: f32[1568,1], index: 3, kind: output, shape index: {}]  }
   0x1   :  { %v423_v0 = vld [vmem:[%s5349_s1 + $0x78] sm:$0xff]  ;;  %v2690_v1 = vld [vmem:[%s5349_s1 + $0x88] sm:$0xff]  ;;  %v422_v2 = vld [vmem:[%s5349_s1 + $0x70] sm:$0xff] }
   0x2   :  { %1019 = vmatpush.msra.mxu0 %v423_v0  ;;  %2626 = vmatpush.msra.mxu2 %v423_v0  ;;  %v2698_v3 = vld [vmem:[%s5349_s1 + $0x80] sm:$0xff]  ;;  %v17_v4 = vld [vmem:[%s5350_s0 + $0x8] sm:$0xff]  ;;  %v419_v7 = vld [vmem:[%s5349_s1 + $0x58] sm:$0xff] }
   0x3   :  { %2627 = vmatpush.msra.mxu3 %v423_v0  ;;  %1638 = vmatpush.msra.mxu1 %v2690_v1  ;;  %v421_v5 = vld [vmem:[%s5349_s1 + $0x68] sm:$0xff]  ;;  %v420_v6 = vld [vmem:[%s5349_s1 + $0x60] sm:$0xff]  ;;  %v418_v8 = vld [vmem:[%s5349_s1 + $0x50] sm:$0xff] }
   0x4   :  { %1020 = vmatpush.msra.mxu0 %v422_v2  ;;  %2628 = vmatpush.msra.mxu2 %v422_v2  ;;  %v19_v9 = vld [vmem:[%s5350_s0 + $0x18] sm:$0xff]  ;;  %v417_v10 = vld [vmem:[%s5349_s1 + $0x48] sm:$0xff]  ;;  %v416_v11 = vld [vmem:[%s5349_s1 + $0x40] sm:$0xff] }
   0x5   :  { %2629 = vmatpush.msra.mxu3 %v422_v2  ;;  %1639 = vmatpush.msra.mxu1 %v2698_v3  ;;  %v415_v12 = vld [vmem:[%s5349_s1 + $0x38] sm:$0xff]  ;;  %v414_v13 = vld [vmem:[%s5349_s1 + $0x30] sm:$0xff]  ;;  %v21_v14 = vld [vmem:[%s5350_s0 + $0x28] sm:$0xff] }
   0x6   :  { %2430 = vmatmul.msk.f32.vlgmr.msra.gmra.mxu1 %vm430_vm0, %v17_v4  ;;  %1021 = vmatpush.msra.mxu0 %v421_v5  ;;  %v413_v15 = vld [vmem:[%s5349_s1 + $0x28] sm:$0xff]  ;;  %v412_v16 = vld [vmem:[%s5349_s1 + $0x20] sm:$0xff]  ;;  %v411_v17 = vld [vmem:[%s5349_s1 + $0x18] sm:$0xff]  ;;  %v8_v4 = vstv %s5351_s2 }
   0x7   :  { %2630 = vmatpush.msra.mxu2 %v421_v5  ;;  %2631 = vmatpush.msra.mxu3 %v421_v5  ;;  %v410_v18 = vld [vmem:[%s5349_s1 + $0x10] sm:$0xff]  ;;  %v23_v19 = vld [vmem:[%s5350_s0 + $0x38] sm:$0xff]  ;;  %v409_v20 = vld [vmem:[%s5349_s1 + $0x8] sm:$0xff]  ;;  %9 = vst [vmem:[#allocation2] sm:$0x1] %v8_v4 }
   0x8   :  { %1022 = vmatpush.msra.mxu0 %v420_v6  ;;  %v408_v21 = vld [vmem:[%s5349_s1] sm:$0xff]  ;;  %v210_v23 = vld [vmem:[%s5350_s0 + $0x610] sm:$0xff]  ;;  %v25_v25 = vld [vmem:[%s5350_s0 + $0x48] sm:$0xff] }
   0x9   :  { %2632 = vmatpush.msra.mxu2 %v420_v6  ;;  %2633 = vmatpush.msra.mxu3 %v420_v6  ;;  %v16_v22 = vld [vmem:[%s5350_s0] sm:$0xff]  ;;  %v406_v24 = vld [vmem:[%s5350_s0 + $0xc30] sm:$0xff]  ;;  %v217_v28 = vld [vmem:[%s5350_s0 + $0x648] sm:$0xff] }
   0xa   :  { %1023 = vmatpush.msra.mxu0 %v419_v7  ;;  %v18_v26 = vld [vmem:[%s5350_s0 + $0x10] sm:$0xff]  ;;  %v212_v27 = vld [vmem:[%s5350_s0 + $0x620] sm:$0xff]  ;;  %v27_v29 = vld [vmem:[%s5350_s0 + $0x58] sm:$0xff] }
   0xb   :  { %2634 = vmatpush.msra.mxu2 %v419_v7  ;;  %2635 = vmatpush.msra.mxu3 %v419_v7  ;;  %v20_v30 = vld [vmem:[%s5350_s0 + $0x20] sm:$0xff]  ;;  %v214_v31 = vld [vmem:[%s5350_s0 + $0x630] sm:$0xff]  ;;  %v219_v32 = vld [vmem:[%s5350_s0 + $0x658] sm:$0xff] }
   0xc   :  { %1024 = vmatpush.msra.mxu0 %v418_v8  ;;  %v29_v33 = vld [vmem:[%s5350_s0 + $0x68] sm:$0xff]  ;;  %v22_v34 = vld [vmem:[%s5350_s0 + $0x30] sm:$0xff]  ;;  %v216_v35 = vld [vmem:[%s5350_s0 + $0x640] sm:$0xff] }
   0xd   :  { %2636 = vmatpush.msra.mxu2 %v418_v8  ;;  %2637 = vmatpush.msra.mxu3 %v418_v8  ;;  %v221_v36 = vld [vmem:[%s5350_s0 + $0x668] sm:$0xff]  ;;  %v31_v37 = vld [vmem:[%s5350_s0 + $0x78] sm:$0xff]  ;;  %v24_v38 = vld [vmem:[%s5350_s0 + $0x40] sm:$0xff] }
   0xe   :  { %2431 = vmatmul.msk.f32.gmra.mxu1 %vm430_vm0, %v19_v9  ;;  %1025 = vmatpush.msra.mxu0 %v417_v10  ;;  %v218_v39 = vld [vmem:[%s5350_s0 + $0x650] sm:$0xff]  ;;  %v223_v40 = vld [vmem:[%s5350_s0 + $0x678] sm:$0xff]  ;;  %v33_v41 = vld [vmem:[%s5350_s0 + $0x88] sm:$0xff] }
   0xf   :  { %2638 = vmatpush.msra.mxu2 %v417_v10  ;;  %2639 = vmatpush.msra.mxu3 %v417_v10  ;;  %v26_v42 = vld [vmem:[%s5350_s0 + $0x50] sm:$0xff]  ;;  %v220_v43 = vld [vmem:[%s5350_s0 + $0x660] sm:$0xff]  ;;  %v225_v44 = vld [vmem:[%s5350_s0 + $0x688] sm:$0xff] }
  0x10   :  { %1026 = vmatpush.msra.mxu0 %v416_v11  ;;  %v35_v45 = vld [vmem:[%s5350_s0 + $0x98] sm:$0xff]  ;;  %v28_v46 = vld [vmem:[%s5350_s0 + $0x60] sm:$0xff]  ;;  %v222_v47 = vld [vmem:[%s5350_s0 + $0x670] sm:$0xff] }
  0x11   :  { %2640 = vmatpush.msra.mxu2 %v416_v11  ;;  %2641 = vmatpush.msra.mxu3 %v416_v11  ;;  %v227_v48 = vld [vmem:[%s5350_s0 + $0x698] sm:$0xff]  ;;  %v37_v49 = vld [vmem:[%s5350_s0 + $0xa8] sm:$0xff]  ;;  %v30_v50 = vld [vmem:[%s5350_s0 + $0x70] sm:$0xff] }
  0x12   :  { %1027 = vmatpush.msra.mxu0 %v415_v12  ;;  %v224_v51 = vld [vmem:[%s5350_s0 + $0x680] sm:$0xff]  ;;  %v229_v52 = vld [vmem:[%s5350_s0 + $0x6a8] sm:$0xff]  ;;  %v39_v53 = vld [vmem:[%s5350_s0 + $0xb8] sm:$0xff] }
  0x13   :  { %2642 = vmatpush.msra.mxu2 %v415_v12  ;;  %2643 = vmatpush.msra.mxu3 %v415_v12  ;;  %v32_v54 = vld [vmem:[%s5350_s0 + $0x80] sm:$0xff]  ;;  %v226_v55 = vld [vmem:[%s5350_s0 + $0x690] sm:$0xff]  ;;  %v231_v56 = vld [vmem:[%s5350_s0 + $0x6b8] sm:$0xff] }
  0x14   :  { %1028 = vmatpush.msra.mxu0 %v414_v13  ;;  %v41_v57 = vld [vmem:[%s5350_s0 + $0xc8] sm:$0xff]  ;;  %v34_v58 = vld [vmem:[%s5350_s0 + $0x90] sm:$0xff]  ;;  %v228_v59 = vld [vmem:[%s5350_s0 + $0x6a0] sm:$0xff] }
  0x15   :  { %2644 = vmatpush.msra.mxu2 %v414_v13  ;;  %2645 = vmatpush.msra.mxu3 %v414_v13  ;;  %v233_v60 = vld [vmem:[%s5350_s0 + $0x6c8] sm:$0xff]  ;;  %v43_v61 = vld [vmem:[%s5350_s0 + $0xd8] sm:$0xff]  ;;  %v36_v62 = vld [vmem:[%s5350_s0 + $0xa0] sm:$0xff] }
  0x16   :  { %2432 = vmatmul.msk.f32.gmra.mxu1 %vm430_vm0, %v21_v14  ;;  %1029 = vmatpush.msra.mxu0 %v413_v15  ;;  %v230_v63 = vld [vmem:[%s5350_s0 + $0x6b0] sm:$0xff]  ;;  %v235_v0 = vld [vmem:[%s5350_s0 + $0x6d8] sm:$0xff]  ;;  %v237_v5 = vld [vmem:[%s5350_s0 + $0x6e8] sm:$0xff] }
  0x17   :  { %2646 = vmatpush.msra.mxu2 %v413_v15  ;;  %2647 = vmatpush.msra.mxu3 %v413_v15  ;;  %v38_v2 = vld [vmem:[%s5350_s0 + $0xb0] sm:$0xff]  ;;  %v47_v6 = vld [vmem:[%s5350_s0 + $0xf8] sm:$0xff]  ;;  %v40_v7 = vld [vmem:[%s5350_s0 + $0xc0] sm:$0xff] }
  0x18   :  { %1030 = vmatpush.msra.mxu0 %v412_v16  ;;  %v234_v8 = vld [vmem:[%s5350_s0 + $0x6d0] sm:$0xff]  ;;  %v239_v9 = vld [vmem:[%s5350_s0 + $0x6f8] sm:$0xff]  ;;  %v49_v11 = vld [vmem:[%s5350_s0 + $0x108] sm:$0xff] }
  0x19   :  { %2648 = vmatpush.msra.mxu2 %v412_v16  ;;  %2649 = vmatpush.msra.mxu3 %v412_v16  ;;  %v42_v12 = vld [vmem:[%s5350_s0 + $0xd0] sm:$0xff]  ;;  %v236_v13 = vld [vmem:[%s5350_s0 + $0x6e0] sm:$0xff]  ;;  %v241_v14 = vld [vmem:[%s5350_s0 + $0x708] sm:$0xff] }
  0x1a   :  { %1031 = vmatpush.msra.mxu0 %v411_v17  ;;  %v51_v16 = vld [vmem:[%s5350_s0 + $0x118] sm:$0xff] }
  0x1b   :  { %2650 = vmatpush.msra.mxu2 %v411_v17  ;;  %2651 = vmatpush.msra.mxu3 %v411_v17  ;;  %v44_v17 = vld [vmem:[%s5350_s0 + $0xe0] sm:$0xff] }
  0x1c   :  { %1032 = vmatpush.msra.mxu0 %v410_v18 }
  0x1d   :  { %2652 = vmatpush.msra.mxu2 %v410_v18  ;;  %2653 = vmatpush.msra.mxu3 %v410_v18  ;;  %v238_v18 = vld [vmem:[%s5350_s0 + $0x6f0] sm:$0xff] }
  0x1e   :  { %2433 = vmatmul.msk.f32.gmra.mxu1 %vm430_vm0, %v23_v19  ;;  %1033 = vmatpush.msra.mxu0 %v409_v20  ;;  %v243_v19 = vld [vmem:[%s5350_s0 + $0x718] sm:$0xff] }
  0x1f   :  { %2654 = vmatpush.msra.mxu2 %v409_v20  ;;  %2655 = vmatpush.msra.mxu3 %v409_v20 }
  0x20   :  { %1034 = vmatpush.msra.mxu0 %v408_v21 }
  0x21   :  { %2656 = vmatpush.msra.mxu2 %v408_v21  ;;  %2657 = vmatpush.msra.mxu3 %v408_v21  ;;  %v53_v21 = vld [vmem:[%s5350_s0 + $0x128] sm:$0xff] }
  0x22   :  { %1035 = vmatmul.f32.vlgmr.msra.gmra.mxu0 %v16_v22  ;;  %1326 = vmatmul.f32.vlgmr.msra.gmra.mxu2 %v210_v23  ;;  %v46_v22 = vld [vmem:[%s5350_s0 + $0xf0] sm:$0xff]  ;;  %v240_v23 = vld [vmem:[%s5350_s0 + $0x700] sm:$0xff] }
  0x23   :  { %1620 = vmatmul.f32.vlgmr.msra.gmra.mxu3 %v406_v24  ;;  %v245_v24 = vld [vmem:[%s5350_s0 + $0x728] sm:$0xff] }
  0x24   :  { %2658 = vmatpush.msrb.mxu3 %v2690_v1  ;;  %v45_v1 = vld [vmem:[%s5350_s0 + $0xe8] sm:$0xff] }
  0x26   :  { %2434 = vmatmul.msk.f32.gmra.mxu1 %vm430_vm0, %v25_v25  ;;  %2659 = vmatpush.msrb.mxu3 %v2698_v3  ;;  %v232_v3 = vld [vmem:[%s5350_s0 + $0x6c0] sm:$0xff] }
  0x2a   :  { %1038 = vmatmul.f32.gmra.mxu0 %v18_v26  ;;  %1329 = vmatmul.f32.gmra.mxu2 %v212_v27  ;;  %v55_v26 = vld [vmem:[%s5350_s0 + $0x138] sm:$0xff]  ;;  %v2987_v27 = vld [vmem:[#allocation2] ss:$0 sm:$0xff] }
  0x2b   :  { %2530 = vmatmul.msk.f32.vlgmr.msrb.gmra.mxu3 %vm430_vm0, %v217_v28 }
  0x2e   :  { %2435 = vmatmul.msk.f32.gmra.mxu1 %vm430_vm0, %v27_v29  ;;  %v48_v29 = vld [vmem:[%s5350_s0 + $0x100] sm:$0xff] }
  0x32   :  { %1041 = vmatmul.f32.gmra.mxu0 %v20_v30  ;;  %1332 = vmatmul.f32.gmra.mxu2 %v214_v31  ;;  %v242_v30 = vld [vmem:[%s5350_s0 + $0x710] sm:$0xff] }
  0x33   :  { %2531 = vmatmul.msk.f32.gmra.mxu3 %vm430_vm0, %v219_v32  ;;  %v247_v32 = vld [vmem:[%s5350_s0 + $0x738] sm:$0xff] }
  0x36   :  { %2436 = vmatmul.msk.f32.gmra.mxu1 %vm430_vm0, %v29_v33 }
  0x3a   :  { %1044 = vmatmul.f32.gmra.mxu0 %v22_v34  ;;  %1335 = vmatmul.f32.gmra.mxu2 %v216_v35  ;;  %v57_v35 = vld [vmem:[%s5350_s0 + $0x148] sm:$0xff] }
  0x3b   :  { %2532 = vmatmul.msk.f32.gmra.mxu3 %vm430_vm0, %v221_v36 }
  0x3e   :  { %2437 = vmatmul.msk.f32.gmra.mxu1 %vm430_vm0, %v31_v37 }
  0x42   :  { %1047 = vmatmul.f32.gmra.mxu0 %v24_v38  ;;  %1338 = vmatmul.f32.gmra.mxu2 %v218_v39  ;;  %v50_v39 = vld [vmem:[%s5350_s0 + $0x110] sm:$0xff] }
  0x43   :  { %2533 = vmatmul.msk.f32.gmra.mxu3 %vm430_vm0, %v223_v40  ;;  %v244_v40 = vld [vmem:[%s5350_s0 + $0x720] sm:$0xff] }
  0x46   :  { %2438 = vmatmul.msk.f32.gmra.mxu1 %vm430_vm0, %v33_v41 }
  0x4a   :  { %1050 = vmatmul.f32.gmra.mxu0 %v26_v42  ;;  %1341 = vmatmul.f32.gmra.mxu2 %v220_v43  ;;  %v249_v42 = vld [vmem:[%s5350_s0 + $0x748] sm:$0xff] }
  0x4b   :  { %2534 = vmatmul.msk.f32.gmra.mxu3 %vm430_vm0, %v225_v44 }
  0x4e   :  { %2439 = vmatmul.msk.f32.gmra.mxu1 %vm430_vm0, %v35_v45  ;;  %v59_v45 = vld [vmem:[%s5350_s0 + $0x158] sm:$0xff] }
  0x52   :  { %1053 = vmatmul.f32.gmra.mxu0 %v28_v46  ;;  %1344 = vmatmul.f32.gmra.mxu2 %v222_v47 }
  0x53   :  { %2535 = vmatmul.msk.f32.gmra.mxu3 %vm430_vm0, %v227_v48 }
  0x56   :  { %2440 = vmatmul.msk.f32.gmra.mxu1 %vm430_vm0, %v37_v49  ;;  %v52_v49 = vld [vmem:[%s5350_s0 + $0x120] sm:$0xff] }
  0x5a   :  { %1056 = vmatmul.f32.gmra.mxu0 %v30_v50  ;;  %1347 = vmatmul.f32.gmra.mxu2 %v224_v51  ;;  %v246_v50 = vld [vmem:[%s5350_s0 + $0x730] sm:$0xff] }
  0x5b   :  { %2536 = vmatmul.msk.f32.gmra.mxu3 %vm430_vm0, %v229_v52  ;;  %v251_v52 = vld [vmem:[%s5350_s0 + $0x758] sm:$0xff] }
  0x5e   :  { %2441 = vmatmul.msk.f32.gmra.mxu1 %vm430_vm0, %v39_v53 }
  0x62   :  { %1059 = vmatmul.f32.gmra.mxu0 %v32_v54  ;;  %1350 = vmatmul.f32.gmra.mxu2 %v226_v55  ;;  %v61_v55 = vld [vmem:[%s5350_s0 + $0x168] sm:$0xff] }
  0x63   :  { %2537 = vmatmul.msk.f32.gmra.mxu3 %vm430_vm0, %v231_v56 }
  0x66   :  { %2442 = vmatmul.msk.f32.gmra.mxu1 %vm430_vm0, %v41_v57 }
  0x6a   :  { %1062 = vmatmul.f32.gmra.mxu0 %v34_v58  ;;  %1353 = vmatmul.f32.gmra.mxu2 %v228_v59  ;;  %v54_v59 = vld [vmem:[%s5350_s0 + $0x130] sm:$0xff] }
  0x6b   :  { %2538 = vmatmul.msk.f32.gmra.mxu3 %vm430_vm0, %v233_v60  ;;  %v248_v60 = vld [vmem:[%s5350_s0 + $0x740] sm:$0xff] }
  0x6e   :  { %2443 = vmatmul.msk.f32.gmra.mxu1 %vm430_vm0, %v43_v61 }
  0x72   :  { %1065 = vmatmul.f32.gmra.mxu0 %v36_v62  ;;  %1356 = vmatmul.f32.gmra.mxu2 %v230_v63  ;;  %v253_v62 = vld [vmem:[%s5350_s0 + $0x768] sm:$0xff] }
  0x73   :  { %2539 = vmatmul.msk.f32.gmra.mxu3 %vm430_vm0, %v235_v0 }
  0x76   :  { %2444 = vmatmul.msk.f32.gmra.mxu1 %vm430_vm0, %v45_v1  ;;  %v63_v1 = vld [vmem:[%s5350_s0 + $0x178] sm:$0xff] }
  0x7a   :  { %1068 = vmatmul.f32.gmra.mxu0 %v38_v2  ;;  %1359 = vmatmul.f32.gmra.mxu2 %v232_v3 }
  0x7b   :  { %2540 = vmatmul.msk.f32.gmra.mxu3 %vm430_vm0, %v237_v5 }
  0x7e   :  { %2445 = vmatmul.msk.f32.gmra.mxu1 %vm430_vm0, %v47_v6  ;;  %v56_v6 = vld [vmem:[%s5350_s0 + $0x140] sm:$0xff] }
  0x82   :  { %1071 = vmatmul.f32.gmra.mxu0 %v40_v7  ;;  %1362 = vmatmul.f32.gmra.mxu2 %v234_v8  ;;  %v250_v7 = vld [vmem:[%s5350_s0 + $0x750] sm:$0xff] }
  0x83   :  { %2541 = vmatmul.msk.f32.gmra.mxu3 %vm430_vm0, %v239_v9  ;;  %v1641_v10 = vpop.f32.mrf.mxu1 }
  0x86   :  { %2446 = vmatmul.msk.f32.gmra.mxu1 %vm430_vm0, %v49_v11 }
  0x8a   :  { %1074 = vmatmul.f32.gmra.mxu0 %v42_v12  ;;  %1365 = vmatmul.f32.gmra.mxu2 %v236_v13  ;;  %v65_v13 = vld [vmem:[%s5350_s0 + $0x188] sm:$0xff] }
  0x8b   :  { %2542 = vmatmul.msk.f32.gmra.mxu3 %vm430_vm0, %v241_v14  ;;  %v1644_v15 = vpop.f32.mrf.mxu1 }
  0x8e   :  { %2447 = vmatmul.msk.f32.gmra.mxu1 %vm430_vm0, %v51_v16 }
  0x92   :  { %1077 = vmatmul.f32.gmra.mxu0 %v44_v17  ;;  %1368 = vmatmul.f32.gmra.mxu2 %v238_v18  ;;  %v58_v18 = vld [vmem:[%s5350_s0 + $0x150] sm:$0xff] }
  0x93   :  { %2543 = vmatmul.msk.f32.gmra.mxu3 %vm430_vm0, %v243_v19  ;;  %v1647_v20 = vpop.f32.mrf.mxu1  ;;  %v252_v19 = vld [vmem:[%s5350_s0 + $0x760] sm:$0xff] }
  0x96   :  { %2448 = vmatmul.msk.f32.gmra.mxu1 %vm430_vm0, %v53_v21 }
  0x9a   :  { %1080 = vmatmul.f32.gmra.mxu0 %v46_v22  ;;  %1371 = vmatmul.f32.gmra.mxu2 %v240_v23  ;;  %v257_v22 = vld [vmem:[%s5350_s0 + $0x788] sm:$0xff] }
  0x9b   :  { %2544 = vmatmul.msk.f32.gmra.mxu3 %vm430_vm0, %v245_v24  ;;  %v1650_v25 = vpop.f32.mrf.mxu1 }
  0x9e   :  { %2449 = vmatmul.msk.f32.gmra.mxu1 %vm430_vm0, %v55_v26 }
  0x9f   :  { %v1036_v28 = vpop.f32.mrf.mxu0 }
  0xa0   :  { %v1037_v31 = vadd.f32 %v2987_v27, %v1036_v28 }
  0xa2   :  { %v1642_v33 = vadd.f32 %v1641_v10, %v1037_v31  ;;  %1083 = vmatmul.f32.gmra.mxu0 %v48_v29  ;;  %1374 = vmatmul.f32.gmra.mxu2 %v242_v30  ;;  %v255_v10 = vld [vmem:[%s5350_s0 + $0x778] sm:$0xff]  ;;  %v60_v31 = vld [vmem:[%s5350_s0 + $0x160] sm:$0xff] }
  0xa3   :  { %2545 = vmatmul.msk.f32.gmra.mxu3 %vm430_vm0, %v247_v32  ;;  %v1653_v34 = vpop.f32.mrf.mxu1  ;;  %v254_v32 = vld [vmem:[%s5350_s0 + $0x770] sm:$0xff] }
  0xa4   :  { %2230 = vst.msk [vmem:[%s5352_s3] sm:$0xff] %vm2229_vm1, %v1642_v33 }
  0xa5   :  { %v3008_v36 = vpop.f32.mrf.mxu2 }
  0xa6   :  { %v3010_v37 = vpop.f32.mrf.mxu3  ;;  %2450 = vmatmul.msk.f32.gmra.mxu1 %vm430_vm0, %v57_v35  ;;  %v259_v35 = vld [vmem:[%s5350_s0 + $0x798] sm:$0xff] }
  0xa7   :  { %v1039_v38 = vpop.f32.mrf.mxu0 }
  0xa8   :  { %v1040_v41 = vadd.f32 %v2987_v27, %v1039_v38 }
  0xaa   :  { %v1645_v43 = vadd.f32 %v1644_v15, %v1040_v41  ;;  %1086 = vmatmul.f32.gmra.mxu0 %v50_v39  ;;  %1377 = vmatmul.f32.gmra.mxu2 %v244_v40  ;;  %v69_v40 = vld [vmem:[%s5350_s0 + $0x1a8] sm:$0xff] }
  0xab   :  { %2546 = vmatmul.msk.f32.gmra.mxu3 %vm430_vm0, %v249_v42  ;;  %v1656_v44 = vpop.f32.mrf.mxu1 }
  0xac   :  { %2231 = vst.msk [vmem:[%s5352_s3 + $0x8] sm:$0xff] %vm2229_vm1, %v1645_v43 }
  0xad   :  { %v3031_v46 = vpop.f32.mrf.mxu2 }
  0xae   :  { %v1941_v47 = vpop.f32.mrf.mxu3  ;;  %2451 = vmatmul.msk.f32.gmra.mxu1 %vm430_vm0, %v59_v45  ;;  %v62_v45 = vld [vmem:[%s5350_s0 + $0x170] sm:$0xff] }
  0xaf   :  { %v1042_v48 = vpop.f32.mrf.mxu0 }
  0xb0   :  { %v1043_v51 = vadd.f32 %v2987_v27, %v1042_v48 }
  0xb2   :  { %v1648_v53 = vadd.f32 %v1647_v20, %v1043_v51  ;;  %1089 = vmatmul.f32.gmra.mxu0 %v52_v49  ;;  %1380 = vmatmul.f32.gmra.mxu2 %v246_v50  ;;  %v261_v50 = vld [vmem:[%s5350_s0 + $0x7a8] sm:$0xff] }
  0xb3   :  { %2547 = vmatmul.msk.f32.gmra.mxu3 %vm430_vm0, %v251_v52  ;;  %v3045_v54 = vpop.f32.mrf.mxu1 }
  0xb4   :  { %2232 = vst.msk [vmem:[%s5352_s3 + $0x10] sm:$0xff] %vm2229_vm1, %v1648_v53  ;;  %v71_v53 = vld [vmem:[%s5350_s0 + $0x1b8] sm:$0xff] }
  0xb5   :  { %v3054_v56 = vpop.f32.mrf.mxu2 }
  0xb6   :  { %v1944_v57 = vpop.f32.mrf.mxu3  ;;  %2452 = vmatmul.msk.f32.gmra.mxu1 %vm430_vm0, %v61_v55 }
  0xb7   :  { %v1045_v58 = vpop.f32.mrf.mxu0 }
  0xb8   :  { %v1046_v61 = vadd.f32 %v2987_v27, %v1045_v58 }
  0xba   :  { %v1651_v63 = vadd.f32 %v1650_v25, %v1046_v61  ;;  %1092 = vmatmul.f32.gmra.mxu0 %v54_v59  ;;  %1383 = vmatmul.f32.gmra.mxu2 %v248_v60  ;;  %v67_v25 = vld [vmem:[%s5350_s0 + $0x198] sm:$0xff]  ;;  %v64_v59 = vld [vmem:[%s5350_s0 + $0x180] sm:$0xff]  ;;  %v258_v60 = vld [vmem:[%s5350_s0 + $0x790] sm:$0xff] }
  0xbb   :  { %2548 = vmatmul.msk.f32.gmra.mxu3 %vm430_vm0, %v253_v62  ;;  %v3068_v0 = vpop.f32.mrf.mxu1 }
  0xbc   :  { %2233 = vst.msk [vmem:[%s5352_s3 + $0x18] sm:$0xff] %vm2229_vm1, %v1651_v63  ;;  %v263_v63 = vld [vmem:[%s5350_s0 + $0x7b8] sm:$0xff] }
  0xbd   :  { %v1336_v2 = vpop.f32.mrf.mxu2 }
  0xbe   :  { %v1337_v3 = vadd.f32 %v2987_v27, %v1336_v2  ;;  %v1947_v4 = vpop.f32.mrf.mxu3  ;;  %2453 = vmatmul.msk.f32.gmra.mxu1 %vm430_vm0, %v63_v1  ;;  %v73_v2 = vld [vmem:[%s5350_s0 + $0x1c8] sm:$0xff] }
  0xbf   :  { %v1048_v5 = vpop.f32.mrf.mxu0 }
  0xc0   :  { %v1942_v8 = vadd.f32 %v1941_v47, %v1337_v3  ;;  %v1049_v9 = vadd.f32 %v2987_v27, %v1048_v5  ;;  %v256_v47 = vld [vmem:[%s5350_s0 + $0x780] sm:$0xff] }
  0xc2   :  { %2330 = vst.msk [vmem:[%s5352_s3 + $0x320] sm:$0xff] %vm2229_vm1, %v1942_v8  ;;  %v1654_v11 = vadd.f32 %v1653_v34, %v1049_v9  ;;  %1095 = vmatmul.f32.gmra.mxu0 %v56_v6  ;;  %1386 = vmatmul.f32.gmra.mxu2 %v250_v7  ;;  %v66_v7 = vld [vmem:[%s5350_s0 + $0x190] sm:$0xff]  ;;  %v260_v8 = vld [vmem:[%s5350_s0 + $0x7a0] sm:$0xff] }
  0xc3   :  { %2549 = vmatmul.msk.f32.gmra.mxu3 %vm430_vm0, %v255_v10  ;;  %v3094_v12 = vpop.f32.mrf.mxu1 }
  0xc4   :  { %2234 = vst.msk [vmem:[%s5352_s3 + $0x20] sm:$0xff] %vm2229_vm1, %v1654_v11  ;;  %v265_v11 = vld [vmem:[%s5350_s0 + $0x7c8] sm:$0xff] }
  0xc5   :  { %v1339_v14 = vpop.f32.mrf.mxu2 }
  0xc6   :  { %v1340_v15 = vadd.f32 %v2987_v27, %v1339_v14  ;;  %v1950_v16 = vpop.f32.mrf.mxu3  ;;  %2454 = vmatmul.msk.f32.gmra.mxu1 %vm430_vm0, %v65_v13  ;;  %v75_v14 = vld [vmem:[%s5350_s0 + $0x1d8] sm:$0xff] }
  0xc7   :  { %v1051_v17 = vpop.f32.mrf.mxu0 }
  0xc8   :  { %v1945_v20 = vadd.f32 %v1944_v57, %v1340_v15  ;;  %v1052_v21 = vadd.f32 %v2987_v27, %v1051_v17 }
  0xca   :  { %2331 = vst.msk [vmem:[%s5352_s3 + $0x328] sm:$0xff] %vm2229_vm1, %v1945_v20  ;;  %v1657_v23 = vadd.f32 %v1656_v44, %v1052_v21  ;;  %1098 = vmatmul.f32.gmra.mxu0 %v58_v18  ;;  %1389 = vmatmul.f32.gmra.mxu2 %v252_v19  ;;  %v68_v19 = vld [vmem:[%s5350_s0 + $0x1a0] sm:$0xff]  ;;  %v262_v20 = vld [vmem:[%s5350_s0 + $0x7b0] sm:$0xff] }
  0xcb   :  { %2550 = vmatmul.msk.f32.gmra.mxu3 %vm430_vm0, %v257_v22  ;;  %v3120_v24 = vpop.f32.mrf.mxu1 }
  0xcc   :  { %2235 = vst.msk [vmem:[%s5352_s3 + $0x28] sm:$0xff] %vm2229_vm1, %v1657_v23  ;;  %v267_v23 = vld [vmem:[%s5350_s0 + $0x7d8] sm:$0xff] }
  0xcd   :  { %v1342_v26 = vpop.f32.mrf.mxu2 }
  0xce   :  { %v1343_v28 = vadd.f32 %v2987_v27, %v1342_v26  ;;  %v1953_v29 = vpop.f32.mrf.mxu3  ;;  %2455 = vmatmul.msk.f32.gmra.mxu1 %vm430_vm0, %v67_v25  ;;  %v77_v26 = vld [vmem:[%s5350_s0 + $0x1e8] sm:$0xff] }
  0xcf   :  { %v1054_v30 = vpop.f32.mrf.mxu0 }
  0xd0   :  { %v1948_v33 = vadd.f32 %v1947_v4, %v1343_v28  ;;  %v1055_v34 = vadd.f32 %v2987_v27, %v1054_v30 }
  0xd2   :  { %2332 = vst.msk [vmem:[%s5352_s3 + $0x330] sm:$0xff] %vm2229_vm1, %v1948_v33  ;;  %v1660_v38 = vadd.f32 %v3045_v54, %v1055_v34  ;;  %1101 = vmatmul.f32.gmra.mxu0 %v60_v31  ;;  %1392 = vmatmul.f32.gmra.mxu2 %v254_v32  ;;  %v70_v32 = vld [vmem:[%s5350_s0 + $0x1b0] sm:$0xff]  ;;  %v264_v33 = vld [vmem:[%s5350_s0 + $0x7c0] sm:$0xff] }
  0xd3   :  { %2551 = vmatmul.msk.f32.gmra.mxu3 %vm430_vm0, %v259_v35  ;;  %v3147_v39 = vpop.f32.mrf.mxu1 }
  0xd4   :  { %2236 = vst.msk [vmem:[%s5352_s3 + $0x30] sm:$0xff] %vm2229_vm1, %v1660_v38  ;;  %v269_v38 = vld [vmem:[%s5350_s0 + $0x7e8] sm:$0xff] }
  0xd5   :  { %v1345_v41 = vpop.f32.mrf.mxu2 }
  0xd6   :  { %v1346_v42 = vadd.f32 %v2987_v27, %v1345_v41  ;;  %v1956_v43 = vpop.f32.mrf.mxu3  ;;  %2456 = vmatmul.msk.f32.gmra.mxu1 %vm430_vm0, %v69_v40  ;;  %v79_v41 = vld [vmem:[%s5350_s0 + $0x1f8] sm:$0xff] }
  0xd7   :  { %v1057_v44 = vpop.f32.mrf.mxu0 }
  0xd8   :  { %v1951_v48 = vadd.f32 %v1950_v16, %v1346_v42  ;;  %v1058_v49 = vadd.f32 %v2987_v27, %v1057_v44 }
  0xda   :  { %2333 = vst.msk [vmem:[%s5352_s3 + $0x338] sm:$0xff] %vm2229_vm1, %v1951_v48  ;;  %v1663_v51 = vadd.f32 %v3068_v0, %v1058_v49  ;;  %1104 = vmatmul.f32.gmra.mxu0 %v62_v45  ;;  %1395 = vmatmul.f32.gmra.mxu2 %v256_v47  ;;  %v72_v47 = vld [vmem:[%s5350_s0 + $0x1c0] sm:$0xff]  ;;  %v266_v48 = vld [vmem:[%s5350_s0 + $0x7d0] sm:$0xff] }
  0xdb   :  { %2552 = vmatmul.msk.f32.gmra.mxu3 %vm430_vm0, %v261_v50  ;;  %v3174_v52 = vpop.f32.mrf.mxu1 }
  0xdc   :  { %2237 = vst.msk [vmem:[%s5352_s3 + $0x38] sm:$0xff] %vm2229_vm1, %v1663_v51  ;;  %v271_v51 = vld [vmem:[%s5350_s0 + $0x7f8] sm:$0xff] }
  0xdd   :  { %v1348_v54 = vpop.f32.mrf.mxu2 }
  0xde   :  { %v1349_v55 = vadd.f32 %v2987_v27, %v1348_v54  ;;  %v1959_v57 = vpop.f32.mrf.mxu3  ;;  %2457 = vmatmul.msk.f32.gmra.mxu1 %vm430_vm0, %v71_v53  ;;  %v81_v54 = vld [vmem:[%s5350_s0 + $0x208] sm:$0xff] }
  0xdf   :  { %v1060_v58 = vpop.f32.mrf.mxu0 }
  0xe0   :  { %v1954_v61 = vadd.f32 %v1953_v29, %v1349_v55  ;;  %v1061_v62 = vadd.f32 %v2987_v27, %v1060_v58 }
  0xe2   :  { %2334 = vst.msk [vmem:[%s5352_s3 + $0x340] sm:$0xff] %vm2229_vm1, %v1954_v61  ;;  %v1666_v0 = vadd.f32 %v3094_v12, %v1061_v62  ;;  %1107 = vmatmul.f32.gmra.mxu0 %v64_v59  ;;  %1398 = vmatmul.f32.gmra.mxu2 %v258_v60  ;;  %v74_v60 = vld [vmem:[%s5350_s0 + $0x1d0] sm:$0xff]  ;;  %v268_v61 = vld [vmem:[%s5350_s0 + $0x7e0] sm:$0xff] }
  0xe3   :  { %2553 = vmatmul.msk.f32.gmra.mxu3 %vm430_vm0, %v263_v63  ;;  %v3201_v1 = vpop.f32.mrf.mxu1 }
  0xe4   :  { %2238 = vst.msk [vmem:[%s5352_s3 + $0x40] sm:$0xff] %vm2229_vm1, %v1666_v0  ;;  %v273_v0 = vld [vmem:[%s5350_s0 + $0x808] sm:$0xff] }
  0xe5   :  { %v1351_v3 = vpop.f32.mrf.mxu2 }
  0xe6   :  { %v1352_v4 = vadd.f32 %v2987_v27, %v1351_v3  ;;  %v1962_v5 = vpop.f32.mrf.mxu3  ;;  %2458 = vmatmul.msk.f32.gmra.mxu1 %vm430_vm0, %v73_v2  ;;  %v83_v3 = vld [vmem:[%s5350_s0 + $0x218] sm:$0xff] }
  0xe7   :  { %v1063_v6 = vpop.f32.mrf.mxu0 }
  0xe8   :  { %v1957_v9 = vadd.f32 %v1956_v43, %v1352_v4  ;;  %v1064_v10 = vadd.f32 %v2987_v27, %v1063_v6 }
  0xea   :  { %2335 = vst.msk [vmem:[%s5352_s3 + $0x348] sm:$0xff] %vm2229_vm1, %v1957_v9  ;;  %v1669_v12 = vadd.f32 %v3120_v24, %v1064_v10  ;;  %1110 = vmatmul.f32.gmra.mxu0 %v66_v7  ;;  %1401 = vmatmul.f32.gmra.mxu2 %v260_v8  ;;  %v76_v8 = vld [vmem:[%s5350_s0 + $0x1e0] sm:$0xff]  ;;  %v270_v9 = vld [vmem:[%s5350_s0 + $0x7f0] sm:$0xff] }
  0xeb   :  { %2554 = vmatmul.msk.f32.gmra.mxu3 %vm430_vm0, %v265_v11  ;;  %v3228_v13 = vpop.f32.mrf.mxu1 }
  0xec   :  { %2239 = vst.msk [vmem:[%s5352_s3 + $0x48] sm:$0xff] %vm2229_vm1, %v1669_v12  ;;  %v275_v12 = vld [vmem:[%s5350_s0 + $0x818] sm:$0xff] }
  0xed   :  { %v1354_v15 = vpop.f32.mrf.mxu2 }
  0xee   :  { %v1355_v16 = vadd.f32 %v2987_v27, %v1354_v15  ;;  %v1965_v17 = vpop.f32.mrf.mxu3  ;;  %2459 = vmatmul.msk.f32.gmra.mxu1 %vm430_vm0, %v75_v14  ;;  %v85_v15 = vld [vmem:[%s5350_s0 + $0x228] sm:$0xff] }
  0xef   :  { %v1066_v18 = vpop.f32.mrf.mxu0 }
  0xf0   :  { %v1960_v21 = vadd.f32 %v1959_v57, %v1355_v16  ;;  %v1067_v22 = vadd.f32 %v2987_v27, %v1066_v18 }
  0xf2   :  { %2336 = vst.msk [vmem:[%s5352_s3 + $0x350] sm:$0xff] %vm2229_vm1, %v1960_v21  ;;  %v1672_v24 = vadd.f32 %v3147_v39, %v1067_v22  ;;  %1113 = vmatmul.f32.gmra.mxu0 %v68_v19  ;;  %1404 = vmatmul.f32.gmra.mxu2 %v262_v20  ;;  %v78_v20 = vld [vmem:[%s5350_s0 + $0x1f0] sm:$0xff]  ;;  %v272_v21 = vld [vmem:[%s5350_s0 + $0x800] sm:$0xff] }
  0xf3   :  { %2555 = vmatmul.msk.f32.gmra.mxu3 %vm430_vm0, %v267_v23  ;;  %v3255_v25 = vpop.f32.mrf.mxu1 }
  0xf4   :  { %2240 = vst.msk [vmem:[%s5352_s3 + $0x50] sm:$0xff] %vm2229_vm1, %v1672_v24  ;;  %v277_v24 = vld [vmem:[%s5350_s0 + $0x828] sm:$0xff] }
  0xf5   :  { %v1357_v28 = vpop.f32.mrf.mxu2 }
  0xf6   :  { %v1358_v29 = vadd.f32 %v2987_v27, %v1357_v28  ;;  %v1968_v30 = vpop.f32.mrf.mxu3  ;;  %2460 = vmatmul.msk.f32.gmra.mxu1 %vm430_vm0, %v77_v26  ;;  %v87_v28 = vld [vmem:[%s5350_s0 + $0x238] sm:$0xff] }
  0xf7   :  { %v1069_v31 = vpop.f32.mrf.mxu0 }
  0xf8   :  { %v1963_v34 = vadd.f32 %v1962_v5, %v1358_v29  ;;  %v1070_v35 = vadd.f32 %v2987_v27, %v1069_v31 }
  0xfa   :  { %2337 = vst.msk [vmem:[%s5352_s3 + $0x358] sm:$0xff] %vm2229_vm1, %v1963_v34  ;;  %v1675_v39 = vadd.f32 %v3174_v52, %v1070_v35  ;;  %1116 = vmatmul.f32.gmra.mxu0 %v70_v32  ;;  %1407 = vmatmul.f32.gmra.mxu2 %v264_v33  ;;  %v80_v33 = vld [vmem:[%s5350_s0 + $0x200] sm:$0xff]  ;;  %v274_v34 = vld [vmem:[%s5350_s0 + $0x810] sm:$0xff] }
  0xfb   :  { %2556 = vmatmul.msk.f32.gmra.mxu3 %vm430_vm0, %v269_v38  ;;  %v3282_v40 = vpop.f32.mrf.mxu1 }
  0xfc   :  { %2241 = vst.msk [vmem:[%s5352_s3 + $0x58] sm:$0xff] %vm2229_vm1, %v1675_v39  ;;  %v279_v39 = vld [vmem:[%s5350_s0 + $0x838] sm:$0xff] }
  0xfd   :  { %v1360_v42 = vpop.f32.mrf.mxu2 }
  0xfe   :  { %v1361_v43 = vadd.f32 %v2987_v27, %v1360_v42  ;;  %v1971_v44 = vpop.f32.mrf.mxu3  ;;  %2461 = vmatmul.msk.f32.gmra.mxu1 %vm430_vm0, %v79_v41  ;;  %v89_v42 = vld [vmem:[%s5350_s0 + $0x248] sm:$0xff] }
  0xff   :  { %v1072_v45 = vpop.f32.mrf.mxu0 }
 0x100   :  { %v1966_v49 = vadd.f32 %v1965_v17, %v1361_v43  ;;  %v1073_v50 = vadd.f32 %v2987_v27, %v1072_v45 }
 0x102   :  { %2338 = vst.msk [vmem:[%s5352_s3 + $0x360] sm:$0xff] %vm2229_vm1, %v1966_v49  ;;  %v1678_v52 = vadd.f32 %v3201_v1, %v1073_v50  ;;  %1119 = vmatmul.f32.gmra.mxu0 %v72_v47  ;;  %1410 = vmatmul.f32.gmra.mxu2 %v266_v48  ;;  %v82_v48 = vld [vmem:[%s5350_s0 + $0x210] sm:$0xff]  ;;  %v276_v49 = vld [vmem:[%s5350_s0 + $0x820] sm:$0xff] }
 0x103   :  { %2557 = vmatmul.msk.f32.gmra.mxu3 %vm430_vm0, %v271_v51  ;;  %v3309_v53 = vpop.f32.mrf.mxu1 }
 0x104   :  { %2242 = vst.msk [vmem:[%s5352_s3 + $0x60] sm:$0xff] %vm2229_vm1, %v1678_v52  ;;  %v281_v52 = vld [vmem:[%s5350_s0 + $0x848] sm:$0xff] }
 0x105   :  { %v1363_v55 = vpop.f32.mrf.mxu2 }
 0x106   :  { %v1364_v57 = vadd.f32 %v2987_v27, %v1363_v55  ;;  %v1974_v58 = vpop.f32.mrf.mxu3  ;;  %2462 = vmatmul.msk.f32.gmra.mxu1 %vm430_vm0, %v81_v54  ;;  %v91_v55 = vld [vmem:[%s5350_s0 + $0x258] sm:$0xff] }
 0x107   :  { %v1075_v59 = vpop.f32.mrf.mxu0 }
 0x108   :  { %v1969_v62 = vadd.f32 %v1968_v30, %v1364_v57  ;;  %v1076_v63 = vadd.f32 %v2987_v27, %v1075_v59 }
 0x10a   :  { %2339 = vst.msk [vmem:[%s5352_s3 + $0x368] sm:$0xff] %vm2229_vm1, %v1969_v62  ;;  %v1681_v1 = vadd.f32 %v3228_v13, %v1076_v63  ;;  %1122 = vmatmul.f32.gmra.mxu0 %v74_v60  ;;  %1413 = vmatmul.f32.gmra.mxu2 %v268_v61  ;;  %v84_v61 = vld [vmem:[%s5350_s0 + $0x220] sm:$0xff]  ;;  %v278_v62 = vld [vmem:[%s5350_s0 + $0x830] sm:$0xff] }
 0x10b   :  { %2558 = vmatmul.msk.f32.gmra.mxu3 %vm430_vm0, %v273_v0  ;;  %v3336_v2 = vpop.f32.mrf.mxu1 }
 0x10c   :  { %2243 = vst.msk [vmem:[%s5352_s3 + $0x68] sm:$0xff] %vm2229_vm1, %v1681_v1  ;;  %v283_v1 = vld [vmem:[%s5350_s0 + $0x858] sm:$0xff] }
 0x10d   :  { %v1366_v4 = vpop.f32.mrf.mxu2 }
 0x10e   :  { %v1367_v5 = vadd.f32 %v2987_v27, %v1366_v4  ;;  %v1977_v6 = vpop.f32.mrf.mxu3  ;;  %2463 = vmatmul.msk.f32.gmra.mxu1 %vm430_vm0, %v83_v3  ;;  %v93_v4 = vld [vmem:[%s5350_s0 + $0x268] sm:$0xff] }
 0x10f   :  { %v1078_v7 = vpop.f32.mrf.mxu0 }
 0x110   :  { %v1972_v10 = vadd.f32 %v1971_v44, %v1367_v5  ;;  %v1079_v11 = vadd.f32 %v2987_v27, %v1078_v7 }
 0x112   :  { %2340 = vst.msk [vmem:[%s5352_s3 + $0x370] sm:$0xff] %vm2229_vm1, %v1972_v10  ;;  %v1684_v13 = vadd.f32 %v3255_v25, %v1079_v11  ;;  %1125 = vmatmul.f32.gmra.mxu0 %v76_v8  ;;  %1416 = vmatmul.f32.gmra.mxu2 %v270_v9  ;;  %v86_v9 = vld [vmem:[%s5350_s0 + $0x230] sm:$0xff]  ;;  %v280_v10 = vld [vmem:[%s5350_s0 + $0x840] sm:$0xff] }
 0x113   :  { %2559 = vmatmul.msk.f32.gmra.mxu3 %vm430_vm0, %v275_v12  ;;  %v3363_v14 = vpop.f32.mrf.mxu1 }
 0x114   :  { %2244 = vst.msk [vmem:[%s5352_s3 + $0x70] sm:$0xff] %vm2229_vm1, %v1684_v13  ;;  %v285_v13 = vld [vmem:[%s5350_s0 + $0x868] sm:$0xff] }
 0x115   :  { %v1369_v16 = vpop.f32.mrf.mxu2 }
 0x116   :  { %v1370_v17 = vadd.f32 %v2987_v27, %v1369_v16  ;;  %v1980_v18 = vpop.f32.mrf.mxu3  ;;  %2464 = vmatmul.msk.f32.gmra.mxu1 %vm430_vm0, %v85_v15  ;;  %v95_v16 = vld [vmem:[%s5350_s0 + $0x278] sm:$0xff] }
 0x117   :  { %v1081_v19 = vpop.f32.mrf.mxu0 }
 0x118   :  { %v1975_v22 = vadd.f32 %v1974_v58, %v1370_v17  ;;  %v1082_v23 = vadd.f32 %v2987_v27, %v1081_v19 }
 0x11a   :  { %2341 = vst.msk [vmem:[%s5352_s3 + $0x378] sm:$0xff] %vm2229_vm1, %v1975_v22  ;;  %v1687_v25 = vadd.f32 %v3282_v40, %v1082_v23  ;;  %1128 = vmatmul.f32.gmra.mxu0 %v78_v20  ;;  %1419 = vmatmul.f32.gmra.mxu2 %v272_v21  ;;  %v88_v21 = vld [vmem:[%s5350_s0 + $0x240] sm:$0xff]  ;;  %v282_v22 = vld [vmem:[%s5350_s0 + $0x850] sm:$0xff] }
 0x11b   :  { %2560 = vmatmul.msk.f32.gmra.mxu3 %vm430_vm0, %v277_v24  ;;  %v3390_v26 = vpop.f32.mrf.mxu1 }
 0x11c   :  { %2245 = vst.msk [vmem:[%s5352_s3 + $0x78] sm:$0xff] %vm2229_vm1, %v1687_v25  ;;  %v287_v25 = vld [vmem:[%s5350_s0 + $0x878] sm:$0xff] }
 0x11d   :  { %v1372_v29 = vpop.f32.mrf.mxu2 }
 0x11e   :  { %v1373_v30 = vadd.f32 %v2987_v27, %v1372_v29  ;;  %v1983_v31 = vpop.f32.mrf.mxu3  ;;  %2465 = vmatmul.msk.f32.gmra.mxu1 %vm430_vm0, %v87_v28  ;;  %v97_v29 = vld [vmem:[%s5350_s0 + $0x288] sm:$0xff] }
 0x11f   :  { %v1084_v32 = vpop.f32.mrf.mxu0 }
 0x120   :  { %v1978_v35 = vadd.f32 %v1977_v6, %v1373_v30  ;;  %v1085_v38 = vadd.f32 %v2987_v27, %v1084_v32 }
 0x122   :  { %2342 = vst.msk [vmem:[%s5352_s3 + $0x380] sm:$0xff] %vm2229_vm1, %v1978_v35  ;;  %v1690_v40 = vadd.f32 %v3309_v53, %v1085_v38  ;;  %1131 = vmatmul.f32.gmra.mxu0 %v80_v33  ;;  %1422 = vmatmul.f32.gmra.mxu2 %v274_v34  ;;  %v90_v34 = vld [vmem:[%s5350_s0 + $0x250] sm:$0xff]  ;;  %v284_v35 = vld [vmem:[%s5350_s0 + $0x860] sm:$0xff] }
 0x123   :  { %2561 = vmatmul.msk.f32.gmra.mxu3 %vm430_vm0, %v279_v39  ;;  %v3417_v41 = vpop.f32.mrf.mxu1 }
 0x124   :  { %2246 = vst.msk [vmem:[%s5352_s3 + $0x80] sm:$0xff] %vm2229_vm1, %v1690_v40  ;;  %v289_v40 = vld [vmem:[%s5350_s0 + $0x888] sm:$0xff] }
 0x125   :  { %v1375_v43 = vpop.f32.mrf.mxu2 }
 0x126   :  { %v1376_v44 = vadd.f32 %v2987_v27, %v1375_v43  ;;  %v1986_v45 = vpop.f32.mrf.mxu3  ;;  %2466 = vmatmul.msk.f32.gmra.mxu1 %vm430_vm0, %v89_v42  ;;  %v99_v43 = vld [vmem:[%s5350_s0 + $0x298] sm:$0xff] }
 0x127   :  { %v1087_v47 = vpop.f32.mrf.mxu0 }
 0x128   :  { %v1981_v50 = vadd.f32 %v1980_v18, %v1376_v44  ;;  %v1088_v51 = vadd.f32 %v2987_v27, %v1087_v47 }
 0x12a   :  { %2343 = vst.msk [vmem:[%s5352_s3 + $0x388] sm:$0xff] %vm2229_vm1, %v1981_v50  ;;  %v1693_v53 = vadd.f32 %v3336_v2, %v1088_v51  ;;  %1134 = vmatmul.f32.gmra.mxu0 %v82_v48  ;;  %1425 = vmatmul.f32.gmra.mxu2 %v276_v49  ;;  %v92_v49 = vld [vmem:[%s5350_s0 + $0x260] sm:$0xff]  ;;  %v286_v50 = vld [vmem:[%s5350_s0 + $0x870] sm:$0xff] }
 0x12b   :  { %2562 = vmatmul.msk.f32.gmra.mxu3 %vm430_vm0, %v281_v52  ;;  %v3444_v54 = vpop.f32.mrf.mxu1 }
 0x12c   :  { %2247 = vst.msk [vmem:[%s5352_s3 + $0x88] sm:$0xff] %vm2229_vm1, %v1693_v53  ;;  %v291_v53 = vld [vmem:[%s5350_s0 + $0x898] sm:$0xff] }
 0x12d   :  { %v1378_v57 = vpop.f32.mrf.mxu2 }
 0x12e   :  { %v1379_v58 = vadd.f32 %v2987_v27, %v1378_v57  ;;  %v1989_v59 = vpop.f32.mrf.mxu3  ;;  %2467 = vmatmul.msk.f32.gmra.mxu1 %vm430_vm0, %v91_v55  ;;  %v101_v57 = vld [vmem:[%s5350_s0 + $0x2a8] sm:$0xff] }
 0x12f   :  { %v1090_v60 = vpop.f32.mrf.mxu0 }
 0x130   :  { %v1984_v63 = vadd.f32 %v1983_v31, %v1379_v58  ;;  %v1091_v0 = vadd.f32 %v2987_v27, %v1090_v60 }
 0x132   :  { %2344 = vst.msk [vmem:[%s5352_s3 + $0x390] sm:$0xff] %vm2229_vm1, %v1984_v63  ;;  %v1696_v2 = vadd.f32 %v3363_v14, %v1091_v0  ;;  %1137 = vmatmul.f32.gmra.mxu0 %v84_v61  ;;  %1428 = vmatmul.f32.gmra.mxu2 %v278_v62  ;;  %v94_v62 = vld [vmem:[%s5350_s0 + $0x270] sm:$0xff]  ;;  %v288_v63 = vld [vmem:[%s5350_s0 + $0x880] sm:$0xff] }
 0x133   :  { %2563 = vmatmul.msk.f32.gmra.mxu3 %vm430_vm0, %v283_v1  ;;  %v3471_v3 = vpop.f32.mrf.mxu1 }
 0x134   :  { %2248 = vst.msk [vmem:[%s5352_s3 + $0x90] sm:$0xff] %vm2229_vm1, %v1696_v2  ;;  %v293_v2 = vld [vmem:[%s5350_s0 + $0x8a8] sm:$0xff] }
 0x135   :  { %v1381_v5 = vpop.f32.mrf.mxu2 }
 0x136   :  { %v1382_v6 = vadd.f32 %v2987_v27, %v1381_v5  ;;  %v1992_v7 = vpop.f32.mrf.mxu3  ;;  %2468 = vmatmul.msk.f32.gmra.mxu1 %vm430_vm0, %v93_v4  ;;  %v103_v5 = vld [vmem:[%s5350_s0 + $0x2b8] sm:$0xff] }
 0x137   :  { %v1093_v8 = vpop.f32.mrf.mxu0 }
 0x138   :  { %v1987_v11 = vadd.f32 %v1986_v45, %v1382_v6  ;;  %v1094_v12 = vadd.f32 %v2987_v27, %v1093_v8 }
 0x13a   :  { %2345 = vst.msk [vmem:[%s5352_s3 + $0x398] sm:$0xff] %vm2229_vm1, %v1987_v11  ;;  %v1699_v14 = vadd.f32 %v3390_v26, %v1094_v12  ;;  %1140 = vmatmul.f32.gmra.mxu0 %v86_v9  ;;  %1431 = vmatmul.f32.gmra.mxu2 %v280_v10  ;;  %v96_v10 = vld [vmem:[%s5350_s0 + $0x280] sm:$0xff]  ;;  %v290_v11 = vld [vmem:[%s5350_s0 + $0x890] sm:$0xff] }
 0x13b   :  { %2564 = vmatmul.msk.f32.gmra.mxu3 %vm430_vm0, %v285_v13  ;;  %v3498_v15 = vpop.f32.mrf.mxu1 }
 0x13c   :  { %2249 = vst.msk [vmem:[%s5352_s3 + $0x98] sm:$0xff] %vm2229_vm1, %v1699_v14  ;;  %v295_v14 = vld [vmem:[%s5350_s0 + $0x8b8] sm:$0xff] }
 0x13d   :  { %v1384_v17 = vpop.f32.mrf.mxu2 }
 0x13e   :  { %v1385_v18 = vadd.f32 %v2987_v27, %v1384_v17  ;;  %v1995_v19 = vpop.f32.mrf.mxu3  ;;  %2469 = vmatmul.msk.f32.gmra.mxu1 %vm430_vm0, %v95_v16  ;;  %v105_v17 = vld [vmem:[%s5350_s0 + $0x2c8] sm:$0xff] }
 0x13f   :  { %v1096_v20 = vpop.f32.mrf.mxu0 }
 0x140   :  { %v1990_v23 = vadd.f32 %v1989_v59, %v1385_v18  ;;  %v1097_v24 = vadd.f32 %v2987_v27, %v1096_v20 }
 0x142   :  { %2346 = vst.msk [vmem:[%s5352_s3 + $0x3a0] sm:$0xff] %vm2229_vm1, %v1990_v23  ;;  %v1702_v26 = vadd.f32 %v3417_v41, %v1097_v24  ;;  %1143 = vmatmul.f32.gmra.mxu0 %v88_v21  ;;  %1434 = vmatmul.f32.gmra.mxu2 %v282_v22  ;;  %v98_v22 = vld [vmem:[%s5350_s0 + $0x290] sm:$0xff]  ;;  %v292_v23 = vld [vmem:[%s5350_s0 + $0x8a0] sm:$0xff] }
 0x143   :  { %2565 = vmatmul.msk.f32.gmra.mxu3 %vm430_vm0, %v287_v25  ;;  %v3525_v28 = vpop.f32.mrf.mxu1 }
 0x144   :  { %2250 = vst.msk [vmem:[%s5352_s3 + $0xa0] sm:$0xff] %vm2229_vm1, %v1702_v26  ;;  %v297_v26 = vld [vmem:[%s5350_s0 + $0x8c8] sm:$0xff] }
 0x145   :  { %v1387_v30 = vpop.f32.mrf.mxu2 }
 0x146   :  { %v1388_v31 = vadd.f32 %v2987_v27, %v1387_v30  ;;  %v1998_v32 = vpop.f32.mrf.mxu3  ;;  %2470 = vmatmul.msk.f32.gmra.mxu1 %vm430_vm0, %v97_v29  ;;  %v107_v30 = vld [vmem:[%s5350_s0 + $0x2d8] sm:$0xff] }
 0x147   :  { %v1099_v33 = vpop.f32.mrf.mxu0 }
 0x148   :  { %v1993_v38 = vadd.f32 %v1992_v7, %v1388_v31  ;;  %v1100_v39 = vadd.f32 %v2987_v27, %v1099_v33 }
 0x14a   :  { %2347 = vst.msk [vmem:[%s5352_s3 + $0x3a8] sm:$0xff] %vm2229_vm1, %v1993_v38  ;;  %v1705_v41 = vadd.f32 %v3444_v54, %v1100_v39  ;;  %1146 = vmatmul.f32.gmra.mxu0 %v90_v34  ;;  %1437 = vmatmul.f32.gmra.mxu2 %v284_v35  ;;  %v100_v35 = vld [vmem:[%s5350_s0 + $0x2a0] sm:$0xff]  ;;  %v294_v38 = vld [vmem:[%s5350_s0 + $0x8b0] sm:$0xff] }
 0x14b   :  { %2566 = vmatmul.msk.f32.gmra.mxu3 %vm430_vm0, %v289_v40  ;;  %v3552_v42 = vpop.f32.mrf.mxu1 }
 0x14c   :  { %2251 = vst.msk [vmem:[%s5352_s3 + $0xa8] sm:$0xff] %vm2229_vm1, %v1705_v41  ;;  %v299_v41 = vld [vmem:[%s5350_s0 + $0x8d8] sm:$0xff] }
 0x14d   :  { %v1390_v44 = vpop.f32.mrf.mxu2 }
 0x14e   :  { %v1391_v45 = vadd.f32 %v2987_v27, %v1390_v44  ;;  %v2001_v47 = vpop.f32.mrf.mxu3  ;;  %2471 = vmatmul.msk.f32.gmra.mxu1 %vm430_vm0, %v99_v43  ;;  %v109_v44 = vld [vmem:[%s5350_s0 + $0x2e8] sm:$0xff] }
 0x14f   :  { %v1102_v48 = vpop.f32.mrf.mxu0 }
 0x150   :  { %v1996_v51 = vadd.f32 %v1995_v19, %v1391_v45  ;;  %v1103_v52 = vadd.f32 %v2987_v27, %v1102_v48 }
 0x152   :  { %2348 = vst.msk [vmem:[%s5352_s3 + $0x3b0] sm:$0xff] %vm2229_vm1, %v1996_v51  ;;  %v1708_v54 = vadd.f32 %v3471_v3, %v1103_v52  ;;  %1149 = vmatmul.f32.gmra.mxu0 %v92_v49  ;;  %1440 = vmatmul.f32.gmra.mxu2 %v286_v50  ;;  %v102_v50 = vld [vmem:[%s5350_s0 + $0x2b0] sm:$0xff]  ;;  %v296_v51 = vld [vmem:[%s5350_s0 + $0x8c0] sm:$0xff] }
 0x153   :  { %2567 = vmatmul.msk.f32.gmra.mxu3 %vm430_vm0, %v291_v53  ;;  %v3579_v55 = vpop.f32.mrf.mxu1 }
 0x154   :  { %2252 = vst.msk [vmem:[%s5352_s3 + $0xb0] sm:$0xff] %vm2229_vm1, %v1708_v54  ;;  %v301_v54 = vld [vmem:[%s5350_s0 + $0x8e8] sm:$0xff] }
 0x155   :  { %v1393_v58 = vpop.f32.mrf.mxu2 }
 0x156   :  { %v1394_v59 = vadd.f32 %v2987_v27, %v1393_v58  ;;  %v2004_v60 = vpop.f32.mrf.mxu3  ;;  %2472 = vmatmul.msk.f32.gmra.mxu1 %vm430_vm0, %v101_v57  ;;  %v111_v58 = vld [vmem:[%s5350_s0 + $0x2f8] sm:$0xff] }
 0x157   :  { %v1105_v61 = vpop.f32.mrf.mxu0 }
 0x158   :  { %v1999_v0 = vadd.f32 %v1998_v32, %v1394_v59  ;;  %v1106_v1 = vadd.f32 %v2987_v27, %v1105_v61 }
 0x15a   :  { %2349 = vst.msk [vmem:[%s5352_s3 + $0x3b8] sm:$0xff] %vm2229_vm1, %v1999_v0  ;;  %v1711_v3 = vadd.f32 %v3498_v15, %v1106_v1  ;;  %1152 = vmatmul.f32.gmra.mxu0 %v94_v62  ;;  %1443 = vmatmul.f32.gmra.mxu2 %v288_v63  ;;  %v104_v63 = vld [vmem:[%s5350_s0 + $0x2c0] sm:$0xff]  ;;  %v298_v0 = vld [vmem:[%s5350_s0 + $0x8d0] sm:$0xff] }
 0x15b   :  { %2568 = vmatmul.msk.f32.gmra.mxu3 %vm430_vm0, %v293_v2  ;;  %v3606_v4 = vpop.f32.mrf.mxu1 }
 0x15c   :  { %2253 = vst.msk [vmem:[%s5352_s3 + $0xb8] sm:$0xff] %vm2229_vm1, %v1711_v3  ;;  %v303_v3 = vld [vmem:[%s5350_s0 + $0x8f8] sm:$0xff] }
 0x15d   :  { %v1396_v6 = vpop.f32.mrf.mxu2 }
 0x15e   :  { %v1397_v7 = vadd.f32 %v2987_v27, %v1396_v6  ;;  %v2007_v8 = vpop.f32.mrf.mxu3  ;;  %2473 = vmatmul.msk.f32.gmra.mxu1 %vm430_vm0, %v103_v5 }
 0x15f   :  { %v1108_v9 = vpop.f32.mrf.mxu0 }
 0x160   :  { %v2002_v12 = vadd.f32 %v2001_v47, %v1397_v7  ;;  %v1109_v13 = vadd.f32 %v2987_v27, %v1108_v9  ;;  %v3750_v7 = vld [vmem:[#allocation2] ss:$0 sm:$0xff] }
 0x162   :  { %2350 = vst.msk [vmem:[%s5352_s3 + $0x3c0] sm:$0xff] %vm2229_vm1, %v2002_v12  ;;  %v1714_v15 = vadd.f32 %v3525_v28, %v1109_v13  ;;  %1155 = vmatmul.f32.gmra.mxu0 %v96_v10  ;;  %1446 = vmatmul.f32.gmra.mxu2 %v290_v11  ;;  %v106_v11 = vld [vmem:[%s5350_s0 + $0x2d0] sm:$0xff]  ;;  %v300_v12 = vld [vmem:[%s5350_s0 + $0x8e0] sm:$0xff] }
 0x163   :  { %2569 = vmatmul.msk.f32.gmra.mxu3 %vm430_vm0, %v295_v14  ;;  %v3633_v16 = vpop.f32.mrf.mxu1 }
 0x164   :  { %2254 = vst.msk [vmem:[%s5352_s3 + $0xc0] sm:$0xff] %vm2229_vm1, %v1714_v15  ;;  %v305_v15 = vld [vmem:[%s5350_s0 + $0x908] sm:$0xff] }
 0x165   :  { %v1399_v18 = vpop.f32.mrf.mxu2 }
 0x166   :  { %v1400_v19 = vadd.f32 %v2987_v27, %v1399_v18  ;;  %v2010_v20 = vpop.f32.mrf.mxu3  ;;  %2474 = vmatmul.msk.f32.gmra.mxu1 %vm430_vm0, %v105_v17  ;;  %v115_v18 = vld [vmem:[%s5350_s0 + $0x318] sm:$0xff] }
 0x167   :  { %v1111_v21 = vpop.f32.mrf.mxu0 }
 0x168   :  { %v2005_v24 = vadd.f32 %v2004_v60, %v1400_v19  ;;  %v1112_v25 = vadd.f32 %v2987_v27, %v1111_v21 }
 0x16a   :  { %2351 = vst.msk [vmem:[%s5352_s3 + $0x3c8] sm:$0xff] %vm2229_vm1, %v2005_v24  ;;  %v1717_v28 = vadd.f32 %v3552_v42, %v1112_v25  ;;  %1158 = vmatmul.f32.gmra.mxu0 %v98_v22  ;;  %1449 = vmatmul.f32.gmra.mxu2 %v292_v23  ;;  %v108_v23 = vld [vmem:[%s5350_s0 + $0x2e0] sm:$0xff]  ;;  %v302_v24 = vld [vmem:[%s5350_s0 + $0x8f0] sm:$0xff] }
 0x16b   :  { %2570 = vmatmul.msk.f32.gmra.mxu3 %vm430_vm0, %v297_v26  ;;  %v3660_v29 = vpop.f32.mrf.mxu1 }
 0x16c   :  { %2255 = vst.msk [vmem:[%s5352_s3 + $0xc8] sm:$0xff] %vm2229_vm1, %v1717_v28  ;;  %v307_v28 = vld [vmem:[%s5350_s0 + $0x918] sm:$0xff] }
 0x16d   :  { %v1402_v31 = vpop.f32.mrf.mxu2 }
 0x16e   :  { %v1403_v32 = vadd.f32 %v2987_v27, %v1402_v31  ;;  %v2013_v33 = vpop.f32.mrf.mxu3  ;;  %2475 = vmatmul.msk.f32.gmra.mxu1 %vm430_vm0, %v107_v30  ;;  %v117_v31 = vld [vmem:[%s5350_s0 + $0x328] sm:$0xff] }
 0x16f   :  { %v1114_v34 = vpop.f32.mrf.mxu0 }
 0x170   :  { %v2008_v39 = vadd.f32 %v2007_v8, %v1403_v32  ;;  %v1115_v40 = vadd.f32 %v2987_v27, %v1114_v34 }
 0x172   :  { %2352 = vst.msk [vmem:[%s5352_s3 + $0x3d0] sm:$0xff] %vm2229_vm1, %v2008_v39  ;;  %v1720_v42 = vadd.f32 %v3579_v55, %v1115_v40  ;;  %1161 = vmatmul.f32.gmra.mxu0 %v100_v35  ;;  %1452 = vmatmul.f32.gmra.mxu2 %v294_v38  ;;  %v110_v38 = vld [vmem:[%s5350_s0 + $0x2f0] sm:$0xff]  ;;  %v304_v39 = vld [vmem:[%s5350_s0 + $0x900] sm:$0xff] }
 0x173   :  { %2571 = vmatmul.msk.f32.gmra.mxu3 %vm430_vm0, %v299_v41  ;;  %v3687_v43 = vpop.f32.mrf.mxu1 }
 0x174   :  { %2256 = vst.msk [vmem:[%s5352_s3 + $0xd0] sm:$0xff] %vm2229_vm1, %v1720_v42  ;;  %v309_v42 = vld [vmem:[%s5350_s0 + $0x928] sm:$0xff] }
 0x175   :  { %v1405_v45 = vpop.f32.mrf.mxu2 }
 0x176   :  { %v1406_v47 = vadd.f32 %v2987_v27, %v1405_v45  ;;  %v2016_v48 = vpop.f32.mrf.mxu3  ;;  %2476 = vmatmul.msk.f32.gmra.mxu1 %vm430_vm0, %v109_v44  ;;  %v119_v45 = vld [vmem:[%s5350_s0 + $0x338] sm:$0xff] }
 0x177   :  { %v1117_v49 = vpop.f32.mrf.mxu0 }
 0x178   :  { %v2011_v52 = vadd.f32 %v2010_v20, %v1406_v47  ;;  %v1118_v53 = vadd.f32 %v2987_v27, %v1117_v49 }
 0x17a   :  { %2353 = vst.msk [vmem:[%s5352_s3 + $0x3d8] sm:$0xff] %vm2229_vm1, %v2011_v52  ;;  %v1723_v55 = vadd.f32 %v3606_v4, %v1118_v53  ;;  %1164 = vmatmul.f32.gmra.mxu0 %v102_v50  ;;  %1455 = vmatmul.f32.gmra.mxu2 %v296_v51  ;;  %v112_v51 = vld [vmem:[%s5350_s0 + $0x300] sm:$0xff]  ;;  %v306_v52 = vld [vmem:[%s5350_s0 + $0x910] sm:$0xff] }
 0x17b   :  { %2572 = vmatmul.msk.f32.gmra.mxu3 %vm430_vm0, %v301_v54  ;;  %v3714_v57 = vpop.f32.mrf.mxu1 }
 0x17c   :  { %2257 = vst.msk [vmem:[%s5352_s3 + $0xd8] sm:$0xff] %vm2229_vm1, %v1723_v55  ;;  %v311_v55 = vld [vmem:[%s5350_s0 + $0x938] sm:$0xff] }
 0x17d   :  { %v1408_v59 = vpop.f32.mrf.mxu2 }
 0x17e   :  { %v1409_v60 = vadd.f32 %v2987_v27, %v1408_v59  ;;  %v2019_v61 = vpop.f32.mrf.mxu3  ;;  %2477 = vmatmul.msk.f32.gmra.mxu1 %vm430_vm0, %v111_v58  ;;  %v121_v59 = vld [vmem:[%s5350_s0 + $0x348] sm:$0xff] }
 0x17f   :  { %v1120_v62 = vpop.f32.mrf.mxu0 }
 0x180   :  { %v2014_v1 = vadd.f32 %v2013_v33, %v1409_v60  ;;  %v1121_v2 = vadd.f32 %v2987_v27, %v1120_v62  ;;  %v113_v27 = vld [vmem:[%s5350_s0 + $0x308] sm:$0xff] }
 0x182   :  { %2354 = vst.msk [vmem:[%s5352_s3 + $0x3e0] sm:$0xff] %vm2229_vm1, %v2014_v1  ;;  %v1726_v4 = vadd.f32 %v3633_v16, %v1121_v2  ;;  %1167 = vmatmul.f32.gmra.mxu0 %v104_v63  ;;  %1458 = vmatmul.f32.gmra.mxu2 %v298_v0  ;;  %v114_v0 = vld [vmem:[%s5350_s0 + $0x310] sm:$0xff]  ;;  %v308_v1 = vld [vmem:[%s5350_s0 + $0x920] sm:$0xff] }
 0x183   :  { %2573 = vmatmul.msk.f32.gmra.mxu3 %vm430_vm0, %v303_v3  ;;  %v3741_v5 = vpop.f32.mrf.mxu1 }
 0x184   :  { %2258 = vst.msk [vmem:[%s5352_s3 + $0xe0] sm:$0xff] %vm2229_vm1, %v1726_v4  ;;  %v313_v4 = vld [vmem:[%s5350_s0 + $0x948] sm:$0xff] }
 0x185   :  { %v1411_v6 = vpop.f32.mrf.mxu2 }
 0x186   :  { %v1412_v8 = vadd.f32 %v3750_v7, %v1411_v6  ;;  %v2022_v9 = vpop.f32.mrf.mxu3  ;;  %2478 = vmatmul.msk.f32.gmra.mxu1 %vm430_vm0, %v113_v27  ;;  %v123_v6 = vld [vmem:[%s5350_s0 + $0x358] sm:$0xff] }
 0x187   :  { %v1123_v10 = vpop.f32.mrf.mxu0 }
 0x188   :  { %v2017_v13 = vadd.f32 %v2016_v48, %v1412_v8  ;;  %v1124_v14 = vadd.f32 %v3750_v7, %v1123_v10 }
 0x18a   :  { %2355 = vst.msk [vmem:[%s5352_s3 + $0x3e8] sm:$0xff] %vm2229_vm1, %v2017_v13  ;;  %v1729_v16 = vadd.f32 %v3660_v29, %v1124_v14  ;;  %1170 = vmatmul.f32.gmra.mxu0 %v106_v11  ;;  %1461 = vmatmul.f32.gmra.mxu2 %v300_v12  ;;  %v116_v12 = vld [vmem:[%s5350_s0 + $0x320] sm:$0xff]  ;;  %v310_v13 = vld [vmem:[%s5350_s0 + $0x930] sm:$0xff] }
 0x18b   :  { %2574 = vmatmul.msk.f32.gmra.mxu3 %vm430_vm0, %v305_v15  ;;  %v3770_v17 = vpop.f32.mrf.mxu1 }
 0x18c   :  { %2259 = vst.msk [vmem:[%s5352_s3 + $0xe8] sm:$0xff] %vm2229_vm1, %v1729_v16  ;;  %v315_v16 = vld [vmem:[%s5350_s0 + $0x958] sm:$0xff] }
 0x18d   :  { %v1414_v19 = vpop.f32.mrf.mxu2 }
 0x18e   :  { %v1415_v20 = vadd.f32 %v3750_v7, %v1414_v19  ;;  %v2025_v21 = vpop.f32.mrf.mxu3  ;;  %2479 = vmatmul.msk.f32.gmra.mxu1 %vm430_vm0, %v115_v18  ;;  %v125_v19 = vld [vmem:[%s5350_s0 + $0x368] sm:$0xff] }
 0x18f   :  { %v1126_v22 = vpop.f32.mrf.mxu0 }
 0x190   :  { %v2020_v25 = vadd.f32 %v2019_v61, %v1415_v20  ;;  %v1127_v26 = vadd.f32 %v3750_v7, %v1126_v22 }
 0x192   :  { %2356 = vst.msk [vmem:[%s5352_s3 + $0x3f0] sm:$0xff] %vm2229_vm1, %v2020_v25  ;;  %v1732_v29 = vadd.f32 %v3687_v43, %v1127_v26  ;;  %1173 = vmatmul.f32.gmra.mxu0 %v108_v23  ;;  %1464 = vmatmul.f32.gmra.mxu2 %v302_v24  ;;  %v118_v24 = vld [vmem:[%s5350_s0 + $0x330] sm:$0xff]  ;;  %v312_v25 = vld [vmem:[%s5350_s0 + $0x940] sm:$0xff] }
 0x193   :  { %2575 = vmatmul.msk.f32.gmra.mxu3 %vm430_vm0, %v307_v28  ;;  %v3797_v30 = vpop.f32.mrf.mxu1 }
 0x194   :  { %2260 = vst.msk [vmem:[%s5352_s3 + $0xf0] sm:$0xff] %vm2229_vm1, %v1732_v29  ;;  %v317_v29 = vld [vmem:[%s5350_s0 + $0x968] sm:$0xff] }
 0x195   :  { %v1417_v32 = vpop.f32.mrf.mxu2 }
 0x196   :  { %v1418_v33 = vadd.f32 %v3750_v7, %v1417_v32  ;;  %v2028_v34 = vpop.f32.mrf.mxu3  ;;  %2480 = vmatmul.msk.f32.gmra.mxu1 %vm430_vm0, %v117_v31  ;;  %v127_v32 = vld [vmem:[%s5350_s0 + $0x378] sm:$0xff] }
 0x197   :  { %v1129_v35 = vpop.f32.mrf.mxu0 }
 0x198   :  { %v2023_v40 = vadd.f32 %v2022_v9, %v1418_v33  ;;  %v1130_v41 = vadd.f32 %v3750_v7, %v1129_v35 }
 0x19a   :  { %2357 = vst.msk [vmem:[%s5352_s3 + $0x3f8] sm:$0xff] %vm2229_vm1, %v2023_v40  ;;  %v1735_v43 = vadd.f32 %v3714_v57, %v1130_v41  ;;  %1176 = vmatmul.f32.gmra.mxu0 %v110_v38  ;;  %1467 = vmatmul.f32.gmra.mxu2 %v304_v39  ;;  %v120_v39 = vld [vmem:[%s5350_s0 + $0x340] sm:$0xff]  ;;  %v314_v40 = vld [vmem:[%s5350_s0 + $0x950] sm:$0xff] }
 0x19b   :  { %2576 = vmatmul.msk.f32.gmra.mxu3 %vm430_vm0, %v309_v42  ;;  %v3824_v44 = vpop.f32.mrf.mxu1 }
 0x19c   :  { %2261 = vst.msk [vmem:[%s5352_s3 + $0xf8] sm:$0xff] %vm2229_vm1, %v1735_v43  ;;  %v319_v43 = vld [vmem:[%s5350_s0 + $0x978] sm:$0xff] }
 0x19d   :  { %v1420_v47 = vpop.f32.mrf.mxu2 }
 0x19e   :  { %v1421_v48 = vadd.f32 %v3750_v7, %v1420_v47  ;;  %v2031_v49 = vpop.f32.mrf.mxu3  ;;  %2481 = vmatmul.msk.f32.gmra.mxu1 %vm430_vm0, %v119_v45  ;;  %v129_v47 = vld [vmem:[%s5350_s0 + $0x388] sm:$0xff] }
 0x19f   :  { %v1132_v50 = vpop.f32.mrf.mxu0 }
 0x1a0   :  { %v2026_v53 = vadd.f32 %v2025_v21, %v1421_v48  ;;  %v1133_v54 = vadd.f32 %v3750_v7, %v1132_v50 }
 0x1a2   :  { %2358 = vst.msk [vmem:[%s5352_s3 + $0x400] sm:$0xff] %vm2229_vm1, %v2026_v53  ;;  %v1738_v57 = vadd.f32 %v3741_v5, %v1133_v54  ;;  %1179 = vmatmul.f32.gmra.mxu0 %v112_v51  ;;  %1470 = vmatmul.f32.gmra.mxu2 %v306_v52  ;;  %v122_v52 = vld [vmem:[%s5350_s0 + $0x350] sm:$0xff]  ;;  %v316_v53 = vld [vmem:[%s5350_s0 + $0x960] sm:$0xff] }
 0x1a3   :  { %2577 = vmatmul.msk.f32.gmra.mxu3 %vm430_vm0, %v311_v55  ;;  %v3851_v58 = vpop.f32.mrf.mxu1 }
 0x1a4   :  { %2262 = vst.msk [vmem:[%s5352_s3 + $0x100] sm:$0xff] %vm2229_vm1, %v1738_v57  ;;  %v321_v57 = vld [vmem:[%s5350_s0 + $0x988] sm:$0xff] }
 0x1a5   :  { %v1423_v60 = vpop.f32.mrf.mxu2 }
 0x1a6   :  { %v1424_v61 = vadd.f32 %v3750_v7, %v1423_v60  ;;  %v2034_v62 = vpop.f32.mrf.mxu3  ;;  %2482 = vmatmul.msk.f32.gmra.mxu1 %vm430_vm0, %v121_v59  ;;  %v131_v60 = vld [vmem:[%s5350_s0 + $0x398] sm:$0xff] }
 0x1a7   :  { %v1135_v63 = vpop.f32.mrf.mxu0 }
 0x1a8   :  { %v2029_v2 = vadd.f32 %v2028_v34, %v1424_v61  ;;  %v1136_v3 = vadd.f32 %v3750_v7, %v1135_v63 }
 0x1aa   :  { %2359 = vst.msk [vmem:[%s5352_s3 + $0x408] sm:$0xff] %vm2229_vm1, %v2029_v2  ;;  %v1741_v5 = vadd.f32 %v3770_v17, %v1136_v3  ;;  %1182 = vmatmul.f32.gmra.mxu0 %v114_v0  ;;  %1473 = vmatmul.f32.gmra.mxu2 %v308_v1  ;;  %v124_v1 = vld [vmem:[%s5350_s0 + $0x360] sm:$0xff]  ;;  %v318_v2 = vld [vmem:[%s5350_s0 + $0x970] sm:$0xff] }
 0x1ab   :  { %2578 = vmatmul.msk.f32.gmra.mxu3 %vm430_vm0, %v313_v4  ;;  %v3878_v27 = vpop.f32.mrf.mxu1 }
 0x1ac   :  { %2263 = vst.msk [vmem:[%s5352_s3 + $0x108] sm:$0xff] %vm2229_vm1, %v1741_v5  ;;  %v323_v5 = vld [vmem:[%s5350_s0 + $0x998] sm:$0xff] }
 0x1ad   :  { %v1426_v8 = vpop.f32.mrf.mxu2 }
 0x1ae   :  { %v1427_v9 = vadd.f32 %v3750_v7, %v1426_v8  ;;  %v2037_v10 = vpop.f32.mrf.mxu3  ;;  %2483 = vmatmul.msk.f32.gmra.mxu1 %vm430_vm0, %v123_v6  ;;  %v133_v8 = vld [vmem:[%s5350_s0 + $0x3a8] sm:$0xff] }
 0x1af   :  { %v1138_v11 = vpop.f32.mrf.mxu0 }
 0x1b0   :  { %v2032_v14 = vadd.f32 %v2031_v49, %v1427_v9  ;;  %v1139_v15 = vadd.f32 %v3750_v7, %v1138_v11 }
 0x1b2   :  { %2360 = vst.msk [vmem:[%s5352_s3 + $0x410] sm:$0xff] %vm2229_vm1, %v2032_v14  ;;  %v1744_v17 = vadd.f32 %v3797_v30, %v1139_v15  ;;  %1185 = vmatmul.f32.gmra.mxu0 %v116_v12  ;;  %1476 = vmatmul.f32.gmra.mxu2 %v310_v13  ;;  %v126_v13 = vld [vmem:[%s5350_s0 + $0x370] sm:$0xff]  ;;  %v320_v14 = vld [vmem:[%s5350_s0 + $0x980] sm:$0xff] }
 0x1b3   :  { %2579 = vmatmul.msk.f32.gmra.mxu3 %vm430_vm0, %v315_v16  ;;  %v3905_v18 = vpop.f32.mrf.mxu1 }
 0x1b4   :  { %2264 = vst.msk [vmem:[%s5352_s3 + $0x110] sm:$0xff] %vm2229_vm1, %v1744_v17  ;;  %v325_v17 = vld [vmem:[%s5350_s0 + $0x9a8] sm:$0xff] }
 0x1b5   :  { %v1429_v20 = vpop.f32.mrf.mxu2 }
 0x1b6   :  { %v1430_v21 = vadd.f32 %v3750_v7, %v1429_v20  ;;  %v2040_v22 = vpop.f32.mrf.mxu3  ;;  %2484 = vmatmul.msk.f32.gmra.mxu1 %vm430_vm0, %v125_v19  ;;  %v135_v20 = vld [vmem:[%s5350_s0 + $0x3b8] sm:$0xff] }
 0x1b7   :  { %v1141_v23 = vpop.f32.mrf.mxu0 }
 0x1b8   :  { %v2035_v26 = vadd.f32 %v2034_v62, %v1430_v21  ;;  %v1142_v28 = vadd.f32 %v3750_v7, %v1141_v23 }
 0x1ba   :  { %2361 = vst.msk [vmem:[%s5352_s3 + $0x418] sm:$0xff] %vm2229_vm1, %v2035_v26  ;;  %v1747_v30 = vadd.f32 %v3824_v44, %v1142_v28  ;;  %1188 = vmatmul.f32.gmra.mxu0 %v118_v24  ;;  %1479 = vmatmul.f32.gmra.mxu2 %v312_v25  ;;  %v128_v25 = vld [vmem:[%s5350_s0 + $0x380] sm:$0xff]  ;;  %v322_v26 = vld [vmem:[%s5350_s0 + $0x990] sm:$0xff] }
 0x1bb   :  { %2580 = vmatmul.msk.f32.gmra.mxu3 %vm430_vm0, %v317_v29  ;;  %v3932_v31 = vpop.f32.mrf.mxu1 }
 0x1bc   :  { %2265 = vst.msk [vmem:[%s5352_s3 + $0x118] sm:$0xff] %vm2229_vm1, %v1747_v30  ;;  %v327_v30 = vld [vmem:[%s5350_s0 + $0x9b8] sm:$0xff] }
 0x1bd   :  { %v1432_v33 = vpop.f32.mrf.mxu2 }
 0x1be   :  { %v1433_v34 = vadd.f32 %v3750_v7, %v1432_v33  ;;  %v2043_v35 = vpop.f32.mrf.mxu3  ;;  %2485 = vmatmul.msk.f32.gmra.mxu1 %vm430_vm0, %v127_v32  ;;  %v137_v33 = vld [vmem:[%s5350_s0 + $0x3c8] sm:$0xff] }
 0x1bf   :  { %v1144_v38 = vpop.f32.mrf.mxu0 }
 0x1c0   :  { %v2038_v41 = vadd.f32 %v2037_v10, %v1433_v34  ;;  %v1145_v42 = vadd.f32 %v3750_v7, %v1144_v38 }
 0x1c2   :  { %2362 = vst.msk [vmem:[%s5352_s3 + $0x420] sm:$0xff] %vm2229_vm1, %v2038_v41  ;;  %v1750_v44 = vadd.f32 %v3851_v58, %v1145_v42  ;;  %1191 = vmatmul.f32.gmra.mxu0 %v120_v39  ;;  %1482 = vmatmul.f32.gmra.mxu2 %v314_v40  ;;  %v130_v40 = vld [vmem:[%s5350_s0 + $0x390] sm:$0xff]  ;;  %v324_v41 = vld [vmem:[%s5350_s0 + $0x9a0] sm:$0xff] }
 0x1c3   :  { %2581 = vmatmul.msk.f32.gmra.mxu3 %vm430_vm0, %v319_v43  ;;  %v3959_v45 = vpop.f32.mrf.mxu1 }
 0x1c4   :  { %2266 = vst.msk [vmem:[%s5352_s3 + $0x120] sm:$0xff] %vm2229_vm1, %v1750_v44  ;;  %v329_v44 = vld [vmem:[%s5350_s0 + $0x9c8] sm:$0xff] }
 0x1c5   :  { %v1435_v48 = vpop.f32.mrf.mxu2 }
 0x1c6   :  { %v1436_v49 = vadd.f32 %v3750_v7, %v1435_v48  ;;  %v2046_v50 = vpop.f32.mrf.mxu3  ;;  %2486 = vmatmul.msk.f32.gmra.mxu1 %vm430_vm0, %v129_v47  ;;  %v139_v48 = vld [vmem:[%s5350_s0 + $0x3d8] sm:$0xff] }
 0x1c7   :  { %v1147_v51 = vpop.f32.mrf.mxu0 }
 0x1c8   :  { %v2041_v54 = vadd.f32 %v2040_v22, %v1436_v49  ;;  %v1148_v55 = vadd.f32 %v3750_v7, %v1147_v51 }
 0x1ca   :  { %2363 = vst.msk [vmem:[%s5352_s3 + $0x428] sm:$0xff] %vm2229_vm1, %v2041_v54  ;;  %v1753_v58 = vadd.f32 %v3878_v27, %v1148_v55  ;;  %1194 = vmatmul.f32.gmra.mxu0 %v122_v52  ;;  %1485 = vmatmul.f32.gmra.mxu2 %v316_v53  ;;  %v132_v53 = vld [vmem:[%s5350_s0 + $0x3a0] sm:$0xff]  ;;  %v326_v54 = vld [vmem:[%s5350_s0 + $0x9b0] sm:$0xff] }
 0x1cb   :  { %2582 = vmatmul.msk.f32.gmra.mxu3 %vm430_vm0, %v321_v57  ;;  %v3986_v59 = vpop.f32.mrf.mxu1 }
 0x1cc   :  { %2267 = vst.msk [vmem:[%s5352_s3 + $0x128] sm:$0xff] %vm2229_vm1, %v1753_v58  ;;  %v331_v58 = vld [vmem:[%s5350_s0 + $0x9d8] sm:$0xff] }
 0x1cd   :  { %v1438_v61 = vpop.f32.mrf.mxu2 }
 0x1ce   :  { %v1439_v62 = vadd.f32 %v3750_v7, %v1438_v61  ;;  %v2049_v63 = vpop.f32.mrf.mxu3  ;;  %2487 = vmatmul.msk.f32.gmra.mxu1 %vm430_vm0, %v131_v60  ;;  %v141_v61 = vld [vmem:[%s5350_s0 + $0x3e8] sm:$0xff] }
 0x1cf   :  { %v1150_v0 = vpop.f32.mrf.mxu0 }
 0x1d0   :  { %v2044_v3 = vadd.f32 %v2043_v35, %v1439_v62  ;;  %v1151_v4 = vadd.f32 %v3750_v7, %v1150_v0 }
 0x1d2   :  { %2364 = vst.msk [vmem:[%s5352_s3 + $0x430] sm:$0xff] %vm2229_vm1, %v2044_v3  ;;  %v1756_v27 = vadd.f32 %v3905_v18, %v1151_v4  ;;  %1197 = vmatmul.f32.gmra.mxu0 %v124_v1  ;;  %1488 = vmatmul.f32.gmra.mxu2 %v318_v2  ;;  %v134_v2 = vld [vmem:[%s5350_s0 + $0x3b0] sm:$0xff]  ;;  %v328_v3 = vld [vmem:[%s5350_s0 + $0x9c0] sm:$0xff] }
 0x1d3   :  { %2583 = vmatmul.msk.f32.gmra.mxu3 %vm430_vm0, %v323_v5  ;;  %v4013_v6 = vpop.f32.mrf.mxu1 }
 0x1d4   :  { %2268 = vst.msk [vmem:[%s5352_s3 + $0x130] sm:$0xff] %vm2229_vm1, %v1756_v27  ;;  %v333_v27 = vld [vmem:[%s5350_s0 + $0x9e8] sm:$0xff] }
 0x1d5   :  { %v1441_v9 = vpop.f32.mrf.mxu2 }
 0x1d6   :  { %v1442_v10 = vadd.f32 %v3750_v7, %v1441_v9  ;;  %v2052_v11 = vpop.f32.mrf.mxu3  ;;  %2488 = vmatmul.msk.f32.gmra.mxu1 %vm430_vm0, %v133_v8  ;;  %v143_v9 = vld [vmem:[%s5350_s0 + $0x3f8] sm:$0xff] }
 0x1d7   :  { %v1153_v12 = vpop.f32.mrf.mxu0 }
 0x1d8   :  { %v2047_v15 = vadd.f32 %v2046_v50, %v1442_v10  ;;  %v1154_v16 = vadd.f32 %v3750_v7, %v1153_v12 }
 0x1da   :  { %2365 = vst.msk [vmem:[%s5352_s3 + $0x438] sm:$0xff] %vm2229_vm1, %v2047_v15  ;;  %v1759_v18 = vadd.f32 %v3932_v31, %v1154_v16  ;;  %1200 = vmatmul.f32.gmra.mxu0 %v126_v13  ;;  %1491 = vmatmul.f32.gmra.mxu2 %v320_v14  ;;  %v136_v14 = vld [vmem:[%s5350_s0 + $0x3c0] sm:$0xff]  ;;  %v330_v15 = vld [vmem:[%s5350_s0 + $0x9d0] sm:$0xff] }
 0x1db   :  { %2584 = vmatmul.msk.f32.gmra.mxu3 %vm430_vm0, %v325_v17  ;;  %v4040_v19 = vpop.f32.mrf.mxu1 }
 0x1dc   :  { %2269 = vst.msk [vmem:[%s5352_s3 + $0x138] sm:$0xff] %vm2229_vm1, %v1759_v18  ;;  %v335_v18 = vld [vmem:[%s5350_s0 + $0x9f8] sm:$0xff] }
 0x1dd   :  { %v1444_v21 = vpop.f32.mrf.mxu2 }
 0x1de   :  { %v1445_v22 = vadd.f32 %v3750_v7, %v1444_v21  ;;  %v2055_v23 = vpop.f32.mrf.mxu3  ;;  %2489 = vmatmul.msk.f32.gmra.mxu1 %vm430_vm0, %v135_v20  ;;  %v145_v21 = vld [vmem:[%s5350_s0 + $0x408] sm:$0xff] }
 0x1df   :  { %v1156_v24 = vpop.f32.mrf.mxu0 }
 0x1e0   :  { %v2050_v28 = vadd.f32 %v2049_v63, %v1445_v22  ;;  %v1157_v29 = vadd.f32 %v3750_v7, %v1156_v24 }
 0x1e2   :  { %2366 = vst.msk [vmem:[%s5352_s3 + $0x440] sm:$0xff] %vm2229_vm1, %v2050_v28  ;;  %v1762_v31 = vadd.f32 %v3959_v45, %v1157_v29  ;;  %1203 = vmatmul.f32.gmra.mxu0 %v128_v25  ;;  %1494 = vmatmul.f32.gmra.mxu2 %v322_v26  ;;  %v138_v26 = vld [vmem:[%s5350_s0 + $0x3d0] sm:$0xff]  ;;  %v332_v28 = vld [vmem:[%s5350_s0 + $0x9e0] sm:$0xff] }
 0x1e3   :  { %2585 = vmatmul.msk.f32.gmra.mxu3 %vm430_vm0, %v327_v30  ;;  %v4067_v32 = vpop.f32.mrf.mxu1 }
 0x1e4   :  { %2270 = vst.msk [vmem:[%s5352_s3 + $0x140] sm:$0xff] %vm2229_vm1, %v1762_v31  ;;  %v337_v31 = vld [vmem:[%s5350_s0 + $0xa08] sm:$0xff] }
 0x1e5   :  { %v1447_v34 = vpop.f32.mrf.mxu2 }
 0x1e6   :  { %v1448_v35 = vadd.f32 %v3750_v7, %v1447_v34  ;;  %v2058_v38 = vpop.f32.mrf.mxu3  ;;  %2490 = vmatmul.msk.f32.gmra.mxu1 %vm430_vm0, %v137_v33  ;;  %v147_v34 = vld [vmem:[%s5350_s0 + $0x418] sm:$0xff] }
 0x1e7   :  { %v1159_v39 = vpop.f32.mrf.mxu0 }
 0x1e8   :  { %v2053_v42 = vadd.f32 %v2052_v11, %v1448_v35  ;;  %v1160_v43 = vadd.f32 %v3750_v7, %v1159_v39 }
 0x1ea   :  { %2367 = vst.msk [vmem:[%s5352_s3 + $0x448] sm:$0xff] %vm2229_vm1, %v2053_v42  ;;  %v1765_v45 = vadd.f32 %v3986_v59, %v1160_v43  ;;  %1206 = vmatmul.f32.gmra.mxu0 %v130_v40  ;;  %1497 = vmatmul.f32.gmra.mxu2 %v324_v41  ;;  %v140_v41 = vld [vmem:[%s5350_s0 + $0x3e0] sm:$0xff]  ;;  %v334_v42 = vld [vmem:[%s5350_s0 + $0x9f0] sm:$0xff] }
 0x1eb   :  { %2586 = vmatmul.msk.f32.gmra.mxu3 %vm430_vm0, %v329_v44  ;;  %v4094_v47 = vpop.f32.mrf.mxu1 }
 0x1ec   :  { %2271 = vst.msk [vmem:[%s5352_s3 + $0x148] sm:$0xff] %vm2229_vm1, %v1765_v45  ;;  %v339_v45 = vld [vmem:[%s5350_s0 + $0xa18] sm:$0xff] }
 0x1ed   :  { %v1450_v49 = vpop.f32.mrf.mxu2 }
 0x1ee   :  { %v1451_v50 = vadd.f32 %v3750_v7, %v1450_v49  ;;  %v2061_v51 = vpop.f32.mrf.mxu3  ;;  %2491 = vmatmul.msk.f32.gmra.mxu1 %vm430_vm0, %v139_v48  ;;  %v149_v49 = vld [vmem:[%s5350_s0 + $0x428] sm:$0xff] }
 0x1ef   :  { %v1162_v52 = vpop.f32.mrf.mxu0 }
 0x1f0   :  { %v2056_v55 = vadd.f32 %v2055_v23, %v1451_v50  ;;  %v1163_v57 = vadd.f32 %v3750_v7, %v1162_v52 }
 0x1f2   :  { %2368 = vst.msk [vmem:[%s5352_s3 + $0x450] sm:$0xff] %vm2229_vm1, %v2056_v55  ;;  %v1768_v59 = vadd.f32 %v4013_v6, %v1163_v57  ;;  %1209 = vmatmul.f32.gmra.mxu0 %v132_v53  ;;  %1500 = vmatmul.f32.gmra.mxu2 %v326_v54  ;;  %v142_v54 = vld [vmem:[%s5350_s0 + $0x3f0] sm:$0xff]  ;;  %v336_v55 = vld [vmem:[%s5350_s0 + $0xa00] sm:$0xff] }
 0x1f3   :  { %2587 = vmatmul.msk.f32.gmra.mxu3 %vm430_vm0, %v331_v58  ;;  %v4121_v60 = vpop.f32.mrf.mxu1 }
 0x1f4   :  { %2272 = vst.msk [vmem:[%s5352_s3 + $0x150] sm:$0xff] %vm2229_vm1, %v1768_v59  ;;  %v341_v59 = vld [vmem:[%s5350_s0 + $0xa28] sm:$0xff] }
 0x1f5   :  { %v1453_v62 = vpop.f32.mrf.mxu2 }
 0x1f6   :  { %v1454_v63 = vadd.f32 %v3750_v7, %v1453_v62  ;;  %v2064_v0 = vpop.f32.mrf.mxu3  ;;  %2492 = vmatmul.msk.f32.gmra.mxu1 %vm430_vm0, %v141_v61  ;;  %v151_v62 = vld [vmem:[%s5350_s0 + $0x438] sm:$0xff] }
 0x1f7   :  { %v1165_v1 = vpop.f32.mrf.mxu0 }
 0x1f8   :  { %v2059_v4 = vadd.f32 %v2058_v38, %v1454_v63  ;;  %v1166_v5 = vadd.f32 %v3750_v7, %v1165_v1 }
 0x1fa   :  { %2369 = vst.msk [vmem:[%s5352_s3 + $0x458] sm:$0xff] %vm2229_vm1, %v2059_v4  ;;  %v1771_v6 = vadd.f32 %v4040_v19, %v1166_v5  ;;  %1212 = vmatmul.f32.gmra.mxu0 %v134_v2  ;;  %1503 = vmatmul.f32.gmra.mxu2 %v328_v3  ;;  %v144_v3 = vld [vmem:[%s5350_s0 + $0x400] sm:$0xff]  ;;  %v338_v4 = vld [vmem:[%s5350_s0 + $0xa10] sm:$0xff] }
 0x1fb   :  { %2588 = vmatmul.msk.f32.gmra.mxu3 %vm430_vm0, %v333_v27  ;;  %v4148_v8 = vpop.f32.mrf.mxu1 }
 0x1fc   :  { %2273 = vst.msk [vmem:[%s5352_s3 + $0x158] sm:$0xff] %vm2229_vm1, %v1771_v6  ;;  %v343_v6 = vld [vmem:[%s5350_s0 + $0xa38] sm:$0xff] }
 0x1fd   :  { %v1456_v10 = vpop.f32.mrf.mxu2 }
 0x1fe   :  { %v1457_v11 = vadd.f32 %v3750_v7, %v1456_v10  ;;  %v2067_v12 = vpop.f32.mrf.mxu3  ;;  %2493 = vmatmul.msk.f32.gmra.mxu1 %vm430_vm0, %v143_v9  ;;  %v153_v10 = vld [vmem:[%s5350_s0 + $0x448] sm:$0xff] }
 0x1ff   :  { %v1168_v13 = vpop.f32.mrf.mxu0 }
 0x200   :  { %v2062_v16 = vadd.f32 %v2061_v51, %v1457_v11  ;;  %v1169_v17 = vadd.f32 %v3750_v7, %v1168_v13 }
 0x202   :  { %2370 = vst.msk [vmem:[%s5352_s3 + $0x460] sm:$0xff] %vm2229_vm1, %v2062_v16  ;;  %v1774_v19 = vadd.f32 %v4067_v32, %v1169_v17  ;;  %1215 = vmatmul.f32.gmra.mxu0 %v136_v14  ;;  %1506 = vmatmul.f32.gmra.mxu2 %v330_v15  ;;  %v146_v15 = vld [vmem:[%s5350_s0 + $0x410] sm:$0xff]  ;;  %v340_v16 = vld [vmem:[%s5350_s0 + $0xa20] sm:$0xff] }
 0x203   :  { %2589 = vmatmul.msk.f32.gmra.mxu3 %vm430_vm0, %v335_v18  ;;  %v4175_v20 = vpop.f32.mrf.mxu1 }
 0x204   :  { %2274 = vst.msk [vmem:[%s5352_s3 + $0x160] sm:$0xff] %vm2229_vm1, %v1774_v19  ;;  %v345_v19 = vld [vmem:[%s5350_s0 + $0xa48] sm:$0xff] }
 0x205   :  { %v1459_v22 = vpop.f32.mrf.mxu2 }
 0x206   :  { %v1460_v23 = vadd.f32 %v3750_v7, %v1459_v22  ;;  %v2070_v24 = vpop.f32.mrf.mxu3  ;;  %2494 = vmatmul.msk.f32.gmra.mxu1 %vm430_vm0, %v145_v21  ;;  %v155_v22 = vld [vmem:[%s5350_s0 + $0x458] sm:$0xff] }
 0x207   :  { %v1171_v25 = vpop.f32.mrf.mxu0 }
 0x208   :  { %v2065_v29 = vadd.f32 %v2064_v0, %v1460_v23  ;;  %v1172_v30 = vadd.f32 %v3750_v7, %v1171_v25 }
 0x20a   :  { %2371 = vst.msk [vmem:[%s5352_s3 + $0x468] sm:$0xff] %vm2229_vm1, %v2065_v29  ;;  %v1777_v32 = vadd.f32 %v4094_v47, %v1172_v30  ;;  %1218 = vmatmul.f32.gmra.mxu0 %v138_v26  ;;  %1509 = vmatmul.f32.gmra.mxu2 %v332_v28  ;;  %v148_v28 = vld [vmem:[%s5350_s0 + $0x420] sm:$0xff]  ;;  %v342_v29 = vld [vmem:[%s5350_s0 + $0xa30] sm:$0xff] }
 0x20b   :  { %2590 = vmatmul.msk.f32.gmra.mxu3 %vm430_vm0, %v337_v31  ;;  %v4202_v33 = vpop.f32.mrf.mxu1 }
 0x20c   :  { %2275 = vst.msk [vmem:[%s5352_s3 + $0x168] sm:$0xff] %vm2229_vm1, %v1777_v32  ;;  %v347_v32 = vld [vmem:[%s5350_s0 + $0xa58] sm:$0xff] }
 0x20d   :  { %v1462_v35 = vpop.f32.mrf.mxu2 }
 0x20e   :  { %v1463_v38 = vadd.f32 %v3750_v7, %v1462_v35  ;;  %v2073_v39 = vpop.f32.mrf.mxu3  ;;  %2495 = vmatmul.msk.f32.gmra.mxu1 %vm430_vm0, %v147_v34  ;;  %v157_v35 = vld [vmem:[%s5350_s0 + $0x468] sm:$0xff] }
 0x20f   :  { %v1174_v40 = vpop.f32.mrf.mxu0 }
 0x210   :  { %v2068_v43 = vadd.f32 %v2067_v12, %v1463_v38  ;;  %v1175_v44 = vadd.f32 %v3750_v7, %v1174_v40 }
 0x212   :  { %2372 = vst.msk [vmem:[%s5352_s3 + $0x470] sm:$0xff] %vm2229_vm1, %v2068_v43  ;;  %v1780_v47 = vadd.f32 %v4121_v60, %v1175_v44  ;;  %1221 = vmatmul.f32.gmra.mxu0 %v140_v41  ;;  %1512 = vmatmul.f32.gmra.mxu2 %v334_v42  ;;  %v150_v42 = vld [vmem:[%s5350_s0 + $0x430] sm:$0xff]  ;;  %v344_v43 = vld [vmem:[%s5350_s0 + $0xa40] sm:$0xff] }
 0x213   :  { %2591 = vmatmul.msk.f32.gmra.mxu3 %vm430_vm0, %v339_v45  ;;  %v4229_v48 = vpop.f32.mrf.mxu1 }
 0x214   :  { %2276 = vst.msk [vmem:[%s5352_s3 + $0x170] sm:$0xff] %vm2229_vm1, %v1780_v47  ;;  %v349_v47 = vld [vmem:[%s5350_s0 + $0xa68] sm:$0xff] }
 0x215   :  { %v1465_v50 = vpop.f32.mrf.mxu2 }
 0x216   :  { %v1466_v51 = vadd.f32 %v3750_v7, %v1465_v50  ;;  %v2076_v52 = vpop.f32.mrf.mxu3  ;;  %2496 = vmatmul.msk.f32.gmra.mxu1 %vm430_vm0, %v149_v49  ;;  %v159_v50 = vld [vmem:[%s5350_s0 + $0x478] sm:$0xff] }
 0x217   :  { %v1177_v53 = vpop.f32.mrf.mxu0 }
 0x218   :  { %v2071_v57 = vadd.f32 %v2070_v24, %v1466_v51  ;;  %v1178_v58 = vadd.f32 %v3750_v7, %v1177_v53 }
 0x21a   :  { %2373 = vst.msk [vmem:[%s5352_s3 + $0x478] sm:$0xff] %vm2229_vm1, %v2071_v57  ;;  %v1783_v60 = vadd.f32 %v4148_v8, %v1178_v58  ;;  %1224 = vmatmul.f32.gmra.mxu0 %v142_v54  ;;  %1515 = vmatmul.f32.gmra.mxu2 %v336_v55  ;;  %v152_v55 = vld [vmem:[%s5350_s0 + $0x440] sm:$0xff]  ;;  %v346_v57 = vld [vmem:[%s5350_s0 + $0xa50] sm:$0xff] }
 0x21b   :  { %2592 = vmatmul.msk.f32.gmra.mxu3 %vm430_vm0, %v341_v59  ;;  %v4256_v61 = vpop.f32.mrf.mxu1 }
 0x21c   :  { %2277 = vst.msk [vmem:[%s5352_s3 + $0x178] sm:$0xff] %vm2229_vm1, %v1783_v60  ;;  %v351_v60 = vld [vmem:[%s5350_s0 + $0xa78] sm:$0xff] }
 0x21d   :  { %v1468_v63 = vpop.f32.mrf.mxu2 }
 0x21e   :  { %v1469_v0 = vadd.f32 %v3750_v7, %v1468_v63  ;;  %v2079_v1 = vpop.f32.mrf.mxu3  ;;  %2497 = vmatmul.msk.f32.gmra.mxu1 %vm430_vm0, %v151_v62  ;;  %v161_v63 = vld [vmem:[%s5350_s0 + $0x488] sm:$0xff] }
 0x21f   :  { %v1180_v2 = vpop.f32.mrf.mxu0 }
 0x220   :  { %v2074_v5 = vadd.f32 %v2073_v39, %v1469_v0  ;;  %v1181_v27 = vadd.f32 %v3750_v7, %v1180_v2 }
 0x222   :  { %2374 = vst.msk [vmem:[%s5352_s3 + $0x480] sm:$0xff] %vm2229_vm1, %v2074_v5  ;;  %v1786_v8 = vadd.f32 %v4175_v20, %v1181_v27  ;;  %1227 = vmatmul.f32.gmra.mxu0 %v144_v3  ;;  %1518 = vmatmul.f32.gmra.mxu2 %v338_v4  ;;  %v154_v4 = vld [vmem:[%s5350_s0 + $0x450] sm:$0xff]  ;;  %v348_v5 = vld [vmem:[%s5350_s0 + $0xa60] sm:$0xff] }
 0x223   :  { %2593 = vmatmul.msk.f32.gmra.mxu3 %vm430_vm0, %v343_v6  ;;  %v4283_v9 = vpop.f32.mrf.mxu1 }
 0x224   :  { %2278 = vst.msk [vmem:[%s5352_s3 + $0x180] sm:$0xff] %vm2229_vm1, %v1786_v8  ;;  %v353_v8 = vld [vmem:[%s5350_s0 + $0xa88] sm:$0xff] }
 0x225   :  { %v1471_v11 = vpop.f32.mrf.mxu2 }
 0x226   :  { %v1472_v12 = vadd.f32 %v3750_v7, %v1471_v11  ;;  %v2082_v13 = vpop.f32.mrf.mxu3  ;;  %2498 = vmatmul.msk.f32.gmra.mxu1 %vm430_vm0, %v153_v10  ;;  %v163_v11 = vld [vmem:[%s5350_s0 + $0x498] sm:$0xff] }
 0x227   :  { %v1183_v14 = vpop.f32.mrf.mxu0 }
 0x228   :  { %v2077_v17 = vadd.f32 %v2076_v52, %v1472_v12  ;;  %v1184_v18 = vadd.f32 %v3750_v7, %v1183_v14 }
 0x22a   :  { %2375 = vst.msk [vmem:[%s5352_s3 + $0x488] sm:$0xff] %vm2229_vm1, %v2077_v17  ;;  %v1789_v20 = vadd.f32 %v4202_v33, %v1184_v18  ;;  %1230 = vmatmul.f32.gmra.mxu0 %v146_v15  ;;  %1521 = vmatmul.f32.gmra.mxu2 %v340_v16  ;;  %v156_v16 = vld [vmem:[%s5350_s0 + $0x460] sm:$0xff]  ;;  %v350_v17 = vld [vmem:[%s5350_s0 + $0xa70] sm:$0xff] }
 0x22b   :  { %2594 = vmatmul.msk.f32.gmra.mxu3 %vm430_vm0, %v345_v19  ;;  %v4310_v21 = vpop.f32.mrf.mxu1 }
 0x22c   :  { %2279 = vst.msk [vmem:[%s5352_s3 + $0x188] sm:$0xff] %vm2229_vm1, %v1789_v20  ;;  %v355_v20 = vld [vmem:[%s5350_s0 + $0xa98] sm:$0xff] }
 0x22d   :  { %v1474_v23 = vpop.f32.mrf.mxu2 }
 0x22e   :  { %v1475_v24 = vadd.f32 %v3750_v7, %v1474_v23  ;;  %v2085_v25 = vpop.f32.mrf.mxu3  ;;  %2499 = vmatmul.msk.f32.gmra.mxu1 %vm430_vm0, %v155_v22  ;;  %v165_v23 = vld [vmem:[%s5350_s0 + $0x4a8] sm:$0xff] }
 0x22f   :  { %v1186_v26 = vpop.f32.mrf.mxu0 }
 0x230   :  { %v2080_v30 = vadd.f32 %v2079_v1, %v1475_v24  ;;  %v1187_v31 = vadd.f32 %v3750_v7, %v1186_v26 }
 0x232   :  { %2376 = vst.msk [vmem:[%s5352_s3 + $0x490] sm:$0xff] %vm2229_vm1, %v2080_v30  ;;  %v1792_v33 = vadd.f32 %v4229_v48, %v1187_v31  ;;  %1233 = vmatmul.f32.gmra.mxu0 %v148_v28  ;;  %1524 = vmatmul.f32.gmra.mxu2 %v342_v29  ;;  %v158_v29 = vld [vmem:[%s5350_s0 + $0x470] sm:$0xff]  ;;  %v352_v30 = vld [vmem:[%s5350_s0 + $0xa80] sm:$0xff] }
 0x233   :  { %2595 = vmatmul.msk.f32.gmra.mxu3 %vm430_vm0, %v347_v32  ;;  %v4337_v34 = vpop.f32.mrf.mxu1 }
 0x234   :  { %2280 = vst.msk [vmem:[%s5352_s3 + $0x190] sm:$0xff] %vm2229_vm1, %v1792_v33  ;;  %v357_v33 = vld [vmem:[%s5350_s0 + $0xaa8] sm:$0xff] }
 0x235   :  { %v1477_v38 = vpop.f32.mrf.mxu2 }
 0x236   :  { %v1478_v39 = vadd.f32 %v3750_v7, %v1477_v38  ;;  %v2088_v40 = vpop.f32.mrf.mxu3  ;;  %2500 = vmatmul.msk.f32.gmra.mxu1 %vm430_vm0, %v157_v35  ;;  %v167_v38 = vld [vmem:[%s5350_s0 + $0x4b8] sm:$0xff] }
 0x237   :  { %v1189_v41 = vpop.f32.mrf.mxu0 }
 0x238   :  { %v2083_v44 = vadd.f32 %v2082_v13, %v1478_v39  ;;  %v1190_v45 = vadd.f32 %v3750_v7, %v1189_v41 }
 0x23a   :  { %2377 = vst.msk [vmem:[%s5352_s3 + $0x498] sm:$0xff] %vm2229_vm1, %v2083_v44  ;;  %v1795_v48 = vadd.f32 %v4256_v61, %v1190_v45  ;;  %1236 = vmatmul.f32.gmra.mxu0 %v150_v42  ;;  %1527 = vmatmul.f32.gmra.mxu2 %v344_v43  ;;  %v160_v43 = vld [vmem:[%s5350_s0 + $0x480] sm:$0xff]  ;;  %v354_v44 = vld [vmem:[%s5350_s0 + $0xa90] sm:$0xff] }
 0x23b   :  { %2596 = vmatmul.msk.f32.gmra.mxu3 %vm430_vm0, %v349_v47  ;;  %v4364_v49 = vpop.f32.mrf.mxu1 }
 0x23c   :  { %2281 = vst.msk [vmem:[%s5352_s3 + $0x198] sm:$0xff] %vm2229_vm1, %v1795_v48  ;;  %v359_v48 = vld [vmem:[%s5350_s0 + $0xab8] sm:$0xff] }
 0x23d   :  { %v1480_v51 = vpop.f32.mrf.mxu2 }
 0x23e   :  { %v1481_v52 = vadd.f32 %v3750_v7, %v1480_v51  ;;  %v2091_v53 = vpop.f32.mrf.mxu3  ;;  %2501 = vmatmul.msk.f32.gmra.mxu1 %vm430_vm0, %v159_v50  ;;  %v169_v51 = vld [vmem:[%s5350_s0 + $0x4c8] sm:$0xff] }
 0x23f   :  { %v1192_v54 = vpop.f32.mrf.mxu0 }
 0x240   :  { %v2086_v58 = vadd.f32 %v2085_v25, %v1481_v52  ;;  %v1193_v59 = vadd.f32 %v3750_v7, %v1192_v54 }
 0x242   :  { %2378 = vst.msk [vmem:[%s5352_s3 + $0x4a0] sm:$0xff] %vm2229_vm1, %v2086_v58  ;;  %v1798_v61 = vadd.f32 %v4283_v9, %v1193_v59  ;;  %1239 = vmatmul.f32.gmra.mxu0 %v152_v55  ;;  %1530 = vmatmul.f32.gmra.mxu2 %v346_v57  ;;  %v162_v57 = vld [vmem:[%s5350_s0 + $0x490] sm:$0xff]  ;;  %v356_v58 = vld [vmem:[%s5350_s0 + $0xaa0] sm:$0xff] }
 0x243   :  { %2597 = vmatmul.msk.f32.gmra.mxu3 %vm430_vm0, %v351_v60  ;;  %v4391_v62 = vpop.f32.mrf.mxu1 }
 0x244   :  { %2282 = vst.msk [vmem:[%s5352_s3 + $0x1a0] sm:$0xff] %vm2229_vm1, %v1798_v61  ;;  %v361_v61 = vld [vmem:[%s5350_s0 + $0xac8] sm:$0xff] }
 0x245   :  { %v1483_v0 = vpop.f32.mrf.mxu2 }
 0x246   :  { %v1484_v1 = vadd.f32 %v3750_v7, %v1483_v0  ;;  %v2094_v2 = vpop.f32.mrf.mxu3  ;;  %2502 = vmatmul.msk.f32.gmra.mxu1 %vm430_vm0, %v161_v63 }
 0x247   :  { %v1195_v3 = vpop.f32.mrf.mxu0 }
 0x248   :  { %v2089_v27 = vadd.f32 %v2088_v40, %v1484_v1  ;;  %v1196_v6 = vadd.f32 %v3750_v7, %v1195_v3  ;;  %v4535_v1 = vld [vmem:[#allocation2] ss:$0 sm:$0xff] }
 0x24a   :  { %2379 = vst.msk [vmem:[%s5352_s3 + $0x4a8] sm:$0xff] %vm2229_vm1, %v2089_v27  ;;  %v1801_v9 = vadd.f32 %v4310_v21, %v1196_v6  ;;  %1242 = vmatmul.f32.gmra.mxu0 %v154_v4  ;;  %1533 = vmatmul.f32.gmra.mxu2 %v348_v5  ;;  %v164_v5 = vld [vmem:[%s5350_s0 + $0x4a0] sm:$0xff]  ;;  %v358_v27 = vld [vmem:[%s5350_s0 + $0xab0] sm:$0xff] }
 0x24b   :  { %2598 = vmatmul.msk.f32.gmra.mxu3 %vm430_vm0, %v353_v8  ;;  %v4418_v10 = vpop.f32.mrf.mxu1 }
 0x24c   :  { %2283 = vst.msk [vmem:[%s5352_s3 + $0x1a8] sm:$0xff] %vm2229_vm1, %v1801_v9  ;;  %v363_v9 = vld [vmem:[%s5350_s0 + $0xad8] sm:$0xff] }
 0x24d   :  { %v1486_v12 = vpop.f32.mrf.mxu2 }
 0x24e   :  { %v1487_v13 = vadd.f32 %v3750_v7, %v1486_v12  ;;  %v2097_v14 = vpop.f32.mrf.mxu3  ;;  %2503 = vmatmul.msk.f32.gmra.mxu1 %vm430_vm0, %v163_v11  ;;  %v173_v12 = vld [vmem:[%s5350_s0 + $0x4e8] sm:$0xff] }
 0x24f   :  { %v1198_v15 = vpop.f32.mrf.mxu0 }
 0x250   :  { %v2092_v18 = vadd.f32 %v2091_v53, %v1487_v13  ;;  %v1199_v19 = vadd.f32 %v3750_v7, %v1198_v15 }
 0x252   :  { %2380 = vst.msk [vmem:[%s5352_s3 + $0x4b0] sm:$0xff] %vm2229_vm1, %v2092_v18  ;;  %v1804_v21 = vadd.f32 %v4337_v34, %v1199_v19  ;;  %1245 = vmatmul.f32.gmra.mxu0 %v156_v16  ;;  %1536 = vmatmul.f32.gmra.mxu2 %v350_v17  ;;  %v166_v17 = vld [vmem:[%s5350_s0 + $0x4b0] sm:$0xff]  ;;  %v360_v18 = vld [vmem:[%s5350_s0 + $0xac0] sm:$0xff] }
 0x253   :  { %2599 = vmatmul.msk.f32.gmra.mxu3 %vm430_vm0, %v355_v20  ;;  %v4445_v22 = vpop.f32.mrf.mxu1 }
 0x254   :  { %2284 = vst.msk [vmem:[%s5352_s3 + $0x1b0] sm:$0xff] %vm2229_vm1, %v1804_v21  ;;  %v365_v21 = vld [vmem:[%s5350_s0 + $0xae8] sm:$0xff] }
 0x255   :  { %v1489_v24 = vpop.f32.mrf.mxu2 }
 0x256   :  { %v1490_v25 = vadd.f32 %v3750_v7, %v1489_v24  ;;  %v2100_v26 = vpop.f32.mrf.mxu3  ;;  %2504 = vmatmul.msk.f32.gmra.mxu1 %vm430_vm0, %v165_v23  ;;  %v175_v24 = vld [vmem:[%s5350_s0 + $0x4f8] sm:$0xff] }
 0x257   :  { %v1201_v28 = vpop.f32.mrf.mxu0 }
 0x258   :  { %v2095_v31 = vadd.f32 %v2094_v2, %v1490_v25  ;;  %v1202_v32 = vadd.f32 %v3750_v7, %v1201_v28 }
 0x25a   :  { %2381 = vst.msk [vmem:[%s5352_s3 + $0x4b8] sm:$0xff] %vm2229_vm1, %v2095_v31  ;;  %v1807_v34 = vadd.f32 %v4364_v49, %v1202_v32  ;;  %1248 = vmatmul.f32.gmra.mxu0 %v158_v29  ;;  %1539 = vmatmul.f32.gmra.mxu2 %v352_v30  ;;  %v168_v30 = vld [vmem:[%s5350_s0 + $0x4c0] sm:$0xff]  ;;  %v362_v31 = vld [vmem:[%s5350_s0 + $0xad0] sm:$0xff] }
 0x25b   :  { %2600 = vmatmul.msk.f32.gmra.mxu3 %vm430_vm0, %v357_v33  ;;  %v4472_v35 = vpop.f32.mrf.mxu1 }
 0x25c   :  { %2285 = vst.msk [vmem:[%s5352_s3 + $0x1b8] sm:$0xff] %vm2229_vm1, %v1807_v34  ;;  %v367_v34 = vld [vmem:[%s5350_s0 + $0xaf8] sm:$0xff] }
 0x25d   :  { %v1492_v39 = vpop.f32.mrf.mxu2 }
 0x25e   :  { %v1493_v40 = vadd.f32 %v3750_v7, %v1492_v39  ;;  %v2103_v41 = vpop.f32.mrf.mxu3  ;;  %2505 = vmatmul.msk.f32.gmra.mxu1 %vm430_vm0, %v167_v38  ;;  %v177_v39 = vld [vmem:[%s5350_s0 + $0x508] sm:$0xff] }
 0x25f   :  { %v1204_v42 = vpop.f32.mrf.mxu0 }
 0x260   :  { %v2098_v45 = vadd.f32 %v2097_v14, %v1493_v40  ;;  %v1205_v47 = vadd.f32 %v3750_v7, %v1204_v42 }
 0x262   :  { %2382 = vst.msk [vmem:[%s5352_s3 + $0x4c0] sm:$0xff] %vm2229_vm1, %v2098_v45  ;;  %v1810_v49 = vadd.f32 %v4391_v62, %v1205_v47  ;;  %1251 = vmatmul.f32.gmra.mxu0 %v160_v43  ;;  %1542 = vmatmul.f32.gmra.mxu2 %v354_v44  ;;  %v170_v44 = vld [vmem:[%s5350_s0 + $0x4d0] sm:$0xff]  ;;  %v364_v45 = vld [vmem:[%s5350_s0 + $0xae0] sm:$0xff] }
 0x263   :  { %2601 = vmatmul.msk.f32.gmra.mxu3 %vm430_vm0, %v359_v48  ;;  %v4499_v50 = vpop.f32.mrf.mxu1 }
 0x264   :  { %2286 = vst.msk [vmem:[%s5352_s3 + $0x1c0] sm:$0xff] %vm2229_vm1, %v1810_v49  ;;  %v369_v49 = vld [vmem:[%s5350_s0 + $0xb08] sm:$0xff] }
 0x265   :  { %v1495_v52 = vpop.f32.mrf.mxu2 }
 0x266   :  { %v1496_v53 = vadd.f32 %v3750_v7, %v1495_v52  ;;  %v2106_v54 = vpop.f32.mrf.mxu3  ;;  %2506 = vmatmul.msk.f32.gmra.mxu1 %vm430_vm0, %v169_v51  ;;  %v179_v52 = vld [vmem:[%s5350_s0 + $0x518] sm:$0xff] }
 0x267   :  { %v1207_v55 = vpop.f32.mrf.mxu0 }
 0x268   :  { %v2101_v59 = vadd.f32 %v2100_v26, %v1496_v53  ;;  %v1208_v60 = vadd.f32 %v3750_v7, %v1207_v55  ;;  %v171_v7 = vld [vmem:[%s5350_s0 + $0x4d8] sm:$0xff] }
 0x26a   :  { %2383 = vst.msk [vmem:[%s5352_s3 + $0x4c8] sm:$0xff] %vm2229_vm1, %v2101_v59  ;;  %v1813_v62 = vadd.f32 %v4418_v10, %v1208_v60  ;;  %1254 = vmatmul.f32.gmra.mxu0 %v162_v57  ;;  %1545 = vmatmul.f32.gmra.mxu2 %v356_v58  ;;  %v172_v58 = vld [vmem:[%s5350_s0 + $0x4e0] sm:$0xff]  ;;  %v366_v59 = vld [vmem:[%s5350_s0 + $0xaf0] sm:$0xff] }
 0x26b   :  { %2602 = vmatmul.msk.f32.gmra.mxu3 %vm430_vm0, %v361_v61  ;;  %v4526_v63 = vpop.f32.mrf.mxu1 }
 0x26c   :  { %2287 = vst.msk [vmem:[%s5352_s3 + $0x1c8] sm:$0xff] %vm2229_vm1, %v1813_v62  ;;  %v371_v62 = vld [vmem:[%s5350_s0 + $0xb18] sm:$0xff] }
 0x26d   :  { %v1498_v0 = vpop.f32.mrf.mxu2 }
 0x26e   :  { %v1499_v2 = vadd.f32 %v4535_v1, %v1498_v0  ;;  %v2109_v3 = vpop.f32.mrf.mxu3  ;;  %2507 = vmatmul.msk.f32.gmra.mxu1 %vm430_vm0, %v171_v7  ;;  %v181_v0 = vld [vmem:[%s5350_s0 + $0x528] sm:$0xff] }
 0x26f   :  { %v1210_v4 = vpop.f32.mrf.mxu0 }
 0x270   :  { %v2104_v6 = vadd.f32 %v2103_v41, %v1499_v2  ;;  %v1211_v8 = vadd.f32 %v4535_v1, %v1210_v4 }
 0x272   :  { %2384 = vst.msk [vmem:[%s5352_s3 + $0x4d0] sm:$0xff] %vm2229_vm1, %v2104_v6  ;;  %v1816_v10 = vadd.f32 %v4445_v22, %v1211_v8  ;;  %1257 = vmatmul.f32.gmra.mxu0 %v164_v5  ;;  %1548 = vmatmul.f32.gmra.mxu2 %v358_v27  ;;  %v174_v27 = vld [vmem:[%s5350_s0 + $0x4f0] sm:$0xff]  ;;  %v368_v6 = vld [vmem:[%s5350_s0 + $0xb00] sm:$0xff] }
 0x273   :  { %2603 = vmatmul.msk.f32.gmra.mxu3 %vm430_vm0, %v363_v9  ;;  %v4555_v11 = vpop.f32.mrf.mxu1 }
 0x274   :  { %2288 = vst.msk [vmem:[%s5352_s3 + $0x1d0] sm:$0xff] %vm2229_vm1, %v1816_v10  ;;  %v373_v10 = vld [vmem:[%s5350_s0 + $0xb28] sm:$0xff] }
 0x275   :  { %v1501_v13 = vpop.f32.mrf.mxu2 }
 0x276   :  { %v1502_v14 = vadd.f32 %v4535_v1, %v1501_v13  ;;  %v2112_v15 = vpop.f32.mrf.mxu3  ;;  %2508 = vmatmul.msk.f32.gmra.mxu1 %vm430_vm0, %v173_v12  ;;  %v183_v13 = vld [vmem:[%s5350_s0 + $0x538] sm:$0xff] }
 0x277   :  { %v1213_v16 = vpop.f32.mrf.mxu0 }
 0x278   :  { %v2107_v19 = vadd.f32 %v2106_v54, %v1502_v14  ;;  %v1214_v20 = vadd.f32 %v4535_v1, %v1213_v16 }
 0x27a   :  { %2385 = vst.msk [vmem:[%s5352_s3 + $0x4d8] sm:$0xff] %vm2229_vm1, %v2107_v19  ;;  %v1819_v22 = vadd.f32 %v4472_v35, %v1214_v20  ;;  %1260 = vmatmul.f32.gmra.mxu0 %v166_v17  ;;  %1551 = vmatmul.f32.gmra.mxu2 %v360_v18  ;;  %v176_v18 = vld [vmem:[%s5350_s0 + $0x500] sm:$0xff]  ;;  %v370_v19 = vld [vmem:[%s5350_s0 + $0xb10] sm:$0xff] }
 0x27b   :  { %2604 = vmatmul.msk.f32.gmra.mxu3 %vm430_vm0, %v365_v21  ;;  %v4582_v23 = vpop.f32.mrf.mxu1 }
 0x27c   :  { %2289 = vst.msk [vmem:[%s5352_s3 + $0x1d8] sm:$0xff] %vm2229_vm1, %v1819_v22  ;;  %v375_v22 = vld [vmem:[%s5350_s0 + $0xb38] sm:$0xff] }
 0x27d   :  { %v1504_v25 = vpop.f32.mrf.mxu2 }
 0x27e   :  { %v1505_v26 = vadd.f32 %v4535_v1, %v1504_v25  ;;  %v2115_v28 = vpop.f32.mrf.mxu3  ;;  %2509 = vmatmul.msk.f32.gmra.mxu1 %vm430_vm0, %v175_v24  ;;  %v185_v25 = vld [vmem:[%s5350_s0 + $0x548] sm:$0xff] }
 0x27f   :  { %v1216_v29 = vpop.f32.mrf.mxu0 }
 0x280   :  { %v2110_v32 = vadd.f32 %v2109_v3, %v1505_v26  ;;  %v1217_v33 = vadd.f32 %v4535_v1, %v1216_v29 }
 0x282   :  { %2386 = vst.msk [vmem:[%s5352_s3 + $0x4e0] sm:$0xff] %vm2229_vm1, %v2110_v32  ;;  %v1822_v35 = vadd.f32 %v4499_v50, %v1217_v33  ;;  %1263 = vmatmul.f32.gmra.mxu0 %v168_v30  ;;  %1554 = vmatmul.f32.gmra.mxu2 %v362_v31  ;;  %v178_v31 = vld [vmem:[%s5350_s0 + $0x510] sm:$0xff]  ;;  %v372_v32 = vld [vmem:[%s5350_s0 + $0xb20] sm:$0xff] }
 0x283   :  { %2605 = vmatmul.msk.f32.gmra.mxu3 %vm430_vm0, %v367_v34  ;;  %v4609_v38 = vpop.f32.mrf.mxu1 }
 0x284   :  { %2290 = vst.msk [vmem:[%s5352_s3 + $0x1e0] sm:$0xff] %vm2229_vm1, %v1822_v35  ;;  %v377_v35 = vld [vmem:[%s5350_s0 + $0xb48] sm:$0xff] }
 0x285   :  { %v1507_v40 = vpop.f32.mrf.mxu2 }
 0x286   :  { %v1508_v41 = vadd.f32 %v4535_v1, %v1507_v40  ;;  %v2118_v42 = vpop.f32.mrf.mxu3  ;;  %2510 = vmatmul.msk.f32.gmra.mxu1 %vm430_vm0, %v177_v39  ;;  %v187_v40 = vld [vmem:[%s5350_s0 + $0x558] sm:$0xff] }
 0x287   :  { %v1219_v43 = vpop.f32.mrf.mxu0 }
 0x288   :  { %v2113_v47 = vadd.f32 %v2112_v15, %v1508_v41  ;;  %v1220_v48 = vadd.f32 %v4535_v1, %v1219_v43 }
 0x28a   :  { %2387 = vst.msk [vmem:[%s5352_s3 + $0x4e8] sm:$0xff] %vm2229_vm1, %v2113_v47  ;;  %v1825_v50 = vadd.f32 %v4526_v63, %v1220_v48  ;;  %1266 = vmatmul.f32.gmra.mxu0 %v170_v44  ;;  %1557 = vmatmul.f32.gmra.mxu2 %v364_v45  ;;  %v180_v45 = vld [vmem:[%s5350_s0 + $0x520] sm:$0xff]  ;;  %v374_v47 = vld [vmem:[%s5350_s0 + $0xb30] sm:$0xff] }
 0x28b   :  { %2606 = vmatmul.msk.f32.gmra.mxu3 %vm430_vm0, %v369_v49  ;;  %v4636_v51 = vpop.f32.mrf.mxu1 }
 0x28c   :  { %2291 = vst.msk [vmem:[%s5352_s3 + $0x1e8] sm:$0xff] %vm2229_vm1, %v1825_v50  ;;  %v379_v50 = vld [vmem:[%s5350_s0 + $0xb58] sm:$0xff] }
 0x28d   :  { %v1510_v53 = vpop.f32.mrf.mxu2 }
 0x28e   :  { %v1511_v54 = vadd.f32 %v4535_v1, %v1510_v53  ;;  %v2121_v55 = vpop.f32.mrf.mxu3  ;;  %2511 = vmatmul.msk.f32.gmra.mxu1 %vm430_vm0, %v179_v52  ;;  %v189_v53 = vld [vmem:[%s5350_s0 + $0x568] sm:$0xff] }
 0x28f   :  { %v1222_v57 = vpop.f32.mrf.mxu0 }
 0x290   :  { %v2116_v60 = vadd.f32 %v2115_v28, %v1511_v54  ;;  %v1223_v61 = vadd.f32 %v4535_v1, %v1222_v57 }
 0x292   :  { %2388 = vst.msk [vmem:[%s5352_s3 + $0x4f0] sm:$0xff] %vm2229_vm1, %v2116_v60  ;;  %v1828_v63 = vadd.f32 %v4555_v11, %v1223_v61  ;;  %1269 = vmatmul.f32.gmra.mxu0 %v172_v58  ;;  %1560 = vmatmul.f32.gmra.mxu2 %v366_v59  ;;  %v182_v59 = vld [vmem:[%s5350_s0 + $0x530] sm:$0xff]  ;;  %v376_v60 = vld [vmem:[%s5350_s0 + $0xb40] sm:$0xff] }
 0x293   :  { %2607 = vmatmul.msk.f32.gmra.mxu3 %vm430_vm0, %v371_v62  ;;  %v4663_v7 = vpop.f32.mrf.mxu1 }
 0x294   :  { %2292 = vst.msk [vmem:[%s5352_s3 + $0x1f0] sm:$0xff] %vm2229_vm1, %v1828_v63  ;;  %v381_v63 = vld [vmem:[%s5350_s0 + $0xb68] sm:$0xff] }
 0x295   :  { %v1513_v2 = vpop.f32.mrf.mxu2 }
 0x296   :  { %v1514_v3 = vadd.f32 %v4535_v1, %v1513_v2  ;;  %v2124_v4 = vpop.f32.mrf.mxu3  ;;  %2512 = vmatmul.msk.f32.gmra.mxu1 %vm430_vm0, %v181_v0  ;;  %v191_v2 = vld [vmem:[%s5350_s0 + $0x578] sm:$0xff] }
 0x297   :  { %v1225_v5 = vpop.f32.mrf.mxu0 }
 0x298   :  { %v2119_v8 = vadd.f32 %v2118_v42, %v1514_v3  ;;  %v1226_v9 = vadd.f32 %v4535_v1, %v1225_v5 }
 0x29a   :  { %2389 = vst.msk [vmem:[%s5352_s3 + $0x4f8] sm:$0xff] %vm2229_vm1, %v2119_v8  ;;  %v1831_v11 = vadd.f32 %v4582_v23, %v1226_v9  ;;  %1272 = vmatmul.f32.gmra.mxu0 %v174_v27  ;;  %1563 = vmatmul.f32.gmra.mxu2 %v368_v6  ;;  %v184_v6 = vld [vmem:[%s5350_s0 + $0x540] sm:$0xff]  ;;  %v378_v8 = vld [vmem:[%s5350_s0 + $0xb50] sm:$0xff] }
 0x29b   :  { %2608 = vmatmul.msk.f32.gmra.mxu3 %vm430_vm0, %v373_v10  ;;  %v4690_v12 = vpop.f32.mrf.mxu1 }
 0x29c   :  { %2293 = vst.msk [vmem:[%s5352_s3 + $0x1f8] sm:$0xff] %vm2229_vm1, %v1831_v11  ;;  %v383_v11 = vld [vmem:[%s5350_s0 + $0xb78] sm:$0xff] }
 0x29d   :  { %v1516_v14 = vpop.f32.mrf.mxu2 }
 0x29e   :  { %v1517_v15 = vadd.f32 %v4535_v1, %v1516_v14  ;;  %v2127_v16 = vpop.f32.mrf.mxu3  ;;  %2513 = vmatmul.msk.f32.gmra.mxu1 %vm430_vm0, %v183_v13  ;;  %v193_v14 = vld [vmem:[%s5350_s0 + $0x588] sm:$0xff] }
 0x29f   :  { %v1228_v17 = vpop.f32.mrf.mxu0 }
 0x2a0   :  { %v2122_v20 = vadd.f32 %v2121_v55, %v1517_v15  ;;  %v1229_v21 = vadd.f32 %v4535_v1, %v1228_v17 }
 0x2a2   :  { %2390 = vst.msk [vmem:[%s5352_s3 + $0x500] sm:$0xff] %vm2229_vm1, %v2122_v20  ;;  %v1834_v23 = vadd.f32 %v4609_v38, %v1229_v21  ;;  %1275 = vmatmul.f32.gmra.mxu0 %v176_v18  ;;  %1566 = vmatmul.f32.gmra.mxu2 %v370_v19  ;;  %v186_v19 = vld [vmem:[%s5350_s0 + $0x550] sm:$0xff]  ;;  %v380_v20 = vld [vmem:[%s5350_s0 + $0xb60] sm:$0xff] }
 0x2a3   :  { %2609 = vmatmul.msk.f32.gmra.mxu3 %vm430_vm0, %v375_v22  ;;  %v4717_v24 = vpop.f32.mrf.mxu1 }
 0x2a4   :  { %2294 = vst.msk [vmem:[%s5352_s3 + $0x200] sm:$0xff] %vm2229_vm1, %v1834_v23  ;;  %v385_v23 = vld [vmem:[%s5350_s0 + $0xb88] sm:$0xff] }
 0x2a5   :  { %v1519_v26 = vpop.f32.mrf.mxu2 }
 0x2a6   :  { %v1520_v28 = vadd.f32 %v4535_v1, %v1519_v26  ;;  %v2130_v29 = vpop.f32.mrf.mxu3  ;;  %2514 = vmatmul.msk.f32.gmra.mxu1 %vm430_vm0, %v185_v25  ;;  %v195_v26 = vld [vmem:[%s5350_s0 + $0x598] sm:$0xff] }
 0x2a7   :  { %v1231_v30 = vpop.f32.mrf.mxu0 }
 0x2a8   :  { %v2125_v33 = vadd.f32 %v2124_v4, %v1520_v28  ;;  %v1232_v34 = vadd.f32 %v4535_v1, %v1231_v30 }
 0x2aa   :  { %2391 = vst.msk [vmem:[%s5352_s3 + $0x508] sm:$0xff] %vm2229_vm1, %v2125_v33  ;;  %v1837_v38 = vadd.f32 %v4636_v51, %v1232_v34  ;;  %1278 = vmatmul.f32.gmra.mxu0 %v178_v31  ;;  %1569 = vmatmul.f32.gmra.mxu2 %v372_v32  ;;  %v188_v32 = vld [vmem:[%s5350_s0 + $0x560] sm:$0xff]  ;;  %v382_v33 = vld [vmem:[%s5350_s0 + $0xb70] sm:$0xff] }
 0x2ab   :  { %2610 = vmatmul.msk.f32.gmra.mxu3 %vm430_vm0, %v377_v35  ;;  %v4744_v39 = vpop.f32.mrf.mxu1 }
 0x2ac   :  { %2295 = vst.msk [vmem:[%s5352_s3 + $0x208] sm:$0xff] %vm2229_vm1, %v1837_v38  ;;  %v387_v38 = vld [vmem:[%s5350_s0 + $0xb98] sm:$0xff] }
 0x2ad   :  { %v1522_v41 = vpop.f32.mrf.mxu2 }
 0x2ae   :  { %v1523_v42 = vadd.f32 %v4535_v1, %v1522_v41  ;;  %v2133_v43 = vpop.f32.mrf.mxu3  ;;  %2515 = vmatmul.msk.f32.gmra.mxu1 %vm430_vm0, %v187_v40  ;;  %v197_v41 = vld [vmem:[%s5350_s0 + $0x5a8] sm:$0xff] }
 0x2af   :  { %v1234_v44 = vpop.f32.mrf.mxu0 }
 0x2b0   :  { %v2128_v48 = vadd.f32 %v2127_v16, %v1523_v42  ;;  %v1235_v49 = vadd.f32 %v4535_v1, %v1234_v44 }
 0x2b2   :  { %2392 = vst.msk [vmem:[%s5352_s3 + $0x510] sm:$0xff] %vm2229_vm1, %v2128_v48  ;;  %v1840_v51 = vadd.f32 %v4663_v7, %v1235_v49  ;;  %1281 = vmatmul.f32.gmra.mxu0 %v180_v45  ;;  %1572 = vmatmul.f32.gmra.mxu2 %v374_v47  ;;  %v190_v47 = vld [vmem:[%s5350_s0 + $0x570] sm:$0xff]  ;;  %v384_v48 = vld [vmem:[%s5350_s0 + $0xb80] sm:$0xff] }
 0x2b3   :  { %2611 = vmatmul.msk.f32.gmra.mxu3 %vm430_vm0, %v379_v50  ;;  %v4771_v52 = vpop.f32.mrf.mxu1 }
 0x2b4   :  { %2296 = vst.msk [vmem:[%s5352_s3 + $0x210] sm:$0xff] %vm2229_vm1, %v1840_v51  ;;  %v389_v51 = vld [vmem:[%s5350_s0 + $0xba8] sm:$0xff] }
 0x2b5   :  { %v1525_v54 = vpop.f32.mrf.mxu2 }
 0x2b6   :  { %v1526_v55 = vadd.f32 %v4535_v1, %v1525_v54  ;;  %v2136_v57 = vpop.f32.mrf.mxu3  ;;  %2516 = vmatmul.msk.f32.gmra.mxu1 %vm430_vm0, %v189_v53  ;;  %v199_v54 = vld [vmem:[%s5350_s0 + $0x5b8] sm:$0xff] }
 0x2b7   :  { %v1237_v58 = vpop.f32.mrf.mxu0 }
 0x2b8   :  { %v2131_v61 = vadd.f32 %v2130_v29, %v1526_v55  ;;  %v1238_v62 = vadd.f32 %v4535_v1, %v1237_v58 }
 0x2ba   :  { %2393 = vst.msk [vmem:[%s5352_s3 + $0x518] sm:$0xff] %vm2229_vm1, %v2131_v61  ;;  %v1843_v7 = vadd.f32 %v4690_v12, %v1238_v62  ;;  %1284 = vmatmul.f32.gmra.mxu0 %v182_v59  ;;  %1575 = vmatmul.f32.gmra.mxu2 %v376_v60  ;;  %v192_v60 = vld [vmem:[%s5350_s0 + $0x580] sm:$0xff]  ;;  %v386_v61 = vld [vmem:[%s5350_s0 + $0xb90] sm:$0xff] }
 0x2bb   :  { %2612 = vmatmul.msk.f32.gmra.mxu3 %vm430_vm0, %v381_v63  ;;  %v4798_v0 = vpop.f32.mrf.mxu1 }
 0x2bc   :  { %2297 = vst.msk [vmem:[%s5352_s3 + $0x218] sm:$0xff] %vm2229_vm1, %v1843_v7  ;;  %v391_v7 = vld [vmem:[%s5350_s0 + $0xbb8] sm:$0xff] }
 0x2bd   :  { %v1528_v3 = vpop.f32.mrf.mxu2 }
 0x2be   :  { %v1529_v4 = vadd.f32 %v4535_v1, %v1528_v3  ;;  %v2139_v5 = vpop.f32.mrf.mxu3  ;;  %2517 = vmatmul.msk.f32.gmra.mxu1 %vm430_vm0, %v191_v2  ;;  %v201_v3 = vld [vmem:[%s5350_s0 + $0x5c8] sm:$0xff] }
 0x2bf   :  { %v1240_v27 = vpop.f32.mrf.mxu0 }
 0x2c0   :  { %v2134_v9 = vadd.f32 %v2133_v43, %v1529_v4  ;;  %v1241_v10 = vadd.f32 %v4535_v1, %v1240_v27 }
 0x2c2   :  { %2394 = vst.msk [vmem:[%s5352_s3 + $0x520] sm:$0xff] %vm2229_vm1, %v2134_v9  ;;  %v1846_v12 = vadd.f32 %v4717_v24, %v1241_v10  ;;  %1287 = vmatmul.f32.gmra.mxu0 %v184_v6  ;;  %1578 = vmatmul.f32.gmra.mxu2 %v378_v8  ;;  %v194_v8 = vld [vmem:[%s5350_s0 + $0x590] sm:$0xff]  ;;  %v388_v9 = vld [vmem:[%s5350_s0 + $0xba0] sm:$0xff] }
 0x2c3   :  { %2613 = vmatmul.msk.f32.gmra.mxu3 %vm430_vm0, %v383_v11  ;;  %v4825_v13 = vpop.f32.mrf.mxu1 }
 0x2c4   :  { %2298 = vst.msk [vmem:[%s5352_s3 + $0x220] sm:$0xff] %vm2229_vm1, %v1846_v12  ;;  %v393_v12 = vld [vmem:[%s5350_s0 + $0xbc8] sm:$0xff] }
 0x2c5   :  { %v1531_v15 = vpop.f32.mrf.mxu2 }
 0x2c6   :  { %v1532_v16 = vadd.f32 %v4535_v1, %v1531_v15  ;;  %v2142_v17 = vpop.f32.mrf.mxu3  ;;  %2518 = vmatmul.msk.f32.gmra.mxu1 %vm430_vm0, %v193_v14  ;;  %v203_v15 = vld [vmem:[%s5350_s0 + $0x5d8] sm:$0xff] }
 0x2c7   :  { %v1243_v18 = vpop.f32.mrf.mxu0 }
 0x2c8   :  { %v2137_v21 = vadd.f32 %v2136_v57, %v1532_v16  ;;  %v1244_v22 = vadd.f32 %v4535_v1, %v1243_v18 }
 0x2ca   :  { %2395 = vst.msk [vmem:[%s5352_s3 + $0x528] sm:$0xff] %vm2229_vm1, %v2137_v21  ;;  %v1849_v24 = vadd.f32 %v4744_v39, %v1244_v22  ;;  %1290 = vmatmul.f32.gmra.mxu0 %v186_v19  ;;  %1581 = vmatmul.f32.gmra.mxu2 %v380_v20  ;;  %v196_v20 = vld [vmem:[%s5350_s0 + $0x5a0] sm:$0xff]  ;;  %v390_v21 = vld [vmem:[%s5350_s0 + $0xbb0] sm:$0xff] }
 0x2cb   :  { %2614 = vmatmul.msk.f32.gmra.mxu3 %vm430_vm0, %v385_v23  ;;  %v4852_v25 = vpop.f32.mrf.mxu1 }
 0x2cc   :  { %2299 = vst.msk [vmem:[%s5352_s3 + $0x228] sm:$0xff] %vm2229_vm1, %v1849_v24  ;;  %v395_v24 = vld [vmem:[%s5350_s0 + $0xbd8] sm:$0xff] }
 0x2cd   :  { %v1534_v28 = vpop.f32.mrf.mxu2 }
 0x2ce   :  { %v1535_v29 = vadd.f32 %v4535_v1, %v1534_v28  ;;  %v2145_v30 = vpop.f32.mrf.mxu3  ;;  %2519 = vmatmul.msk.f32.gmra.mxu1 %vm430_vm0, %v195_v26  ;;  %v205_v28 = vld [vmem:[%s5350_s0 + $0x5e8] sm:$0xff] }
 0x2cf   :  { %v1246_v31 = vpop.f32.mrf.mxu0 }
 0x2d0   :  { %v2140_v34 = vadd.f32 %v2139_v5, %v1535_v29  ;;  %v1247_v35 = vadd.f32 %v4535_v1, %v1246_v31 }
 0x2d2   :  { %2396 = vst.msk [vmem:[%s5352_s3 + $0x530] sm:$0xff] %vm2229_vm1, %v2140_v34  ;;  %v1852_v39 = vadd.f32 %v4771_v52, %v1247_v35  ;;  %1293 = vmatmul.f32.gmra.mxu0 %v188_v32  ;;  %1584 = vmatmul.f32.gmra.mxu2 %v382_v33  ;;  %v198_v33 = vld [vmem:[%s5350_s0 + $0x5b0] sm:$0xff]  ;;  %v392_v34 = vld [vmem:[%s5350_s0 + $0xbc0] sm:$0xff] }
 0x2d3   :  { %2615 = vmatmul.msk.f32.gmra.mxu3 %vm430_vm0, %v387_v38  ;;  %v4879_v40 = vpop.f32.mrf.mxu1 }
 0x2d4   :  { %2300 = vst.msk [vmem:[%s5352_s3 + $0x230] sm:$0xff] %vm2229_vm1, %v1852_v39  ;;  %v397_v39 = vld [vmem:[%s5350_s0 + $0xbe8] sm:$0xff] }
 0x2d5   :  { %v1537_v42 = vpop.f32.mrf.mxu2 }
 0x2d6   :  { %v1538_v43 = vadd.f32 %v4535_v1, %v1537_v42  ;;  %v2148_v44 = vpop.f32.mrf.mxu3  ;;  %2520 = vmatmul.msk.f32.gmra.mxu1 %vm430_vm0, %v197_v41  ;;  %v207_v42 = vld [vmem:[%s5350_s0 + $0x5f8] sm:$0xff] }
 0x2d7   :  { %v1249_v45 = vpop.f32.mrf.mxu0 }
 0x2d8   :  { %v2143_v49 = vadd.f32 %v2142_v17, %v1538_v43  ;;  %v1250_v50 = vadd.f32 %v4535_v1, %v1249_v45 }
 0x2da   :  { %2397 = vst.msk [vmem:[%s5352_s3 + $0x538] sm:$0xff] %vm2229_vm1, %v2143_v49  ;;  %v1855_v52 = vadd.f32 %v4798_v0, %v1250_v50  ;;  %1296 = vmatmul.f32.gmra.mxu0 %v190_v47  ;;  %1587 = vmatmul.f32.gmra.mxu2 %v384_v48  ;;  %v200_v48 = vld [vmem:[%s5350_s0 + $0x5c0] sm:$0xff]  ;;  %v394_v49 = vld [vmem:[%s5350_s0 + $0xbd0] sm:$0xff] }
 0x2db   :  { %2616 = vmatmul.msk.f32.gmra.mxu3 %vm430_vm0, %v389_v51  ;;  %v4906_v53 = vpop.f32.mrf.mxu1 }
 0x2dc   :  { %2301 = vst.msk [vmem:[%s5352_s3 + $0x238] sm:$0xff] %vm2229_vm1, %v1855_v52  ;;  %v399_v52 = vld [vmem:[%s5350_s0 + $0xbf8] sm:$0xff] }
 0x2dd   :  { %v1540_v55 = vpop.f32.mrf.mxu2 }
 0x2de   :  { %v1541_v57 = vadd.f32 %v4535_v1, %v1540_v55  ;;  %v2151_v58 = vpop.f32.mrf.mxu3  ;;  %2521 = vmatmul.msk.f32.gmra.mxu1 %vm430_vm0, %v199_v54  ;;  %v209_v55 = vld [vmem:[%s5350_s0 + $0x608] sm:$0xff] }
 0x2df   :  { %v1252_v59 = vpop.f32.mrf.mxu0 }
 0x2e0   :  { %v2146_v62 = vadd.f32 %v2145_v30, %v1541_v57  ;;  %v1253_v63 = vadd.f32 %v4535_v1, %v1252_v59 }
 0x2e2   :  { %2398 = vst.msk [vmem:[%s5352_s3 + $0x540] sm:$0xff] %vm2229_vm1, %v2146_v62  ;;  %v1858_v0 = vadd.f32 %v4825_v13, %v1253_v63  ;;  %1299 = vmatmul.f32.gmra.mxu0 %v192_v60  ;;  %1590 = vmatmul.f32.gmra.mxu2 %v386_v61  ;;  %v202_v61 = vld [vmem:[%s5350_s0 + $0x5d0] sm:$0xff]  ;;  %v396_v62 = vld [vmem:[%s5350_s0 + $0xbe0] sm:$0xff] }
 0x2e3   :  { %2617 = vmatmul.msk.f32.gmra.mxu3 %vm430_vm0, %v391_v7  ;;  %v4933_v2 = vpop.f32.mrf.mxu1 }
 0x2e4   :  { %2302 = vst.msk [vmem:[%s5352_s3 + $0x240] sm:$0xff] %vm2229_vm1, %v1858_v0  ;;  %v401_v0 = vld [vmem:[%s5350_s0 + $0xc08] sm:$0xff] }
 0x2e5   :  { %v1543_v4 = vpop.f32.mrf.mxu2 }
 0x2e6   :  { %v1544_v5 = vadd.f32 %v4535_v1, %v1543_v4  ;;  %v2154_v27 = vpop.f32.mrf.mxu3  ;;  %2522 = vmatmul.msk.f32.gmra.mxu1 %vm430_vm0, %v201_v3  ;;  %v211_v4 = vld [vmem:[%s5350_s0 + $0x618] sm:$0xff] }
 0x2e7   :  { %v1255_v6 = vpop.f32.mrf.mxu0 }
 0x2e8   :  { %v2149_v10 = vadd.f32 %v2148_v44, %v1544_v5  ;;  %v1256_v11 = vadd.f32 %v4535_v1, %v1255_v6 }
 0x2ea   :  { %2399 = vst.msk [vmem:[%s5352_s3 + $0x548] sm:$0xff] %vm2229_vm1, %v2149_v10  ;;  %v1861_v13 = vadd.f32 %v4852_v25, %v1256_v11  ;;  %1302 = vmatmul.f32.gmra.mxu0 %v194_v8  ;;  %1593 = vmatmul.f32.gmra.mxu2 %v388_v9  ;;  %v204_v9 = vld [vmem:[%s5350_s0 + $0x5e0] sm:$0xff]  ;;  %v398_v10 = vld [vmem:[%s5350_s0 + $0xbf0] sm:$0xff] }
 0x2eb   :  { %2618 = vmatmul.msk.f32.gmra.mxu3 %vm430_vm0, %v393_v12  ;;  %v4960_v14 = vpop.f32.mrf.mxu1 }
 0x2ec   :  { %2303 = vst.msk [vmem:[%s5352_s3 + $0x248] sm:$0xff] %vm2229_vm1, %v1861_v13  ;;  %v403_v13 = vld [vmem:[%s5350_s0 + $0xc18] sm:$0xff] }
 0x2ed   :  { %v1546_v16 = vpop.f32.mrf.mxu2 }
 0x2ee   :  { %v1547_v17 = vadd.f32 %v4535_v1, %v1546_v16  ;;  %v2157_v18 = vpop.f32.mrf.mxu3  ;;  %2523 = vmatmul.msk.f32.gmra.mxu1 %vm430_vm0, %v203_v15  ;;  %v213_v16 = vld [vmem:[%s5350_s0 + $0x628] sm:$0xff] }
 0x2ef   :  { %v1258_v19 = vpop.f32.mrf.mxu0 }
 0x2f0   :  { %v2152_v22 = vadd.f32 %v2151_v58, %v1547_v17  ;;  %v1259_v23 = vadd.f32 %v4535_v1, %v1258_v19 }
 0x2f2   :  { %2400 = vst.msk [vmem:[%s5352_s3 + $0x550] sm:$0xff] %vm2229_vm1, %v2152_v22  ;;  %v1864_v25 = vadd.f32 %v4879_v40, %v1259_v23  ;;  %1305 = vmatmul.f32.gmra.mxu0 %v196_v20  ;;  %1596 = vmatmul.f32.gmra.mxu2 %v390_v21  ;;  %v206_v21 = vld [vmem:[%s5350_s0 + $0x5f0] sm:$0xff]  ;;  %v400_v22 = vld [vmem:[%s5350_s0 + $0xc00] sm:$0xff] }
 0x2f3   :  { %2619 = vmatmul.msk.f32.gmra.mxu3 %vm430_vm0, %v395_v24  ;;  %v4987_v26 = vpop.f32.mrf.mxu1 }
 0x2f4   :  { %2304 = vst.msk [vmem:[%s5352_s3 + $0x250] sm:$0xff] %vm2229_vm1, %v1864_v25  ;;  %v405_v25 = vld [vmem:[%s5350_s0 + $0xc28] sm:$0xff] }
 0x2f5   :  { %v1549_v29 = vpop.f32.mrf.mxu2 }
 0x2f6   :  { %v1550_v30 = vadd.f32 %v4535_v1, %v1549_v29  ;;  %v2160_v31 = vpop.f32.mrf.mxu3  ;;  %2524 = vmatmul.msk.f32.gmra.mxu1 %vm430_vm0, %v205_v28  ;;  %v215_v29 = vld [vmem:[%s5350_s0 + $0x638] sm:$0xff] }
 0x2f7   :  { %v1261_v32 = vpop.f32.mrf.mxu0 }
 0x2f8   :  { %v2155_v35 = vadd.f32 %v2154_v27, %v1550_v30  ;;  %v1262_v38 = vadd.f32 %v4535_v1, %v1261_v32 }
 0x2fa   :  { %2401 = vst.msk [vmem:[%s5352_s3 + $0x558] sm:$0xff] %vm2229_vm1, %v2155_v35  ;;  %v1867_v40 = vadd.f32 %v4906_v53, %v1262_v38  ;;  %1308 = vmatmul.f32.gmra.mxu0 %v198_v33  ;;  %1599 = vmatmul.f32.gmra.mxu2 %v392_v34  ;;  %v208_v34 = vld [vmem:[%s5350_s0 + $0x600] sm:$0xff]  ;;  %v402_v35 = vld [vmem:[%s5350_s0 + $0xc10] sm:$0xff] }
 0x2fb   :  { %2620 = vmatmul.msk.f32.gmra.mxu3 %vm430_vm0, %v397_v39  ;;  %v5014_v41 = vpop.f32.mrf.mxu1 }
 0x2fc   :  { %2305 = vst.msk [vmem:[%s5352_s3 + $0x258] sm:$0xff] %vm2229_vm1, %v1867_v40  ;;  %v407_v40 = vld [vmem:[%s5350_s0 + $0xc38] sm:$0xff] }
 0x2fd   :  { %v1552_v43 = vpop.f32.mrf.mxu2 }
 0x2fe   :  { %v1553_v44 = vadd.f32 %v4535_v1, %v1552_v43  ;;  %v2163_v45 = vpop.f32.mrf.mxu3  ;;  %2525 = vmatmul.msk.f32.gmra.mxu1 %vm430_vm0, %v207_v42 }
 0x2ff   :  { %v1264_v47 = vpop.f32.mrf.mxu0 }
 0x300   :  { %v2158_v50 = vadd.f32 %v2157_v18, %v1553_v44  ;;  %v1265_v51 = vadd.f32 %v4535_v1, %v1264_v47 }
 0x302   :  { %2402 = vst.msk [vmem:[%s5352_s3 + $0x560] sm:$0xff] %vm2229_vm1, %v2158_v50  ;;  %v1870_v53 = vadd.f32 %v4933_v2, %v1265_v51  ;;  %1311 = vmatmul.f32.gmra.mxu0 %v200_v48  ;;  %1602 = vmatmul.f32.gmra.mxu2 %v394_v49  ;;  %v404_v48 = vld [vmem:[%s5350_s0 + $0xc20] sm:$0xff] }
 0x303   :  { %2621 = vmatmul.msk.f32.gmra.mxu3 %vm430_vm0, %v399_v52  ;;  %v5041_v54 = vpop.f32.mrf.mxu1 }
 0x304   :  { %2306 = vst.msk [vmem:[%s5352_s3 + $0x260] sm:$0xff] %vm2229_vm1, %v1870_v53 }
 0x305   :  { %v1555_v57 = vpop.f32.mrf.mxu2 }
 0x306   :  { %v1556_v58 = vadd.f32 %v4535_v1, %v1555_v57  ;;  %v2166_v59 = vpop.f32.mrf.mxu3  ;;  %2526 = vmatmul.msk.f32.gmra.mxu1 %vm430_vm0, %v209_v55 }
 0x307   :  { %v1267_v60 = vpop.f32.mrf.mxu0 }
 0x308   :  { %v2161_v63 = vadd.f32 %v2160_v31, %v1556_v58  ;;  %v1268_v7 = vadd.f32 %v4535_v1, %v1267_v60 }
 0x30a   :  { %2403 = vst.msk [vmem:[%s5352_s3 + $0x568] sm:$0xff] %vm2229_vm1, %v2161_v63  ;;  %v1873_v2 = vadd.f32 %v4960_v14, %v1268_v7  ;;  %1314 = vmatmul.f32.gmra.mxu0 %v202_v61  ;;  %1605 = vmatmul.f32.gmra.mxu2 %v396_v62 }
 0x30b   :  { %2622 = vmatmul.msk.f32.gmra.mxu3 %vm430_vm0, %v401_v0  ;;  %v5068_v3 = vpop.f32.mrf.mxu1 }
 0x30c   :  { %2307 = vst.msk [vmem:[%s5352_s3 + $0x268] sm:$0xff] %vm2229_vm1, %v1873_v2 }
 0x30d   :  { %v1558_v5 = vpop.f32.mrf.mxu2 }
 0x30e   :  { %v1559_v27 = vadd.f32 %v4535_v1, %v1558_v5  ;;  %v2169_v6 = vpop.f32.mrf.mxu3  ;;  %2527 = vmatmul.msk.f32.gmra.mxu1 %vm430_vm0, %v211_v4 }
 0x30f   :  { %v1270_v8 = vpop.f32.mrf.mxu0 }
 0x310   :  { %v2164_v11 = vadd.f32 %v2163_v45, %v1559_v27  ;;  %v1271_v12 = vadd.f32 %v4535_v1, %v1270_v8 }
 0x312   :  { %2404 = vst.msk [vmem:[%s5352_s3 + $0x570] sm:$0xff] %vm2229_vm1, %v2164_v11  ;;  %v1876_v14 = vadd.f32 %v4987_v26, %v1271_v12  ;;  %1317 = vmatmul.f32.gmra.mxu0 %v204_v9  ;;  %1608 = vmatmul.f32.gmra.mxu2 %v398_v10 }
 0x313   :  { %2623 = vmatmul.msk.f32.gmra.mxu3 %vm430_vm0, %v403_v13  ;;  %v1887_v15 = vpop.f32.mrf.mxu1 }
 0x314   :  { %2308 = vst.msk [vmem:[%s5352_s3 + $0x270] sm:$0xff] %vm2229_vm1, %v1876_v14 }
 0x315   :  { %v1561_v17 = vpop.f32.mrf.mxu2 }
 0x316   :  { %v1562_v18 = vadd.f32 %v4535_v1, %v1561_v17  ;;  %v2172_v19 = vpop.f32.mrf.mxu3  ;;  %2528 = vmatmul.msk.f32.gmra.mxu1 %vm430_vm0, %v213_v16 }
 0x317   :  { %v1273_v20 = vpop.f32.mrf.mxu0 }
 0x318   :  { %v2167_v23 = vadd.f32 %v2166_v59, %v1562_v18  ;;  %v1274_v24 = vadd.f32 %v4535_v1, %v1273_v20 }
 0x31a   :  { %2405 = vst.msk [vmem:[%s5352_s3 + $0x578] sm:$0xff] %vm2229_vm1, %v2167_v23  ;;  %v1879_v26 = vadd.f32 %v5014_v41, %v1274_v24  ;;  %1320 = vmatmul.f32.gmra.mxu0 %v206_v21  ;;  %1611 = vmatmul.f32.gmra.mxu2 %v400_v22 }
 0x31b   :  { %2624 = vmatmul.msk.f32.gmra.mxu3 %vm430_vm0, %v405_v25  ;;  %v1890_v28 = vpop.f32.mrf.mxu1 }
 0x31c   :  { %2309 = vst.msk [vmem:[%s5352_s3 + $0x278] sm:$0xff] %vm2229_vm1, %v1879_v26 }
 0x31d   :  { %v1564_v30 = vpop.f32.mrf.mxu2 }
 0x31e   :  { %v1565_v31 = vadd.f32 %v4535_v1, %v1564_v30  ;;  %v2175_v32 = vpop.f32.mrf.mxu3  ;;  %2529 = vmatmul.msk.f32.gmra.mxu1 %vm430_vm0, %v215_v29 }
 0x31f   :  { %v1276_v33 = vpop.f32.mrf.mxu0 }
 0x320   :  { %v2170_v38 = vadd.f32 %v2169_v6, %v1565_v31  ;;  %v1277_v39 = vadd.f32 %v4535_v1, %v1276_v33 }
 0x322   :  { %2406 = vst.msk [vmem:[%s5352_s3 + $0x580] sm:$0xff] %vm2229_vm1, %v2170_v38  ;;  %v1882_v41 = vadd.f32 %v5041_v54, %v1277_v39  ;;  %1323 = vmatmul.f32.gmra.mxu0 %v208_v34  ;;  %1614 = vmatmul.f32.gmra.mxu2 %v402_v35 }
 0x323   :  { %2625 = vmatmul.msk.f32.gmra.mxu3 %vm430_vm0, %v407_v40  ;;  %v1893_v42 = vpop.f32.mrf.mxu1 }
 0x324   :  { %2310 = vst.msk [vmem:[%s5352_s3 + $0x280] sm:$0xff] %vm2229_vm1, %v1882_v41 }
 0x325   :  { %v1567_v43 = vpop.f32.mrf.mxu2 }
 0x326   :  { %v1568_v44 = vadd.f32 %v4535_v1, %v1567_v43  ;;  %v2178_v45 = vpop.f32.mrf.mxu3 }
 0x327   :  { %v1279_v47 = vpop.f32.mrf.mxu0 }
 0x328   :  { %v2173_v49 = vadd.f32 %v2172_v19, %v1568_v44  ;;  %v1280_v50 = vadd.f32 %v4535_v1, %v1279_v47 }
 0x32a   :  { %2407 = vst.msk [vmem:[%s5352_s3 + $0x588] sm:$0xff] %vm2229_vm1, %v2173_v49  ;;  %v1885_v51 = vadd.f32 %v5068_v3, %v1280_v50  ;;  %1617 = vmatmul.f32.gmra.mxu2 %v404_v48 }
 0x32b   :  { %v1896_v52 = vpop.f32.mrf.mxu1 }
 0x32c   :  { %2311 = vst.msk [vmem:[%s5352_s3 + $0x288] sm:$0xff] %vm2229_vm1, %v1885_v51 }
 0x32d   :  { %v1570_v53 = vpop.f32.mrf.mxu2 }
 0x32e   :  { %v1571_v54 = vadd.f32 %v4535_v1, %v1570_v53  ;;  %v2181_v55 = vpop.f32.mrf.mxu3 }
 0x32f   :  { %v1282_v57 = vpop.f32.mrf.mxu0 }
 0x330   :  { %v2176_v58 = vadd.f32 %v2175_v32, %v1571_v54  ;;  %v1283_v59 = vadd.f32 %v4535_v1, %v1282_v57 }
 0x332   :  { %2408 = vst.msk [vmem:[%s5352_s3 + $0x590] sm:$0xff] %vm2229_vm1, %v2176_v58  ;;  %v1888_v60 = vadd.f32 %v1887_v15, %v1283_v59 }
 0x333   :  { %v1899_v61 = vpop.f32.mrf.mxu1 }
 0x334   :  { %2312 = vst.msk [vmem:[%s5352_s3 + $0x290] sm:$0xff] %vm2229_vm1, %v1888_v60 }
 0x335   :  { %v1573_v62 = vpop.f32.mrf.mxu2 }
 0x336   :  { %v1574_v63 = vadd.f32 %v4535_v1, %v1573_v62  ;;  %v2184_v7 = vpop.f32.mrf.mxu3 }
 0x337   :  { %v1285_v0 = vpop.f32.mrf.mxu0 }
 0x338   :  { %v2179_v2 = vadd.f32 %v2178_v45, %v1574_v63  ;;  %v1286_v3 = vadd.f32 %v4535_v1, %v1285_v0 }
 0x33a   :  { %2409 = vst.msk [vmem:[%s5352_s3 + $0x598] sm:$0xff] %vm2229_vm1, %v2179_v2  ;;  %v1891_v4 = vadd.f32 %v1890_v28, %v1286_v3 }
 0x33b   :  { %v1902_v5 = vpop.f32.mrf.mxu1 }
 0x33c   :  { %2313 = vst.msk [vmem:[%s5352_s3 + $0x298] sm:$0xff] %vm2229_vm1, %v1891_v4  ;;  %v5253_v4 = vld [vmem:[#allocation2] ss:$0 sm:$0xff] }
 0x33d   :  { %v1576_v27 = vpop.f32.mrf.mxu2 }
 0x33e   :  { %v1577_v6 = vadd.f32 %v4535_v1, %v1576_v27  ;;  %v2187_v8 = vpop.f32.mrf.mxu3 }
 0x33f   :  { %v1288_v9 = vpop.f32.mrf.mxu0 }
 0x340   :  { %v2182_v10 = vadd.f32 %v2181_v55, %v1577_v6  ;;  %v1289_v11 = vadd.f32 %v4535_v1, %v1288_v9 }
 0x342   :  { %2410 = vst.msk [vmem:[%s5352_s3 + $0x5a0] sm:$0xff] %vm2229_vm1, %v2182_v10  ;;  %v1894_v12 = vadd.f32 %v1893_v42, %v1289_v11 }
 0x343   :  { %v1905_v13 = vpop.f32.mrf.mxu1 }
 0x344   :  { %2314 = vst.msk [vmem:[%s5352_s3 + $0x2a0] sm:$0xff] %vm2229_vm1, %v1894_v12 }
 0x345   :  { %v1579_v14 = vpop.f32.mrf.mxu2 }
 0x346   :  { %v1580_v15 = vadd.f32 %v4535_v1, %v1579_v14  ;;  %v2190_v16 = vpop.f32.mrf.mxu3 }
 0x347   :  { %v1291_v17 = vpop.f32.mrf.mxu0 }
 0x348   :  { %v2185_v18 = vadd.f32 %v2184_v7, %v1580_v15  ;;  %v1292_v19 = vadd.f32 %v4535_v1, %v1291_v17 }
 0x34a   :  { %2411 = vst.msk [vmem:[%s5352_s3 + $0x5a8] sm:$0xff] %vm2229_vm1, %v2185_v18  ;;  %v1897_v20 = vadd.f32 %v1896_v52, %v1292_v19 }
 0x34b   :  { %v1908_v21 = vpop.f32.mrf.mxu1 }
 0x34c   :  { %2315 = vst.msk [vmem:[%s5352_s3 + $0x2a8] sm:$0xff] %vm2229_vm1, %v1897_v20 }
 0x34d   :  { %v1582_v22 = vpop.f32.mrf.mxu2 }
 0x34e   :  { %v1583_v23 = vadd.f32 %v4535_v1, %v1582_v22  ;;  %v2193_v24 = vpop.f32.mrf.mxu3 }
 0x34f   :  { %v1294_v25 = vpop.f32.mrf.mxu0 }
 0x350   :  { %v2188_v26 = vadd.f32 %v2187_v8, %v1583_v23  ;;  %v1295_v28 = vadd.f32 %v4535_v1, %v1294_v25  ;;  %v1328_v25 = vadd.f32 %v5253_v4, %v3008_v36 }
 0x352   :  { %2412 = vst.msk [vmem:[%s5352_s3 + $0x5b0] sm:$0xff] %vm2229_vm1, %v2188_v26  ;;  %v1900_v29 = vadd.f32 %v1899_v61, %v1295_v28 }
 0x353   :  { %v1911_v30 = vpop.f32.mrf.mxu1 }
 0x354   :  { %2316 = vst.msk [vmem:[%s5352_s3 + $0x2b0] sm:$0xff] %vm2229_vm1, %v1900_v29 }
 0x355   :  { %v1585_v31 = vpop.f32.mrf.mxu2 }
 0x356   :  { %v1586_v32 = vadd.f32 %v4535_v1, %v1585_v31  ;;  %v2196_v33 = vpop.f32.mrf.mxu3 }
 0x357   :  { %v1297_v34 = vpop.f32.mrf.mxu0 }
 0x358   :  { %v2191_v35 = vadd.f32 %v2190_v16, %v1586_v32  ;;  %v1298_v38 = vadd.f32 %v4535_v1, %v1297_v34 }
 0x35a   :  { %2413 = vst.msk [vmem:[%s5352_s3 + $0x5b8] sm:$0xff] %vm2229_vm1, %v2191_v35  ;;  %v1903_v39 = vadd.f32 %v1902_v5, %v1298_v38  ;;  %v1331_v35 = vadd.f32 %v5253_v4, %v3031_v46 }
 0x35b   :  { %v1914_v40 = vpop.f32.mrf.mxu1 }
 0x35c   :  { %2317 = vst.msk [vmem:[%s5352_s3 + $0x2b8] sm:$0xff] %vm2229_vm1, %v1903_v39 }
 0x35d   :  { %v1588_v41 = vpop.f32.mrf.mxu2 }
 0x35e   :  { %v1589_v42 = vadd.f32 %v4535_v1, %v1588_v41  ;;  %v2199_v43 = vpop.f32.mrf.mxu3 }
 0x35f   :  { %v1300_v44 = vpop.f32.mrf.mxu0 }
 0x360   :  { %v2194_v45 = vadd.f32 %v2193_v24, %v1589_v42  ;;  %v1301_v47 = vadd.f32 %v4535_v1, %v1300_v44 }
 0x362   :  { %2414 = vst.msk [vmem:[%s5352_s3 + $0x5c0] sm:$0xff] %vm2229_vm1, %v2194_v45  ;;  %v1906_v48 = vadd.f32 %v1905_v13, %v1301_v47  ;;  %v1334_v47 = vadd.f32 %v5253_v4, %v3054_v56 }
 0x363   :  { %v1917_v49 = vpop.f32.mrf.mxu1 }
 0x364   :  { %2318 = vst.msk [vmem:[%s5352_s3 + $0x2c0] sm:$0xff] %vm2229_vm1, %v1906_v48 }
 0x365   :  { %v1591_v50 = vpop.f32.mrf.mxu2 }
 0x366   :  { %v1592_v51 = vadd.f32 %v4535_v1, %v1591_v50  ;;  %v2202_v52 = vpop.f32.mrf.mxu3 }
 0x367   :  { %v1303_v53 = vpop.f32.mrf.mxu0 }
 0x368   :  { %v2197_v54 = vadd.f32 %v2196_v33, %v1592_v51  ;;  %v1304_v55 = vadd.f32 %v4535_v1, %v1303_v53 }
 0x36a   :  { %2415 = vst.msk [vmem:[%s5352_s3 + $0x5c8] sm:$0xff] %vm2229_vm1, %v2197_v54  ;;  %v1909_v57 = vadd.f32 %v1908_v21, %v1304_v55 }
 0x36b   :  { %v1920_v58 = vpop.f32.mrf.mxu1 }
 0x36c   :  { %2319 = vst.msk [vmem:[%s5352_s3 + $0x2c8] sm:$0xff] %vm2229_vm1, %v1909_v57 }
 0x36d   :  { %v1594_v59 = vpop.f32.mrf.mxu2 }
 0x36e   :  { %v1595_v60 = vadd.f32 %v4535_v1, %v1594_v59  ;;  %v2205_v61 = vpop.f32.mrf.mxu3 }
 0x36f   :  { %v1306_v62 = vpop.f32.mrf.mxu0 }
 0x370   :  { %v2200_v63 = vadd.f32 %v2199_v43, %v1595_v60  ;;  %v1307_v7 = vadd.f32 %v4535_v1, %v1306_v62 }
 0x372   :  { %2416 = vst.msk [vmem:[%s5352_s3 + $0x5d0] sm:$0xff] %vm2229_vm1, %v2200_v63  ;;  %v1912_v0 = vadd.f32 %v1911_v30, %v1307_v7 }
 0x373   :  { %v1923_v2 = vpop.f32.mrf.mxu1 }
 0x374   :  { %2320 = vst.msk [vmem:[%s5352_s3 + $0x2d0] sm:$0xff] %vm2229_vm1, %v1912_v0 }
 0x375   :  { %v1597_v3 = vpop.f32.mrf.mxu2 }
 0x376   :  { %v1598_v5 = vadd.f32 %v5253_v4, %v1597_v3  ;;  %v2208_v27 = vpop.f32.mrf.mxu3 }
 0x377   :  { %v1309_v6 = vpop.f32.mrf.mxu0 }
 0x378   :  { %v2203_v1 = vadd.f32 %v2202_v52, %v1598_v5  ;;  %v1310_v8 = vadd.f32 %v5253_v4, %v1309_v6 }
 0x37a   :  { %2417 = vst.msk [vmem:[%s5352_s3 + $0x5d8] sm:$0xff] %vm2229_vm1, %v2203_v1  ;;  %v1915_v9 = vadd.f32 %v1914_v40, %v1310_v8 }
 0x37b   :  { %v1926_v10 = vpop.f32.mrf.mxu1 }
 0x37c   :  { %2321 = vst.msk [vmem:[%s5352_s3 + $0x2d8] sm:$0xff] %vm2229_vm1, %v1915_v9 }
 0x37d   :  { %v1600_v11 = vpop.f32.mrf.mxu2 }
 0x37e   :  { %v1601_v12 = vadd.f32 %v5253_v4, %v1600_v11  ;;  %v2211_v13 = vpop.f32.mrf.mxu3 }
 0x37f   :  { %v1312_v14 = vpop.f32.mrf.mxu0 }
 0x380   :  { %v2206_v15 = vadd.f32 %v2205_v61, %v1601_v12  ;;  %v1313_v16 = vadd.f32 %v5253_v4, %v1312_v14 }
 0x382   :  { %2418 = vst.msk [vmem:[%s5352_s3 + $0x5e0] sm:$0xff] %vm2229_vm1, %v2206_v15  ;;  %v1918_v17 = vadd.f32 %v1917_v49, %v1313_v16 }
 0x383   :  { %v1929_v18 = vpop.f32.mrf.mxu1 }
 0x384   :  { %2322 = vst.msk [vmem:[%s5352_s3 + $0x2e0] sm:$0xff] %vm2229_vm1, %v1918_v17 }
 0x385   :  { %v1603_v19 = vpop.f32.mrf.mxu2 }
 0x386   :  { %v1604_v20 = vadd.f32 %v5253_v4, %v1603_v19  ;;  %v2214_v21 = vpop.f32.mrf.mxu3 }
 0x387   :  { %v1315_v22 = vpop.f32.mrf.mxu0 }
 0x388   :  { %v2209_v23 = vadd.f32 %v2208_v27, %v1604_v20  ;;  %v1316_v24 = vadd.f32 %v5253_v4, %v1315_v22 }
 0x38a   :  { %2419 = vst.msk [vmem:[%s5352_s3 + $0x5e8] sm:$0xff] %vm2229_vm1, %v2209_v23  ;;  %v1921_v26 = vadd.f32 %v1920_v58, %v1316_v24  ;;  %v1622_v58 = vadd.f32 %v5253_v4, %v3010_v37 }
 0x38b   :  { %v1932_v28 = vpop.f32.mrf.mxu1 }
 0x38c   :  { %2323 = vst.msk [vmem:[%s5352_s3 + $0x2e8] sm:$0xff] %vm2229_vm1, %v1921_v26  ;;  %v1933_v29 = vadd.f32 %v1932_v28, %v1328_v25 }
 0x38d   :  { %v1606_v30 = vpop.f32.mrf.mxu2 }
 0x38e   :  { %2327 = vst.msk [vmem:[%s5352_s3 + $0x308] sm:$0xff] %vm2229_vm1, %v1933_v29  ;;  %v1607_v36 = vadd.f32 %v5253_v4, %v1606_v30  ;;  %v2217_v31 = vpop.f32.mrf.mxu3 }
 0x38f   :  { %v1318_v32 = vpop.f32.mrf.mxu0 }
 0x390   :  { %v2212_v33 = vadd.f32 %v2211_v13, %v1607_v36  ;;  %v1319_v34 = vadd.f32 %v5253_v4, %v1318_v32 }
 0x392   :  { %2420 = vst.msk [vmem:[%s5352_s3 + $0x5f0] sm:$0xff] %vm2229_vm1, %v2212_v33  ;;  %v1924_v38 = vadd.f32 %v1923_v2, %v1319_v34 }
 0x393   :  { %v1935_v39 = vpop.f32.mrf.mxu1 }
 0x394   :  { %2324 = vst.msk [vmem:[%s5352_s3 + $0x2f0] sm:$0xff] %vm2229_vm1, %v1924_v38  ;;  %v1936_v40 = vadd.f32 %v1935_v39, %v1331_v35 }
 0x395   :  { %v1609_v41 = vpop.f32.mrf.mxu2 }
 0x396   :  { %2328 = vst.msk [vmem:[%s5352_s3 + $0x310] sm:$0xff] %vm2229_vm1, %v1936_v40  ;;  %v1610_v46 = vadd.f32 %v5253_v4, %v1609_v41  ;;  %v2220_v42 = vpop.f32.mrf.mxu3 }
 0x397   :  { %v1321_v43 = vpop.f32.mrf.mxu0 }
 0x398   :  { %v2215_v44 = vadd.f32 %v2214_v21, %v1610_v46  ;;  %v1322_v45 = vadd.f32 %v5253_v4, %v1321_v43 }
 0x39a   :  { %2421 = vst.msk [vmem:[%s5352_s3 + $0x5f8] sm:$0xff] %vm2229_vm1, %v2215_v44  ;;  %v1927_v48 = vadd.f32 %v1926_v10, %v1322_v45 }
 0x39b   :  { %v1938_v49 = vpop.f32.mrf.mxu1 }
 0x39c   :  { %2325 = vst.msk [vmem:[%s5352_s3 + $0x2f8] sm:$0xff] %vm2229_vm1, %v1927_v48  ;;  %v1939_v50 = vadd.f32 %v1938_v49, %v1334_v47 }
 0x39d   :  { %v1612_v51 = vpop.f32.mrf.mxu2 }
 0x39e   :  { %2329 = vst.msk [vmem:[%s5352_s3 + $0x318] sm:$0xff] %vm2229_vm1, %v1939_v50  ;;  %v1613_v56 = vadd.f32 %v5253_v4, %v1612_v51  ;;  %v2223_v52 = vpop.f32.mrf.mxu3 }
 0x39f   :  { %v1324_v53 = vpop.f32.mrf.mxu0 }
 0x3a0   :  { %v2218_v54 = vadd.f32 %v2217_v31, %v1613_v56  ;;  %v1325_v55 = vadd.f32 %v5253_v4, %v1324_v53 }
 0x3a2   :  { %2422 = vst.msk [vmem:[%s5352_s3 + $0x600] sm:$0xff] %vm2229_vm1, %v2218_v54  ;;  %v1930_v57 = vadd.f32 %v1929_v18, %v1325_v55 }
 0x3a4   :  { %2326 = vst.msk [vmem:[%s5352_s3 + $0x300] sm:$0xff] %vm2229_vm1, %v1930_v57 }
 0x3a5   :  { %v1615_v59 = vpop.f32.mrf.mxu2 }
 0x3a6   :  { %v1616_v60 = vadd.f32 %v5253_v4, %v1615_v59  ;;  %v2226_v61 = vpop.f32.mrf.mxu3 }
 0x3a7   :  { %v2227_v62 = vadd.f32 %v2226_v61, %v1622_v58 }
 0x3a8   :  { %v2221_v63 = vadd.f32 %v2220_v42, %v1616_v60 }
 0x3a9   :  { %2425 = vst.msk [vmem:[%s5352_s3 + $0x618] sm:$0xff] %vm2229_vm1, %v2227_v62 }
 0x3aa   :  { %2423 = vst.msk [vmem:[%s5352_s3 + $0x608] sm:$0xff] %vm2229_vm1, %v2221_v63 }
 0x3ad   :  { %v1618_v7 = vpop.f32.mrf.mxu2 }
 0x3ae   :  { %v1619_v0 = vadd.f32 %v5253_v4, %v1618_v7 }
 0x3b0   :  { %v2224_v37 = vadd.f32 %v2223_v52, %v1619_v0 }
 0x3b2   :  { %2424 = vst.msk [vmem:[%s5352_s3 + $0x610] sm:$0xff] %vm2229_vm1, %v2224_v37 }

</bundles_post_ra>
